<compile_context>
chip_gen: v7x
topology: tpu7x:2x2x1
jax: 0.10.0
libtpu: 0.0.40
codegen_flags: <defaults>
</compile_context>

<pallas_src>
import math
from functools import partial

import jax
import jax.numpy as jnp
import numpy as np
from jax.experimental import pallas as pl
from jax.experimental.pallas import tpu as pltpu


# --------------------------------------------------------------------------------------
# Kernel 1: Chebyshev supports  S_1 .. S_{K-1}   (the k=0 identity is never stored)
#   S_1 = softmax(relu(E @ E^T), dim=1),  S_k = 2 S_1 S_{k-1} - S_{k-2},  S_0 = I
# --------------------------------------------------------------------------------------
def _supports_kernel(e_ref, out_ref):
    e = e_ref[...]                                                   # (N, E)
    n = e.shape[0]
    a = jnp.einsum("nc,mc->nm", e, e, preferred_element_type=jnp.float32)
    a = jnp.maximum(a, 0.0)                                          # relu
    a_max = jnp.max(a, axis=1, keepdims=True)
    ex = jnp.exp(a - a_max)
    s = ex / jnp.sum(ex, axis=1, keepdims=True)                      # row softmax (dim=1)
    out_ref[0] = s                                                   # S_1

    row = jax.lax.broadcasted_iota(jnp.int32, (n, n), 0)
    col = jax.lax.broadcasted_iota(jnp.int32, (n, n), 1)
    prev2 = (row == col).astype(jnp.float32)                         # S_0 (recursion only)
    prev1 = s
    for k in range(2, out_ref.shape[0] + 1):
        cur = 2.0 * jnp.dot(s, prev1, preferred_element_type=jnp.float32) - prev2
        out_ref[k - 1] = cur
        prev2, prev1 = prev1, cur


def compute_supports(node_embeddings, cheb_k):
    assert cheb_k >= 2, "cheb_k >= 2 required (as in the PyTorch module)"
    n = node_embeddings.shape[0]
    return pl.pallas_call(
        _supports_kernel,
        out_shape=jax.ShapeDtypeStruct((cheb_k - 1, n, n), jnp.float32),
    )(node_embeddings)


# --------------------------------------------------------------------------------------
# Small layout helpers used INSIDE the recurrent kernel.
# Rows are n-major within a batch tile: row = node * bt + local_batch.
# "wide" form puts the tile batch in the lane dim: (N, bt*F).  Implemented with
# leading-dim reshapes + lane slices/concat only (robust Mosaic lowering).
# --------------------------------------------------------------------------------------
def _rows_to_wide(v, nodes, bt, feat):
    if bt == 1:
        return v
    v3 = v.reshape(nodes, bt, feat)
    return jnp.concatenate([v3[:, b, :] for b in range(bt)], axis=-1)


def _wide_to_rows(v, nodes, bt, feat):
    if bt == 1:
        return v
    pieces = [v[:, b * feat:(b + 1) * feat] for b in range(bt)]
    return jnp.stack(pieces, axis=1).reshape(nodes * bt, feat)


# --------------------------------------------------------------------------------------
# Kernel 2: recurrent AGCRN layer.  grid = (batch_tiles, time_chunks).
# Per timestep (x-part + bias already folded into px outside the loop):
#   p   = px[:, :2H] + h @ Wgh_0 + sum_{k>=1} rows(S_k @ wide(h)) @ Wgh_k
#   z,r = sigmoid(p) split
#   q   = px[:, 2H:] + (z*h) @ Wuh_0 + sum_{k>=1} rows(S_k @ wide(z*h)) @ Wuh_k
#   h   = r*h + (1-r)*tanh(q)
# --------------------------------------------------------------------------------------
def _make_layer_kernel(nodes, bt, cheb_k, hdim, time_chunk):
    def kernel(px_ref, h0_ref, s_ref, wgh_ref, wuh_ref, out_ref, state_ref):
        @pl.when(pl.program_id(1) == 0)                       # first time chunk of a tile
        def _():
            state_ref[...] = h0_ref[0]

        s_stack = s_ref[...]                                  # ((K-1)*N, N), resident
        wgh = [wgh_ref[k] for k in range(cheb_k)]             # each (H, 2H)
        wuh = [wuh_ref[k] for k in range(cheb_k)]             # each (H, H)

        h = state_ref[...]                                    # (R, H), n-major rows
        # Statically unrolled over the (small) time chunk — amortises grid-step
        # overhead and gives the scheduler cross-timestep visibility (review item 12).
        for tc in range(time_chunk):
            px = px_ref[0, tc]                                # (R, 3H)  x-part + bias

            # ---- gate: one dense conv matmul + per-k accumulated projections ----
            h_wide = _rows_to_wide(h, nodes, bt, hdim)        # (N, bt*H)
            gh = jnp.dot(s_stack, h_wide,
                         preferred_element_type=jnp.float32)  # ((K-1)*N, bt*H)
            p = px[:, :2 * hdim] + jnp.dot(h, wgh[0],
                                           preferred_element_type=jnp.float32)
            for k in range(1, cheb_k):
                ghk = _wide_to_rows(gh[(k - 1) * nodes:k * nodes, :], nodes, bt, hdim)
                p = p + jnp.dot(ghk, wgh[k], preferred_element_type=jnp.float32)
            zr = jax.nn.sigmoid(p)
            z = zr[:, :hdim]
            r = zr[:, hdim:]

            # ---- candidate on z*h (same structure) ----
            zs = z * h
            zs_wide = _rows_to_wide(zs, nodes, bt, hdim)
            gs = jnp.dot(s_stack, zs_wide, preferred_element_type=jnp.float32)
            q = px[:, 2 * hdim:] + jnp.dot(zs, wuh[0],
                                           preferred_element_type=jnp.float32)
            for k in range(1, cheb_k):
                gsk = _wide_to_rows(gs[(k - 1) * nodes:k * nodes, :], nodes, bt, hdim)
                q = q + jnp.dot(gsk, wuh[k], preferred_element_type=jnp.float32)
            hc = jnp.tanh(q)

            # ---- GRU combine; lane-dense store of this timestep ----
            h = r * h + (1.0 - r) * hc
            out_ref[0, tc] = _rows_to_wide(h, nodes, bt, hdim)

        state_ref[...] = h                                    # carry to next chunk

    return kernel


def agcrn_layer_scan(px, h0, s_stack, wgh, wuh, *, nodes, bt, cheb_k,
                     hidden_dim, time_chunk):
    """px: (num_bt, T, N*bt, 3H) -> output sequence (num_bt, T, N, bt*H)."""
    num_bt, t_len, rows, _ = px.shape
    kernel = _make_layer_kernel(nodes, bt, cheb_k, hidden_dim, time_chunk)
    return pl.pallas_call(
        kernel,
        out_shape=jax.ShapeDtypeStruct((num_bt, t_len, nodes, bt * hidden_dim),
                                       jnp.float32),
        grid=(num_bt, t_len // time_chunk),
        in_specs=[
            pl.BlockSpec((1, time_chunk, rows, 3 * hidden_dim),
                         lambda g, c: (g, c, 0, 0)),                       # px chunk
            pl.BlockSpec((1, rows, hidden_dim), lambda g, c: (g, 0, 0)),   # init state
            pl.BlockSpec(((cheb_k - 1) * nodes, nodes), lambda g, c: (0, 0)),   # supports
            pl.BlockSpec((cheb_k, hidden_dim, 2 * hidden_dim),
                         lambda g, c: (0, 0, 0)),                          # gate h-weights
            pl.BlockSpec((cheb_k, hidden_dim, hidden_dim),
                         lambda g, c: (0, 0, 0)),                          # update h-weights
        ],
        out_specs=pl.BlockSpec((1, time_chunk, nodes, bt * hidden_dim),
                               lambda g, c: (g, c, 0, 0)),
        scratch_shapes=[pltpu.VMEM((rows, hidden_dim), jnp.float32)],      # carried state
        compiler_params=pltpu.CompilerParams(
            dimension_semantics=("parallel", "arbitrary"),   # batch tiles || , T recurrent
            vmem_limit_bytes=32 * 1024 * 1024),              # explicit (review item 10)
    )(px, h0, s_stack, wgh, wuh)


# --------------------------------------------------------------------------------------
# Parameter init (matches torch: xavier_normal_ weights, zero bias), deterministic.
# --------------------------------------------------------------------------------------
def init_agcn_params(key, dim_in_total, dim_out, cheb_k):
    fan_in, fan_out = cheb_k * dim_in_total, dim_out
    std = math.sqrt(2.0 / (fan_in + fan_out))
    w = jax.random.normal(key, (fan_in, fan_out), jnp.float32) * std
    b = jnp.zeros((dim_out,), jnp.float32)
    return w, b


def init_adcrnn_params(key, node_num, dim_in, dim_out, cheb_k, embed_dim, num_layers):
    params = []
    for layer in range(num_layers):
        din = dim_in if layer == 0 else dim_out
        k1, k2, key = jax.random.split(key, 3)
        wg, bg = init_agcn_params(k1, din + dim_out, 2 * dim_out, cheb_k)
        wu, bu = init_agcn_params(k2, din + dim_out, dim_out, cheb_k)
        params.append({"gate": (wg, bg), "update": (wu, bu)})
    return params


def _prep_layer_weights(wg, bg, wu, bu, cheb_k, din, hdim):
    """Split the AGCN weights into x-rows (hoisted) and state-rows (in-kernel)."""
    c = din + hdim
    wg3 = wg.reshape(cheb_k, c, 2 * hdim)
    wu3 = wu.reshape(cheb_k, c, hdim)
    wgh = wg3[:, din:, :]                                             # (K, H, 2H)
    wuh = wu3[:, din:, :]                                             # (K, H, H)
    wx = jnp.concatenate([wg3[:, :din, :], wu3[:, :din, :]], axis=-1)  # (K, Din, 3H)
    b_cat = jnp.concatenate([bg, bu]).reshape(1, 1, 1, 3 * hdim)       # (1,1,1,3H)
    return wgh, wuh, wx, b_cat


def _precompute_px(x, supports, wx, b_cat, cheb_k):
    """Time-parallel hoist of the x-dependent projections (review item 4):
       px[b,t,n,:] = sum_k (S_k @ x[b,t]) @ Wx_k + [b_gate | b_update],  S_0 = I.
    One dense batched matmul chain over T*B*N rows (full f32 precision)."""
    hp = jax.lax.Precision.HIGHEST
    px = jnp.einsum("btnd,do->btno", x, wx[0], precision=hp)
    for k in range(1, cheb_k):
        xk = jnp.einsum("nm,btmd->btnd", supports[k - 1], x, precision=hp)
        px = px + jnp.einsum("btnd,do->btno", xk, wx[k], precision=hp)
    return px + b_cat


def _largest_divisor_leq(n, cap):
    for d in range(min(n, cap), 0, -1):
        if n % d == 0:
            return d
    return 1


# --------------------------------------------------------------------------------------
# ADCRNN forward
# --------------------------------------------------------------------------------------
@partial(jax.jit, static_argnames=("cheb_k", "dim_out"))
def adcrnn_forward(x, init_states, node_embeddings, params, cheb_k, dim_out):
    b, t_len, n, _ = x.shape
    h = dim_out

    # Batch tiles feed the leading "parallel" grid axis (v7x megacore); the time chunk
    # processes several steps per grid iteration.  Correct on any tiling.
    num_bt = 2 if b % 2 == 0 else 1
    bt = b // num_bt
    time_chunk = _largest_divisor_leq(t_len, 4)

    supports = compute_supports(node_embeddings, cheb_k)              # (K-1, N, N)
    s_stack = supports.reshape((cheb_k - 1) * n, n)                   # shared, ~N^2*(K-1)

    cur = x                                                           # (B, T, N, Din)
    output_hidden = []
    for layer_idx, p in enumerate(params):
        wg, bg = p["gate"]
        wu, bu = p["update"]
        din = cur.shape[-1]
        wgh, wuh, wx, b_cat = _prep_layer_weights(wg, bg, wu, bu, cheb_k, din, h)

        # hoisted, time-parallel x projection (+ biases): (B, T, N, 3H)
        px = _precompute_px(cur, supports, wx, b_cat, cheb_k)

        # rearrange to n-major rows per batch tile: (num_bt, T, N*bt, 3H)
        px_k = (px.reshape(num_bt, bt, t_len, n, 3 * h)
                  .transpose(0, 2, 3, 1, 4)
                  .reshape(num_bt, t_len, n * bt, 3 * h))
        h0_k = (init_states[layer_idx].reshape(num_bt, bt, n, h)
                .transpose(0, 2, 1, 3)
                .reshape(num_bt, n * bt, h))

        out_w = agcrn_layer_scan(px_k, h0_k, s_stack, wgh, wuh,
                                 nodes=n, bt=bt, cheb_k=cheb_k,
                                 hidden_dim=h, time_chunk=time_chunk)  # (num_bt,T,N,bt*H)

        cur = (out_w.reshape(num_bt, t_len, n, bt, h)
                    .transpose(0, 3, 1, 2, 4)
                    .reshape(b, t_len, n, h))                          # (B, T, N, H)
        output_hidden.append(cur[:, -1])
    return cur, output_hidden


# --------------------------------------------------------------------------------------
# Pure-JAX reference (mirrors the PyTorch code literally) for validation
# --------------------------------------------------------------------------------------
def _ref_agcn(x, node_embeddings, weights, bias, cheb_k):
    n = node_embeddings.shape[0]
    supports = jax.nn.softmax(
        jnp.maximum(node_embeddings @ node_embeddings.T, 0.0), axis=1)
    support_set = [jnp.eye(n, dtype=jnp.float32), supports]
    for _ in range(2, cheb_k):
        support_set.append(2.0 * supports @ support_set[-1] - support_set[-2])
    x_g = jnp.concatenate(
        [jnp.einsum("nm,bmc->bnc", s, x) for s in support_set], axis=-1)
    return jnp.einsum("bni,io->bno", x_g, weights) + bias


def _ref_cell(x, state, node_embeddings, p, cheb_k, hidden):
    wg, bg = p["gate"]
    wu, bu = p["update"]
    ins = jnp.concatenate([x, state], axis=-1)
    z_r = jax.nn.sigmoid(_ref_agcn(ins, node_embeddings, wg, bg, cheb_k))
    z, r = z_r[..., :hidden], z_r[..., hidden:]
    cand = jnp.concatenate([x, z * state], axis=-1)
    hc = jnp.tanh(_ref_agcn(cand, node_embeddings, wu, bu, cheb_k))
    return r * state + (1.0 - r) * hc


def _ref_adcrnn(x, init_states, node_embeddings, params, cheb_k, hidden):
    t_len = x.shape[1]
    cur = x
    hid = []
    for layer, p in enumerate(params):
        state = init_states[layer]
        states = []
        for t in range(t_len):
            state = _ref_cell(cur[:, t], state, node_embeddings, p, cheb_k, hidden)
            states.append(state)
        hid.append(state)
        cur = jnp.stack(states, axis=1)
    return cur, hid


# --------------------------------------------------------------------------------------
if __name__ == "__main__":
    # small, forward-consistent shapes
    B, T = 4, 8
    node_num, dim_in, dim_out = 16, 2, 16
    cheb_k, embed_dim, num_layers = 3, 8, 2

    key = jax.random.PRNGKey(0)
    kx, ke, kp = jax.random.split(key, 3)
    x = jax.random.normal(kx, (B, T, node_num, dim_in), jnp.float32)
    node_embeddings = jax.random.normal(ke, (node_num, embed_dim), jnp.float32)
    init_states = [jnp.zeros((B, node_num, dim_out), jnp.float32)
                   for _ in range(num_layers)]

    params = init_adcrnn_params(kp, node_num, dim_in, dim_out, cheb_k,
                                embed_dim, num_layers)

    out_seq, out_hidden = adcrnn_forward(x, init_states, node_embeddings,
                                         params, cheb_k, dim_out)
    out_seq = jax.block_until_ready(out_seq)
    out_hidden = [jax.block_until_ready(hh) for hh in out_hidden]

    # correctness check against a literal pure-JAX port of the torch module
    ref_seq, ref_hidden = _ref_adcrnn(x, init_states, node_embeddings,
                                      params, cheb_k, dim_out)
    np.testing.assert_allclose(np.asarray(out_seq), np.asarray(ref_seq),
                               rtol=1e-3, atol=1e-3)
    for a, b_ref in zip(out_hidden, ref_hidden):
        np.testing.assert_allclose(np.asarray(a), np.asarray(b_ref),
                                   rtol=1e-3, atol=1e-3)

    print("KERNEL_OK")
</pallas_src>

<mosaic_0001>
module attributes {stable_mosaic.version = 11 : i64} {
  func.func @_supports_kernel(%arg0: memref<16x8xf32, #tpu.memory_space<vmem>>, %arg1: memref<2x16x16xf32, #tpu.memory_space<vmem>>) attributes {dimension_semantics = [], scalar_prefetch = 0 : i64, scratch_operands = 0 : i64, tpu.core_type = #tpu.core_type<tc>} {
    %c0 = arith.constant 0 : index
    %c0_0 = arith.constant 0 : index
    %0 = vector.load %arg0[%c0, %c0_0] : memref<16x8xf32, #tpu.memory_space<vmem>>, vector<16x8xf32>
    "tpu.trace_start"() <{level = 10 : i32, message = "nc,mc->nm"}> : () -> ()
    %cst = arith.constant dense<0.000000e+00> : vector<16x16xf32>
    %1 = tpu.matmul %0, %0, %cst {dimension_numbers = #tpu.dot_dimension_numbers<[1], [1], [0], [0], [0, 0, 1, 0], [], []>} : vector<16x8xf32>, vector<16x8xf32>, vector<16x16xf32> -> vector<16x16xf32>
    "tpu.trace_stop"() : () -> ()
    %cst_1 = arith.constant 0.000000e+00 : f32
    %2 = vector.broadcast %cst_1 : f32 to vector<16x16xf32>
    %3 = arith.maximumf %1, %2 : vector<16x16xf32>
    %cst_2 = arith.constant dense<0xFF800000> : vector<16xf32>
    %4 = vector.multi_reduction <maximumf>, %3, %cst_2 [1] : vector<16x16xf32> to vector<16xf32>
    %5 = vector.shape_cast %4 : vector<16xf32> to vector<16x1xf32>
    %6 = vector.broadcast %5 : vector<16x1xf32> to vector<16x16xf32>
    %7 = arith.subf %3, %6 : vector<16x16xf32>
    %8 = math.exp %7 : vector<16x16xf32>
    %cst_3 = arith.constant dense<0.000000e+00> : vector<16xf32>
    %9 = vector.multi_reduction <add>, %8, %cst_3 [1] : vector<16x16xf32> to vector<16xf32>
    %10 = vector.shape_cast %9 : vector<16xf32> to vector<16x1xf32>
    %11 = vector.broadcast %10 : vector<16x1xf32> to vector<16x16xf32>
    %12 = arith.divf %8, %11 : vector<16x16xf32>
    %c0_4 = arith.constant 0 : index
    %c0_5 = arith.constant 0 : index
    %c0_6 = arith.constant 0 : index
    %13 = vector.load %arg1[%c0_4, %c0_5, %c0_6] : memref<2x16x16xf32, #tpu.memory_space<vmem>>, vector<1x16x16xf32>
    %14 = vector.shape_cast %13 : vector<1x16x16xf32> to vector<16x16xf32>
    %15 = vector.shape_cast %12 : vector<16x16xf32> to vector<1x16x16xf32>
    tpu.vector_store %arg1[%c0_4, %c0_5, %c0_6], %15 {strides = array<i32>} : memref<2x16x16xf32, #tpu.memory_space<vmem>>, vector<1x16x16xf32>,
    %16 = tpu.iota {dimensions = array<i32: 0>} : vector<16x16xi32>
    %17 = tpu.iota {dimensions = array<i32: 1>} : vector<16x16xi32>
    %18 = arith.cmpi eq, %16, %17 : vector<16x16xi32>
    %19 = arith.extui %18 : vector<16x16xi1> to vector<16x16xi32>
    %20 = arith.sitofp %19 : vector<16x16xi32> to vector<16x16xf32>
    %cst_7 = arith.constant dense<0.000000e+00> : vector<16x16xf32>
    %21 = tpu.matmul %12, %12, %cst_7 {dimension_numbers = #tpu.dot_dimension_numbers<[1], [0], [0], [1], [0, 0, 1, 1], [], []>} : vector<16x16xf32>, vector<16x16xf32>, vector<16x16xf32> -> vector<16x16xf32>
    %cst_8 = arith.constant 2.000000e+00 : f32
    %22 = vector.broadcast %cst_8 : f32 to vector<16x16xf32>
    %23 = arith.mulf %22, %21 : vector<16x16xf32>
    %24 = arith.subf %23, %20 : vector<16x16xf32>
    %c1 = arith.constant 1 : index
    %c0_9 = arith.constant 0 : index
    %c0_10 = arith.constant 0 : index
    %25 = vector.load %arg1[%c1, %c0_9, %c0_10] : memref<2x16x16xf32, #tpu.memory_space<vmem>>, vector<1x16x16xf32>
    %26 = vector.shape_cast %25 : vector<1x16x16xf32> to vector<16x16xf32>
    %27 = vector.shape_cast %24 : vector<16x16xf32> to vector<1x16x16xf32>
    tpu.vector_store %arg1[%c1, %c0_9, %c0_10], %27 {strides = array<i32>} : memref<2x16x16xf32, #tpu.memory_space<vmem>>, vector<1x16x16xf32>,
    return
  }
}

module attributes {stable_mosaic.version = 11 : i64} {
  func.func @kernel(%arg0: i32, %arg1: i32, %arg2: memref<1x4x32x48xf32, #tpu.memory_space<vmem>>, %arg3: memref<1x32x16xf32, #tpu.memory_space<vmem>>, %arg4: memref<32x16xf32, #tpu.memory_space<vmem>>, %arg5: memref<3x16x32xf32, #tpu.memory_space<vmem>>, %arg6: memref<3x16x16xf32, #tpu.memory_space<vmem>>, %arg7: memref<1x4x16x32xf32, #tpu.memory_space<vmem>>, %arg8: memref<32x16xf32, #tpu.memory_space<vmem>>) attributes {dimension_semantics = [#tpu.dimension_semantics<parallel>, #tpu.dimension_semantics<arbitrary>], iteration_bounds = array<i64: 2, 2>, scalar_prefetch = 0 : i64, scratch_operands = 1 : i64, tpu.core_type = #tpu.core_type<tc>, window_params = [{transform_indices = @transform_0, window_bounds = array<i64: 1, 4, 32, 48>}, {transform_indices = @transform_1, window_bounds = array<i64: 1, 32, 16>}, {pipeline_mode = #tpu.pipeline_mode<synchronous>, transform_indices = @transform_2, window_bounds = array<i64: 32, 16>}, {pipeline_mode = #tpu.pipeline_mode<synchronous>, transform_indices = @transform_3, window_bounds = array<i64: 3, 16, 32>}, {pipeline_mode = #tpu.pipeline_mode<synchronous>, transform_indices = @transform_4, window_bounds = array<i64: 3, 16, 16>}, {transform_indices = @transform_5, window_bounds = array<i64: 1, 4, 16, 32>}]} {
    %c0_i32 = arith.constant 0 : i32
    %0 = arith.cmpi eq, %arg1, %c0_i32 : i32
    %1 = arith.extui %0 : i1 to i32
    %c0_i32_0 = arith.constant 0 : i32
    %2 = arith.cmpi ne, %1, %c0_i32_0 : i32
    scf.if %2 {
      %c0_92 = arith.constant 0 : index
      %c0_93 = arith.constant 0 : index
      %c0_94 = arith.constant 0 : index
      %342 = vector.load %arg3[%c0_92, %c0_93, %c0_94] : memref<1x32x16xf32, #tpu.memory_space<vmem>>, vector<1x32x16xf32>
      %343 = vector.shape_cast %342 : vector<1x32x16xf32> to vector<32x16xf32>
      %c0_95 = arith.constant 0 : index
      %c0_96 = arith.constant 0 : index
      %344 = vector.load %arg8[%c0_95, %c0_96] : memref<32x16xf32, #tpu.memory_space<vmem>>, vector<32x16xf32>
      tpu.vector_store %arg8[%c0_95, %c0_96], %343 {strides = array<i32>} : memref<32x16xf32, #tpu.memory_space<vmem>>, vector<32x16xf32>,
    } else {
    }
    %c0 = arith.constant 0 : index
    %c0_1 = arith.constant 0 : index
    %3 = vector.load %arg4[%c0, %c0_1] : memref<32x16xf32, #tpu.memory_space<vmem>>, vector<32x16xf32>
    %c0_2 = arith.constant 0 : index
    %c0_3 = arith.constant 0 : index
    %c0_4 = arith.constant 0 : index
    %4 = vector.load %arg5[%c0_2, %c0_3, %c0_4] : memref<3x16x32xf32, #tpu.memory_space<vmem>>, vector<1x16x32xf32>
    %5 = vector.shape_cast %4 : vector<1x16x32xf32> to vector<16x32xf32>
    %c1 = arith.constant 1 : index
    %c0_5 = arith.constant 0 : index
    %c0_6 = arith.constant 0 : index
    %6 = vector.load %arg5[%c1, %c0_5, %c0_6] : memref<3x16x32xf32, #tpu.memory_space<vmem>>, vector<1x16x32xf32>
    %7 = vector.shape_cast %6 : vector<1x16x32xf32> to vector<16x32xf32>
    %c2 = arith.constant 2 : index
    %c0_7 = arith.constant 0 : index
    %c0_8 = arith.constant 0 : index
    %8 = vector.load %arg5[%c2, %c0_7, %c0_8] : memref<3x16x32xf32, #tpu.memory_space<vmem>>, vector<1x16x32xf32>
    %9 = vector.shape_cast %8 : vector<1x16x32xf32> to vector<16x32xf32>
    %c0_9 = arith.constant 0 : index
    %c0_10 = arith.constant 0 : index
    %c0_11 = arith.constant 0 : index
    %10 = vector.load %arg6[%c0_9, %c0_10, %c0_11] : memref<3x16x16xf32, #tpu.memory_space<vmem>>, vector<1x16x16xf32>
    %11 = vector.shape_cast %10 : vector<1x16x16xf32> to vector<16x16xf32>
    %c1_12 = arith.constant 1 : index
    %c0_13 = arith.constant 0 : index
    %c0_14 = arith.constant 0 : index
    %12 = vector.load %arg6[%c1_12, %c0_13, %c0_14] : memref<3x16x16xf32, #tpu.memory_space<vmem>>, vector<1x16x16xf32>
    %13 = vector.shape_cast %12 : vector<1x16x16xf32> to vector<16x16xf32>
    %c2_15 = arith.constant 2 : index
    %c0_16 = arith.constant 0 : index
    %c0_17 = arith.constant 0 : index
    %14 = vector.load %arg6[%c2_15, %c0_16, %c0_17] : memref<3x16x16xf32, #tpu.memory_space<vmem>>, vector<1x16x16xf32>
    %15 = vector.shape_cast %14 : vector<1x16x16xf32> to vector<16x16xf32>
    %c0_18 = arith.constant 0 : index
    %c0_19 = arith.constant 0 : index
    %16 = vector.load %arg8[%c0_18, %c0_19] : memref<32x16xf32, #tpu.memory_space<vmem>>, vector<32x16xf32>
    %c0_20 = arith.constant 0 : index
    %c0_21 = arith.constant 0 : index
    %c0_22 = arith.constant 0 : index
    %c0_23 = arith.constant 0 : index
    %17 = vector.load %arg2[%c0_20, %c0_21, %c0_22, %c0_23] : memref<1x4x32x48xf32, #tpu.memory_space<vmem>>, vector<1x1x32x48xf32>
    %18 = vector.shape_cast %17 : vector<1x1x32x48xf32> to vector<32x48xf32>
    %19 = vector.shape_cast %16 : vector<32x16xf32> to vector<16x2x16xf32>
    %20 = vector.extract_strided_slice %19 {offsets = [0, 0, 0], sizes = [16, 1, 16], strides = [1, 1, 1]} : vector<16x2x16xf32> to vector<16x1x16xf32>
    %21 = vector.shape_cast %20 : vector<16x1x16xf32> to vector<16x16xf32>
    %22 = vector.extract_strided_slice %19 {offsets = [0, 1, 0], sizes = [16, 1, 16], strides = [1, 1, 1]} : vector<16x2x16xf32> to vector<16x1x16xf32>
    %23 = vector.shape_cast %22 : vector<16x1x16xf32> to vector<16x16xf32>
    %24 = tpu.concatenate %21, %23 in 1 : vector<16x16xf32>, vector<16x16xf32> -> vector<16x32xf32>
    %cst = arith.constant dense<0.000000e+00> : vector<32x32xf32>
    %25 = tpu.matmul %3, %24, %cst {dimension_numbers = #tpu.dot_dimension_numbers<[1], [0], [0], [1], [0, 0, 1, 1], [], []>} : vector<32x16xf32>, vector<16x32xf32>, vector<32x32xf32> -> vector<32x32xf32>
    %26 = vector.extract_strided_slice %18 {offsets = [0, 0], sizes = [32, 32], strides = [1, 1]} : vector<32x48xf32> to vector<32x32xf32>
    %cst_24 = arith.constant dense<0.000000e+00> : vector<32x32xf32>
    %27 = tpu.matmul %16, %5, %cst_24 {dimension_numbers = #tpu.dot_dimension_numbers<[1], [0], [0], [1], [0, 0, 1, 1], [], []>} : vector<32x16xf32>, vector<16x32xf32>, vector<32x32xf32> -> vector<32x32xf32>
    %28 = arith.addf %26, %27 : vector<32x32xf32>
    %29 = vector.extract_strided_slice %25 {offsets = [0, 0], sizes = [16, 32], strides = [1, 1]} : vector<32x32xf32> to vector<16x32xf32>
    %30 = vector.extract_strided_slice %29 {offsets = [0, 0], sizes = [16, 16], strides = [1, 1]} : vector<16x32xf32> to vector<16x16xf32>
    %31 = vector.extract_strided_slice %29 {offsets = [0, 16], sizes = [16, 16], strides = [1, 1]} : vector<16x32xf32> to vector<16x16xf32>
    %32 = vector.shape_cast %30 : vector<16x16xf32> to vector<16x1x16xf32>
    %33 = vector.shape_cast %31 : vector<16x16xf32> to vector<16x1x16xf32>
    %34 = tpu.concatenate %32, %33 in 1 : vector<16x1x16xf32>, vector<16x1x16xf32> -> vector<16x2x16xf32>
    %35 = vector.shape_cast %34 : vector<16x2x16xf32> to vector<32x16xf32>
    %cst_25 = arith.constant dense<0.000000e+00> : vector<32x32xf32>
    %36 = tpu.matmul %35, %7, %cst_25 {dimension_numbers = #tpu.dot_dimension_numbers<[1], [0], [0], [1], [0, 0, 1, 1], [], []>} : vector<32x16xf32>, vector<16x32xf32>, vector<32x32xf32> -> vector<32x32xf32>
    %37 = arith.addf %28, %36 : vector<32x32xf32>
    %38 = vector.extract_strided_slice %25 {offsets = [16, 0], sizes = [16, 32], strides = [1, 1]} : vector<32x32xf32> to vector<16x32xf32>
    %39 = vector.extract_strided_slice %38 {offsets = [0, 0], sizes = [16, 16], strides = [1, 1]} : vector<16x32xf32> to vector<16x16xf32>
    %40 = vector.extract_strided_slice %38 {offsets = [0, 16], sizes = [16, 16], strides = [1, 1]} : vector<16x32xf32> to vector<16x16xf32>
    %41 = vector.shape_cast %39 : vector<16x16xf32> to vector<16x1x16xf32>
    %42 = vector.shape_cast %40 : vector<16x16xf32> to vector<16x1x16xf32>
    %43 = tpu.concatenate %41, %42 in 1 : vector<16x1x16xf32>, vector<16x1x16xf32> -> vector<16x2x16xf32>
    %44 = vector.shape_cast %43 : vector<16x2x16xf32> to vector<32x16xf32>
    %cst_26 = arith.constant dense<0.000000e+00> : vector<32x32xf32>
    %45 = tpu.matmul %44, %9, %cst_26 {dimension_numbers = #tpu.dot_dimension_numbers<[1], [0], [0], [1], [0, 0, 1, 1], [], []>} : vector<32x16xf32>, vector<16x32xf32>, vector<32x32xf32> -> vector<32x32xf32>
    %46 = arith.addf %37, %45 : vector<32x32xf32>
    %47 = arith.negf %46 : vector<32x32xf32>
    %48 = math.exp %47 : vector<32x32xf32>
    %cst_27 = arith.constant 1.000000e+00 : f32
    %49 = vector.broadcast %cst_27 : f32 to vector<32x32xf32>
    %50 = arith.addf %49, %48 : vector<32x32xf32>
    %51 = arith.divf %49, %50 : vector<32x32xf32>
    %52 = vector.extract_strided_slice %51 {offsets = [0, 0], sizes = [32, 16], strides = [1, 1]} : vector<32x32xf32> to vector<32x16xf32>
    %53 = vector.extract_strided_slice %51 {offsets = [0, 16], sizes = [32, 16], strides = [1, 1]} : vector<32x32xf32> to vector<32x16xf32>
    %54 = arith.mulf %52, %16 : vector<32x16xf32>
    %55 = vector.shape_cast %54 : vector<32x16xf32> to vector<16x2x16xf32>
    %56 = vector.extract_strided_slice %55 {offsets = [0, 0, 0], sizes = [16, 1, 16], strides = [1, 1, 1]} : vector<16x2x16xf32> to vector<16x1x16xf32>
    %57 = vector.shape_cast %56 : vector<16x1x16xf32> to vector<16x16xf32>
    %58 = vector.extract_strided_slice %55 {offsets = [0, 1, 0], sizes = [16, 1, 16], strides = [1, 1, 1]} : vector<16x2x16xf32> to vector<16x1x16xf32>
    %59 = vector.shape_cast %58 : vector<16x1x16xf32> to vector<16x16xf32>
    %60 = tpu.concatenate %57, %59 in 1 : vector<16x16xf32>, vector<16x16xf32> -> vector<16x32xf32>
    %cst_28 = arith.constant dense<0.000000e+00> : vector<32x32xf32>
    %61 = tpu.matmul %3, %60, %cst_28 {dimension_numbers = #tpu.dot_dimension_numbers<[1], [0], [0], [1], [0, 0, 1, 1], [], []>} : vector<32x16xf32>, vector<16x32xf32>, vector<32x32xf32> -> vector<32x32xf32>
    %62 = vector.extract_strided_slice %18 {offsets = [0, 32], sizes = [32, 16], strides = [1, 1]} : vector<32x48xf32> to vector<32x16xf32>
    %cst_29 = arith.constant dense<0.000000e+00> : vector<32x16xf32>
    %63 = tpu.matmul %54, %11, %cst_29 {dimension_numbers = #tpu.dot_dimension_numbers<[1], [0], [0], [1], [0, 0, 1, 1], [], []>} : vector<32x16xf32>, vector<16x16xf32>, vector<32x16xf32> -> vector<32x16xf32>
    %64 = arith.addf %62, %63 : vector<32x16xf32>
    %65 = vector.extract_strided_slice %61 {offsets = [0, 0], sizes = [16, 32], strides = [1, 1]} : vector<32x32xf32> to vector<16x32xf32>
    %66 = vector.extract_strided_slice %65 {offsets = [0, 0], sizes = [16, 16], strides = [1, 1]} : vector<16x32xf32> to vector<16x16xf32>
    %67 = vector.extract_strided_slice %65 {offsets = [0, 16], sizes = [16, 16], strides = [1, 1]} : vector<16x32xf32> to vector<16x16xf32>
    %68 = vector.shape_cast %66 : vector<16x16xf32> to vector<16x1x16xf32>
    %69 = vector.shape_cast %67 : vector<16x16xf32> to vector<16x1x16xf32>
    %70 = tpu.concatenate %68, %69 in 1 : vector<16x1x16xf32>, vector<16x1x16xf32> -> vector<16x2x16xf32>
    %71 = vector.shape_cast %70 : vector<16x2x16xf32> to vector<32x16xf32>
    %cst_30 = arith.constant dense<0.000000e+00> : vector<32x16xf32>
    %72 = tpu.matmul %71, %13, %cst_30 {dimension_numbers = #tpu.dot_dimension_numbers<[1], [0], [0], [1], [0, 0, 1, 1], [], []>} : vector<32x16xf32>, vector<16x16xf32>, vector<32x16xf32> -> vector<32x16xf32>
    %73 = arith.addf %64, %72 : vector<32x16xf32>
    %74 = vector.extract_strided_slice %61 {offsets = [16, 0], sizes = [16, 32], strides = [1, 1]} : vector<32x32xf32> to vector<16x32xf32>
    %75 = vector.extract_strided_slice %74 {offsets = [0, 0], sizes = [16, 16], strides = [1, 1]} : vector<16x32xf32> to vector<16x16xf32>
    %76 = vector.extract_strided_slice %74 {offsets = [0, 16], sizes = [16, 16], strides = [1, 1]} : vector<16x32xf32> to vector<16x16xf32>
    %77 = vector.shape_cast %75 : vector<16x16xf32> to vector<16x1x16xf32>
    %78 = vector.shape_cast %76 : vector<16x16xf32> to vector<16x1x16xf32>
    %79 = tpu.concatenate %77, %78 in 1 : vector<16x1x16xf32>, vector<16x1x16xf32> -> vector<16x2x16xf32>
    %80 = vector.shape_cast %79 : vector<16x2x16xf32> to vector<32x16xf32>
    %cst_31 = arith.constant dense<0.000000e+00> : vector<32x16xf32>
    %81 = tpu.matmul %80, %15, %cst_31 {dimension_numbers = #tpu.dot_dimension_numbers<[1], [0], [0], [1], [0, 0, 1, 1], [], []>} : vector<32x16xf32>, vector<16x16xf32>, vector<32x16xf32> -> vector<32x16xf32>
    %82 = arith.addf %73, %81 : vector<32x16xf32>
    %83 = math.tanh %82 : vector<32x16xf32>
    %84 = arith.mulf %53, %16 : vector<32x16xf32>
    %cst_32 = arith.constant 1.000000e+00 : f32
    %85 = vector.broadcast %cst_32 : f32 to vector<32x16xf32>
    %86 = arith.subf %85, %53 : vector<32x16xf32>
    %87 = arith.mulf %86, %83 : vector<32x16xf32>
    %88 = arith.addf %84, %87 : vector<32x16xf32>
    %89 = vector.shape_cast %88 : vector<32x16xf32> to vector<16x2x16xf32>
    %90 = vector.extract_strided_slice %89 {offsets = [0, 0, 0], sizes = [16, 1, 16], strides = [1, 1, 1]} : vector<16x2x16xf32> to vector<16x1x16xf32>
    %91 = vector.shape_cast %90 : vector<16x1x16xf32> to vector<16x16xf32>
    %92 = vector.extract_strided_slice %89 {offsets = [0, 1, 0], sizes = [16, 1, 16], strides = [1, 1, 1]} : vector<16x2x16xf32> to vector<16x1x16xf32>
    %93 = vector.shape_cast %92 : vector<16x1x16xf32> to vector<16x16xf32>
    %94 = tpu.concatenate %91, %93 in 1 : vector<16x16xf32>, vector<16x16xf32> -> vector<16x32xf32>
    %c0_33 = arith.constant 0 : index
    %c0_34 = arith.constant 0 : index
    %c0_35 = arith.constant 0 : index
    %c0_36 = arith.constant 0 : index
    %95 = vector.load %arg7[%c0_33, %c0_34, %c0_35, %c0_36] : memref<1x4x16x32xf32, #tpu.memory_space<vmem>>, vector<1x1x16x32xf32>
    %96 = vector.shape_cast %95 : vector<1x1x16x32xf32> to vector<16x32xf32>
    %97 = vector.shape_cast %94 : vector<16x32xf32> to vector<1x1x16x32xf32>
    tpu.vector_store %arg7[%c0_33, %c0_34, %c0_35, %c0_36], %97 {strides = array<i32>} : memref<1x4x16x32xf32, #tpu.memory_space<vmem>>, vector<1x1x16x32xf32>,
    %c0_37 = arith.constant 0 : index
    %c1_38 = arith.constant 1 : index
    %c0_39 = arith.constant 0 : index
    %c0_40 = arith.constant 0 : index
    %98 = vector.load %arg2[%c0_37, %c1_38, %c0_39, %c0_40] : memref<1x4x32x48xf32, #tpu.memory_space<vmem>>, vector<1x1x32x48xf32>
    %99 = vector.shape_cast %98 : vector<1x1x32x48xf32> to vector<32x48xf32>
    %100 = vector.shape_cast %88 : vector<32x16xf32> to vector<16x2x16xf32>
    %101 = vector.extract_strided_slice %100 {offsets = [0, 0, 0], sizes = [16, 1, 16], strides = [1, 1, 1]} : vector<16x2x16xf32> to vector<16x1x16xf32>
    %102 = vector.shape_cast %101 : vector<16x1x16xf32> to vector<16x16xf32>
    %103 = vector.extract_strided_slice %100 {offsets = [0, 1, 0], sizes = [16, 1, 16], strides = [1, 1, 1]} : vector<16x2x16xf32> to vector<16x1x16xf32>
    %104 = vector.shape_cast %103 : vector<16x1x16xf32> to vector<16x16xf32>
    %105 = tpu.concatenate %102, %104 in 1 : vector<16x16xf32>, vector<16x16xf32> -> vector<16x32xf32>
    %cst_41 = arith.constant dense<0.000000e+00> : vector<32x32xf32>
    %106 = tpu.matmul %3, %105, %cst_41 {dimension_numbers = #tpu.dot_dimension_numbers<[1], [0], [0], [1], [0, 0, 1, 1], [], []>} : vector<32x16xf32>, vector<16x32xf32>, vector<32x32xf32> -> vector<32x32xf32>
    %107 = vector.extract_strided_slice %99 {offsets = [0, 0], sizes = [32, 32], strides = [1, 1]} : vector<32x48xf32> to vector<32x32xf32>
    %cst_42 = arith.constant dense<0.000000e+00> : vector<32x32xf32>
    %108 = tpu.matmul %88, %5, %cst_42 {dimension_numbers = #tpu.dot_dimension_numbers<[1], [0], [0], [1], [0, 0, 1, 1], [], []>} : vector<32x16xf32>, vector<16x32xf32>, vector<32x32xf32> -> vector<32x32xf32>
    %109 = arith.addf %107, %108 : vector<32x32xf32>
    %110 = vector.extract_strided_slice %106 {offsets = [0, 0], sizes = [16, 32], strides = [1, 1]} : vector<32x32xf32> to vector<16x32xf32>
    %111 = vector.extract_strided_slice %110 {offsets = [0, 0], sizes = [16, 16], strides = [1, 1]} : vector<16x32xf32> to vector<16x16xf32>
    %112 = vector.extract_strided_slice %110 {offsets = [0, 16], sizes = [16, 16], strides = [1, 1]} : vector<16x32xf32> to vector<16x16xf32>
    %113 = vector.shape_cast %111 : vector<16x16xf32> to vector<16x1x16xf32>
    %114 = vector.shape_cast %112 : vector<16x16xf32> to vector<16x1x16xf32>
    %115 = tpu.concatenate %113, %114 in 1 : vector<16x1x16xf32>, vector<16x1x16xf32> -> vector<16x2x16xf32>
    %116 = vector.shape_cast %115 : vector<16x2x16xf32> to vector<32x16xf32>
    %cst_43 = arith.constant dense<0.000000e+00> : vector<32x32xf32>
    %117 = tpu.matmul %116, %7, %cst_43 {dimension_numbers = #tpu.dot_dimension_numbers<[1], [0], [0], [1], [0, 0, 1, 1], [], []>} : vector<32x16xf32>, vector<16x32xf32>, vector<32x32xf32> -> vector<32x32xf32>
    %118 = arith.addf %109, %117 : vector<32x32xf32>
    %119 = vector.extract_strided_slice %106 {offsets = [16, 0], sizes = [16, 32], strides = [1, 1]} : vector<32x32xf32> to vector<16x32xf32>
    %120 = vector.extract_strided_slice %119 {offsets = [0, 0], sizes = [16, 16], strides = [1, 1]} : vector<16x32xf32> to vector<16x16xf32>
    %121 = vector.extract_strided_slice %119 {offsets = [0, 16], sizes = [16, 16], strides = [1, 1]} : vector<16x32xf32> to vector<16x16xf32>
    %122 = vector.shape_cast %120 : vector<16x16xf32> to vector<16x1x16xf32>
    %123 = vector.shape_cast %121 : vector<16x16xf32> to vector<16x1x16xf32>
    %124 = tpu.concatenate %122, %123 in 1 : vector<16x1x16xf32>, vector<16x1x16xf32> -> vector<16x2x16xf32>
    %125 = vector.shape_cast %124 : vector<16x2x16xf32> to vector<32x16xf32>
    %cst_44 = arith.constant dense<0.000000e+00> : vector<32x32xf32>
    %126 = tpu.matmul %125, %9, %cst_44 {dimension_numbers = #tpu.dot_dimension_numbers<[1], [0], [0], [1], [0, 0, 1, 1], [], []>} : vector<32x16xf32>, vector<16x32xf32>, vector<32x32xf32> -> vector<32x32xf32>
    %127 = arith.addf %118, %126 : vector<32x32xf32>
    %128 = arith.negf %127 : vector<32x32xf32>
    %129 = math.exp %128 : vector<32x32xf32>
    %cst_45 = arith.constant 1.000000e+00 : f32
    %130 = vector.broadcast %cst_45 : f32 to vector<32x32xf32>
    %131 = arith.addf %130, %129 : vector<32x32xf32>
    %132 = arith.divf %130, %131 : vector<32x32xf32>
    %133 = vector.extract_strided_slice %132 {offsets = [0, 0], sizes = [32, 16], strides = [1, 1]} : vector<32x32xf32> to vector<32x16xf32>
    %134 = vector.extract_strided_slice %132 {offsets = [0, 16], sizes = [32, 16], strides = [1, 1]} : vector<32x32xf32> to vector<32x16xf32>
    %135 = arith.mulf %133, %88 : vector<32x16xf32>
    %136 = vector.shape_cast %135 : vector<32x16xf32> to vector<16x2x16xf32>
    %137 = vector.extract_strided_slice %136 {offsets = [0, 0, 0], sizes = [16, 1, 16], strides = [1, 1, 1]} : vector<16x2x16xf32> to vector<16x1x16xf32>
    %138 = vector.shape_cast %137 : vector<16x1x16xf32> to vector<16x16xf32>
    %139 = vector.extract_strided_slice %136 {offsets = [0, 1, 0], sizes = [16, 1, 16], strides = [1, 1, 1]} : vector<16x2x16xf32> to vector<16x1x16xf32>
    %140 = vector.shape_cast %139 : vector<16x1x16xf32> to vector<16x16xf32>
    %141 = tpu.concatenate %138, %140 in 1 : vector<16x16xf32>, vector<16x16xf32> -> vector<16x32xf32>
    %cst_46 = arith.constant dense<0.000000e+00> : vector<32x32xf32>
    %142 = tpu.matmul %3, %141, %cst_46 {dimension_numbers = #tpu.dot_dimension_numbers<[1], [0], [0], [1], [0, 0, 1, 1], [], []>} : vector<32x16xf32>, vector<16x32xf32>, vector<32x32xf32> -> vector<32x32xf32>
    %143 = vector.extract_strided_slice %99 {offsets = [0, 32], sizes = [32, 16], strides = [1, 1]} : vector<32x48xf32> to vector<32x16xf32>
    %cst_47 = arith.constant dense<0.000000e+00> : vector<32x16xf32>
    %144 = tpu.matmul %135, %11, %cst_47 {dimension_numbers = #tpu.dot_dimension_numbers<[1], [0], [0], [1], [0, 0, 1, 1], [], []>} : vector<32x16xf32>, vector<16x16xf32>, vector<32x16xf32> -> vector<32x16xf32>
    %145 = arith.addf %143, %144 : vector<32x16xf32>
    %146 = vector.extract_strided_slice %142 {offsets = [0, 0], sizes = [16, 32], strides = [1, 1]} : vector<32x32xf32> to vector<16x32xf32>
    %147 = vector.extract_strided_slice %146 {offsets = [0, 0], sizes = [16, 16], strides = [1, 1]} : vector<16x32xf32> to vector<16x16xf32>
    %148 = vector.extract_strided_slice %146 {offsets = [0, 16], sizes = [16, 16], strides = [1, 1]} : vector<16x32xf32> to vector<16x16xf32>
    %149 = vector.shape_cast %147 : vector<16x16xf32> to vector<16x1x16xf32>
    %150 = vector.shape_cast %148 : vector<16x16xf32> to vector<16x1x16xf32>
    %151 = tpu.concatenate %149, %150 in 1 : vector<16x1x16xf32>, vector<16x1x16xf32> -> vector<16x2x16xf32>
    %152 = vector.shape_cast %151 : vector<16x2x16xf32> to vector<32x16xf32>
    %cst_48 = arith.constant dense<0.000000e+00> : vector<32x16xf32>
    %153 = tpu.matmul %152, %13, %cst_48 {dimension_numbers = #tpu.dot_dimension_numbers<[1], [0], [0], [1], [0, 0, 1, 1], [], []>} : vector<32x16xf32>, vector<16x16xf32>, vector<32x16xf32> -> vector<32x16xf32>
    %154 = arith.addf %145, %153 : vector<32x16xf32>
    %155 = vector.extract_strided_slice %142 {offsets = [16, 0], sizes = [16, 32], strides = [1, 1]} : vector<32x32xf32> to vector<16x32xf32>
    %156 = vector.extract_strided_slice %155 {offsets = [0, 0], sizes = [16, 16], strides = [1, 1]} : vector<16x32xf32> to vector<16x16xf32>
    %157 = vector.extract_strided_slice %155 {offsets = [0, 16], sizes = [16, 16], strides = [1, 1]} : vector<16x32xf32> to vector<16x16xf32>
    %158 = vector.shape_cast %156 : vector<16x16xf32> to vector<16x1x16xf32>
    %159 = vector.shape_cast %157 : vector<16x16xf32> to vector<16x1x16xf32>
    %160 = tpu.concatenate %158, %159 in 1 : vector<16x1x16xf32>, vector<16x1x16xf32> -> vector<16x2x16xf32>
    %161 = vector.shape_cast %160 : vector<16x2x16xf32> to vector<32x16xf32>
    %cst_49 = arith.constant dense<0.000000e+00> : vector<32x16xf32>
    %162 = tpu.matmul %161, %15, %cst_49 {dimension_numbers = #tpu.dot_dimension_numbers<[1], [0], [0], [1], [0, 0, 1, 1], [], []>} : vector<32x16xf32>, vector<16x16xf32>, vector<32x16xf32> -> vector<32x16xf32>
    %163 = arith.addf %154, %162 : vector<32x16xf32>
    %164 = math.tanh %163 : vector<32x16xf32>
    %165 = arith.mulf %134, %88 : vector<32x16xf32>
    %cst_50 = arith.constant 1.000000e+00 : f32
    %166 = vector.broadcast %cst_50 : f32 to vector<32x16xf32>
    %167 = arith.subf %166, %134 : vector<32x16xf32>
    %168 = arith.mulf %167, %164 : vector<32x16xf32>
    %169 = arith.addf %165, %168 : vector<32x16xf32>
    %170 = vector.shape_cast %169 : vector<32x16xf32> to vector<16x2x16xf32>
    %171 = vector.extract_strided_slice %170 {offsets = [0, 0, 0], sizes = [16, 1, 16], strides = [1, 1, 1]} : vector<16x2x16xf32> to vector<16x1x16xf32>
    %172 = vector.shape_cast %171 : vector<16x1x16xf32> to vector<16x16xf32>
    %173 = vector.extract_strided_slice %170 {offsets = [0, 1, 0], sizes = [16, 1, 16], strides = [1, 1, 1]} : vector<16x2x16xf32> to vector<16x1x16xf32>
    %174 = vector.shape_cast %173 : vector<16x1x16xf32> to vector<16x16xf32>
    %175 = tpu.concatenate %172, %174 in 1 : vector<16x16xf32>, vector<16x16xf32> -> vector<16x32xf32>
    %c0_51 = arith.constant 0 : index
    %c1_52 = arith.constant 1 : index
    %c0_53 = arith.constant 0 : index
    %c0_54 = arith.constant 0 : index
    %176 = vector.load %arg7[%c0_51, %c1_52, %c0_53, %c0_54] : memref<1x4x16x32xf32, #tpu.memory_space<vmem>>, vector<1x1x16x32xf32>
    %177 = vector.shape_cast %176 : vector<1x1x16x32xf32> to vector<16x32xf32>
    %178 = vector.shape_cast %175 : vector<16x32xf32> to vector<1x1x16x32xf32>
    tpu.vector_store %arg7[%c0_51, %c1_52, %c0_53, %c0_54], %178 {strides = array<i32>} : memref<1x4x16x32xf32, #tpu.memory_space<vmem>>, vector<1x1x16x32xf32>,
    %c0_55 = arith.constant 0 : index
    %c2_56 = arith.constant 2 : index
    %c0_57 = arith.constant 0 : index
    %c0_58 = arith.constant 0 : index
    %179 = vector.load %arg2[%c0_55, %c2_56, %c0_57, %c0_58] : memref<1x4x32x48xf32, #tpu.memory_space<vmem>>, vector<1x1x32x48xf32>
    %180 = vector.shape_cast %179 : vector<1x1x32x48xf32> to vector<32x48xf32>
    %181 = vector.shape_cast %169 : vector<32x16xf32> to vector<16x2x16xf32>
    %182 = vector.extract_strided_slice %181 {offsets = [0, 0, 0], sizes = [16, 1, 16], strides = [1, 1, 1]} : vector<16x2x16xf32> to vector<16x1x16xf32>
    %183 = vector.shape_cast %182 : vector<16x1x16xf32> to vector<16x16xf32>
    %184 = vector.extract_strided_slice %181 {offsets = [0, 1, 0], sizes = [16, 1, 16], strides = [1, 1, 1]} : vector<16x2x16xf32> to vector<16x1x16xf32>
    %185 = vector.shape_cast %184 : vector<16x1x16xf32> to vector<16x16xf32>
    %186 = tpu.concatenate %183, %185 in 1 : vector<16x16xf32>, vector<16x16xf32> -> vector<16x32xf32>
    %cst_59 = arith.constant dense<0.000000e+00> : vector<32x32xf32>
    %187 = tpu.matmul %3, %186, %cst_59 {dimension_numbers = #tpu.dot_dimension_numbers<[1], [0], [0], [1], [0, 0, 1, 1], [], []>} : vector<32x16xf32>, vector<16x32xf32>, vector<32x32xf32> -> vector<32x32xf32>
    %188 = vector.extract_strided_slice %180 {offsets = [0, 0], sizes = [32, 32], strides = [1, 1]} : vector<32x48xf32> to vector<32x32xf32>
    %cst_60 = arith.constant dense<0.000000e+00> : vector<32x32xf32>
    %189 = tpu.matmul %169, %5, %cst_60 {dimension_numbers = #tpu.dot_dimension_numbers<[1], [0], [0], [1], [0, 0, 1, 1], [], []>} : vector<32x16xf32>, vector<16x32xf32>, vector<32x32xf32> -> vector<32x32xf32>
    %190 = arith.addf %188, %189 : vector<32x32xf32>
    %191 = vector.extract_strided_slice %187 {offsets = [0, 0], sizes = [16, 32], strides = [1, 1]} : vector<32x32xf32> to vector<16x32xf32>
    %192 = vector.extract_strided_slice %191 {offsets = [0, 0], sizes = [16, 16], strides = [1, 1]} : vector<16x32xf32> to vector<16x16xf32>
    %193 = vector.extract_strided_slice %191 {offsets = [0, 16], sizes = [16, 16], strides = [1, 1]} : vector<16x32xf32> to vector<16x16xf32>
    %194 = vector.shape_cast %192 : vector<16x16xf32> to vector<16x1x16xf32>
    %195 = vector.shape_cast %193 : vector<16x16xf32> to vector<16x1x16xf32>
    %196 = tpu.concatenate %194, %195 in 1 : vector<16x1x16xf32>, vector<16x1x16xf32> -> vector<16x2x16xf32>
    %197 = vector.shape_cast %196 : vector<16x2x16xf32> to vector<32x16xf32>
    %cst_61 = arith.constant dense<0.000000e+00> : vector<32x32xf32>
    %198 = tpu.matmul %197, %7, %cst_61 {dimension_numbers = #tpu.dot_dimension_numbers<[1], [0], [0], [1], [0, 0, 1, 1], [], []>} : vector<32x16xf32>, vector<16x32xf32>, vector<32x32xf32> -> vector<32x32xf32>
    %199 = arith.addf %190, %198 : vector<32x32xf32>
    %200 = vector.extract_strided_slice %187 {offsets = [16, 0], sizes = [16, 32], strides = [1, 1]} : vector<32x32xf32> to vector<16x32xf32>
    %201 = vector.extract_strided_slice %200 {offsets = [0, 0], sizes = [16, 16], strides = [1, 1]} : vector<16x32xf32> to vector<16x16xf32>
    %202 = vector.extract_strided_slice %200 {offsets = [0, 16], sizes = [16, 16], strides = [1, 1]} : vector<16x32xf32> to vector<16x16xf32>
    %203 = vector.shape_cast %201 : vector<16x16xf32> to vector<16x1x16xf32>
    %204 = vector.shape_cast %202 : vector<16x16xf32> to vector<16x1x16xf32>
    %205 = tpu.concatenate %203, %204 in 1 : vector<16x1x16xf32>, vector<16x1x16xf32> -> vector<16x2x16xf32>
    %206 = vector.shape_cast %205 : vector<16x2x16xf32> to vector<32x16xf32>
    %cst_62 = arith.constant dense<0.000000e+00> : vector<32x32xf32>
    %207 = tpu.matmul %206, %9, %cst_62 {dimension_numbers = #tpu.dot_dimension_numbers<[1], [0], [0], [1], [0, 0, 1, 1], [], []>} : vector<32x16xf32>, vector<16x32xf32>, vector<32x32xf32> -> vector<32x32xf32>
    %208 = arith.addf %199, %207 : vector<32x32xf32>
    %209 = arith.negf %208 : vector<32x32xf32>
    %210 = math.exp %209 : vector<32x32xf32>
    %cst_63 = arith.constant 1.000000e+00 : f32
    %211 = vector.broadcast %cst_63 : f32 to vector<32x32xf32>
    %212 = arith.addf %211, %210 : vector<32x32xf32>
    %213 = arith.divf %211, %212 : vector<32x32xf32>
    %214 = vector.extract_strided_slice %213 {offsets = [0, 0], sizes = [32, 16], strides = [1, 1]} : vector<32x32xf32> to vector<32x16xf32>
    %215 = vector.extract_strided_slice %213 {offsets = [0, 16], sizes = [32, 16], strides = [1, 1]} : vector<32x32xf32> to vector<32x16xf32>
    %216 = arith.mulf %214, %169 : vector<32x16xf32>
    %217 = vector.shape_cast %216 : vector<32x16xf32> to vector<16x2x16xf32>
    %218 = vector.extract_strided_slice %217 {offsets = [0, 0, 0], sizes = [16, 1, 16], strides = [1, 1, 1]} : vector<16x2x16xf32> to vector<16x1x16xf32>
    %219 = vector.shape_cast %218 : vector<16x1x16xf32> to vector<16x16xf32>
    %220 = vector.extract_strided_slice %217 {offsets = [0, 1, 0], sizes = [16, 1, 16], strides = [1, 1, 1]} : vector<16x2x16xf32> to vector<16x1x16xf32>
    %221 = vector.shape_cast %220 : vector<16x1x16xf32> to vector<16x16xf32>
    %222 = tpu.concatenate %219, %221 in 1 : vector<16x16xf32>, vector<16x16xf32> -> vector<16x32xf32>
    %cst_64 = arith.constant dense<0.000000e+00> : vector<32x32xf32>
    %223 = tpu.matmul %3, %222, %cst_64 {dimension_numbers = #tpu.dot_dimension_numbers<[1], [0], [0], [1], [0, 0, 1, 1], [], []>} : vector<32x16xf32>, vector<16x32xf32>, vector<32x32xf32> -> vector<32x32xf32>
    %224 = vector.extract_strided_slice %180 {offsets = [0, 32], sizes = [32, 16], strides = [1, 1]} : vector<32x48xf32> to vector<32x16xf32>
    %cst_65 = arith.constant dense<0.000000e+00> : vector<32x16xf32>
    %225 = tpu.matmul %216, %11, %cst_65 {dimension_numbers = #tpu.dot_dimension_numbers<[1], [0], [0], [1], [0, 0, 1, 1], [], []>} : vector<32x16xf32>, vector<16x16xf32>, vector<32x16xf32> -> vector<32x16xf32>
    %226 = arith.addf %224, %225 : vector<32x16xf32>
    %227 = vector.extract_strided_slice %223 {offsets = [0, 0], sizes = [16, 32], strides = [1, 1]} : vector<32x32xf32> to vector<16x32xf32>
    %228 = vector.extract_strided_slice %227 {offsets = [0, 0], sizes = [16, 16], strides = [1, 1]} : vector<16x32xf32> to vector<16x16xf32>
    %229 = vector.extract_strided_slice %227 {offsets = [0, 16], sizes = [16, 16], strides = [1, 1]} : vector<16x32xf32> to vector<16x16xf32>
    %230 = vector.shape_cast %228 : vector<16x16xf32> to vector<16x1x16xf32>
    %231 = vector.shape_cast %229 : vector<16x16xf32> to vector<16x1x16xf32>
    %232 = tpu.concatenate %230, %231 in 1 : vector<16x1x16xf32>, vector<16x1x16xf32> -> vector<16x2x16xf32>
    %233 = vector.shape_cast %232 : vector<16x2x16xf32> to vector<32x16xf32>
    %cst_66 = arith.constant dense<0.000000e+00> : vector<32x16xf32>
    %234 = tpu.matmul %233, %13, %cst_66 {dimension_numbers = #tpu.dot_dimension_numbers<[1], [0], [0], [1], [0, 0, 1, 1], [], []>} : vector<32x16xf32>, vector<16x16xf32>, vector<32x16xf32> -> vector<32x16xf32>
    %235 = arith.addf %226, %234 : vector<32x16xf32>
    %236 = vector.extract_strided_slice %223 {offsets = [16, 0], sizes = [16, 32], strides = [1, 1]} : vector<32x32xf32> to vector<16x32xf32>
    %237 = vector.extract_strided_slice %236 {offsets = [0, 0], sizes = [16, 16], strides = [1, 1]} : vector<16x32xf32> to vector<16x16xf32>
    %238 = vector.extract_strided_slice %236 {offsets = [0, 16], sizes = [16, 16], strides = [1, 1]} : vector<16x32xf32> to vector<16x16xf32>
    %239 = vector.shape_cast %237 : vector<16x16xf32> to vector<16x1x16xf32>
    %240 = vector.shape_cast %238 : vector<16x16xf32> to vector<16x1x16xf32>
    %241 = tpu.concatenate %239, %240 in 1 : vector<16x1x16xf32>, vector<16x1x16xf32> -> vector<16x2x16xf32>
    %242 = vector.shape_cast %241 : vector<16x2x16xf32> to vector<32x16xf32>
    %cst_67 = arith.constant dense<0.000000e+00> : vector<32x16xf32>
    %243 = tpu.matmul %242, %15, %cst_67 {dimension_numbers = #tpu.dot_dimension_numbers<[1], [0], [0], [1], [0, 0, 1, 1], [], []>} : vector<32x16xf32>, vector<16x16xf32>, vector<32x16xf32> -> vector<32x16xf32>
    %244 = arith.addf %235, %243 : vector<32x16xf32>
    %245 = math.tanh %244 : vector<32x16xf32>
    %246 = arith.mulf %215, %169 : vector<32x16xf32>
    %cst_68 = arith.constant 1.000000e+00 : f32
    %247 = vector.broadcast %cst_68 : f32 to vector<32x16xf32>
    %248 = arith.subf %247, %215 : vector<32x16xf32>
    %249 = arith.mulf %248, %245 : vector<32x16xf32>
    %250 = arith.addf %246, %249 : vector<32x16xf32>
    %251 = vector.shape_cast %250 : vector<32x16xf32> to vector<16x2x16xf32>
    %252 = vector.extract_strided_slice %251 {offsets = [0, 0, 0], sizes = [16, 1, 16], strides = [1, 1, 1]} : vector<16x2x16xf32> to vector<16x1x16xf32>
    %253 = vector.shape_cast %252 : vector<16x1x16xf32> to vector<16x16xf32>
    %254 = vector.extract_strided_slice %251 {offsets = [0, 1, 0], sizes = [16, 1, 16], strides = [1, 1, 1]} : vector<16x2x16xf32> to vector<16x1x16xf32>
    %255 = vector.shape_cast %254 : vector<16x1x16xf32> to vector<16x16xf32>
    %256 = tpu.concatenate %253, %255 in 1 : vector<16x16xf32>, vector<16x16xf32> -> vector<16x32xf32>
    %c0_69 = arith.constant 0 : index
    %c2_70 = arith.constant 2 : index
    %c0_71 = arith.constant 0 : index
    %c0_72 = arith.constant 0 : index
    %257 = vector.load %arg7[%c0_69, %c2_70, %c0_71, %c0_72] : memref<1x4x16x32xf32, #tpu.memory_space<vmem>>, vector<1x1x16x32xf32>
    %258 = vector.shape_cast %257 : vector<1x1x16x32xf32> to vector<16x32xf32>
    %259 = vector.shape_cast %256 : vector<16x32xf32> to vector<1x1x16x32xf32>
    tpu.vector_store %arg7[%c0_69, %c2_70, %c0_71, %c0_72], %259 {strides = array<i32>} : memref<1x4x16x32xf32, #tpu.memory_space<vmem>>, vector<1x1x16x32xf32>,
    %c0_73 = arith.constant 0 : index
    %c3 = arith.constant 3 : index
    %c0_74 = arith.constant 0 : index
    %c0_75 = arith.constant 0 : index
    %260 = vector.load %arg2[%c0_73, %c3, %c0_74, %c0_75] : memref<1x4x32x48xf32, #tpu.memory_space<vmem>>, vector<1x1x32x48xf32>
    %261 = vector.shape_cast %260 : vector<1x1x32x48xf32> to vector<32x48xf32>
    %262 = vector.shape_cast %250 : vector<32x16xf32> to vector<16x2x16xf32>
    %263 = vector.extract_strided_slice %262 {offsets = [0, 0, 0], sizes = [16, 1, 16], strides = [1, 1, 1]} : vector<16x2x16xf32> to vector<16x1x16xf32>
    %264 = vector.shape_cast %263 : vector<16x1x16xf32> to vector<16x16xf32>
    %265 = vector.extract_strided_slice %262 {offsets = [0, 1, 0], sizes = [16, 1, 16], strides = [1, 1, 1]} : vector<16x2x16xf32> to vector<16x1x16xf32>
    %266 = vector.shape_cast %265 : vector<16x1x16xf32> to vector<16x16xf32>
    %267 = tpu.concatenate %264, %266 in 1 : vector<16x16xf32>, vector<16x16xf32> -> vector<16x32xf32>
    %cst_76 = arith.constant dense<0.000000e+00> : vector<32x32xf32>
    %268 = tpu.matmul %3, %267, %cst_76 {dimension_numbers = #tpu.dot_dimension_numbers<[1], [0], [0], [1], [0, 0, 1, 1], [], []>} : vector<32x16xf32>, vector<16x32xf32>, vector<32x32xf32> -> vector<32x32xf32>
    %269 = vector.extract_strided_slice %261 {offsets = [0, 0], sizes = [32, 32], strides = [1, 1]} : vector<32x48xf32> to vector<32x32xf32>
    %cst_77 = arith.constant dense<0.000000e+00> : vector<32x32xf32>
    %270 = tpu.matmul %250, %5, %cst_77 {dimension_numbers = #tpu.dot_dimension_numbers<[1], [0], [0], [1], [0, 0, 1, 1], [], []>} : vector<32x16xf32>, vector<16x32xf32>, vector<32x32xf32> -> vector<32x32xf32>
    %271 = arith.addf %269, %270 : vector<32x32xf32>
    %272 = vector.extract_strided_slice %268 {offsets = [0, 0], sizes = [16, 32], strides = [1, 1]} : vector<32x32xf32> to vector<16x32xf32>
    %273 = vector.extract_strided_slice %272 {offsets = [0, 0], sizes = [16, 16], strides = [1, 1]} : vector<16x32xf32> to vector<16x16xf32>
    %274 = vector.extract_strided_slice %272 {offsets = [0, 16], sizes = [16, 16], strides = [1, 1]} : vector<16x32xf32> to vector<16x16xf32>
    %275 = vector.shape_cast %273 : vector<16x16xf32> to vector<16x1x16xf32>
    %276 = vector.shape_cast %274 : vector<16x16xf32> to vector<16x1x16xf32>
    %277 = tpu.concatenate %275, %276 in 1 : vector<16x1x16xf32>, vector<16x1x16xf32> -> vector<16x2x16xf32>
    %278 = vector.shape_cast %277 : vector<16x2x16xf32> to vector<32x16xf32>
    %cst_78 = arith.constant dense<0.000000e+00> : vector<32x32xf32>
    %279 = tpu.matmul %278, %7, %cst_78 {dimension_numbers = #tpu.dot_dimension_numbers<[1], [0], [0], [1], [0, 0, 1, 1], [], []>} : vector<32x16xf32>, vector<16x32xf32>, vector<32x32xf32> -> vector<32x32xf32>
    %280 = arith.addf %271, %279 : vector<32x32xf32>
    %281 = vector.extract_strided_slice %268 {offsets = [16, 0], sizes = [16, 32], strides = [1, 1]} : vector<32x32xf32> to vector<16x32xf32>
    %282 = vector.extract_strided_slice %281 {offsets = [0, 0], sizes = [16, 16], strides = [1, 1]} : vector<16x32xf32> to vector<16x16xf32>
    %283 = vector.extract_strided_slice %281 {offsets = [0, 16], sizes = [16, 16], strides = [1, 1]} : vector<16x32xf32> to vector<16x16xf32>
    %284 = vector.shape_cast %282 : vector<16x16xf32> to vector<16x1x16xf32>
    %285 = vector.shape_cast %283 : vector<16x16xf32> to vector<16x1x16xf32>
    %286 = tpu.concatenate %284, %285 in 1 : vector<16x1x16xf32>, vector<16x1x16xf32> -> vector<16x2x16xf32>
    %287 = vector.shape_cast %286 : vector<16x2x16xf32> to vector<32x16xf32>
    %cst_79 = arith.constant dense<0.000000e+00> : vector<32x32xf32>
    %288 = tpu.matmul %287, %9, %cst_79 {dimension_numbers = #tpu.dot_dimension_numbers<[1], [0], [0], [1], [0, 0, 1, 1], [], []>} : vector<32x16xf32>, vector<16x32xf32>, vector<32x32xf32> -> vector<32x32xf32>
    %289 = arith.addf %280, %288 : vector<32x32xf32>
    %290 = arith.negf %289 : vector<32x32xf32>
    %291 = math.exp %290 : vector<32x32xf32>
    %cst_80 = arith.constant 1.000000e+00 : f32
    %292 = vector.broadcast %cst_80 : f32 to vector<32x32xf32>
    %293 = arith.addf %292, %291 : vector<32x32xf32>
    %294 = arith.divf %292, %293 : vector<32x32xf32>
    %295 = vector.extract_strided_slice %294 {offsets = [0, 0], sizes = [32, 16], strides = [1, 1]} : vector<32x32xf32> to vector<32x16xf32>
    %296 = vector.extract_strided_slice %294 {offsets = [0, 16], sizes = [32, 16], strides = [1, 1]} : vector<32x32xf32> to vector<32x16xf32>
    %297 = arith.mulf %295, %250 : vector<32x16xf32>
    %298 = vector.shape_cast %297 : vector<32x16xf32> to vector<16x2x16xf32>
    %299 = vector.extract_strided_slice %298 {offsets = [0, 0, 0], sizes = [16, 1, 16], strides = [1, 1, 1]} : vector<16x2x16xf32> to vector<16x1x16xf32>
    %300 = vector.shape_cast %299 : vector<16x1x16xf32> to vector<16x16xf32>
    %301 = vector.extract_strided_slice %298 {offsets = [0, 1, 0], sizes = [16, 1, 16], strides = [1, 1, 1]} : vector<16x2x16xf32> to vector<16x1x16xf32>
    %302 = vector.shape_cast %301 : vector<16x1x16xf32> to vector<16x16xf32>
    %303 = tpu.concatenate %300, %302 in 1 : vector<16x16xf32>, vector<16x16xf32> -> vector<16x32xf32>
    %cst_81 = arith.constant dense<0.000000e+00> : vector<32x32xf32>
    %304 = tpu.matmul %3, %303, %cst_81 {dimension_numbers = #tpu.dot_dimension_numbers<[1], [0], [0], [1], [0, 0, 1, 1], [], []>} : vector<32x16xf32>, vector<16x32xf32>, vector<32x32xf32> -> vector<32x32xf32>
    %305 = vector.extract_strided_slice %261 {offsets = [0, 32], sizes = [32, 16], strides = [1, 1]} : vector<32x48xf32> to vector<32x16xf32>
    %cst_82 = arith.constant dense<0.000000e+00> : vector<32x16xf32>
    %306 = tpu.matmul %297, %11, %cst_82 {dimension_numbers = #tpu.dot_dimension_numbers<[1], [0], [0], [1], [0, 0, 1, 1], [], []>} : vector<32x16xf32>, vector<16x16xf32>, vector<32x16xf32> -> vector<32x16xf32>
    %307 = arith.addf %305, %306 : vector<32x16xf32>
    %308 = vector.extract_strided_slice %304 {offsets = [0, 0], sizes = [16, 32], strides = [1, 1]} : vector<32x32xf32> to vector<16x32xf32>
    %309 = vector.extract_strided_slice %308 {offsets = [0, 0], sizes = [16, 16], strides = [1, 1]} : vector<16x32xf32> to vector<16x16xf32>
    %310 = vector.extract_strided_slice %308 {offsets = [0, 16], sizes = [16, 16], strides = [1, 1]} : vector<16x32xf32> to vector<16x16xf32>
    %311 = vector.shape_cast %309 : vector<16x16xf32> to vector<16x1x16xf32>
    %312 = vector.shape_cast %310 : vector<16x16xf32> to vector<16x1x16xf32>
    %313 = tpu.concatenate %311, %312 in 1 : vector<16x1x16xf32>, vector<16x1x16xf32> -> vector<16x2x16xf32>
    %314 = vector.shape_cast %313 : vector<16x2x16xf32> to vector<32x16xf32>
    %cst_83 = arith.constant dense<0.000000e+00> : vector<32x16xf32>
    %315 = tpu.matmul %314, %13, %cst_83 {dimension_numbers = #tpu.dot_dimension_numbers<[1], [0], [0], [1], [0, 0, 1, 1], [], []>} : vector<32x16xf32>, vector<16x16xf32>, vector<32x16xf32> -> vector<32x16xf32>
    %316 = arith.addf %307, %315 : vector<32x16xf32>
    %317 = vector.extract_strided_slice %304 {offsets = [16, 0], sizes = [16, 32], strides = [1, 1]} : vector<32x32xf32> to vector<16x32xf32>
    %318 = vector.extract_strided_slice %317 {offsets = [0, 0], sizes = [16, 16], strides = [1, 1]} : vector<16x32xf32> to vector<16x16xf32>
    %319 = vector.extract_strided_slice %317 {offsets = [0, 16], sizes = [16, 16], strides = [1, 1]} : vector<16x32xf32> to vector<16x16xf32>
    %320 = vector.shape_cast %318 : vector<16x16xf32> to vector<16x1x16xf32>
    %321 = vector.shape_cast %319 : vector<16x16xf32> to vector<16x1x16xf32>
    %322 = tpu.concatenate %320, %321 in 1 : vector<16x1x16xf32>, vector<16x1x16xf32> -> vector<16x2x16xf32>
    %323 = vector.shape_cast %322 : vector<16x2x16xf32> to vector<32x16xf32>
    %cst_84 = arith.constant dense<0.000000e+00> : vector<32x16xf32>
    %324 = tpu.matmul %323, %15, %cst_84 {dimension_numbers = #tpu.dot_dimension_numbers<[1], [0], [0], [1], [0, 0, 1, 1], [], []>} : vector<32x16xf32>, vector<16x16xf32>, vector<32x16xf32> -> vector<32x16xf32>
    %325 = arith.addf %316, %324 : vector<32x16xf32>
    %326 = math.tanh %325 : vector<32x16xf32>
    %327 = arith.mulf %296, %250 : vector<32x16xf32>
    %cst_85 = arith.constant 1.000000e+00 : f32
    %328 = vector.broadcast %cst_85 : f32 to vector<32x16xf32>
    %329 = arith.subf %328, %296 : vector<32x16xf32>
    %330 = arith.mulf %329, %326 : vector<32x16xf32>
    %331 = arith.addf %327, %330 : vector<32x16xf32>
    %332 = vector.shape_cast %331 : vector<32x16xf32> to vector<16x2x16xf32>
    %333 = vector.extract_strided_slice %332 {offsets = [0, 0, 0], sizes = [16, 1, 16], strides = [1, 1, 1]} : vector<16x2x16xf32> to vector<16x1x16xf32>
    %334 = vector.shape_cast %333 : vector<16x1x16xf32> to vector<16x16xf32>
    %335 = vector.extract_strided_slice %332 {offsets = [0, 1, 0], sizes = [16, 1, 16], strides = [1, 1, 1]} : vector<16x2x16xf32> to vector<16x1x16xf32>
    %336 = vector.shape_cast %335 : vector<16x1x16xf32> to vector<16x16xf32>
    %337 = tpu.concatenate %334, %336 in 1 : vector<16x16xf32>, vector<16x16xf32> -> vector<16x32xf32>
    %c0_86 = arith.constant 0 : index
    %c3_87 = arith.constant 3 : index
    %c0_88 = arith.constant 0 : index
    %c0_89 = arith.constant 0 : index
    %338 = vector.load %arg7[%c0_86, %c3_87, %c0_88, %c0_89] : memref<1x4x16x32xf32, #tpu.memory_space<vmem>>, vector<1x1x16x32xf32>
    %339 = vector.shape_cast %338 : vector<1x1x16x32xf32> to vector<16x32xf32>
    %340 = vector.shape_cast %337 : vector<16x32xf32> to vector<1x1x16x32xf32>
    tpu.vector_store %arg7[%c0_86, %c3_87, %c0_88, %c0_89], %340 {strides = array<i32>} : memref<1x4x16x32xf32, #tpu.memory_space<vmem>>, vector<1x1x16x32xf32>,
    %c0_90 = arith.constant 0 : index
    %c0_91 = arith.constant 0 : index
    %341 = vector.load %arg8[%c0_90, %c0_91] : memref<32x16xf32, #tpu.memory_space<vmem>>, vector<32x16xf32>
    tpu.vector_store %arg8[%c0_90, %c0_91], %331 {strides = array<i32>} : memref<32x16xf32, #tpu.memory_space<vmem>>, vector<32x16xf32>,
    return
  }
  func.func @transform_0(%arg0: i32, %arg1: i32) -> (i32, i32, i32, i32) {
    %c0_i32 = arith.constant 0 : i32
    %c0_i32_0 = arith.constant 0 : i32
    %c0_i32_1 = arith.constant 0 : i32
    return %arg0, %arg1, %c0_i32, %c0_i32_0 : i32, i32, i32, i32
  }
  func.func @transform_1(%arg0: i32, %arg1: i32) -> (i32, i32, i32) {
    %c0_i32 = arith.constant 0 : i32
    %c0_i32_0 = arith.constant 0 : i32
    %c0_i32_1 = arith.constant 0 : i32
    return %arg0, %c0_i32, %c0_i32_0 : i32, i32, i32
  }
  func.func @transform_2(%arg0: i32, %arg1: i32) -> (i32, i32) {
    %c0_i32 = arith.constant 0 : i32
    %c0_i32_0 = arith.constant 0 : i32
    %c0_i32_1 = arith.constant 0 : i32
    return %c0_i32, %c0_i32_0 : i32, i32
  }
  func.func @transform_3(%arg0: i32, %arg1: i32) -> (i32, i32, i32) {
    %c0_i32 = arith.constant 0 : i32
    %c0_i32_0 = arith.constant 0 : i32
    %c0_i32_1 = arith.constant 0 : i32
    %c0_i32_2 = arith.constant 0 : i32
    return %c0_i32, %c0_i32_0, %c0_i32_1 : i32, i32, i32
  }
  func.func @transform_4(%arg0: i32, %arg1: i32) -> (i32, i32, i32) {
    %c0_i32 = arith.constant 0 : i32
    %c0_i32_0 = arith.constant 0 : i32
    %c0_i32_1 = arith.constant 0 : i32
    %c0_i32_2 = arith.constant 0 : i32
    return %c0_i32, %c0_i32_0, %c0_i32_1 : i32, i32, i32
  }
  func.func @transform_5(%arg0: i32, %arg1: i32) -> (i32, i32, i32, i32) {
    %c0_i32 = arith.constant 0 : i32
    %c0_i32_0 = arith.constant 0 : i32
    %c0_i32_1 = arith.constant 0 : i32
    return %arg0, %arg1, %c0_i32, %c0_i32_0 : i32, i32, i32, i32
  }
}

</mosaic_0001>

<bundles_post_ra>
// kernel: adcrnn_forward.3
= control target key start
LH: loop header
LB: loop body
LE: loop exit
PB: predicated region body
PF: predicated region fallthrough
CT: control target
= control target key end

     0   :  { %vm10_vm0 = vcmask 64512   ;;  %vm94_vm2 = vcmask 130048   ;;  %v119_v26 = vlaneseq  ;;  %v273_v30 = vmov 0.0   ;;  %s312_s0 = inlined_call_operand.vmem [shape: f32[16,8], index: 0, kind: input, shape index: {}]   ;;  %s313_s1 = inlined_call_operand.vmem [shape: f32[2,16,16], index: 1, kind: output, shape index: {}]  }
   0x1   :  { %v8_v0 = vld [vmem:[%s312_s0] sm:$0xff]  ;;  %v9_v1 = vld [vmem:[%s312_s0 + $0x8] sm:$0xff]  ;;  %vm255_vm1 = vmpackc.low %vm10_vm0, %vm10_vm0 }
   0x2   :  { %v254_v2 = vpack.c.bf16 %v9_v1, %v8_v0  ;;  %244 = vmatprep.mubr.msk.f32.mxu0 %vm10_vm0, %v8_v0  ;;  %v120_v27 = vshrl.u32 %v119_v26, 7  ;;  %v123_v29 = vand.u32 127, %v119_v26 }
   0x4   :  { %256 = vmatprep.subr.msk.bf16.mxu0 %vm255_vm1, %v254_v2  ;;  %v121_v28 = vadd.s32 8, %v120_v27  ;;  %vm124_vm4 = vcmp.eq.s32.totalorder %v120_v27, %v123_v29 }
   0x5   :  { %259 = vmatpush3.bf16.xpose.msk.msra.mxu0 %vm255_vm1, %v254_v2  ;;  %v226_v34 = vsel %vm124_vm4, 1.0, %v273_v30 }
   0x6   :  { %vm125_vm3 = vcmp.eq.s32.totalorder %v121_v28, %v123_v29 }
   0x7   :  { %v227_v31 = vsel %vm125_vm3, 1.0, %v273_v30 }
   0xc   :  { %245 = vmatmul.mubr.msk.f32.vlgmr.msra.gmra.mrb[0].mxu0 %vm10_vm0, %v9_v1 }
  0xdf   :  { %v246_v3 = vpop.f32.mrb[0].mxu0 }
  0xe0   :  { %v83_v4 = vpop.f32.mrb[1].mxu0  ;;  %v93_v6 = vmax.f32 %v246_v3, 0.0 }
  0xe1   :  { %v92_v5 = vmax.f32 %v83_v4, 0.0 }
  0xe2   :  { %v98_v8 = vsel %vm94_vm2, %v93_v6, -inf }
  0xe3   :  { %v95_v7 = vsel %vm94_vm2, %v92_v5, -inf }
  0xe4   :  { %96 = vmax.xlane.f32.xlu0 %v95_v7 }
  0xe8   :  { %99 = vmax.xlane.f32.xlu0 %v98_v8 }
 0x171   :  { %v97_v9 = vpop.xlane.xlu0 %96 }
 0x172   :  { %v101_v10 = vsub.f32 %v92_v5, %v97_v9 }
 0x174   :  { %v103_v11 = vmul.f32 1.442695, %v101_v10 }
 0x175   :  { %v100_v12 = vpop.xlane.xlu0 %99 }
 0x176   :  { %265 = vpow2.f32 %v103_v11  ;;  %v102_v13 = vsub.f32 %v93_v6, %v100_v12 }
 0x178   :  { %v105_v14 = vmul.f32 1.442695, %v102_v13 }
 0x17a   :  { %267 = vpow2.f32 %v105_v14 }
 0x180   :  { %v266_v15 = vpop.eup %265 }
 0x181   :  { %v107_v16 = vsel %vm94_vm2, %v266_v15, 0.0 }
 0x182   :  { %108 = vadd.xlane.f32.xlu1 %v107_v16 }
 0x184   :  { %v268_v17 = vpop.eup %267 }
 0x185   :  { %v110_v18 = vsel %vm94_vm2, %v268_v17, 0.0 }
 0x186   :  { %111 = vadd.xlane.f32.xlu1 %v110_v18 }
 0x20f   :  { %v109_v19 = vpop.xlane.xlu1 %108 }
 0x210   :  { %269 = vrcp.f32 %v109_v19 }
 0x213   :  { %v112_v20 = vpop.xlane.xlu1 %111 }
 0x214   :  { %271 = vrcp.f32 %v112_v20 }
 0x21a   :  { %v270_v21 = vpop.eup %269 }
 0x21b   :  { %v114_v22 = vmul.f32 %v270_v21, %v266_v15 }
 0x21d   :  { %117 = vst.msk [vmem:[%s313_s1] sm:$0xff] %vm94_vm2, %v114_v22  ;;  %251 = vmatprep.mubr.msk.f32.mxu1 %vm94_vm2, %v114_v22 }
 0x21e   :  { %v272_v23 = vpop.eup %271 }
 0x21f   :  { %v116_v24 = vmul.f32 %v272_v23, %v268_v17 }
 0x221   :  { %118 = vst.msk [vmem:[%s313_s1 + $0x8] sm:$0xff] %vm94_vm2, %v116_v24  ;;  %v260_v25 = vpack.c.bf16 %v116_v24, %v114_v22 }
 0x223   :  { %261 = vmatprep.subr.bf16.mxu1 %v260_v25 }
 0x224   :  { %263 = vmatpush3.bf16.msra.mxu1 %v260_v25 }
 0x227   :  { %252 = vmatmul.mubr.msk.f32.vlgmr.msra.gmra.mrb[0].mxu1 %vm94_vm2, %v116_v24 }
 0x2fa   :  { %v253_v32 = vpop.f32.mrb[0].mxu1 }
 0x2fb   :  { %v212_v33 = vmul.f32 2.0, %v253_v32  ;;  %v202_v35 = vpop.f32.mrb[1].mxu1 }
 0x2fc   :  { %v211_v36 = vmul.f32 2.0, %v202_v35 }
 0x2fd   :  { %v214_v37 = vsub.f32 %v212_v33, %v227_v31 }
 0x2fe   :  { %v213_v38 = vsub.f32 %v211_v36, %v226_v34 }
 0x2ff   :  { %231 = vst.msk [vmem:[%s313_s1 + $0x18] sm:$0xff] %vm94_vm2, %v214_v37 }
 0x300   :  { %230 = vst.msk [vmem:[%s313_s1 + $0x10] sm:$0xff] %vm94_vm2, %v213_v38 }

// kernel: adcrnn_forward.4
= control target key start
LH: loop header
LB: loop body
LE: loop exit
PB: predicated region body
PF: predicated region fallthrough
CT: control target
= control target key end

     0   :  { %s12537_s18 = smov 0   ;;  %s12539_s19 = smov 0   ;;  %s16892_s0 = inlined_call_operand.vmem [shape: f32[2,8,32,48], index: 0, kind: input, shape index: {}]   ;;  %s16893_s1 = inlined_call_operand.vmem [shape: f32[2,32,16], index: 1, kind: input, shape index: {}]   ;;  %s16894_s2 = inlined_call_operand.vmem [shape: f32[32,16], index: 2, kind: input, shape index: {}]   ;;  %s16895_s3 = inlined_call_operand.vmem [shape: f32[3,16,32], index: 3, kind: input, shape index: {}]   ;;  %s16896_s4 = inlined_call_operand.vmem [shape: f32[3,16,16], index: 4, kind: input, shape index: {}]   ;;  %s16897_s5 = inlined_call_operand.vmem [shape: f32[2,8,16,32], index: 5, kind: output, shape index: {}]  }
   0x1   :  { %s12541_s20 = smov 0   ;;  %s12543_s21 = smov 0  }
   0x2   :  { %s12545_s22 = smov 0  }
   0x3 LB: > { %s24_s23 = sadd.s32 1, %s12492_s20  ;;  %s27_s24 = sadd.s32 1, %s12496_s21  ;;  %s12500_s22 = sphi %s12545_s22, %s15_s22   ;;  %s12496_s21 = sphi %s12543_s21, %s16993_s21   ;;  %s12492_s20 = sphi %s12541_s20, %s16992_s20   ;;  %s12488_s19 = sphi %s12539_s19, %s16991_s19   ;;  %s12484_s18 = sphi %s12537_s18, %s16990_s18  }
   0x4   : > { %p25_p0 = scmp.ge.s32.totalorder %s24_s23, 2  ;;  %p11403_p1 = scmp.ge.s32.totalorder %s12500_s22, 1 }
   0x5   : > { %p219_p2 = scmp.lt.s32.totalorder %s12500_s22, 5 }
   0x6   : > { %s16995_s23 = smov (%p25_p0, %s24_s23), 0  ;;  %s16997_s24 = smov (!%p25_p0, %s27_s24), %s12496_s21 }
   0x7   : > { %p220_p3 = pnand %p11403_p1, %p219_p2  ;;  %p29_p4 = scmp.ge.s32.totalorder %s16997_s24, 2 }
   0x9   : > { %s16999_s24 = smov (%p29_p4, %s16997_s24), 0  ;;  %223 = sbr.rel (%p220_p3) target bundleno = 7314 (0x1c92), region = 40 }
  0x10   : > { %s11404_s25 = sshll.u32 %s12484_s18, 2  ;;  %p263_p5 = scmp.lt.s32.totalorder %s12488_s19, 1 }
  0x11   : > { %p265_p6 = scmp.lt.s32.totalorder %s11404_s25, 7  ;;  %p11414_p7 = scmp.ne.s32.totalorder %s12484_s18, 0 }
  0x12   : > { %s17001_s19 = smov (!%p263_p5, %s12488_s19), 1  ;;  %vm297_vm0 = vcmask (!%p11414_p7), 130048  }
  0x13   : > { %s17003_s25 = smov (!%p265_p6, %s11404_s25), 7  ;;  %s11406_s26 = sshll.u32 %s17001_s19, 5 }
  0x14   : > { %s11412_s27 = sshll.u32 %s17001_s19, 4  ;;  %s11405_s28 = sshll.u32 %s17003_s25, 2 }
  0x15   : > { %s277_s6 = scalar_lea.vmem %s16893_s1, %s11406_s26  ;;  %s269_s7 = sadd.s32 %s11406_s26, %s11405_s28 }
  0x16   : > { %s11411_s8 = sshll.u32 %s17003_s25, 1  ;;  %s11407_s9 = sshll.u32 %s269_s7, 3  ;;  %v293_v0 = vld [vmem:[%s277_s6] sm:$0xff] (!%p11414_p7)  ;;  %v294_v1 = vld [vmem:[%s277_s6 + $0x8] sm:$0xff] (!%p11414_p7)  ;;  %v295_v2 = vld [vmem:[%s277_s6 + $0x10] sm:$0xff] (!%p11414_p7) }
  0x17   : > { %s285_s10 = sadd.s32 %s11412_s27, %s11411_s8  ;;  %s12576_s13 = scalar_lea.vmem %s16892_s0, %s11407_s9  ;;  %298 = vst.msk [vmem:[#allocation2] sm:$0xff] (!%p11414_p7), %vm297_vm0, %v293_v0  ;;  %299 = vst.msk [vmem:[#allocation2 + $0x8] sm:$0xff] (!%p11414_p7), %vm297_vm0, %v294_v1  ;;  %v296_v3 = vld [vmem:[%s277_s6 + $0x18] sm:$0xff] (!%p11414_p7) }
  0x18   : > { %s11413_s14 = sshll.u32 %s285_s10, 3  ;;  %292 = sbr.rel (%p11414_p7) target bundleno = 31 (0x1f), region = 44  ;;  %300 = vst.msk [vmem:[#allocation2 + $0x10] sm:$0xff] (!%p11414_p7), %vm297_vm0, %v295_v2  ;;  %301 = vst.msk [vmem:[#allocation2 + $0x18] sm:$0xff] (!%p11414_p7), %vm297_vm0, %v296_v3 }
  0x19   : > { %s12581_s17 = scalar_lea.vmem %s16897_s5, %s11413_s14 }
  0x1f PF: > { %v12584_v4 = vld [vmem:[#allocation2] sm:$0xff]  ;;  %v12586_v5 = vld [vmem:[#allocation2 + $0x8] sm:$0xff]  ;;  %v338_v6 = vlaneseq  ;;  %v12588_v7 = vld [vmem:[#allocation2 + $0x10] sm:$0xff]  ;;  %v12502_v9 = vmov 1983009808   ;;  %vm466_vm1 = vcmask 1041409  }
  0x20   : > { %v12590_v8 = vld [vmem:[#allocation2 + $0x18] sm:$0xff]  ;;  %v336_v10 = vunpack.c.l.s4 %v12502_v9  ;;  %v334_v12 = vcombine.high %v12584_v4, %v12584_v4  ;;  %v351_v14 = vcombine.high %v12586_v5, %v12586_v5  ;;  %v368_v15 = vcombine.high %v12588_v7, %v12588_v7  ;;  %s12503_s25 = smov 16   ;;  %s12505_s7 = smov 112  }
  0x21   : > { %v12592_v11 = vshrl.u32 %v338_v6, 7  ;;  %v385_v16 = vcombine.high %v12590_v8, %v12590_v8  ;;  %vm468_vm2 = vcmask 1042434   ;;  %vm470_vm3 = vcmask 1043459   ;;  %s12506_s18 = smov 32  }
  0x22   : > { %v337_v13 = vunpack.c.0.s8 %v336_v10  ;;  %vm472_vm4 = vcmask 1044484   ;;  %vm474_vm5 = vcmask 1045509   ;;  %vm476_vm6 = vcmask 1046534  }
  0x23   : > { %v12606_v18 = vsub.s32 1, %v12592_v11  ;;  %v12657_v33 = vsub.s32 0, %v12592_v11  ;;  %vm478_vm7 = vcmask 1047559   ;;  %vm573_vm8 = vcmask 130048  }
  0x24   : > { %v12603_v17 = vsub.s32 %v337_v13, %v12592_v11  ;;  %11794 = vmatprep.mubr.msk.f32.mxu1 %vm573_vm8, %v12584_v4  ;;  %vm998_vm9 = vcmask 1040384   ;;  %vm3253_vm10 = vcmask 261120  }
  0x26   : > { %v12610_v19 = vrot.slane %v12584_v4, %v12603_v17  ;;  %v12613_v20 = vrot.slane %v334_v12, %v12603_v17  ;;  %v12617_v21 = vrot.slane %v12586_v5, %v12603_v17  ;;  %v12620_v22 = vrot.slane %v351_v14, %v12603_v17 }
  0x27   : > { %v12624_v23 = vrot.slane %v12588_v7, %v12603_v17  ;;  %v12627_v24 = vrot.slane %v368_v15, %v12603_v17  ;;  %v12631_v25 = vrot.slane %v12590_v8, %v12603_v17  ;;  %v12634_v26 = vrot.slane %v385_v16, %v12603_v17  ;;  %v302_v16 = vld [vmem:[%s16894_s2] sm:$0xff] }
  0x28   : > { %v349_v27 = vcombine.high %v12610_v19, %v12610_v19  ;;  %v12640_v28 = vcombine.high %v12613_v20, %v12613_v20  ;;  %v12644_v29 = vcombine.high %v12617_v21, %v12617_v21  ;;  %v492_v34 = vrot.slane %v12610_v19, %v12606_v18  ;;  %11784 = vmatprep.mubr.msk.f32.mxu0 %vm573_vm8, %v302_v16 }
  0x29   : > { %v383_v30 = vcombine.high %v12624_v23, %v12624_v23  ;;  %v12650_v31 = vcombine.high %v12627_v24, %v12627_v24  ;;  %v12654_v32 = vcombine.high %v12631_v25, %v12631_v25  ;;  %v12664_v36 = vcombine.high %v12620_v22, %v12620_v22 }
  0x2a   : > { %v496_v35 = vrot.slane %v349_v27, %v12606_v18  ;;  %v12668_v37 = vcombine.high %v12634_v26, %v12634_v26  ;;  %v500_v38 = vrot.slane %v12613_v20, %v12606_v18  ;;  %v504_v39 = vrot.slane %v12640_v28, %v12606_v18 }
  0x2b   : > { %v524_v40 = vrot.slane %v12624_v23, %v12606_v18  ;;  %v528_v41 = vrot.slane %v383_v30, %v12606_v18  ;;  %v532_v42 = vrot.slane %v12627_v24, %v12606_v18  ;;  %v536_v43 = vrot.slane %v12650_v31, %v12606_v18 }
  0x2c   : > { %v508_v44 = vrot.slane %v12617_v21, %v12606_v18  ;;  %v512_v45 = vrot.slane %v12644_v29, %v12606_v18  ;;  %v540_v46 = vrot.slane %v12631_v25, %v12606_v18  ;;  %v516_v47 = vrot.slane %v12620_v22, %v12606_v18 }
  0x2d   : > { %v544_v48 = vrot.slane %v12654_v32, %v12606_v18  ;;  %v553_v49 = vsel %vm466_vm1, %v496_v35, %v492_v34  ;;  %v560_v50 = vsel %vm466_vm1, %v528_v41, %v524_v40  ;;  %v520_v51 = vrot.slane %v12664_v36, %v12606_v18 }
  0x2e   : > { %v548_v52 = vrot.slane %v12634_v26, %v12606_v18  ;;  %v554_v53 = vsel %vm468_vm2, %v500_v38, %v553_v49  ;;  %v561_v54 = vsel %vm468_vm2, %v532_v42, %v560_v50  ;;  %v552_v55 = vrot.slane %v12668_v37, %v12606_v18  ;;  %v12772_v49 = vld [vmem:[%s16894_s2 + $0x10] sm:$0xff]  ;;  %v12781_v50 = vld [vmem:[%s16894_s2 + $0x18] sm:$0xff] }
  0x2f   : > { %v555_v56 = vsel %vm470_vm3, %v504_v39, %v554_v53  ;;  %v562_v57 = vsel %vm470_vm3, %v536_v43, %v561_v54  ;;  %v405_v58 = vrot.slane %v12610_v19, %v12657_v33  ;;  %v409_v61 = vrot.slane %v349_v27, %v12657_v33 }
  0x30   : > { %v556_v59 = vsel %vm472_vm4, %v508_v44, %v555_v56  ;;  %v563_v60 = vsel %vm472_vm4, %v540_v46, %v562_v57  ;;  %v413_v62 = vrot.slane %v12613_v20, %v12657_v33  ;;  %v417_v1 = vrot.slane %v12640_v28, %v12657_v33 }
  0x31   : > { %v557_v63 = vsel %vm474_vm5, %v512_v45, %v556_v59  ;;  %v564_v0 = vsel %vm474_vm5, %v544_v48, %v563_v60  ;;  %v421_v2 = vrot.slane %v12617_v21, %v12657_v33  ;;  %v437_v9 = vrot.slane %v12624_v23, %v12657_v33  ;;  %v12767_v48 = vld [vmem:[%s16894_s2 + $0x8] sm:$0xff] }
  0x32   : > { %v558_v3 = vsel %vm476_vm6, %v516_v47, %v557_v63  ;;  %v565_v6 = vsel %vm476_vm6, %v548_v52, %v564_v0  ;;  %v441_v10 = vrot.slane %v383_v30, %v12657_v33  ;;  %v445_v14 = vrot.slane %v12627_v24, %v12657_v33 }
  0x33   : > { %v559_v12 = vsel %vm478_vm7, %v520_v51, %v558_v3  ;;  %v566_v13 = vsel %vm478_vm7, %v552_v55, %v565_v6  ;;  %v449_v15 = vrot.slane %v12650_v31, %v12657_v33  ;;  %v425_v20 = vrot.slane %v12644_v29, %v12657_v33 }
  0x34   : > { %v12321_v19 = vpack.i.bf16 %v566_v13, %v559_v12  ;;  %v429_v21 = vrot.slane %v12620_v22, %v12657_v33  ;;  %v453_v23 = vrot.slane %v12631_v25, %v12657_v33  ;;  %v457_v24 = vrot.slane %v12654_v32, %v12657_v33 }
  0x35   : > { %v467_v27 = vsel %vm466_vm1, %v409_v61, %v405_v58  ;;  %v480_v28 = vsel %vm466_vm1, %v441_v10, %v437_v9  ;;  %v461_v29 = vrot.slane %v12634_v26, %v12657_v33  ;;  %v433_v25 = vrot.slane %v12664_v36, %v12657_v33 }
  0x36   : > { %12322 = vrot.lane.b32.xlu0 %v12321_v19, %s12503_s25  ;;  %v469_v30 = vsel %vm468_vm2, %v413_v62, %v467_v27  ;;  %v481_v22 = vsel %vm468_vm2, %v445_v14, %v480_v28  ;;  %v465_v31 = vrot.slane %v12668_v37, %v12657_v33  ;;  %v12504_v51 = vmov 1966171168  }
  0x37   : > { %v471_v32 = vsel %vm470_vm3, %v417_v1, %v469_v30  ;;  %v482_v34 = vsel %vm470_vm3, %v449_v15, %v481_v22  ;;  %v774_v52 = vunpack.c.l.s4 %v12504_v51 }
  0x38   : > { %v473_v26 = vsel %vm472_vm4, %v421_v2, %v471_v32  ;;  %v483_v35 = vsel %vm472_vm4, %v453_v23, %v482_v34 }
  0x39   : > { %v475_v38 = vsel %vm474_vm5, %v425_v20, %v473_v26  ;;  %v484_v39 = vsel %vm474_vm5, %v457_v24, %v483_v35  ;;  %v775_v53 = vunpack.c.0.s8 %v774_v52 }
  0x3a   : > { %v477_v36 = vsel %vm476_vm6, %v429_v21, %v475_v38  ;;  %v485_v40 = vsel %vm476_vm6, %v461_v29, %v484_v39 }
  0x3b   : > { %v479_v37 = vsel %vm478_vm7, %v433_v25, %v477_v36  ;;  %v486_v41 = vsel %vm478_vm7, %v465_v31, %v485_v40  ;;  %v12787_v54 = vsub.s32 %v775_v53, %v12592_v11  ;;  %v306_v25 = vld [vmem:[%s16895_s3] sm:$0xff]  ;;  %v307_v31 = vld [vmem:[%s16895_s3 + $0x8] sm:$0xff]  ;;  %v11415_v53 = vld [vmem:[%s16895_s3 + $0x10] sm:$0xff] }
  0x3c   : > { %v12873_v39 = vpack.c.bf16 %v307_v31, %v306_v25 }
  0x3d   : > { %16938 = vst [vmem:[#allocation3_spill] sm:$0xff] %v12787_v54 }
  0x3e   : > { %16939 = vst [vmem:[#allocation4_spill] sm:$0xff] %v12873_v39  ;;  %12105 = vmatprep.subr.bf16.mxu1 %v12873_v39 }
  0x3f   : > { %12107 = vmatpush3.bf16.msra.mxu1 %v12873_v39 }
  0x42   : > { %11795 = vmatmul.mubr.msk.f32.vlgmr.msra.gmra.mrb[0].mxu1 %vm573_vm8, %v12586_v5 }
  0x43   : > { %11797 = vmatprep.mubr.msk.f32.mxu1 %vm573_vm8, %v12588_v7 }
  0x46   : > { %11798 = vmatmul.mubr.msk.f32.gmra.mrb[2].mxu1 %vm573_vm8, %v12590_v8 }
  0xa8   : > { %v12323_v42 = vpop.permute.xlu0 %12322 }
  0xa9   : > { %v12325_v43 = vunpack.i.h.bf16 %v12323_v42  ;;  %v12324_v44 = vunpack.i.l.bf16 %v12323_v42 }
  0xab   : > { %v574_v45 = vsel %vm573_vm8, %v479_v37, %v12324_v44  ;;  %v575_v46 = vsel %vm573_vm8, %v486_v41, %v12325_v43 }
  0xac   : > { %v12100_v47 = vpack.c.bf16 %v575_v46, %v574_v45 }
  0xae   : > { %12101 = vmatprep.subr.bf16.mxu0 %v12100_v47 }
  0xaf   : > { %12103 = vmatpush3.bf16.msra.mxu0 %v12100_v47 }
  0xb2   : > { %11785 = vmatmul.mubr.msk.f32.vlgmr.msra.gmra.mrb[0].mxu0 %vm573_vm8, %v12767_v48 }
  0xb3   : > { %11787 = vmatprep.mubr.msk.f32.mxu0 %vm573_vm8, %v12772_v49 }
  0xb6   : > { %11788 = vmatmul.mubr.msk.f32.gmra.mrb[2].mxu0 %vm573_vm8, %v12781_v50 }
  0xb7   : > { %11824 = vmatprep.mubr.msk.f32.mxu0 %vm573_vm8, %v302_v16 }
 0x185   : > { %v11786_v55 = vpop.f32.mrb[0].mxu0 }
 0x186   : > { %v821_v56 = vcombine.high %v11786_v55, %v11786_v55  ;;  %v828_v57 = vrot.slane %v11786_v55, %v12787_v54  ;;  %v654_v58 = vpop.f32.mrb[1].mxu0  ;;  %v11416_v55 = vld [vmem:[%s16895_s3 + $0x18] sm:$0xff] }
 0x187   : > { %v779_v59 = vrot.slane %v654_v58, %v12787_v54  ;;  %v772_v14 = vcombine.high %v654_v58, %v654_v58 }
 0x188   : > { %v836_v60 = vcombine.high %v828_v57, %v828_v57  ;;  %v12792_v61 = vrot.slane %v828_v57, %v12787_v54  ;;  %v835_v0 = vrot.slane %v821_v56, %v12787_v54  ;;  %v12927_v57 = vpack.c.bf16 %v11416_v55, %v11415_v53 }
 0x189   : > { %v12795_v62 = vrot.slane %v779_v59, %v12787_v54  ;;  %v12797_v63 = vpop.f32.mrb[2].mxu0  ;;  %v787_v10 = vcombine.high %v779_v59, %v779_v59  ;;  %v786_v23 = vrot.slane %v772_v14, %v12787_v54 }
 0x18a   : > { %v921_v11 = vrot.slane %v12792_v61, %v12657_v33  ;;  %v12802_v1 = vpop.f32.mrb[3].mxu0  ;;  %v12805_v2 = vrot.slane %v836_v60, %v12787_v54  ;;  %v12812_v6 = vcombine.high %v12792_v61, %v12792_v61  ;;  %v12816_v9 = vrot.slane %v835_v0, %v12787_v54  ;;  %16940 = vst [vmem:[#allocation5_spill] sm:$0xff] %v12927_v57 }
 0x18b   : > { %v889_v3 = vrot.slane %v12795_v62, %v12657_v33  ;;  %v837_v13 = vcombine.high %v835_v0, %v835_v0  ;;  %v12829_v19 = vrot.slane %v787_v10, %v12787_v54  ;;  %v12845_v28 = vcombine.high %v12795_v62, %v12795_v62  ;;  %12109 = vmatprep.subr.bf16.mxu1 %v12927_v57 }
 0x18c   : > { %966 = vrot.lane.b32.xlu1 %v921_v11, %s12505_s7  ;;  %v929_v12 = vrot.slane %v12812_v6, %v12657_v33  ;;  %v925_v15 = vrot.slane %v12805_v2, %v12657_v33  ;;  %v12824_v16 = vcombine.high %v12805_v2, %v12805_v2  ;;  %v937_v20 = vrot.slane %v12816_v9, %v12657_v33 }
 0x18d   : > { %950 = vrot.lane.b32.xlu0 %v889_v3, %s12505_s7  ;;  %v12834_v21 = vrot.slane %v837_v13, %v12787_v54  ;;  %v893_v27 = vrot.slane %v12829_v19, %v12657_v33  ;;  %v788_v29 = vcombine.high %v786_v23, %v786_v23  ;;  %v12851_v22 = vcombine.high %v12829_v19, %v12829_v19 }
 0x18e   : > { %v933_v24 = vrot.slane %v12824_v16, %v12657_v33  ;;  %v1254_v32 = vrot.slane %v12797_v63, %v12787_v54  ;;  %v12864_v34 = vrot.slane %v786_v23, %v12787_v54  ;;  %v897_v26 = vrot.slane %v12845_v28, %v12657_v33  ;;  %12111 = vmatpush3.bf16.msra.mxu1 %v12927_v57 }
 0x18f   : > { %v941_v30 = vrot.slane %v12834_v21, %v12657_v33  ;;  %v12869_v35 = vrot.slane %v788_v29, %v12787_v54  ;;  %v901_v38 = vrot.slane %v12851_v22, %v12657_v33  ;;  %v12882_v37 = vcombine.high %v12816_v9, %v12816_v9 }
 0x190   : > { %970 = vrot.lane.b32.xlu1 %v929_v12, %s12505_s7  ;;  %v1262_v36 = vcombine.high %v1254_v32, %v1254_v32  ;;  %v905_v40 = vrot.slane %v12864_v34, %v12657_v33  ;;  %v12889_v42 = vcombine.high %v12834_v21, %v12834_v21  ;;  %v12892_v43 = vrot.slane %v1254_v32, %v12787_v54 }
 0x191   : > { %968 = vrot.lane.b32.xlu0 %v925_v15, %s12505_s7  ;;  %v909_v41 = vrot.slane %v12869_v35, %v12657_v33  ;;  %v945_v45 = vrot.slane %v12882_v37, %v12657_v33  ;;  %v1205_v46 = vrot.slane %v12802_v1, %v12787_v54  ;;  %v12925_v56 = vcombine.high %v12864_v34, %v12864_v34 }
 0x192   : > { %v12896_v44 = vrot.slane %v1262_v36, %v12787_v54  ;;  %v949_v47 = vrot.slane %v12889_v42, %v12657_v33  ;;  %v1347_v51 = vrot.slane %v12892_v43, %v12657_v33  ;;  %v1247_v58 = vcombine.high %v12797_v63, %v12797_v63 }
 0x193   : > { %v1213_v59 = vcombine.high %v1205_v46, %v1205_v46  ;;  %v12933_v60 = vcombine.high %v12869_v35, %v12869_v35  ;;  %v12940_v0 = vrot.slane %v1205_v46, %v12787_v54  ;;  %v913_v11 = vrot.slane %v12925_v56, %v12657_v33  ;;  %v11417_v46 = vld [vmem:[%s16895_s3 + $0x20] sm:$0xff] }
 0x194   : > { %974 = vrot.lane.b32.xlu1 %v937_v20, %s12505_s7  ;;  %v1351_v52 = vrot.slane %v12896_v44, %v12657_v33  ;;  %v1261_v63 = vrot.slane %v1247_v58, %v12787_v54  ;;  %v12956_v13 = vcombine.high %v12892_v43, %v12892_v43  ;;  %v1198_v15 = vcombine.high %v12802_v1, %v12802_v1 }
 0x195   : > { %972 = vrot.lane.b32.xlu0 %v933_v24, %s12505_s7  ;;  %v12946_v3 = vrot.slane %v1213_v59, %v12787_v54  ;;  %v917_v10 = vrot.slane %v12933_v60, %v12657_v33  ;;  %v1315_v12 = vrot.slane %v12940_v0, %v12657_v33  ;;  %v12964_v23 = vcombine.high %v12896_v44, %v12896_v44 }
 0x196   : > { %v1263_v14 = vcombine.high %v1261_v63, %v1261_v63  ;;  %v12969_v24 = vrot.slane %v1261_v63, %v12787_v54  ;;  %v1212_v1 = vrot.slane %v1198_v15, %v12787_v54  ;;  %v12985_v31 = vcombine.high %v12940_v0, %v12940_v0 }
 0x197   : > { %v1319_v20 = vrot.slane %v12946_v3, %v12657_v33 }
 0x198   : > { %952 = vrot.lane.b32.xlu1 %v893_v27, %s12505_s7  ;;  %v1355_v27 = vrot.slane %v12956_v13, %v12657_v33  ;;  %v12974_v29 = vrot.slane %v1263_v14, %v12787_v54  ;;  %v1363_v25 = vrot.slane %v12969_v24, %v12657_v33  ;;  %v1214_v32 = vcombine.high %v1212_v1, %v1212_v1 }
 0x199   : > { %976 = vrot.lane.b32.xlu0 %v941_v30, %s12505_s7  ;;  %v1359_v30 = vrot.slane %v12964_v23, %v12657_v33  ;;  %v12996_v36 = vrot.slane %v1212_v1, %v12787_v54 }
 0x19c   : > { %954 = vrot.lane.b32.xlu1 %v897_v26, %s12505_s7  ;;  %v1367_v26 = vrot.slane %v12974_v29, %v12657_v33 }
 0x19d   : > { %956 = vrot.lane.b32.xlu0 %v901_v38, %s12505_s7  ;;  %v12991_v38 = vcombine.high %v12946_v3, %v12946_v3 }
 0x1a0   : > { %958 = vrot.lane.b32.xlu1 %v905_v40, %s12505_s7  ;;  %v1323_v40 = vrot.slane %v12985_v31, %v12657_v33 }
 0x1a1   : > { %960 = vrot.lane.b32.xlu0 %v909_v41, %s12505_s7  ;;  %v13001_v41 = vrot.slane %v1214_v32, %v12787_v54 }
 0x1a3   : > { %v1335_v55 = vrot.slane %v13001_v41, %v12657_v33  ;;  %v13025_v58 = vcombine.high %v13001_v41, %v13001_v41 }
 0x1a4   : > { %978 = vrot.lane.b32.xlu1 %v945_v45, %s12505_s7  ;;  %v1327_v45 = vrot.slane %v12991_v38, %v12657_v33 }
 0x1a5   : > { %980 = vrot.lane.b32.xlu0 %v949_v47, %s12505_s7  ;;  %v11418_v47 = vld [vmem:[%s16895_s3 + $0x28] sm:$0xff]  ;;  %v1343_v63 = vrot.slane %v13025_v58, %v12657_v33 }
 0x1a6   : > { %v13019_v53 = vpack.c.bf16 %v11418_v47, %v11417_v46 }
 0x1a8   : > { %1392 = vrot.lane.b32.xlu1 %v1347_v51, %s12505_s7  ;;  %v1331_v51 = vrot.slane %v12996_v36, %v12657_v33  ;;  %16941 = vst [vmem:[#allocation6_spill] sm:$0xff] %v13019_v53  ;;  %12113 = vmatprep.subr.bf16.mxu1 %v13019_v53 }
 0x1a9   : > { %1394 = vrot.lane.b32.xlu0 %v1351_v52, %s12505_s7  ;;  %v13017_v52 = vcombine.high %v12996_v36, %v12996_v36 }
 0x1ab   : > { %v1339_v59 = vrot.slane %v13017_v52, %v12657_v33 }
 0x1ac   : > { %962 = vrot.lane.b32.xlu1 %v913_v11, %s12505_s7  ;;  %v13034_v11 = vcombine.high %v12969_v24, %v12969_v24 }
 0x1ad   : > { %964 = vrot.lane.b32.xlu0 %v917_v10, %s12505_s7  ;;  %v13040_v10 = vcombine.high %v12974_v29, %v12974_v29 }
 0x1af   : > { %v1375_v14 = vrot.slane %v13040_v10, %v12657_v33 }
 0x1b0   : > { %1376 = vrot.lane.b32.xlu1 %v1315_v12, %s12505_s7  ;;  %v1371_v12 = vrot.slane %v13034_v11, %v12657_v33 }
 0x1b1   : > { %1378 = vrot.lane.b32.xlu0 %v1319_v20, %s12505_s7 }
 0x1b4   : > { %1396 = vrot.lane.b32.xlu1 %v1355_v27, %s12505_s7 }
 0x1b5   : > { %1398 = vrot.lane.b32.xlu0 %v1359_v30, %s12505_s7 }
 0x1b8   : > { %1400 = vrot.lane.b32.xlu1 %v1363_v25, %s12505_s7 }
 0x1b9   : > { %1402 = vrot.lane.b32.xlu0 %v1367_v26, %s12505_s7 }
 0x1bc   : > { %1380 = vrot.lane.b32.xlu1 %v1323_v40, %s12505_s7 }
 0x1bd   : > { %1382 = vrot.lane.b32.xlu0 %v1327_v45, %s12505_s7 }
 0x1c0   : > { %1384 = vrot.lane.b32.xlu1 %v1331_v51, %s12505_s7 }
 0x1c1   : > { %1386 = vrot.lane.b32.xlu0 %v1335_v55, %s12505_s7 }
 0x1c4   : > { %1388 = vrot.lane.b32.xlu1 %v1339_v59, %s12505_s7 }
 0x1c5   : > { %1390 = vrot.lane.b32.xlu0 %v1343_v63, %s12505_s7 }
 0x1c8   : > { %1404 = vrot.lane.b32.xlu1 %v1371_v12, %s12505_s7 }
 0x1c9   : > { %1406 = vrot.lane.b32.xlu0 %v1375_v14, %s12505_s7 }
 0x1fe   : > { %v967_v15 = vpop.permute.xlu1 %966 }
 0x1ff   : > { %v951_v20 = vpop.permute.xlu0 %950 }
 0x200   : > { %v999_v45 = vsel %vm998_vm9, %v12795_v62, %v951_v20 }
 0x202   : > { %v971_v27 = vpop.permute.xlu1 %970 }
 0x203   : > { %v969_v1 = vpop.permute.xlu0 %968 }
 0x206   : > { %v975_v30 = vpop.permute.xlu1 %974 }
 0x207   : > { %v973_v25 = vpop.permute.xlu0 %972 }
 0x20a   : > { %v953_v32 = vpop.permute.xlu1 %952 }
 0x20b   : > { %v977_v26 = vpop.permute.xlu0 %976  ;;  %v1000_v40 = vsel %vm998_vm9, %v12829_v19, %v953_v32 }
 0x20c   : > { %v1031_v47 = vcombine.low %v999_v45, %v1000_v40 }
 0x20e   : > { %v955_v46 = vpop.permute.xlu1 %954  ;;  %v1039_v14 = vrot.slane %v1031_v47, %v12603_v17 }
 0x20f   : > { %v1001_v51 = vsel %vm998_vm9, %v12845_v28, %v955_v46  ;;  %v957_v55 = vpop.permute.xlu0 %956  ;;  %v1010_v28 = vsel %vm998_vm9, %v12824_v16, %v973_v25  ;;  %v1009_v46 = vsel %vm998_vm9, %v12812_v6, %v971_v27 }
 0x210   : > { %v1002_v59 = vsel %vm998_vm9, %v12851_v22, %v957_v55  ;;  %v1066_v47 = vcombine.low %v1009_v46, %v1010_v28 }
 0x211   : > { %v1032_v63 = vcombine.low %v1001_v51, %v1002_v59 }
 0x212   : > { %v959_v12 = vpop.permute.xlu1 %958  ;;  %v1080_v59 = vrot.slane %v1066_v47, %v12603_v17 }
 0x213   : > { %v1046_v57 = vrot.slane %v1032_v63, %v12603_v17  ;;  %v961_v39 = vpop.permute.xlu0 %960  ;;  %v1003_v22 = vsel %vm998_vm9, %v12864_v34, %v959_v12  ;;  %v1007_v34 = vsel %vm998_vm9, %v12792_v61, %v967_v15 }
 0x214   : > { %v1004_v45 = vsel %vm998_vm9, %v12869_v35, %v961_v39 }
 0x215   : > { %v1047_v19 = vcombine.low %v1039_v14, %v1046_v57  ;;  %v1008_v57 = vsel %vm998_vm9, %v12805_v2, %v969_v1  ;;  %v1048_v55 = vcombine.low %v1003_v22, %v1004_v45  ;;  %v1012_v2 = vsel %vm998_vm9, %v12834_v21, %v977_v26 }
 0x216   : > { %v979_v32 = vpop.permute.xlu1 %978  ;;  %v1065_v6 = vcombine.low %v1007_v34, %v1008_v57 }
 0x217   : > { %11804 = vmatprep.mubr.msk.f32.mxu1 %vm573_vm8, %v1047_v19  ;;  %v981_v62 = vpop.permute.xlu0 %980  ;;  %v1013_v51 = vsel %vm998_vm9, %v12882_v37, %v979_v32  ;;  %v1056_v63 = vrot.slane %v1048_v55, %v12603_v17 }
 0x218   : > { %v1014_v16 = vsel %vm998_vm9, %v12889_v42, %v981_v62  ;;  %v1011_v42 = vsel %vm998_vm9, %v12816_v9, %v975_v30  ;;  %v1073_v14 = vrot.slane %v1065_v6, %v12603_v17 }
 0x219   : > { %v1083_v37 = vcombine.low %v1013_v51, %v1014_v16  ;;  %v1082_v15 = vcombine.low %v1011_v42, %v1012_v2 }
 0x21a   : > { %v1393_v20 = vpop.permute.xlu1 %1392 }
 0x21b   : > { %v1395_v40 = vpop.permute.xlu0 %1394  ;;  %v1097_v21 = vrot.slane %v1083_v37, %v12603_v17  ;;  %v1090_v32 = vrot.slane %v1082_v15, %v12603_v17 }
 0x21c   : > { %v1433_v2 = vsel %vm998_vm9, %v12896_v44, %v1395_v40 }
 0x21d   : > { %v1098_v30 = vcombine.low %v1090_v32, %v1097_v21 }
 0x21e   : > { %v963_v25 = vpop.permute.xlu1 %962 }
 0x21f   : > { %v1005_v35 = vsel %vm998_vm9, %v12925_v56, %v963_v25  ;;  %v965_v39 = vpop.permute.xlu0 %964 }
 0x220   : > { %v1006_v27 = vsel %vm998_vm9, %v12933_v60, %v965_v39  ;;  %v1081_v60 = vcombine.low %v1073_v14, %v1080_v59 }
 0x221   : > { %v1049_v1 = vcombine.low %v1005_v35, %v1006_v27 }
 0x222   : > { %v1377_v61 = vpop.permute.xlu1 %1376 }
 0x223   : > { %v1063_v56 = vrot.slane %v1049_v1, %v12603_v17  ;;  %v1379_v12 = vpop.permute.xlu0 %1378  ;;  %v1424_v22 = vsel %vm998_vm9, %v12940_v0, %v1377_v61 }
 0x224   : > { %v1425_v45 = vsel %vm998_vm9, %v12946_v3, %v1379_v12 }
 0x225   : > { %v1064_v26 = vcombine.low %v1056_v63, %v1063_v56  ;;  %v1456_v57 = vcombine.low %v1424_v22, %v1425_v45  ;;  %v13151_v22 = vld [vmem:[%s12576_s13 + $0x10] sm:$0xff] }
 0x226   : > { %v1397_v19 = vpop.permute.xlu1 %1396 }
 0x227   : > { %11805 = vmatmul.mubr.msk.f32.vlgmr.msra.gmra.mrb[0].mxu1 %vm573_vm8, %v1064_v26  ;;  %v1399_v9 = vpop.permute.xlu0 %1398  ;;  %v1464_v55 = vrot.slane %v1456_v57, %v12603_v17  ;;  %v1434_v35 = vsel %vm998_vm9, %v12956_v13, %v1397_v19  ;;  %v13143_v19 = vld [vmem:[%s12576_s13] sm:$0xff] }
 0x228   : > { %11807 = vmatprep.mubr.msk.f32.mxu1 %vm573_vm8, %v1081_v60  ;;  %12115 = vmatpush3.bf16.msra.mxu1 %v13019_v53  ;;  %v1435_v0 = vsel %vm998_vm9, %v12964_v23, %v1399_v9  ;;  %v13140_v60 = vld [vmem:[%s12576_s13 + $0x8] sm:$0xff] }
 0x229   : > { %v1491_v13 = vcombine.low %v1434_v35, %v1435_v0 }
 0x22a   : > { %v1401_v62 = vpop.permute.xlu1 %1400 }
 0x22b   : > { %11808 = vmatmul.mubr.msk.f32.gmra.mrb[2].mxu1 %vm573_vm8, %v1098_v30  ;;  %v1403_v28 = vpop.permute.xlu0 %1402  ;;  %v1505_v40 = vrot.slane %v1491_v13, %v12603_v17 }
 0x22e   : > { %v1381_v46 = vpop.permute.xlu1 %1380 }
 0x22f   : > { %v1426_v47 = vsel %vm998_vm9, %v12985_v31, %v1381_v46  ;;  %v1383_v51 = vpop.permute.xlu0 %1382 }
 0x230   : > { %v1427_v16 = vsel %vm998_vm9, %v12991_v38, %v1383_v51  ;;  %v1432_v38 = vsel %vm998_vm9, %v12892_v43, %v1393_v20  ;;  %v1437_v43 = vsel %vm998_vm9, %v12974_v29, %v1403_v28 }
 0x231   : > { %v1457_v25 = vcombine.low %v1426_v47, %v1427_v16 }
 0x232   : > { %v1385_v34 = vpop.permute.xlu1 %1384 }
 0x233   : > { %v1471_v3 = vrot.slane %v1457_v25, %v12603_v17  ;;  %v1387_v39 = vpop.permute.xlu0 %1386  ;;  %v1428_v31 = vsel %vm998_vm9, %v12996_v36, %v1385_v34  ;;  %v1490_v36 = vcombine.low %v1432_v38, %v1433_v2 }
 0x234   : > { %v1429_v6 = vsel %vm998_vm9, %v13001_v41, %v1387_v39  ;;  %v1436_v41 = vsel %vm998_vm9, %v12969_v24, %v1401_v62  ;;  %v13148_v62 = vld [vmem:[%s12576_s13 + $0x18] sm:$0xff] }
 0x235   : > { %v1472_v27 = vcombine.low %v1464_v55, %v1471_v3  ;;  %v1473_v1 = vcombine.low %v1428_v31, %v1429_v6  ;;  %v1507_v61 = vcombine.low %v1436_v41, %v1437_v43  ;;  %v1498_v29 = vrot.slane %v1490_v36, %v12603_v17 }
 0x236   : > { %v1389_v37 = vpop.permute.xlu1 %1388 }
 0x237   : > { %v1430_v23 = vsel %vm998_vm9, %v13017_v52, %v1389_v37  ;;  %11814 = vmatprep.mubr.msk.f32.mxu1 %vm573_vm8, %v1472_v27  ;;  %v1391_v42 = vpop.permute.xlu0 %1390  ;;  %v1481_v52 = vrot.slane %v1473_v1, %v12603_v17  ;;  %v1506_v14 = vcombine.low %v1498_v29, %v1505_v40  ;;  %v1515_v21 = vrot.slane %v1507_v61, %v12603_v17 }
 0x238   : > { %v1431_v44 = vsel %vm998_vm9, %v13025_v58, %v1391_v42 }
 0x239   : > { %v1474_v20 = vcombine.low %v1430_v23, %v1431_v44 }
 0x23a   : > { %v1405_v59 = vpop.permute.xlu1 %1404 }
 0x23b   : > { %v1488_v15 = vrot.slane %v1474_v20, %v12603_v17  ;;  %v1438_v24 = vsel %vm998_vm9, %v13034_v11, %v1405_v59  ;;  %v1407_v63 = vpop.permute.xlu0 %1406 }
 0x23c   : > { %v1439_v58 = vsel %vm998_vm9, %v13040_v10, %v1407_v63 }
 0x23d   : > { %v1489_v56 = vcombine.low %v1481_v52, %v1488_v15  ;;  %v1508_v12 = vcombine.low %v1438_v24, %v1439_v58 }
 0x23f   : > { %v1522_v26 = vrot.slane %v1508_v12, %v12603_v17  ;;  %11815 = vmatmul.mubr.msk.f32.vlgmr.msra.gmra.mrb[0].mxu1 %vm573_vm8, %v1489_v56 }
 0x240   : > { %11817 = vmatprep.mubr.msk.f32.mxu1 %vm573_vm8, %v1506_v14 }
 0x241   : > { %v1523_v11 = vcombine.low %v1515_v21, %v1522_v26 }
 0x243   : > { %11818 = vmatmul.mubr.msk.f32.gmra.mrb[2].mxu1 %vm573_vm8, %v1523_v11 }
 0x312   : > { %v11816_v10 = vpop.f32.mrb[0].mxu1 }
 0x313   : > { %v12228_v32 = vadd.f32 %v11816_v10, %v13140_v60  ;;  %v1598_v9 = vpop.f32.mrb[1].mxu1 }
 0x314   : > { %v12229_v30 = vadd.f32 %v1598_v9, %v13143_v19 }
 0x315   : > { %v11440_v28 = vmul.f32 -1.442695, %v12228_v32 }
 0x316   : > { %v11439_v45 = vmul.f32 -1.442695, %v12229_v30  ;;  %v11819_v46 = vpop.f32.mrb[2].mxu1 }
 0x317   : > { %12350 = vpow2.f32 %v11440_v28  ;;  %v12230_v57 = vadd.f32 %v11819_v46, %v13148_v62  ;;  %v1608_v47 = vpop.f32.mrb[3].mxu1 }
 0x318   : > { %12352 = vpow2.f32 %v11439_v45  ;;  %v12231_v51 = vadd.f32 %v1608_v47, %v13151_v22 }
 0x319   : > { %v11442_v16 = vmul.f32 -1.442695, %v12230_v57 }
 0x31a   : > { %v11441_v25 = vmul.f32 -1.442695, %v12231_v51 }
 0x31b   : > { %12354 = vpow2.f32 %v11442_v16 }
 0x31c   : > { %12356 = vpow2.f32 %v11441_v25 }
 0x321   : > { %v12351_v34 = vpop.eup %12350 }
 0x322   : > { %v12353_v55 = vpop.eup %12352  ;;  %v1634_v35 = vadd.f32 1.0, %v12351_v34 }
 0x323   : > { %v1633_v0 = vadd.f32 1.0, %v12353_v55 }
 0x324   : > { %12358 = vrcp.f32 %v1634_v35 }
 0x325   : > { %v12355_v3 = vpop.eup %12354  ;;  %12360 = vrcp.f32 %v1633_v0 }
 0x326   : > { %v12357_v39 = vpop.eup %12356  ;;  %v1636_v31 = vadd.f32 1.0, %v12355_v3 }
 0x327   : > { %v1635_v6 = vadd.f32 1.0, %v12357_v39 }
 0x328   : > { %12362 = vrcp.f32 %v1636_v31 }
 0x329   : > { %12364 = vrcp.f32 %v1635_v6 }
 0x32e   : > { %v13155_v38 = vpop.eup %12358 }
 0x32f   : > { %v13157_v2 = vpop.eup %12360  ;;  %v13161_v27 = vmul.f32 %v13155_v38, %v12586_v5 }
 0x330   : > { %v13165_v13 = vmul.f32 %v13157_v2, %v12584_v4 }
 0x331   : > { %v1670_v37 = vcombine.high %v13161_v27, %v13161_v27  ;;  %v13183_v4 = vrot.slane %v13161_v27, %v12603_v17 }
 0x332   : > { %v13169_v1 = vpop.eup %12362  ;;  %v1653_v23 = vcombine.high %v13165_v13, %v13165_v13  ;;  %v1660_v42 = vrot.slane %v13165_v13, %v12603_v17 }
 0x333   : > { %v13175_v36 = vpop.eup %12364  ;;  %v13179_v5 = vmul.f32 %v13169_v1, %v12590_v8  ;;  %v13186_v41 = vrot.slane %v1670_v37, %v12603_v17  ;;  %v1820_v12 = vrot.slane %v13183_v4, %v12606_v18 }
 0x334   : > { %v13190_v43 = vmul.f32 %v13175_v36, %v12588_v7  ;;  %v1667_v44 = vrot.slane %v1653_v23, %v12603_v17  ;;  %v1668_v20 = vcombine.high %v1660_v42, %v1660_v42  ;;  %v13205_v7 = vcombine.high %v13183_v4, %v13183_v4 }
 0x335   : > { %v1704_v40 = vcombine.high %v13179_v5, %v13179_v5  ;;  %v13197_v8 = vrot.slane %v13179_v5, %v12603_v17  ;;  %v13209_v15 = vcombine.high %v13186_v41, %v13186_v41  ;;  %v1804_v26 = vrot.slane %v1660_v42, %v12606_v18 }
 0x336   : > { %v1669_v59 = vcombine.high %v1667_v44, %v1667_v44  ;;  %v1687_v61 = vcombine.high %v13190_v43, %v13190_v43  ;;  %v1694_v52 = vrot.slane %v13190_v43, %v12603_v17  ;;  %v1808_v63 = vrot.slane %v1668_v20, %v12606_v18 }
 0x337   : > { %v13212_v24 = vrot.slane %v1704_v40, %v12603_v17  ;;  %v1812_v56 = vrot.slane %v1667_v44, %v12606_v18  ;;  %v1719_v14 = vcombine.high %v13197_v8, %v13197_v8  ;;  %v1824_v28 = vrot.slane %v13205_v7, %v12606_v18 }
 0x338   : > { %v1701_v29 = vrot.slane %v1687_v61, %v12603_v17  ;;  %v1702_v58 = vcombine.high %v1694_v52, %v1694_v52  ;;  %v1816_v11 = vrot.slane %v1669_v59, %v12606_v18  ;;  %v1836_v32 = vrot.slane %v1694_v52, %v12606_v18 }
 0x339   : > { %v1720_v21 = vcombine.high %v13212_v24, %v13212_v24  ;;  %v1828_v45 = vrot.slane %v13186_v41, %v12606_v18  ;;  %v1832_v46 = vrot.slane %v13209_v15, %v12606_v18  ;;  %v1865_v57 = vsel %vm466_vm1, %v1808_v63, %v1804_v26 }
 0x33a   : > { %v1703_v10 = vcombine.high %v1701_v29, %v1701_v29  ;;  %v1840_v9 = vrot.slane %v1702_v58, %v12606_v18  ;;  %v1844_v30 = vrot.slane %v1701_v29, %v12606_v18  ;;  %v1852_v51 = vrot.slane %v13197_v8, %v12606_v18 }
 0x33b   : > { %v1866_v16 = vsel %vm468_vm2, %v1812_v56, %v1865_v57  ;;  %v1856_v34 = vrot.slane %v1719_v14, %v12606_v18  ;;  %v1860_v55 = vrot.slane %v13212_v24, %v12606_v18  ;;  %v1864_v3 = vrot.slane %v1720_v21, %v12606_v18 }
 0x33c   : > { %v1848_v47 = vrot.slane %v1703_v10, %v12606_v18  ;;  %v1872_v25 = vsel %vm466_vm1, %v1840_v9, %v1836_v32  ;;  %v1867_v35 = vsel %vm470_vm3, %v1816_v11, %v1866_v16  ;;  %v1724_v6 = vrot.slane %v1660_v42, %v12657_v33 }
 0x33d   : > { %v1873_v0 = vsel %vm468_vm2, %v1844_v30, %v1872_v25  ;;  %v1868_v39 = vsel %vm472_vm4, %v1820_v12, %v1867_v35  ;;  %v1728_v40 = vrot.slane %v1668_v20, %v12657_v33  ;;  %v1732_v61 = vrot.slane %v1667_v44, %v12657_v33 }
 0x33e   : > { %v1874_v31 = vsel %vm470_vm3, %v1848_v47, %v1873_v0  ;;  %v1869_v37 = vsel %vm474_vm5, %v1824_v28, %v1868_v39  ;;  %v1760_v26 = vrot.slane %v1702_v58, %v12657_v33  ;;  %v1764_v12 = vrot.slane %v1701_v29, %v12657_v33 }
 0x33f   : > { %v1875_v23 = vsel %vm472_vm4, %v1852_v51, %v1874_v31  ;;  %v1870_v63 = vsel %vm476_vm6, %v1828_v45, %v1869_v37  ;;  %v1736_v42 = vrot.slane %v1669_v59, %v12657_v33  ;;  %v1756_v32 = vrot.slane %v1694_v52, %v12657_v33 }
 0x340   : > { %v1876_v56 = vsel %vm474_vm5, %v1856_v34, %v1875_v23  ;;  %v1768_v9 = vrot.slane %v1703_v10, %v12657_v33  ;;  %v1871_v20 = vsel %vm478_vm7, %v1832_v46, %v1870_v63  ;;  %v1785_v28 = vsel %vm466_vm1, %v1728_v40, %v1724_v6 }
 0x341   : > { %v1877_v11 = vsel %vm476_vm6, %v1860_v55, %v1876_v56  ;;  %v1792_v45 = vsel %vm466_vm1, %v1760_v26, %v1756_v32  ;;  %v1740_v29 = vrot.slane %v13183_v4, %v12657_v33  ;;  %v1772_v58 = vrot.slane %v13197_v8, %v12657_v33 }
 0x342   : > { %v1878_v44 = vsel %vm478_vm7, %v1864_v3, %v1877_v11  ;;  %v1786_v59 = vsel %vm468_vm2, %v1732_v61, %v1785_v28  ;;  %v1793_v52 = vsel %vm468_vm2, %v1764_v12, %v1792_v45  ;;  %v1744_v10 = vrot.slane %v13205_v7, %v12657_v33 }
 0x343   : > { %v12326_v30 = vpack.i.bf16 %v1878_v44, %v1871_v20  ;;  %v1776_v46 = vrot.slane %v1719_v14, %v12657_v33  ;;  %v1787_v57 = vsel %vm470_vm3, %v1736_v42, %v1786_v59  ;;  %v1794_v47 = vsel %vm470_vm3, %v1768_v9, %v1793_v52 }
 0x344   : > { %v1748_v4 = vrot.slane %v13186_v41, %v12657_v33  ;;  %v1780_v8 = vrot.slane %v13212_v24, %v12657_v33  ;;  %v1788_v51 = vsel %vm472_vm4, %v1740_v29, %v1787_v57  ;;  %v1795_v16 = vsel %vm472_vm4, %v1772_v58, %v1794_v47 }
 0x345   : > { %12327 = vrot.lane.b32.xlu1 %v12326_v30, %s12503_s25  ;;  %v1752_v25 = vrot.slane %v13209_v15, %v12657_v33  ;;  %v1784_v7 = vrot.slane %v1720_v21, %v12657_v33  ;;  %v1789_v14 = vsel %vm474_vm5, %v1744_v10, %v1788_v51  ;;  %v1796_v34 = vsel %vm474_vm5, %v1776_v46, %v1795_v16  ;;  %v314_v15 = vld [vmem:[%s16896_s4] sm:$0xff]  ;;  %v315_v21 = vld [vmem:[%s16896_s4 + $0x8] sm:$0xff] }
 0x346   : > { %v1790_v55 = vsel %vm476_vm6, %v1748_v4, %v1789_v14  ;;  %v1797_v41 = vsel %vm476_vm6, %v1780_v8, %v1796_v34  ;;  %v13300_v23 = vpack.c.bf16 %v315_v21, %v314_v15 }
 0x347   : > { %v1791_v35 = vsel %vm478_vm7, %v1752_v25, %v1790_v55  ;;  %v1798_v24 = vsel %vm478_vm7, %v1784_v7, %v1797_v41 }
 0x348   : > { %16942 = vst [vmem:[#allocation7_spill] sm:$0xff] %v13300_v23 }
 0x3b7   : > { %v12328_v0 = vpop.permute.xlu1 %12327 }
 0x3b8   : > { %v12330_v3 = vunpack.i.h.bf16 %v12328_v0  ;;  %v12329_v39 = vunpack.i.l.bf16 %v12328_v0 }
 0x3ba   : > { %v1885_v31 = vsel %vm573_vm8, %v1791_v35, %v12329_v39  ;;  %v1886_v6 = vsel %vm573_vm8, %v1798_v24, %v12330_v3 }
 0x3bb   : > { %v12116_v37 = vpack.c.bf16 %v1886_v6, %v1885_v31 }
 0x3bd   : > { %12117 = vmatprep.subr.bf16.mxu0 %v12116_v37 }
 0x3be   : > { %12119 = vmatpush3.bf16.msra.mxu0 %v12116_v37 }
 0x3bf   : > { %12121 = vmatprep.subr.bf16.mxu0 %v13300_v23 }
 0x3c1   : > { %11825 = vmatmul.mubr.msk.f32.vlgmr.msra.gmra.mrb[4].mxu0 %vm573_vm8, %v12767_v48 }
 0x3c2   : > { %11827 = vmatprep.mubr.msk.f32.mxu0 %vm573_vm8, %v12772_v49  ;;  %12123 = vmatpush3.bf16.msra.mxu0 %v13300_v23 }
 0x3c5   : > { %11828 = vmatmul.mubr.msk.f32.gmra.mrb[6].mxu0 %vm573_vm8, %v12781_v50 }
 0x3c6   : > { %11834 = vmatprep.mubr.msk.f32.mxu0 %vm573_vm8, %v13165_v13 }
 0x3c9   : > { %11835 = vmatmul.mubr.msk.f32.vlgmr.msra.gmra.mrb[8].mxu0 %vm573_vm8, %v13161_v27 }
 0x3ca   : > { %11837 = vmatprep.mubr.msk.f32.mxu0 %vm573_vm8, %v13190_v43 }
 0x3cd   : > { %11838 = vmatmul.mubr.msk.f32.gmra.mrb[10].mxu0 %vm573_vm8, %v13179_v5 }
 0x494   : > { %v11826_v48 = vpop.f32.mrb[4].mxu0 }
 0x495   : > { %v2143_v49 = vrot.slane %v11826_v48, %v12787_v54  ;;  %v1953_v40 = vpop.f32.mrb[5].mxu0  ;;  %v2136_v56 = vcombine.high %v11826_v48, %v11826_v48 }
 0x496   : > { %v2094_v61 = vrot.slane %v1953_v40, %v12787_v54  ;;  %v2087_v29 = vcombine.high %v1953_v40, %v1953_v40 }
 0x497   : > { %v2151_v63 = vcombine.high %v2143_v49, %v2143_v49  ;;  %v13321_v50 = vrot.slane %v2143_v49, %v12787_v54  ;;  %v2150_v42 = vrot.slane %v2136_v56, %v12787_v54  ;;  %v11420_v56 = vld [vmem:[%s16896_s4 + $0x18] sm:$0xff] }
 0x498   : > { %v13323_v13 = vpop.f32.mrb[6].mxu0  ;;  %v2102_v43 = vcombine.high %v2094_v61, %v2094_v61  ;;  %v13331_v5 = vrot.slane %v2094_v61, %v12787_v54  ;;  %v2101_v47 = vrot.slane %v2087_v29, %v12787_v54 }
 0x499   : > { %v13326_v27 = vrot.slane %v2151_v63, %v12787_v54  ;;  %v13328_v26 = vpop.f32.mrb[7].mxu0  ;;  %v2236_v12 = vrot.slane %v13321_v50, %v12657_v33  ;;  %v13353_v28 = vcombine.high %v13321_v50, %v13321_v50  ;;  %v2152_v45 = vcombine.high %v2150_v42, %v2150_v42  ;;  %v11419_v63 = vld [vmem:[%s16896_s4 + $0x10] sm:$0xff] }
 0x49a   : > { %v13339_v32 = vrot.slane %v2102_v43, %v12787_v54  ;;  %v2204_v44 = vrot.slane %v13331_v5, %v12657_v33  ;;  %v13365_v10 = vrot.slane %v2150_v42, %v12787_v54  ;;  %v13382_v51 = vcombine.high %v13331_v5, %v13331_v5 }
 0x49b   : > { %2281 = vrot.lane.b32.xlu0 %v2236_v12, %s12505_s7  ;;  %v2240_v9 = vrot.slane %v13326_v27, %v12657_v33  ;;  %v13362_v52 = vcombine.high %v13326_v27, %v13326_v27  ;;  %v2244_v46 = vrot.slane %v13353_v28, %v12657_v33  ;;  %v13371_v57 = vrot.slane %v2152_v45, %v12787_v54 }
 0x49c   : > { %v13335_v11 = vpop.f32.mrb[8].mxu0  ;;  %v2208_v58 = vrot.slane %v13339_v32, %v12657_v33  ;;  %v2252_v8 = vrot.slane %v13365_v10, %v12657_v33  ;;  %v2103_v16 = vcombine.high %v2101_v47, %v2101_v47  ;;  %v13389_v7 = vcombine.high %v13339_v32, %v13339_v32 }
 0x49d   : > { %v13344_v20 = vpop.f32.mrb[9].mxu0  ;;  %2283 = vrot.lane.b32.xlu1 %v2240_v9, %s12505_s7  ;;  %v2248_v4 = vrot.slane %v13362_v52, %v12657_v33  ;;  %v2256_v25 = vrot.slane %v13371_v57, %v12657_v33  ;;  %v13392_v14 = vrot.slane %v2101_v47, %v12787_v54  ;;  %v2584_v34 = vrot.slane %v13323_v13, %v12787_v54 }
 0x49e   : > { %v2212_v55 = vrot.slane %v13382_v51, %v12657_v33  ;;  %v13400_v41 = vrot.slane %v2103_v16, %v12787_v54  ;;  %v2216_v35 = vrot.slane %v13389_v7, %v12657_v33  ;;  %v13410_v3 = vcombine.high %v13365_v10, %v13365_v10 }
 0x49f   : > { %2265 = vrot.lane.b32.xlu0 %v2204_v44, %s12505_s7  ;;  %v2592_v24 = vcombine.high %v2584_v34, %v2584_v34  ;;  %v2220_v0 = vrot.slane %v13392_v14, %v12657_v33  ;;  %v13413_v39 = vrot.slane %v2584_v34, %v12787_v54  ;;  %v13420_v21 = vcombine.high %v13371_v57, %v13371_v57 }
 0x4a0   : > { %v13349_v30 = vpop.f32.mrb[10].mxu0  ;;  %v2224_v15 = vrot.slane %v13400_v41, %v12657_v33  ;;  %v2260_v6 = vrot.slane %v13410_v3, %v12657_v33  ;;  %v2535_v37 = vrot.slane %v13328_v26, %v12787_v54  ;;  %v13440_v61 = vcombine.high %v13392_v14, %v13392_v14 }
 0x4a1   : > { %v13358_v59 = vpop.f32.mrb[11].mxu0  ;;  %2267 = vrot.lane.b32.xlu1 %v2208_v58, %s12505_s7  ;;  %v13423_v31 = vrot.slane %v2592_v24, %v12787_v54  ;;  %v2264_v48 = vrot.slane %v13420_v21, %v12657_v33  ;;  %v2677_v49 = vrot.slane %v13413_v39, %v12657_v33  ;;  %v13448_v43 = vpack.c.bf16 %v11420_v56, %v11419_v63 }
 0x4a2   : > { %v2577_v12 = vcombine.high %v13323_v13, %v13323_v13  ;;  %v2543_v42 = vcombine.high %v2535_v37, %v2535_v37  ;;  %v13455_v9 = vcombine.high %v13400_v41, %v13400_v41  ;;  %v13459_v44 = vrot.slane %v2535_v37, %v12787_v54 }
 0x4a3   : > { %2285 = vrot.lane.b32.xlu0 %v2244_v46, %s12505_s7  ;;  %v2681_v40 = vrot.slane %v13423_v31, %v12657_v33  ;;  %16943 = vst [vmem:[#allocation8_spill] sm:$0xff] %v13448_v43  ;;  %12125 = vmatprep.subr.bf16.mxu0 %v13448_v43  ;;  %v2228_v45 = vrot.slane %v13440_v61, %v12657_v33 }
 0x4a4   : > { %12127 = vmatpush3.bf16.msra.mxu0 %v13448_v43  ;;  %v2591_v13 = vrot.slane %v2577_v12, %v12787_v54  ;;  %v13467_v29 = vrot.slane %v2543_v42, %v12787_v54  ;;  %v2232_v58 = vrot.slane %v13455_v9, %v12657_v33  ;;  %v2645_v46 = vrot.slane %v13459_v44, %v12657_v33 }
 0x4a5   : > { %2287 = vrot.lane.b32.xlu1 %v2248_v4, %s12505_s7  ;;  %v13477_v47 = vcombine.high %v13413_v39, %v13413_v39 }
 0x4a6   : > { %v2593_v4 = vcombine.high %v2591_v13, %v2591_v13  ;;  %v2649_v16 = vrot.slane %v13467_v29, %v12657_v33  ;;  %v13489_v34 = vrot.slane %v2591_v13, %v12787_v54  ;;  %v11422_v13 = vld [vmem:[%s16896_s4 + $0x28] sm:$0xff] }
 0x4a7   : > { %2289 = vrot.lane.b32.xlu0 %v2252_v8, %s12505_s7  ;;  %v2528_v8 = vcombine.high %v13328_v26, %v13328_v26 }
 0x4a9   : > { %2291 = vrot.lane.b32.xlu1 %v2256_v25, %s12505_s7  ;;  %v13486_v25 = vcombine.high %v13423_v31, %v13423_v31  ;;  %v2542_v26 = vrot.slane %v2528_v8, %v12787_v54 }
 0x4ab   : > { %2269 = vrot.lane.b32.xlu0 %v2212_v55, %s12505_s7  ;;  %v2685_v55 = vrot.slane %v13477_v47, %v12657_v33  ;;  %v2689_v24 = vrot.slane %v13486_v25, %v12657_v33 }
 0x4ad   : > { %2271 = vrot.lane.b32.xlu1 %v2216_v35, %s12505_s7  ;;  %v13495_v35 = vrot.slane %v2593_v4, %v12787_v54 }
 0x4af   : > { %2273 = vrot.lane.b32.xlu0 %v2220_v0, %s12505_s7  ;;  %v2693_v0 = vrot.slane %v13489_v34, %v12657_v33  ;;  %v2697_v37 = vrot.slane %v13495_v35, %v12657_v33 }
 0x4b1   : > { %2275 = vrot.lane.b32.xlu1 %v2224_v15, %s12505_s7  ;;  %v13506_v15 = vcombine.high %v13459_v44, %v13459_v44 }
 0x4b3   : > { %2293 = vrot.lane.b32.xlu0 %v2260_v6, %s12505_s7  ;;  %v2544_v6 = vcombine.high %v2542_v26, %v2542_v26 }
 0x4b5   : > { %2295 = vrot.lane.b32.xlu1 %v2264_v48, %s12505_s7  ;;  %v13513_v48 = vcombine.high %v13467_v29, %v13467_v29  ;;  %v13522_v63 = vrot.slane %v2544_v6, %v12787_v54 }
 0x4b7   : > { %2722 = vrot.lane.b32.xlu0 %v2677_v49, %s12505_s7  ;;  %v13516_v49 = vrot.slane %v2542_v26, %v12787_v54  ;;  %v2657_v56 = vrot.slane %v13513_v48, %v12657_v33  ;;  %v13547_v4 = vcombine.high %v13522_v63, %v13522_v63 }
 0x4b9   : > { %2724 = vrot.lane.b32.xlu1 %v2681_v40, %s12505_s7  ;;  %v2653_v40 = vrot.slane %v13506_v15, %v12657_v33  ;;  %v2661_v12 = vrot.slane %v13516_v49, %v12657_v33  ;;  %v13532_v42 = vcombine.high %v13516_v49, %v13516_v49  ;;  %v2673_v26 = vrot.slane %v13547_v4, %v12657_v33 }
 0x4bb   : > { %2277 = vrot.lane.b32.xlu0 %v2228_v45, %s12505_s7  ;;  %v11421_v45 = vld [vmem:[%s16896_s4 + $0x20] sm:$0xff]  ;;  %v2669_v8 = vrot.slane %v13532_v42, %v12657_v33 }
 0x4bd   : > { %2279 = vrot.lane.b32.xlu1 %v2232_v58, %s12505_s7  ;;  %v13540_v58 = vpack.c.bf16 %v11422_v13, %v11421_v45 }
 0x4bf   : > { %2706 = vrot.lane.b32.xlu0 %v2645_v46, %s12505_s7  ;;  %16944 = vst [vmem:[#allocation9_spill] sm:$0xff] %v13540_v58  ;;  %v2665_v46 = vrot.slane %v13522_v63, %v12657_v33  ;;  %12129 = vmatprep.subr.bf16.mxu1 %v13540_v58 }
 0x4c0   : > { %12131 = vmatpush3.bf16.msra.mxu1 %v13540_v58 }
 0x4c1   : > { %2708 = vrot.lane.b32.xlu1 %v2649_v16, %s12505_s7  ;;  %v13555_v16 = vcombine.high %v13489_v34, %v13489_v34 }
 0x4c3   : > { %2726 = vrot.lane.b32.xlu0 %v2685_v55, %s12505_s7  ;;  %v16945_v55 = vld [vmem:[#allocation4_spill] sm:$0xff] }
 0x4c4   : > { %12137 = vmatprep.subr.bf16.mxu1 %v16945_v55 }
 0x4c5   : > { %2728 = vrot.lane.b32.xlu1 %v2689_v24, %s12505_s7  ;;  %v13564_v24 = vcombine.high %v13495_v35, %v13495_v35 }
 0x4c7   : > { %2730 = vrot.lane.b32.xlu0 %v2693_v0, %s12505_s7  ;;  %v2701_v0 = vrot.slane %v13555_v16, %v12657_v33  ;;  %v2705_v6 = vrot.slane %v13564_v24, %v12657_v33 }
 0x4c9   : > { %2732 = vrot.lane.b32.xlu1 %v2697_v37, %s12505_s7 }
 0x4cb   : > { %2710 = vrot.lane.b32.xlu0 %v2653_v40, %s12505_s7 }
 0x4cd   : > { %2712 = vrot.lane.b32.xlu1 %v2657_v56, %s12505_s7 }
 0x4cf   : > { %2714 = vrot.lane.b32.xlu0 %v2661_v12, %s12505_s7 }
 0x4d1   : > { %2716 = vrot.lane.b32.xlu1 %v2665_v46, %s12505_s7 }
 0x4d3   : > { %2718 = vrot.lane.b32.xlu0 %v2669_v8, %s12505_s7 }
 0x4d5   : > { %2720 = vrot.lane.b32.xlu1 %v2673_v26, %s12505_s7 }
 0x4d7   : > { %2734 = vrot.lane.b32.xlu0 %v2701_v0, %s12505_s7 }
 0x4d9   : > { %2736 = vrot.lane.b32.xlu1 %v2705_v6, %s12505_s7 }
 0x4db   : > { %2069 = vrot.lane.b32.xlu0 %v13344_v20, %s12506_s18 }
 0x4dd   : > { %2073 = vrot.lane.b32.xlu1 %v13358_v59, %s12506_s18 }
 0x4df   : > { %2071 = vrot.lane.b32.xlu0 %v13335_v11, %s12506_s18 }
 0x4e1   : > { %2075 = vrot.lane.b32.xlu1 %v13349_v30, %s12506_s18 }
 0x50d   : > { %v2282_v37 = vpop.permute.xlu0 %2281 }
 0x50f   : > { %v2284_v40 = vpop.permute.xlu1 %2283 }
 0x511   : > { %v2266_v56 = vpop.permute.xlu0 %2265 }
 0x512   : > { %v2313_v59 = vsel %vm998_vm9, %v13331_v5, %v2266_v56 }
 0x513   : > { %v2268_v12 = vpop.permute.xlu1 %2267 }
 0x514   : > { %v2314_v20 = vsel %vm998_vm9, %v13339_v32, %v2268_v12 }
 0x515   : > { %v2286_v45 = vpop.permute.xlu0 %2285  ;;  %v2345_v0 = vcombine.low %v2313_v59, %v2314_v20 }
 0x517   : > { %v2288_v13 = vpop.permute.xlu1 %2287  ;;  %v2353_v58 = vrot.slane %v2345_v0, %v12603_v17 }
 0x519   : > { %v2290_v46 = vpop.permute.xlu0 %2289 }
 0x51b   : > { %v2292_v8 = vpop.permute.xlu1 %2291 }
 0x51d   : > { %v2270_v26 = vpop.permute.xlu0 %2269 }
 0x51e   : > { %v2315_v30 = vsel %vm998_vm9, %v13382_v51, %v2270_v26  ;;  %v2324_v51 = vsel %vm998_vm9, %v13362_v52, %v2288_v13 }
 0x51f   : > { %v2272_v11 = vpop.permute.xlu1 %2271 }
 0x520   : > { %v2316_v6 = vsel %vm998_vm9, %v13389_v7, %v2272_v11  ;;  %v2322_v7 = vsel %vm998_vm9, %v13326_v27, %v2284_v40  ;;  %v2325_v40 = vsel %vm998_vm9, %v13365_v10, %v2290_v46 }
 0x521   : > { %v2346_v43 = vcombine.low %v2315_v30, %v2316_v6  ;;  %v2274_v23 = vpop.permute.xlu0 %2273 }
 0x522   : > { %v2317_v0 = vsel %vm998_vm9, %v13392_v14, %v2274_v23 }
 0x523   : > { %v2360_v54 = vrot.slane %v2346_v43, %v12603_v17  ;;  %v2276_v53 = vpop.permute.xlu1 %2275  ;;  %v2323_v43 = vsel %vm998_vm9, %v13353_v28, %v2286_v45 }
 0x524   : > { %v2318_v26 = vsel %vm998_vm9, %v13400_v41, %v2276_v53  ;;  %v2380_v59 = vcombine.low %v2323_v43, %v2324_v51  ;;  %v2326_v53 = vsel %vm998_vm9, %v13371_v57, %v2292_v8 }
 0x525   : > { %v2361_v32 = vcombine.low %v2353_v58, %v2360_v54  ;;  %v2294_v12 = vpop.permute.xlu0 %2293  ;;  %v2321_v58 = vsel %vm998_vm9, %v13321_v50, %v2282_v37  ;;  %v2362_v11 = vcombine.low %v2317_v0, %v2318_v26  ;;  %v2396_v45 = vcombine.low %v2325_v40, %v2326_v53  ;;  %v13632_v26 = vld [vmem:[%s16894_s2] sm:$0xff] }
 0x526   : > { %v2379_v13 = vcombine.low %v2321_v58, %v2322_v7  ;;  %v2327_v28 = vsel %vm998_vm9, %v13410_v3, %v2294_v12 }
 0x527   : > { %11844 = vmatprep.mubr.msk.f32.mxu0 %vm573_vm8, %v2361_v32  ;;  %v2296_v5 = vpop.permute.xlu1 %2295  ;;  %v2370_v57 = vrot.slane %v2362_v11, %v12603_v17  ;;  %v2404_v12 = vrot.slane %v2396_v45, %v12603_v17 }
 0x528   : > { %v2328_v52 = vsel %vm998_vm9, %v13420_v21, %v2296_v5  ;;  %v2394_v21 = vrot.slane %v2380_v59, %v12603_v17  ;;  %v2387_v30 = vrot.slane %v2379_v13, %v12603_v17 }
 0x529   : > { %v13592_v56 = vpop.permute.xlu0 %2722  ;;  %v2397_v37 = vcombine.low %v2327_v28, %v2328_v52 }
 0x52a   : > { %v2395_v32 = vcombine.low %v2387_v30, %v2394_v21 }
 0x52b   : > { %v2725_v20 = vpop.permute.xlu1 %2724 }
 0x52d   : > { %v2278_v54 = vpop.permute.xlu0 %2277 }
 0x52e   : > { %v2319_v41 = vsel %vm998_vm9, %v13440_v61, %v2278_v54  ;;  %v2411_v61 = vrot.slane %v2397_v37, %v12603_v17 }
 0x52f   : > { %v2280_v27 = vpop.permute.xlu1 %2279 }
 0x530   : > { %v2320_v50 = vsel %vm998_vm9, %v13455_v9, %v2280_v27  ;;  %v2412_v10 = vcombine.low %v2404_v12, %v2411_v61  ;;  %v16946_v12 = vld [vmem:[#allocation5_spill] sm:$0xff] }
 0x531   : > { %v2363_v23 = vcombine.low %v2319_v41, %v2320_v50  ;;  %v2707_v14 = vpop.permute.xlu0 %2706  ;;  %v2763_v41 = vsel %vm998_vm9, %v13423_v31, %v2725_v20 }
 0x532   : > { %v2754_v54 = vsel %vm998_vm9, %v13459_v44, %v2707_v14 }
 0x533   : > { %v2377_v8 = vrot.slane %v2363_v23, %v12603_v17  ;;  %v2709_v3 = vpop.permute.xlu1 %2708 }
 0x534   : > { %v2755_v7 = vsel %vm998_vm9, %v13467_v29, %v2709_v3 }
 0x535   : > { %v2378_v6 = vcombine.low %v2370_v57, %v2377_v8  ;;  %v2727_v9 = vpop.permute.xlu0 %2726  ;;  %v2786_v58 = vcombine.low %v2754_v54, %v2755_v7  ;;  %v12447_v54 = vld [vmem:[#allocation2] sm:$0xff] }
 0x537   : > { %11845 = vmatmul.mubr.msk.f32.vlgmr.msra.gmra.mrb[12].mxu0 %vm573_vm8, %v2378_v6  ;;  %v2729_v5 = vpop.permute.xlu1 %2728  ;;  %v2794_v11 = vrot.slane %v2786_v58, %v12603_v17  ;;  %v12448_v58 = vld [vmem:[#allocation2 + $0x8] sm:$0xff] }
 0x538   : > { %11847 = vmatprep.mubr.msk.f32.mxu0 %vm573_vm8, %v2395_v32  ;;  %v2765_v27 = vsel %vm998_vm9, %v13486_v25, %v2729_v5  ;;  %v2762_v25 = vsel %vm998_vm9, %v13413_v39, %v13592_v56 }
 0x539   : > { %v2731_v46 = vpop.permute.xlu0 %2730  ;;  %v2820_v21 = vcombine.low %v2762_v25, %v2763_v41 }
 0x53a   : > { %v2766_v39 = vsel %vm998_vm9, %v13489_v34, %v2731_v46 }
 0x53b   : > { %11848 = vmatmul.mubr.msk.f32.gmra.mrb[14].mxu0 %vm573_vm8, %v2412_v10  ;;  %v2733_v51 = vpop.permute.xlu1 %2732 }
 0x53c   : > { %11864 = vmatprep.mubr.msk.f32.mxu0 %vm573_vm8, %v13632_v26  ;;  %v2767_v31 = vsel %vm998_vm9, %v13495_v35, %v2733_v51  ;;  %v2828_v35 = vrot.slane %v2820_v21, %v12603_v17 }
 0x53d   : > { %v2711_v43 = vpop.permute.xlu0 %2710  ;;  %v2837_v56 = vcombine.low %v2766_v39, %v2767_v31 }
 0x53e   : > { %v2756_v0 = vsel %vm998_vm9, %v13506_v15, %v2711_v43  ;;  %v2764_v15 = vsel %vm998_vm9, %v13477_v47, %v2727_v9 }
 0x53f   : > { %v2713_v59 = vpop.permute.xlu1 %2712  ;;  %v2821_v37 = vcombine.low %v2764_v15, %v2765_v27  ;;  %v2845_v9 = vrot.slane %v2837_v56, %v12603_v17 }
 0x540   : > { %v2757_v29 = vsel %vm998_vm9, %v13513_v48, %v2713_v59  ;;  %v12449_v59 = vld [vmem:[#allocation2 + $0x10] sm:$0xff] }
 0x541   : > { %v2787_v52 = vcombine.low %v2756_v0, %v2757_v29  ;;  %v2715_v13 = vpop.permute.xlu0 %2714  ;;  %v2835_v45 = vrot.slane %v2821_v37, %v12603_v17  ;;  %v12450_v0 = vld [vmem:[#allocation2 + $0x18] sm:$0xff] }
 0x542   : > { %v2758_v23 = vsel %vm998_vm9, %v13516_v49, %v2715_v13 }
 0x543   : > { %v2801_v53 = vrot.slane %v2787_v52, %v12603_v17  ;;  %v2717_v28 = vpop.permute.xlu1 %2716  ;;  %v2836_v6 = vcombine.low %v2828_v35, %v2835_v45 }
 0x544   : > { %v2759_v44 = vsel %vm998_vm9, %v13522_v63, %v2717_v28 }
 0x545   : > { %v2802_v48 = vcombine.low %v2794_v11, %v2801_v53  ;;  %v2719_v50 = vpop.permute.xlu0 %2718  ;;  %v2803_v14 = vcombine.low %v2758_v23, %v2759_v44 }
 0x546   : > { %v2760_v47 = vsel %vm998_vm9, %v13532_v42, %v2719_v50 }
 0x547   : > { %11854 = vmatprep.mubr.msk.f32.mxu1 %vm573_vm8, %v2802_v48  ;;  %v2721_v63 = vpop.permute.xlu1 %2720  ;;  %v2811_v57 = vrot.slane %v2803_v14, %v12603_v17 }
 0x548   : > { %v2761_v20 = vsel %vm998_vm9, %v13547_v4, %v2721_v63 }
 0x549   : > { %v2804_v40 = vcombine.low %v2760_v47, %v2761_v20  ;;  %v2735_v49 = vpop.permute.xlu0 %2734 }
 0x54a   : > { %v2768_v42 = vsel %vm998_vm9, %v13555_v16, %v2735_v49 }
 0x54b   : > { %v2818_v8 = vrot.slane %v2804_v40, %v12603_v17  ;;  %v2737_v3 = vpop.permute.xlu1 %2736 }
 0x54c   : > { %v2769_v4 = vsel %vm998_vm9, %v13564_v24, %v2737_v3 }
 0x54d   : > { %v2819_v30 = vcombine.low %v2811_v57, %v2818_v8  ;;  %v2838_v61 = vcombine.low %v2768_v42, %v2769_v4  ;;  %v2070_v29 = vpop.permute.xlu0 %2069  ;;  %v2987_v8 = vsub.f32 1.0, %v13157_v2 }
 0x54e   : > { %v2081_v44 = vadd.f32 %v2070_v29, %v13143_v19 }
 0x54f   : > { %v2852_v34 = vrot.slane %v2838_v61, %v12603_v17  ;;  %11855 = vmatmul.mubr.msk.f32.vlgmr.msra.gmra.mrb[4].mxu1 %vm573_vm8, %v2819_v30  ;;  %v2074_v52 = vpop.permute.xlu1 %2073  ;;  %v2988_v61 = vsub.f32 1.0, %v13155_v38 }
 0x550   : > { %11857 = vmatprep.mubr.msk.f32.mxu1 %vm573_vm8, %v2836_v6  ;;  %12139 = vmatpush3.bf16.msra.mxu1 %v16945_v55  ;;  %v2083_v50 = vadd.f32 %v2074_v52, %v13151_v22 }
 0x551   : > { %v2853_v32 = vcombine.low %v2845_v9, %v2852_v34  ;;  %12141 = vmatprep.subr.bf16.mxu1 %v16946_v12  ;;  %v2072_v13 = vpop.permute.xlu0 %2071  ;;  %v2989_v9 = vsub.f32 1.0, %v13175_v36 }
 0x552   : > { %v2082_v37 = vadd.f32 %v2072_v13, %v13140_v60 }
 0x553   : > { %11858 = vmatmul.mubr.msk.f32.gmra.mrb[6].mxu1 %vm573_vm8, %v2853_v32  ;;  %v2076_v11 = vpop.permute.xlu1 %2075 }
 0x554   : > { %v2084_v31 = vadd.f32 %v2076_v11, %v13148_v62 }
 0x60a   : > { %v11846_v16 = vpop.f32.mrb[12].mxu0 }
 0x60b   : > { %2512 = vrot.lane.b32.xlu0 %v11846_v16, %s12506_s18  ;;  %v2487_v24 = vpop.f32.mrb[13].mxu0 }
 0x60e   : > { %v11849_v5 = vpop.f32.mrb[14].mxu0 }
 0x60f   : > { %2510 = vrot.lane.b32.xlu0 %v2487_v24, %s12506_s18  ;;  %2516 = vrot.lane.b32.xlu1 %v11849_v5, %s12506_s18  ;;  %v2497_v10 = vpop.f32.mrb[15].mxu0 }
 0x613   : > { %2514 = vrot.lane.b32.xlu1 %v2497_v10, %s12506_s18 }
 0x622   : > { %v11856_v46 = vpop.f32.mrb[4].mxu1 }
 0x623   : > { %v2928_v51 = vpop.f32.mrb[5].mxu1 }
 0x624   : > { %2951 = vrot.lane.b32.xlu0 %v2928_v51, %s12506_s18 }
 0x626   : > { %v11859_v7 = vpop.f32.mrb[6].mxu1 }
 0x627   : > { %v2938_v43 = vpop.f32.mrb[7].mxu1 }
 0x628   : > { %2953 = vrot.lane.b32.xlu0 %v11856_v46, %s12506_s18  ;;  %2955 = vrot.lane.b32.xlu1 %v2938_v43, %s12506_s18 }
 0x62c   : > { %2971 = vrot.lane.b32.xlu0 %v12447_v54, %s12503_s25  ;;  %2957 = vrot.lane.b32.xlu1 %v11859_v7, %s12506_s18  ;;  %v2990_v54 = vsub.f32 1.0, %v13169_v1 }
 0x630   : > { %2973 = vrot.lane.b32.xlu0 %v12448_v58, %s12503_s25  ;;  %2975 = vrot.lane.b32.xlu1 %v12449_v59, %s12503_s25 }
 0x634   : > { %2977 = vrot.lane.b32.xlu1 %v12450_v0, %s12503_s25 }
 0x67d   : > { %v2513_v27 = vpop.permute.xlu0 %2512 }
 0x67e   : > { %v2523_v25 = vadd.f32 %v2513_v27, %v2082_v37 }
 0x681   : > { %v2517_v53 = vpop.permute.xlu1 %2516  ;;  %v2511_v28 = vpop.permute.xlu0 %2510 }
 0x682   : > { %v2522_v41 = vadd.f32 %v2511_v28, %v2081_v44  ;;  %v2525_v40 = vadd.f32 %v2517_v53, %v2084_v31 }
 0x685   : > { %v2515_v15 = vpop.permute.xlu1 %2514 }
 0x686   : > { %v2524_v14 = vadd.f32 %v2515_v15, %v2083_v50 }
 0x696   : > { %v2952_v48 = vpop.permute.xlu0 %2951 }
 0x697   : > { %v2963_v23 = vadd.f32 %v2952_v48, %v2522_v41 }
 0x699   : > { %12366 = vtanh.f32 %v2963_v23 }
 0x69a   : > { %v2954_v63 = vpop.permute.xlu0 %2953  ;;  %v2956_v21 = vpop.permute.xlu1 %2955 }
 0x69b   : > { %v2964_v47 = vadd.f32 %v2954_v63, %v2523_v25  ;;  %v2965_v20 = vadd.f32 %v2956_v21, %v2524_v14 }
 0x69d   : > { %12368 = vtanh.f32 %v2964_v47 }
 0x69e   : > { %12370 = vtanh.f32 %v2965_v20  ;;  %v2958_v19 = vpop.permute.xlu1 %2957  ;;  %v2972_v62 = vpop.permute.xlu0 %2971 }
 0x69f   : > { %v2966_v49 = vadd.f32 %v2958_v19, %v2525_v40  ;;  %v2983_v35 = vmul.f32 %v13157_v2, %v2972_v62 }
 0x6a1   : > { %12372 = vtanh.f32 %v2966_v49 }
 0x6a2   : > { %v2976_v56 = vpop.permute.xlu1 %2975  ;;  %v2974_v57 = vpop.permute.xlu0 %2973 }
 0x6a3   : > { %v12367_v45 = vpop.eup %12366  ;;  %v2984_v2 = vmul.f32 %v13155_v38, %v2974_v57  ;;  %v2985_v5 = vmul.f32 %v13175_v36, %v2976_v56 }
 0x6a4   : > { %2995 = vrot.lane.b32.xlu0 %v12367_v45, %s12505_s7 }
 0x6a6   : > { %v2978_v42 = vpop.permute.xlu1 %2977 }
 0x6a7   : > { %v12369_v60 = vpop.eup %12368  ;;  %v2986_v58 = vmul.f32 %v13169_v1, %v2978_v42 }
 0x6a8   : > { %v12371_v22 = vpop.eup %12370  ;;  %2997 = vrot.lane.b32.xlu0 %v12369_v60, %s12505_s7 }
 0x6a9   : > { %2999 = vrot.lane.b32.xlu1 %v12371_v22, %s12505_s7 }
 0x6ab   : > { %v12373_v39 = vpop.eup %12372 }
 0x6ad   : > { %3001 = vrot.lane.b32.xlu1 %v12373_v39, %s12505_s7 }
 0x716   : > { %v2996_v3 = vpop.permute.xlu0 %2995 }
 0x717   : > { %v3007_v4 = vmul.f32 %v2996_v3, %v2987_v8 }
 0x719   : > { %v13703_v30 = vadd.f32 %v3007_v4, %v2983_v35 }
 0x71a   : > { %v2998_v6 = vpop.permute.xlu0 %2997 }
 0x71b   : > { %16947 = vst [vmem:[#allocation4_spill] sm:$0xff] %v13703_v30  ;;  %v3019_v34 = vcombine.high %v13703_v30, %v13703_v30  ;;  %v13711_v32 = vrot.slane %v13703_v30, %v12603_v17  ;;  %v3008_v16 = vmul.f32 %v2998_v6, %v2988_v61  ;;  %v3000_v24 = vpop.permute.xlu1 %2999 }
 0x71c   : > { %v3009_v10 = vmul.f32 %v3000_v24, %v2989_v9 }
 0x71d   : > { %v13716_v46 = vrot.slane %v3019_v34, %v12603_v17  ;;  %v13720_v51 = vcombine.high %v13711_v32, %v13711_v32  ;;  %v13722_v7 = vadd.f32 %v3008_v16, %v2984_v2  ;;  %v3090_v38 = vrot.slane %v13711_v32, %v12657_v33 }
 0x71e   : > { %v13724_v43 = vadd.f32 %v3009_v10, %v2985_v5  ;;  %v3174_v11 = vrot.slane %v13711_v32, %v12606_v18 }
 0x71f   : > { %16948 = vst [vmem:[#allocation10_spill] sm:$0xff] %v13722_v7  ;;  %v3094_v36 = vrot.slane %v13720_v51, %v12657_v33  ;;  %v3002_v59 = vpop.permute.xlu1 %3001  ;;  %v3035_v0 = vcombine.high %v13716_v46, %v13716_v46  ;;  %v3036_v29 = vcombine.high %v13722_v7, %v13722_v7  ;;  %v13738_v52 = vrot.slane %v13722_v7, %v12603_v17 }
 0x720   : > { %16949 = vst [vmem:[#allocation11_spill] sm:$0xff] %v13724_v43  ;;  %v3053_v1 = vcombine.high %v13724_v43, %v13724_v43  ;;  %v13744_v13 = vrot.slane %v13724_v43, %v12603_v17  ;;  %v3010_v27 = vmul.f32 %v3002_v59, %v2990_v54  ;;  %v3098_v53 = vrot.slane %v13716_v46, %v12657_v33 }
 0x721   : > { %v3151_v28 = vsel %vm466_vm1, %v3094_v36, %v3090_v38  ;;  %v3178_v44 = vrot.slane %v13720_v51, %v12606_v18  ;;  %v3102_v48 = vrot.slane %v3035_v0, %v12657_v33  ;;  %v3050_v37 = vrot.slane %v3036_v29, %v12603_v17 }
 0x722   : > { %v3067_v41 = vrot.slane %v3053_v1, %v12603_v17  ;;  %v3068_v15 = vcombine.high %v13744_v13, %v13744_v13  ;;  %v13757_v50 = vadd.f32 %v3010_v27, %v2986_v58  ;;  %v3051_v23 = vcombine.high %v13738_v52, %v13738_v52 }
 0x723   : > { %v3106_v25 = vrot.slane %v13738_v52, %v12657_v33  ;;  %v3182_v14 = vrot.slane %v13716_v46, %v12606_v18  ;;  %v3122_v63 = vrot.slane %v13744_v13, %v12657_v33  ;;  %v3152_v31 = vsel %vm468_vm2, %v3098_v53, %v3151_v28 }
 0x724   : > { %16950 = vst [vmem:[#allocation12_spill] sm:$0xff] %v13757_v50  ;;  %v3126_v21 = vrot.slane %v3068_v15, %v12657_v33  ;;  %v3070_v47 = vcombine.high %v13757_v50, %v13757_v50  ;;  %v3077_v20 = vrot.slane %v13757_v50, %v12603_v17  ;;  %v3052_v40 = vcombine.high %v3050_v37, %v3050_v37 }
 0x725   : > { %v3110_v19 = vrot.slane %v3051_v23, %v12657_v33  ;;  %v3114_v49 = vrot.slane %v3050_v37, %v12657_v33  ;;  %v3153_v45 = vsel %vm470_vm3, %v3102_v48, %v3152_v31  ;;  %v3069_v60 = vcombine.high %v3067_v41, %v3067_v41 }
 0x726   : > { %v3130_v22 = vrot.slane %v3067_v41, %v12657_v33  ;;  %v3118_v39 = vrot.slane %v3052_v40, %v12657_v33  ;;  %v3154_v62 = vsel %vm472_vm4, %v3106_v25, %v3153_v45  ;;  %v3084_v56 = vrot.slane %v3070_v47, %v12603_v17 }
 0x727   : > { %v3085_v57 = vcombine.high %v3077_v20, %v3077_v20  ;;  %v3155_v8 = vsel %vm474_vm5, %v3110_v19, %v3154_v62  ;;  %v3134_v3 = vrot.slane %v3069_v60, %v12657_v33  ;;  %v3138_v35 = vrot.slane %v3077_v20, %v12657_v33  ;;  %v16951_v62 = vld [vmem:[#allocation6_spill] sm:$0xff] }
 0x728   : > { %v3158_v42 = vsel %vm466_vm1, %v3126_v21, %v3122_v63  ;;  %v3206_v4 = vrot.slane %v13744_v13, %v12606_v18  ;;  %v3156_v61 = vsel %vm476_vm6, %v3114_v49, %v3155_v8  ;;  %v3086_v6 = vcombine.high %v3084_v56, %v3084_v56  ;;  %v13869_v8 = vld [vmem:[%s16894_s2 + $0x10] sm:$0xff] }
 0x729   : > { %v3142_v9 = vrot.slane %v3085_v57, %v12657_v33  ;;  %v3157_v34 = vsel %vm478_vm7, %v3118_v39, %v3156_v61  ;;  %v3146_v32 = vrot.slane %v3084_v56, %v12657_v33  ;;  %v3159_v16 = vsel %vm468_vm2, %v3130_v22, %v3158_v42  ;;  %v16952_v42 = vld [vmem:[#allocation3_spill] sm:$0xff] }
 0x72a   : > { %v3186_v24 = vrot.slane %v3035_v0, %v12606_v18  ;;  %v3210_v2 = vrot.slane %v3068_v15, %v12606_v18  ;;  %3165 = vrot.lane.b32.xlu0 %v3157_v34, %s12505_s7  ;;  %v3150_v5 = vrot.slane %v3086_v6, %v12657_v33  ;;  %v3160_v10 = vsel %vm470_vm3, %v3134_v3, %v3159_v16  ;;  %v13876_v3 = vld [vmem:[%s16894_s2 + $0x18] sm:$0xff] }
 0x72b   : > { %v3190_v46 = vrot.slane %v13738_v52, %v12606_v18  ;;  %v3214_v51 = vrot.slane %v3067_v41, %v12606_v18  ;;  %v3161_v54 = vsel %vm472_vm4, %v3138_v35, %v3160_v10  ;;  %v3194_v58 = vrot.slane %v3051_v23, %v12606_v18 }
 0x72c   : > { %v3235_v38 = vsel %vm466_vm1, %v3178_v44, %v3174_v11  ;;  %v3162_v36 = vsel %vm474_vm5, %v3142_v9, %v3161_v54  ;;  %v3198_v59 = vrot.slane %v3050_v37, %v12606_v18  ;;  %v3218_v29 = vrot.slane %v3069_v60, %v12606_v18 }
 0x72d   : > { %v3236_v0 = vsel %vm468_vm2, %v3182_v14, %v3235_v38  ;;  %v3163_v1 = vsel %vm476_vm6, %v3146_v32, %v3162_v36  ;;  %v3202_v52 = vrot.slane %v3052_v40, %v12606_v18  ;;  %v3222_v27 = vrot.slane %v3077_v20, %v12606_v18 }
 0x72e   : > { %v3237_v13 = vsel %vm470_vm3, %v3186_v24, %v3236_v0  ;;  %3346 = vrot.lane.b32.xlu0 %v13703_v30, %s12505_s7  ;;  %v3164_v11 = vsel %vm478_vm7, %v3150_v5, %v3163_v1  ;;  %v3226_v28 = vrot.slane %v3085_v57, %v12606_v18  ;;  %v3242_v44 = vsel %vm466_vm1, %v3210_v2, %v3206_v4 }
 0x72f   : > { %v3238_v53 = vsel %vm472_vm4, %v3190_v46, %v3237_v13  ;;  %3167 = vrot.lane.b32.xlu1 %v3164_v11, %s12505_s7  ;;  %v3230_v15 = vrot.slane %v3084_v56, %v12606_v18  ;;  %v3243_v48 = vsel %vm468_vm2, %v3214_v51, %v3242_v44  ;;  %v3234_v23 = vrot.slane %v3086_v6, %v12606_v18  ;;  %v13858_v56 = vld [vmem:[%s16894_s2 + $0x8] sm:$0xff] }
 0x730   : > { %v3239_v41 = vsel %vm474_vm5, %v3194_v58, %v3238_v53  ;;  %v3244_v25 = vsel %vm470_vm3, %v3218_v29, %v3243_v48 }
 0x731   : > { %v3240_v37 = vsel %vm476_vm6, %v3198_v59, %v3239_v41  ;;  %v3245_v63 = vsel %vm472_vm4, %v3222_v27, %v3244_v25 }
 0x732   : > { %v3241_v14 = vsel %vm478_vm7, %v3202_v52, %v3240_v37  ;;  %3350 = vrot.lane.b32.xlu0 %v13724_v43, %s12505_s7  ;;  %v3246_v21 = vsel %vm474_vm5, %v3226_v28, %v3245_v63 }
 0x733   : > { %3348 = vrot.lane.b32.xlu1 %v13722_v7, %s12505_s7  ;;  %v3247_v31 = vsel %vm476_vm6, %v3230_v15, %v3246_v21 }
 0x734   : > { %v3248_v47 = vsel %vm478_vm7, %v3234_v23, %v3247_v31 }
 0x737   : > { %3352 = vrot.lane.b32.xlu1 %v13757_v50, %s12505_s7 }
 0x79c   : > { %v3166_v20 = vpop.permute.xlu0 %3165 }
 0x79d   : > { %v3251_v40 = vsel %vm573_vm8, %v3166_v20, %v3241_v14 }
 0x79e   : > { %3254 = vst.msk [vmem:[%s12581_s17] sm:$0xff] %vm3253_vm10, %v3251_v40 }
 0x7a0   : > { %v13838_v19 = vpop.permute.xlu0 %3346 }
 0x7a1   : > { %v3168_v49 = vpop.permute.xlu1 %3167  ;;  %11874 = vmatprep.mubr.msk.f32.mxu1 %vm573_vm8, %v13838_v19 }
 0x7a2   : > { %v3252_v45 = vsel %vm573_vm8, %v3168_v49, %v3248_v47 }
 0x7a3   : > { %3255 = vst.msk [vmem:[%s12581_s17 + $0x8] sm:$0xff] %vm3253_vm10, %v3252_v45  ;;  %v12132_v60 = vpack.c.bf16 %v3252_v45, %v3251_v40 }
 0x7a4   : > { %v13845_v22 = vpop.permute.xlu0 %3350 }
 0x7a5   : > { %12133 = vmatprep.subr.bf16.mxu0 %v12132_v60  ;;  %v13847_v39 = vpop.permute.xlu1 %3348 }
 0x7a6   : > { %12135 = vmatpush3.bf16.msra.mxu0 %v12132_v60  ;;  %11875 = vmatmul.mubr.msk.f32.vlgmr.msra.gmra.mrb[8].mxu1 %vm573_vm8, %v13847_v39 }
 0x7a7   : > { %11877 = vmatprep.mubr.msk.f32.mxu1 %vm573_vm8, %v13845_v22  ;;  %12143 = vmatpush3.bf16.msra.mxu1 %v16946_v12 }
 0x7a8   : > { %12145 = vmatprep.subr.bf16.mxu1 %v16951_v62 }
 0x7a9   : > { %11865 = vmatmul.mubr.msk.f32.vlgmr.msra.gmra.mrb[16].mxu0 %vm573_vm8, %v13858_v56  ;;  %v13862_v57 = vpop.permute.xlu1 %3352 }
 0x7aa   : > { %11878 = vmatmul.mubr.msk.f32.gmra.mrb[10].mxu1 %vm573_vm8, %v13862_v57  ;;  %11867 = vmatprep.mubr.msk.f32.mxu0 %vm573_vm8, %v13869_v8 }
 0x7ad   : > { %11868 = vmatmul.mubr.msk.f32.gmra.mrb[18].mxu0 %vm573_vm8, %v13876_v3 }
 0x7ae   : > { %11904 = vmatprep.mubr.msk.f32.mxu0 %vm573_vm8, %v13632_v26 }
 0x87c   : > { %v11866_v35 = vpop.f32.mrb[16].mxu0 }
 0x87d   : > { %v3509_v4 = vrot.slane %v11866_v35, %v16952_v42  ;;  %v3327_v61 = vpop.f32.mrb[17].mxu0  ;;  %v3502_v9 = vcombine.high %v11866_v35, %v11866_v35 }
 0x87e   : > { %v3460_v6 = vrot.slane %v3327_v61, %v16952_v42  ;;  %v3453_v59 = vcombine.high %v3327_v61, %v3327_v61 }
 0x87f   : > { %v3517_v34 = vcombine.high %v3509_v4, %v3509_v4  ;;  %v13885_v32 = vrot.slane %v3509_v4, %v16952_v42  ;;  %v3516_v46 = vrot.slane %v3502_v9, %v16952_v42 }
 0x880   : > { %v3468_v16 = vcombine.high %v3460_v6, %v3460_v6  ;;  %v13887_v24 = vpop.f32.mrb[18].mxu0  ;;  %v13893_v5 = vrot.slane %v3460_v6, %v16952_v42  ;;  %v3467_v27 = vrot.slane %v3453_v59, %v16952_v42 }
 0x881   : > { %v13890_v2 = vrot.slane %v3517_v34, %v16952_v42  ;;  %v3602_v26 = vrot.slane %v13885_v32, %v12657_v33  ;;  %v13897_v10 = vpop.f32.mrb[19].mxu0  ;;  %v13911_v38 = vcombine.high %v13885_v32, %v13885_v32  ;;  %v3518_v36 = vcombine.high %v3516_v46, %v3516_v46 }
 0x882   : > { %v13901_v51 = vrot.slane %v3468_v16, %v16952_v42  ;;  %v3570_v58 = vrot.slane %v13893_v5, %v12657_v33  ;;  %v13921_v1 = vrot.slane %v3516_v46, %v16952_v42  ;;  %v13935_v53 = vcombine.high %v13893_v5, %v13893_v5 }
 0x883   : > { %3647 = vrot.lane.b32.xlu0 %v3602_v26, %s12505_s7  ;;  %v3606_v54 = vrot.slane %v13890_v2, %v12657_v33  ;;  %v13918_v29 = vcombine.high %v13890_v2, %v13890_v2  ;;  %v3610_v52 = vrot.slane %v13911_v38, %v12657_v33  ;;  %v13927_v13 = vrot.slane %v3518_v36, %v16952_v42 }
 0x884   : > { %v3574_v0 = vrot.slane %v13901_v51, %v12657_v33  ;;  %v3618_v28 = vrot.slane %v13921_v1, %v12657_v33  ;;  %v3469_v44 = vcombine.high %v3467_v27, %v3467_v27  ;;  %v13945_v15 = vcombine.high %v13901_v51, %v13901_v51 }
 0x885   : > { %3649 = vrot.lane.b32.xlu1 %v3606_v54, %s12505_s7  ;;  %v3614_v11 = vrot.slane %v13918_v29, %v12657_v33  ;;  %v3622_v41 = vrot.slane %v13927_v13, %v12657_v33  ;;  %v13948_v48 = vrot.slane %v3467_v27, %v16952_v42  ;;  %v3578_v37 = vrot.slane %v13935_v53, %v12657_v33 }
 0x886   : > { %v3934_v23 = vrot.slane %v13887_v24, %v16952_v42  ;;  %v13956_v25 = vrot.slane %v3469_v44, %v16952_v42  ;;  %v3582_v14 = vrot.slane %v13945_v15, %v12657_v33  ;;  %v13966_v31 = vcombine.high %v13921_v1, %v13921_v1 }
 0x887   : > { %3631 = vrot.lane.b32.xlu0 %v3570_v58, %s12505_s7  ;;  %v3586_v63 = vrot.slane %v13948_v48, %v12657_v33  ;;  %v13976_v40 = vcombine.high %v13927_v13, %v13927_v13  ;;  %v3885_v60 = vrot.slane %v13897_v10, %v16952_v42  ;;  %v13996_v6 = vcombine.high %v13948_v48, %v13948_v48 }
 0x888   : > { %v3942_v21 = vcombine.high %v3934_v23, %v3934_v23  ;;  %v13970_v47 = vrot.slane %v3934_v23, %v16952_v42  ;;  %v3590_v20 = vrot.slane %v13956_v25, %v12657_v33  ;;  %v3626_v45 = vrot.slane %v13966_v31, %v12657_v33 }
 0x889   : > { %3633 = vrot.lane.b32.xlu1 %v3574_v0, %s12505_s7  ;;  %v3630_v35 = vrot.slane %v13976_v40, %v12657_v33  ;;  %v3927_v9 = vcombine.high %v13887_v24, %v13887_v24  ;;  %v3893_v34 = vcombine.high %v3885_v60, %v3885_v60  ;;  %v14003_v16 = vcombine.high %v13956_v25, %v13956_v25 }
 0x88a   : > { %v13979_v49 = vrot.slane %v3942_v21, %v16952_v42  ;;  %v4027_v4 = vrot.slane %v13970_v47, %v12657_v33  ;;  %v14006_v26 = vrot.slane %v3885_v60, %v16952_v42  ;;  %v3594_v46 = vrot.slane %v13996_v6, %v12657_v33 }
 0x88b   : > { %3651 = vrot.lane.b32.xlu0 %v3610_v52, %s12505_s7  ;;  %v3941_v54 = vrot.slane %v3927_v9, %v16952_v42  ;;  %v14013_v58 = vrot.slane %v3893_v34, %v16952_v42  ;;  %v3598_v24 = vrot.slane %v14003_v16, %v12657_v33  ;;  %v14020_v36 = vcombine.high %v13970_v47, %v13970_v47 }
 0x88c   : > { %v4031_v61 = vrot.slane %v13979_v49, %v12657_v33  ;;  %v3995_v59 = vrot.slane %v14006_v26, %v12657_v33  ;;  %v3878_v52 = vcombine.high %v13897_v10, %v13897_v10  ;;  %v14049_v23 = vcombine.high %v14006_v26, %v14006_v26 }
 0x88d   : > { %3653 = vrot.lane.b32.xlu1 %v3614_v11, %s12505_s7  ;;  %v3943_v0 = vcombine.high %v3941_v54, %v3941_v54  ;;  %v3999_v27 = vrot.slane %v14013_v58, %v12657_v33  ;;  %v14032_v11 = vcombine.high %v13979_v49, %v13979_v49  ;;  %v4035_v44 = vrot.slane %v14020_v36, %v12657_v33 }
 0x88e   : > { %v3892_v10 = vrot.slane %v3878_v52, %v16952_v42  ;;  %v4003_v60 = vrot.slane %v14049_v23, %v12657_v33 }
 0x88f   : > { %3655 = vrot.lane.b32.xlu0 %v3618_v28, %s12505_s7  ;;  %v14035_v28 = vrot.slane %v3941_v54, %v16952_v42 }
 0x891   : > { %3657 = vrot.lane.b32.xlu1 %v3622_v41, %s12505_s7  ;;  %v14041_v41 = vrot.slane %v3943_v0, %v16952_v42 }
 0x893   : > { %3635 = vrot.lane.b32.xlu0 %v3578_v37, %s12505_s7  ;;  %v4039_v37 = vrot.slane %v14032_v11, %v12657_v33  ;;  %v4047_v21 = vrot.slane %v14041_v41, %v12657_v33  ;;  %v14099_v0 = vcombine.high %v14041_v41, %v14041_v41 }
 0x895   : > { %3637 = vrot.lane.b32.xlu1 %v3582_v14, %s12505_s7  ;;  %v4043_v14 = vrot.slane %v14035_v28, %v12657_v33 }
 0x897   : > { %3639 = vrot.lane.b32.xlu0 %v3586_v63, %s12505_s7  ;;  %v3894_v63 = vcombine.high %v3892_v10, %v3892_v10 }
 0x899   : > { %3641 = vrot.lane.b32.xlu1 %v3590_v20, %s12505_s7  ;;  %v14059_v20 = vcombine.high %v14013_v58, %v14013_v58 }
 0x89b   : > { %3659 = vrot.lane.b32.xlu0 %v3626_v45, %s12505_s7  ;;  %v14062_v45 = vrot.slane %v3892_v10, %v16952_v42 }
 0x89d   : > { %3661 = vrot.lane.b32.xlu1 %v3630_v35, %s12505_s7  ;;  %v14068_v35 = vrot.slane %v3894_v63, %v16952_v42  ;;  %v14078_v9 = vcombine.high %v14062_v45, %v14062_v45 }
 0x89f   : > { %4072 = vrot.lane.b32.xlu0 %v4027_v4, %s12505_s7  ;;  %v4007_v4 = vrot.slane %v14059_v20, %v12657_v33  ;;  %v4015_v34 = vrot.slane %v14068_v35, %v12657_v33  ;;  %v4019_v54 = vrot.slane %v14078_v9, %v12657_v33 }
 0x8a1   : > { %4074 = vrot.lane.b32.xlu1 %v4031_v61, %s12505_s7  ;;  %v4011_v61 = vrot.slane %v14062_v45, %v12657_v33 }
 0x8a3   : > { %3643 = vrot.lane.b32.xlu0 %v3594_v46, %s12505_s7  ;;  %v14085_v46 = vcombine.high %v14068_v35, %v14068_v35 }
 0x8a5   : > { %3645 = vrot.lane.b32.xlu1 %v3598_v24, %s12505_s7  ;;  %v14092_v24 = vcombine.high %v14035_v28, %v14035_v28 }
 0x8a7   : > { %4056 = vrot.lane.b32.xlu0 %v3995_v59, %s12505_s7  ;;  %v4023_v59 = vrot.slane %v14085_v46, %v12657_v33  ;;  %v4051_v52 = vrot.slane %v14092_v24, %v12657_v33 }
 0x8a9   : > { %4058 = vrot.lane.b32.xlu1 %v3999_v27, %s12505_s7  ;;  %v4055_v27 = vrot.slane %v14099_v0, %v12657_v33 }
 0x8ab   : > { %4076 = vrot.lane.b32.xlu0 %v4035_v44, %s12505_s7 }
 0x8ad   : > { %4078 = vrot.lane.b32.xlu1 %v4039_v37, %s12505_s7 }
 0x8af   : > { %4080 = vrot.lane.b32.xlu0 %v4043_v14, %s12505_s7 }
 0x8b1   : > { %4082 = vrot.lane.b32.xlu1 %v4047_v21, %s12505_s7 }
 0x8b3   : > { %4060 = vrot.lane.b32.xlu0 %v4003_v60, %s12505_s7 }
 0x8b5   : > { %4062 = vrot.lane.b32.xlu1 %v4007_v4, %s12505_s7 }
 0x8b7   : > { %4064 = vrot.lane.b32.xlu0 %v4011_v61, %s12505_s7 }
 0x8b9   : > { %4066 = vrot.lane.b32.xlu1 %v4015_v34, %s12505_s7 }
 0x8bb   : > { %4068 = vrot.lane.b32.xlu0 %v4019_v54, %s12505_s7 }
 0x8bd   : > { %4070 = vrot.lane.b32.xlu1 %v4023_v59, %s12505_s7 }
 0x8bf   : > { %4084 = vrot.lane.b32.xlu0 %v4051_v52, %s12505_s7 }
 0x8c1   : > { %4086 = vrot.lane.b32.xlu1 %v4055_v27, %s12505_s7 }
 0x8f5   : > { %v3648_v44 = vpop.permute.xlu0 %3647 }
 0x8f7   : > { %v3650_v10 = vpop.permute.xlu1 %3649 }
 0x8f9   : > { %v3632_v37 = vpop.permute.xlu0 %3631 }
 0x8fa   : > { %v3679_v54 = vsel %vm998_vm9, %v13893_v5, %v3632_v37 }
 0x8fb   : > { %v3634_v14 = vpop.permute.xlu1 %3633 }
 0x8fc   : > { %v3680_v61 = vsel %vm998_vm9, %v13901_v51, %v3634_v14 }
 0x8fd   : > { %v3652_v63 = vpop.permute.xlu0 %3651  ;;  %v3711_v59 = vcombine.low %v3679_v54, %v3680_v61 }
 0x8ff   : > { %v3654_v21 = vpop.permute.xlu1 %3653  ;;  %v3719_v30 = vrot.slane %v3711_v59, %v12603_v17 }
 0x901   : > { %v3656_v60 = vpop.permute.xlu0 %3655 }
 0x903   : > { %v3658_v4 = vpop.permute.xlu1 %3657 }
 0x905   : > { %v3636_v34 = vpop.permute.xlu0 %3635 }
 0x906   : > { %v3681_v27 = vsel %vm998_vm9, %v13935_v53, %v3636_v34  ;;  %v3690_v53 = vsel %vm998_vm9, %v13918_v29, %v3654_v21 }
 0x907   : > { %v3638_v52 = vpop.permute.xlu1 %3637 }
 0x908   : > { %v3682_v50 = vsel %vm998_vm9, %v13945_v15, %v3638_v52 }
 0x909   : > { %v3712_v43 = vcombine.low %v3681_v27, %v3682_v50  ;;  %v3640_v7 = vpop.permute.xlu0 %3639  ;;  %v3688_v50 = vsel %vm998_vm9, %v13890_v2, %v3650_v10  ;;  %v3691_v10 = vsel %vm998_vm9, %v13921_v1, %v3656_v60 }
 0x90a   : > { %v3683_v54 = vsel %vm998_vm9, %v13948_v48, %v3640_v7 }
 0x90b   : > { %v3726_v12 = vrot.slane %v3712_v43, %v12603_v17  ;;  %v3642_v42 = vpop.permute.xlu1 %3641  ;;  %v3689_v43 = vsel %vm998_vm9, %v13911_v38, %v3652_v63 }
 0x90c   : > { %v3684_v15 = vsel %vm998_vm9, %v13956_v25, %v3642_v42  ;;  %v3746_v34 = vcombine.low %v3689_v43, %v3690_v53  ;;  %v3692_v42 = vsel %vm998_vm9, %v13927_v13, %v3658_v4  ;;  %v16953_v53 = vld [vmem:[#allocation9_spill] sm:$0xff] }
 0x90d   : > { %v3727_v51 = vcombine.low %v3719_v30, %v3726_v12  ;;  %v3660_v14 = vpop.permute.xlu0 %3659  ;;  %v3687_v30 = vsel %vm998_vm9, %v13885_v32, %v3648_v44  ;;  %v3728_v59 = vcombine.low %v3683_v54, %v3684_v15  ;;  %v3762_v63 = vcombine.low %v3691_v10, %v3692_v42 }
 0x90e   : > { %v3745_v21 = vcombine.low %v3687_v30, %v3688_v50  ;;  %v3693_v38 = vsel %vm998_vm9, %v13966_v31, %v3660_v14 }
 0x90f   : > { %11884 = vmatprep.mubr.msk.f32.mxu1 %vm573_vm8, %v3727_v51  ;;  %v3662_v5 = vpop.permute.xlu1 %3661  ;;  %v3736_v13 = vrot.slane %v3728_v59, %v12603_v17  ;;  %v3770_v14 = vrot.slane %v3762_v63, %v12603_v17 }
 0x910   : > { %v3694_v29 = vsel %vm998_vm9, %v13976_v40, %v3662_v5  ;;  %v3760_v40 = vrot.slane %v3746_v34, %v12603_v17  ;;  %v3753_v52 = vrot.slane %v3745_v21, %v12603_v17 }
 0x911   : > { %v14119_v37 = vpop.permute.xlu0 %4072  ;;  %v3763_v44 = vcombine.low %v3693_v38, %v3694_v29 }
 0x912   : > { %v3761_v51 = vcombine.low %v3753_v52, %v3760_v40 }
 0x913   : > { %v4075_v61 = vpop.permute.xlu1 %4074 }
 0x915   : > { %v3644_v12 = vpop.permute.xlu0 %3643 }
 0x916   : > { %v3685_v25 = vsel %vm998_vm9, %v13996_v6, %v3644_v12  ;;  %v3777_v6 = vrot.slane %v3763_v44, %v12603_v17 }
 0x917   : > { %v3646_v2 = vpop.permute.xlu1 %3645 }
 0x918   : > { %v3686_v32 = vsel %vm998_vm9, %v14003_v16, %v3646_v2  ;;  %v3778_v1 = vcombine.low %v3770_v14, %v3777_v6 }
 0x919   : > { %v3729_v7 = vcombine.low %v3685_v25, %v3686_v32  ;;  %v4057_v48 = vpop.permute.xlu0 %4056  ;;  %v4113_v25 = vsel %vm998_vm9, %v13979_v49, %v4075_v61 }
 0x91a   : > { %v4104_v12 = vsel %vm998_vm9, %v14006_v26, %v4057_v48 }
 0x91b   : > { %v3743_v4 = vrot.slane %v3729_v7, %v12603_v17  ;;  %v4059_v31 = vpop.permute.xlu1 %4058 }
 0x91c   : > { %v4105_v15 = vsel %vm998_vm9, %v14013_v58, %v4059_v31 }
 0x91d   : > { %v3744_v27 = vcombine.low %v3736_v13, %v3743_v4  ;;  %v4077_v16 = vpop.permute.xlu0 %4076  ;;  %v4136_v30 = vcombine.low %v4104_v12, %v4105_v15 }
 0x91f   : > { %11885 = vmatmul.mubr.msk.f32.vlgmr.msra.gmra.mrb[8].mxu1 %vm573_vm8, %v3744_v27  ;;  %v4079_v5 = vpop.permute.xlu1 %4078  ;;  %v4144_v2 = vrot.slane %v4136_v30, %v12603_v17 }
 0x920   : > { %11887 = vmatprep.mubr.msk.f32.mxu1 %vm573_vm8, %v3761_v51  ;;  %12147 = vmatpush3.bf16.msra.mxu1 %v16951_v62  ;;  %v4115_v42 = vsel %vm998_vm9, %v14032_v11, %v4079_v5  ;;  %v4112_v11 = vsel %vm998_vm9, %v13970_v47, %v14119_v37 }
 0x921   : > { %v4081_v60 = vpop.permute.xlu0 %4080  ;;  %12161 = vmatprep.subr.bf16.mxu1 %v16953_v53  ;;  %v4170_v40 = vcombine.low %v4112_v11, %v4113_v25 }
 0x922   : > { %v4116_v47 = vsel %vm998_vm9, %v14035_v28, %v4081_v60 }
 0x923   : > { %11888 = vmatmul.mubr.msk.f32.gmra.mrb[10].mxu1 %vm573_vm8, %v3778_v1  ;;  %v4083_v50 = vpop.permute.xlu1 %4082 }
 0x924   : > { %v4117_v49 = vsel %vm998_vm9, %v14041_v41, %v4083_v50  ;;  %v14212_v50 = vld [vmem:[%s12576_s13 + $0x38] sm:$0xff] }
 0x925   : > { %v4061_v43 = vpop.permute.xlu0 %4060  ;;  %v4187_v37 = vcombine.low %v4116_v47, %v4117_v49 }
 0x926   : > { %v4106_v54 = vsel %vm998_vm9, %v14049_v23, %v4061_v43  ;;  %v4114_v23 = vsel %vm998_vm9, %v14020_v36, %v4077_v16  ;;  %v14215_v43 = vld [vmem:[%s12576_s13 + $0x30] sm:$0xff] }
 0x927   : > { %v4063_v34 = vpop.permute.xlu1 %4062  ;;  %v4171_v44 = vcombine.low %v4114_v23, %v4115_v42  ;;  %v4195_v27 = vrot.slane %v4187_v37, %v12603_v17 }
 0x928   : > { %v4107_v29 = vsel %vm998_vm9, %v14059_v20, %v4063_v34 }
 0x929   : > { %v4137_v21 = vcombine.low %v4106_v54, %v4107_v29  ;;  %v4065_v59 = vpop.permute.xlu0 %4064  ;;  %v4185_v63 = vrot.slane %v4171_v44, %v12603_v17 }
 0x92a   : > { %v4108_v7 = vsel %vm998_vm9, %v14062_v45, %v4065_v59 }
 0x92b   : > { %v4151_v58 = vrot.slane %v4137_v21, %v12603_v17  ;;  %v4067_v38 = vpop.permute.xlu1 %4066 }
 0x92c   : > { %v4109_v26 = vsel %vm998_vm9, %v14068_v35, %v4067_v38 }
 0x92d   : > { %v4152_v20 = vcombine.low %v4144_v2, %v4151_v58  ;;  %v4069_v32 = vpop.permute.xlu0 %4068  ;;  %v4153_v48 = vcombine.low %v4108_v7, %v4109_v26 }
 0x92e   : > { %v4110_v36 = vsel %vm998_vm9, %v14078_v9, %v4069_v32  ;;  %v4178_v9 = vrot.slane %v4170_v40, %v12603_v17 }
 0x92f   : > { %11894 = vmatprep.mubr.msk.f32.mxu1 %vm573_vm8, %v4152_v20  ;;  %v4071_v35 = vpop.permute.xlu1 %4070  ;;  %v4161_v13 = vrot.slane %v4153_v48, %v12603_v17 }
 0x930   : > { %v4111_v61 = vsel %vm998_vm9, %v14085_v46, %v4071_v35  ;;  %v4186_v28 = vcombine.low %v4178_v9, %v4185_v63 }
 0x931   : > { %v4154_v10 = vcombine.low %v4110_v36, %v4111_v61  ;;  %v4085_v45 = vpop.permute.xlu0 %4084 }
 0x932   : > { %v4118_v46 = vsel %vm998_vm9, %v14092_v24, %v4085_v45  ;;  %v14204_v24 = vld [vmem:[%s12576_s13 + $0x28] sm:$0xff] }
 0x933   : > { %v4168_v4 = vrot.slane %v4154_v10, %v12603_v17  ;;  %v4087_v41 = vpop.permute.xlu1 %4086 }
 0x934   : > { %v4119_v31 = vsel %vm998_vm9, %v14099_v0, %v4087_v41  ;;  %v14207_v0 = vld [vmem:[%s12576_s13 + $0x20] sm:$0xff] }
 0x935   : > { %v4169_v52 = vcombine.low %v4161_v13, %v4168_v4  ;;  %v4188_v6 = vcombine.low %v4118_v46, %v4119_v31 }
 0x937   : > { %v4202_v16 = vrot.slane %v4188_v6, %v12603_v17  ;;  %11895 = vmatmul.mubr.msk.f32.vlgmr.msra.gmra.mrb[8].mxu1 %vm573_vm8, %v4169_v52 }
 0x938   : > { %11897 = vmatprep.mubr.msk.f32.mxu1 %vm573_vm8, %v4186_v28  ;;  %12163 = vmatpush3.bf16.msra.mxu1 %v16953_v53 }
 0x939   : > { %v4203_v51 = vcombine.low %v4195_v27, %v4202_v16  ;;  %12169 = vmatprep.subr.bf16.mxu1 %v16945_v55 }
 0x93b   : > { %11898 = vmatmul.mubr.msk.f32.gmra.mrb[10].mxu1 %vm573_vm8, %v4203_v51 }
 0xa0a   : > { %v11896_v14 = vpop.f32.mrb[8].mxu1 }
 0xa0b   : > { %v12232_v5 = vadd.f32 %v11896_v14, %v14204_v24  ;;  %v4278_v1 = vpop.f32.mrb[9].mxu1 }
 0xa0c   : > { %v12233_v60 = vadd.f32 %v14207_v0, %v4278_v1 }
 0xa0d   : > { %v11480_v15 = vmul.f32 -1.442695, %v12232_v5 }
 0xa0e   : > { %v11479_v12 = vmul.f32 -1.442695, %v12233_v60  ;;  %v11899_v30 = vpop.f32.mrb[10].mxu1 }
 0xa0f   : > { %12374 = vpow2.f32 %v11480_v15  ;;  %v12234_v34 = vadd.f32 %v11899_v30, %v14212_v50  ;;  %v4288_v54 = vpop.f32.mrb[11].mxu1 }
 0xa10   : > { %12376 = vpow2.f32 %v11479_v12  ;;  %v12235_v29 = vadd.f32 %v14215_v43, %v4288_v54 }
 0xa11   : > { %v11482_v21 = vmul.f32 -1.442695, %v12234_v34 }
 0xa12   : > { %v11481_v59 = vmul.f32 -1.442695, %v12235_v29 }
 0xa13   : > { %12378 = vpow2.f32 %v11482_v21 }
 0xa14   : > { %12380 = vpow2.f32 %v11481_v59 }
 0xa19   : > { %v12375_v2 = vpop.eup %12374 }
 0xa1a   : > { %v12377_v42 = vpop.eup %12376  ;;  %v4314_v58 = vadd.f32 1.0, %v12375_v2 }
 0xa1b   : > { %v4313_v38 = vadd.f32 1.0, %v12377_v42 }
 0xa1c   : > { %12382 = vrcp.f32 %v4314_v58 }
 0xa1d   : > { %v12379_v26 = vpop.eup %12378  ;;  %12384 = vrcp.f32 %v4313_v38 }
 0xa1e   : > { %v12381_v25 = vpop.eup %12380  ;;  %v4316_v23 = vadd.f32 1.0, %v12379_v26 }
 0xa1f   : > { %v4315_v20 = vadd.f32 1.0, %v12381_v25 }
 0xa20   : > { %12386 = vrcp.f32 %v4316_v23 }
 0xa21   : > { %12388 = vrcp.f32 %v4315_v20 }
 0xa26   : > { %v14219_v32 = vpop.eup %12382 }
 0xa27   : > { %v14221_v44 = vpop.eup %12384  ;;  %v14225_v7 = vmul.f32 %v14219_v32, %v13847_v39 }
 0xa28   : > { %v14229_v11 = vmul.f32 %v14221_v44, %v13838_v19 }
 0xa29   : > { %v4354_v48 = vcombine.high %v14225_v7, %v14225_v7  ;;  %v14247_v19 = vrot.slane %v14225_v7, %v12603_v17 }
 0xa2a   : > { %v14233_v35 = vpop.eup %12386  ;;  %v4337_v40 = vcombine.high %v14229_v11, %v14229_v11  ;;  %v4344_v49 = vrot.slane %v14229_v11, %v12603_v17 }
 0xa2b   : > { %v14239_v36 = vpop.eup %12388  ;;  %v14243_v39 = vmul.f32 %v14233_v35, %v13862_v57  ;;  %v14250_v61 = vrot.slane %v4354_v48, %v12603_v17  ;;  %v4504_v28 = vrot.slane %v14247_v19, %v12606_v18 }
 0xa2c   : > { %v14254_v10 = vmul.f32 %v14239_v36, %v13845_v22  ;;  %v4351_v45 = vrot.slane %v4337_v40, %v12603_v17  ;;  %v4352_v63 = vcombine.high %v4344_v49, %v4344_v49  ;;  %v14269_v22 = vcombine.high %v14247_v19, %v14247_v19 }
 0xa2d   : > { %v4388_v47 = vcombine.high %v14243_v39, %v14243_v39  ;;  %v14261_v57 = vrot.slane %v14243_v39, %v12603_v17  ;;  %v14273_v41 = vcombine.high %v14250_v61, %v14250_v61  ;;  %v4488_v51 = vrot.slane %v4344_v49, %v12606_v18 }
 0xa2e   : > { %v4353_v37 = vcombine.high %v4351_v45, %v4351_v45  ;;  %v4371_v13 = vcombine.high %v14254_v10, %v14254_v10  ;;  %v4378_v4 = vrot.slane %v14254_v10, %v12603_v17  ;;  %v4492_v46 = vrot.slane %v4352_v63, %v12606_v18 }
 0xa2f   : > { %v14276_v9 = vrot.slane %v4388_v47, %v12603_v17  ;;  %v4496_v6 = vrot.slane %v4351_v45, %v12606_v18  ;;  %v4403_v27 = vcombine.high %v14261_v57, %v14261_v57  ;;  %v4508_v12 = vrot.slane %v14269_v22, %v12606_v18 }
 0xa30   : > { %v4385_v31 = vrot.slane %v4371_v13, %v12603_v17  ;;  %v4386_v52 = vcombine.high %v4378_v4, %v4378_v4  ;;  %v4500_v14 = vrot.slane %v4353_v37, %v12606_v18  ;;  %v4520_v1 = vrot.slane %v4378_v4, %v12606_v18 }
 0xa31   : > { %v4404_v16 = vcombine.high %v14276_v9, %v14276_v9  ;;  %v4512_v30 = vrot.slane %v14250_v61, %v12606_v18  ;;  %v4516_v34 = vrot.slane %v14273_v41, %v12606_v18  ;;  %v4549_v54 = vsel %vm466_vm1, %v4492_v46, %v4488_v51 }
 0xa32   : > { %v4387_v5 = vcombine.high %v4385_v31, %v4385_v31  ;;  %v4524_v60 = vrot.slane %v4386_v52, %v12606_v18  ;;  %v4528_v15 = vrot.slane %v4385_v31, %v12606_v18  ;;  %v4536_v21 = vrot.slane %v14261_v57, %v12606_v18 }
 0xa33   : > { %v4550_v59 = vsel %vm468_vm2, %v4496_v6, %v4549_v54  ;;  %v4540_v42 = vrot.slane %v4403_v27, %v12606_v18  ;;  %v4544_v58 = vrot.slane %v14276_v9, %v12606_v18  ;;  %v4548_v25 = vrot.slane %v4404_v16, %v12606_v18 }
 0xa34   : > { %v4532_v29 = vrot.slane %v4387_v5, %v12606_v18  ;;  %v4556_v2 = vsel %vm466_vm1, %v4524_v60, %v4520_v1  ;;  %v4551_v38 = vsel %vm470_vm3, %v4500_v14, %v4550_v59  ;;  %v4408_v48 = vrot.slane %v4344_v49, %v12657_v33 }
 0xa35   : > { %v4557_v26 = vsel %vm468_vm2, %v4528_v15, %v4556_v2  ;;  %v4552_v23 = vsel %vm472_vm4, %v4504_v28, %v4551_v38  ;;  %v4412_v13 = vrot.slane %v4352_v63, %v12657_v33  ;;  %v4416_v46 = vrot.slane %v4351_v45, %v12657_v33 }
 0xa36   : > { %v4558_v20 = vsel %vm470_vm3, %v4532_v29, %v4557_v26  ;;  %v4553_v40 = vsel %vm474_vm5, %v4508_v12, %v4552_v23  ;;  %v4444_v14 = vrot.slane %v4386_v52, %v12657_v33  ;;  %v4448_v28 = vrot.slane %v4385_v31, %v12657_v33 }
 0xa37   : > { %v4559_v47 = vsel %vm472_vm4, %v4536_v21, %v4558_v20  ;;  %v4554_v6 = vsel %vm476_vm6, %v4512_v30, %v4553_v40  ;;  %v4420_v49 = vrot.slane %v4353_v37, %v12657_v33  ;;  %v4440_v60 = vrot.slane %v4378_v4, %v12657_v33  ;;  %v16954_v40 = vld [vmem:[#allocation7_spill] sm:$0xff] }
 0xa38   : > { %v4560_v51 = vsel %vm474_vm5, %v4540_v42, %v4559_v47  ;;  %v4452_v15 = vrot.slane %v4387_v5, %v12657_v33  ;;  %v4555_v63 = vsel %vm478_vm7, %v4516_v34, %v4554_v6  ;;  %v4469_v30 = vsel %vm466_vm1, %v4412_v13, %v4408_v48  ;;  %v16955_v47 = vld [vmem:[#allocation8_spill] sm:$0xff] }
 0xa39   : > { %v4561_v1 = vsel %vm476_vm6, %v4544_v58, %v4560_v51  ;;  %v4476_v54 = vsel %vm466_vm1, %v4444_v14, %v4440_v60  ;;  %v4424_v31 = vrot.slane %v14247_v19, %v12657_v33  ;;  %v4456_v52 = vrot.slane %v14261_v57, %v12657_v33 }
 0xa3a   : > { %v4562_v45 = vsel %vm478_vm7, %v4548_v25, %v4561_v1  ;;  %v4470_v37 = vsel %vm468_vm2, %v4416_v46, %v4469_v30  ;;  %v4477_v4 = vsel %vm468_vm2, %v4448_v28, %v4476_v54  ;;  %v4428_v5 = vrot.slane %v14269_v22, %v12657_v33 }
 0xa3b   : > { %v12331_v12 = vpack.i.bf16 %v4562_v45, %v4555_v63  ;;  %v4460_v34 = vrot.slane %v4403_v27, %v12657_v33  ;;  %v4471_v29 = vsel %vm470_vm3, %v4420_v49, %v4470_v37  ;;  %v4478_v21 = vsel %vm470_vm3, %v4452_v15, %v4477_v4 }
 0xa3c   : > { %v4432_v19 = vrot.slane %v14250_v61, %v12657_v33  ;;  %v4464_v57 = vrot.slane %v14276_v9, %v12657_v33  ;;  %v4472_v59 = vsel %vm472_vm4, %v4424_v31, %v4471_v29  ;;  %v4479_v2 = vsel %vm472_vm4, %v4456_v52, %v4478_v21 }
 0xa3d   : > { %12332 = vrot.lane.b32.xlu0 %v12331_v12, %s12503_s25  ;;  %v4436_v42 = vrot.slane %v14273_v41, %v12657_v33  ;;  %v4468_v22 = vrot.slane %v4404_v16, %v12657_v33  ;;  %v4473_v27 = vsel %vm474_vm5, %v4428_v5, %v4472_v59  ;;  %v4480_v58 = vsel %vm474_vm5, %v4460_v34, %v4479_v2 }
 0xa3e   : > { %v4474_v38 = vsel %vm476_vm6, %v4432_v19, %v4473_v27  ;;  %v4481_v61 = vsel %vm476_vm6, %v4464_v57, %v4480_v58 }
 0xa3f   : > { %v4475_v26 = vsel %vm478_vm7, %v4436_v42, %v4474_v38  ;;  %v4482_v9 = vsel %vm478_vm7, %v4468_v22, %v4481_v61 }
 0xaaf   : > { %v12333_v25 = vpop.permute.xlu0 %12332 }
 0xab0   : > { %v12335_v23 = vunpack.i.h.bf16 %v12333_v25  ;;  %v12334_v20 = vunpack.i.l.bf16 %v12333_v25 }
 0xab2   : > { %v4569_v48 = vsel %vm573_vm8, %v4475_v26, %v12334_v20  ;;  %v4570_v41 = vsel %vm573_vm8, %v4482_v9, %v12335_v23 }
 0xab3   : > { %v12148_v16 = vpack.c.bf16 %v4570_v41, %v4569_v48 }
 0xab5   : > { %12149 = vmatprep.subr.bf16.mxu0 %v12148_v16 }
 0xab6   : > { %12151 = vmatpush3.bf16.msra.mxu0 %v12148_v16 }
 0xab7   : > { %12153 = vmatprep.subr.bf16.mxu0 %v16954_v40 }
 0xab9   : > { %11905 = vmatmul.mubr.msk.f32.vlgmr.msra.gmra.mrb[20].mxu0 %vm573_vm8, %v13858_v56 }
 0xaba   : > { %11907 = vmatprep.mubr.msk.f32.mxu0 %vm573_vm8, %v13869_v8  ;;  %12155 = vmatpush3.bf16.msra.mxu0 %v16954_v40  ;;  %v16956_v8 = vld [vmem:[#allocation3_spill] sm:$0xff] }
 0xabb   : > { %12157 = vmatprep.subr.bf16.mxu0 %v16955_v47 }
 0xabd   : > { %11908 = vmatmul.mubr.msk.f32.gmra.mrb[22].mxu0 %vm573_vm8, %v13876_v3 }
 0xabe   : > { %11914 = vmatprep.mubr.msk.f32.mxu0 %vm573_vm8, %v14229_v11 }
 0xac1   : > { %11915 = vmatmul.mubr.msk.f32.vlgmr.msra.gmra.mrb[24].mxu0 %vm573_vm8, %v14225_v7 }
 0xac2   : > { %11917 = vmatprep.mubr.msk.f32.mxu0 %vm573_vm8, %v14254_v10  ;;  %12159 = vmatpush3.bf16.msra.mxu0 %v16955_v47 }
 0xac5   : > { %11918 = vmatmul.mubr.msk.f32.gmra.mrb[26].mxu0 %vm573_vm8, %v14243_v39 }
 0xb8c   : > { %v11906_v56 = vpop.f32.mrb[20].mxu0 }
 0xb8d   : > { %v4827_v13 = vrot.slane %v11906_v56, %v16956_v8  ;;  %v4637_v46 = vpop.f32.mrb[21].mxu0  ;;  %v4820_v51 = vcombine.high %v11906_v56, %v11906_v56 }
 0xb8e   : > { %v4778_v3 = vrot.slane %v4637_v46, %v16956_v8  ;;  %v4771_v31 = vcombine.high %v4637_v46, %v4637_v46 }
 0xb8f   : > { %v4835_v6 = vcombine.high %v4827_v13, %v4827_v13  ;;  %v14379_v11 = vrot.slane %v4827_v13, %v16956_v8  ;;  %v4834_v49 = vrot.slane %v4820_v51, %v16956_v8 }
 0xb90   : > { %v4786_v7 = vcombine.high %v4778_v3, %v4778_v3  ;;  %v14381_v14 = vpop.f32.mrb[22].mxu0  ;;  %v14389_v39 = vrot.slane %v4778_v3, %v16956_v8  ;;  %v4785_v19 = vrot.slane %v4771_v31, %v16956_v8 }
 0xb91   : > { %v14384_v10 = vrot.slane %v4835_v6, %v16956_v8  ;;  %v14386_v28 = vpop.f32.mrb[23].mxu0  ;;  %v4920_v1 = vrot.slane %v14379_v11, %v12657_v33  ;;  %v14407_v12 = vcombine.high %v14379_v11, %v14379_v11  ;;  %v4836_v54 = vcombine.high %v4834_v49, %v4834_v49 }
 0xb92   : > { %v14395_v60 = vrot.slane %v4786_v7, %v16956_v8  ;;  %v4888_v30 = vrot.slane %v14389_v39, %v12657_v33  ;;  %v14424_v34 = vrot.slane %v4834_v49, %v16956_v8  ;;  %v14438_v59 = vcombine.high %v14389_v39, %v14389_v39 }
 0xb93   : > { %v4924_v63 = vrot.slane %v14384_v10, %v12657_v33  ;;  %4965 = vrot.lane.b32.xlu1 %v4920_v1, %s12505_s7  ;;  %v14420_v5 = vcombine.high %v14384_v10, %v14384_v10  ;;  %v4928_v29 = vrot.slane %v14407_v12, %v12657_v33  ;;  %v14429_v21 = vrot.slane %v4836_v54, %v16956_v8 }
 0xb94   : > { %v14397_v15 = vpop.f32.mrb[24].mxu0  ;;  %v4892_v37 = vrot.slane %v14395_v60, %v12657_v33  ;;  %v4936_v2 = vrot.slane %v14424_v34, %v12657_v33  ;;  %v4787_v42 = vcombine.high %v4785_v19, %v4785_v19  ;;  %v14446_v27 = vcombine.high %v14395_v60, %v14395_v60 }
 0xb95   : > { %v14402_v45 = vpop.f32.mrb[25].mxu0  ;;  %4967 = vrot.lane.b32.xlu0 %v4924_v63, %s12505_s7  ;;  %v4932_v57 = vrot.slane %v14420_v5, %v12657_v33  ;;  %v4940_v22 = vrot.slane %v14429_v21, %v12657_v33  ;;  %v5268_v58 = vrot.slane %v14381_v14, %v16956_v8  ;;  %v14453_v38 = vrot.slane %v4785_v19, %v16956_v8 }
 0xb96   : > { %v4896_v61 = vrot.slane %v14438_v59, %v12657_v33  ;;  %v14458_v26 = vrot.slane %v4787_v42, %v16956_v8  ;;  %v4900_v9 = vrot.slane %v14446_v27, %v12657_v33  ;;  %v14468_v20 = vcombine.high %v14424_v34, %v14424_v34 }
 0xb97   : > { %4949 = vrot.lane.b32.xlu1 %v4888_v30, %s12505_s7  ;;  %v5276_v25 = vcombine.high %v5268_v58, %v5268_v58  ;;  %v4904_v23 = vrot.slane %v14453_v38, %v12657_v33  ;;  %v14474_v41 = vcombine.high %v14429_v21, %v14429_v21  ;;  %v14477_v16 = vrot.slane %v5268_v58, %v16956_v8 }
 0xb98   : > { %v14411_v52 = vpop.f32.mrb[26].mxu0  ;;  %v4908_v48 = vrot.slane %v14458_v26, %v12657_v33  ;;  %v4944_v13 = vrot.slane %v14468_v20, %v12657_v33  ;;  %v5219_v46 = vrot.slane %v14386_v28, %v16956_v8  ;;  %v14498_v7 = vcombine.high %v14453_v38, %v14453_v38 }
 0xb99   : > { %v14416_v4 = vpop.f32.mrb[27].mxu0  ;;  %4951 = vrot.lane.b32.xlu0 %v4892_v37, %s12505_s7  ;;  %v14481_v56 = vrot.slane %v5276_v25, %v16956_v8  ;;  %v4948_v3 = vrot.slane %v14474_v41, %v12657_v33  ;;  %v5361_v6 = vrot.slane %v14477_v16, %v12657_v33  ;;  %v5261_v1 = vcombine.high %v14381_v14, %v14381_v14 }
 0xb9a   : > { %v5227_v49 = vcombine.high %v5219_v46, %v5219_v46  ;;  %v14504_v63 = vcombine.high %v14458_v26, %v14458_v26  ;;  %v14509_v30 = vrot.slane %v5219_v46, %v16956_v8  ;;  %v4912_v54 = vrot.slane %v14498_v7, %v12657_v33 }
 0xb9b   : > { %4969 = vrot.lane.b32.xlu1 %v4928_v29, %s12505_s7  ;;  %v5365_v51 = vrot.slane %v14481_v56, %v12657_v33  ;;  %v5275_v31 = vrot.slane %v5261_v1, %v16956_v8  ;;  %v14523_v29 = vcombine.high %v14477_v16, %v14477_v16 }
 0xb9c   : > { %v14515_v37 = vrot.slane %v5227_v49, %v16956_v8  ;;  %v4916_v14 = vrot.slane %v14504_v63, %v12657_v33  ;;  %v5329_v19 = vrot.slane %v14509_v30, %v12657_v33 }
 0xb9d   : > { %4971 = vrot.lane.b32.xlu0 %v4932_v57, %s12505_s7  ;;  %v5277_v57 = vcombine.high %v5275_v31, %v5275_v31  ;;  %v14538_v58 = vrot.slane %v5275_v31, %v16956_v8 }
 0xb9e   : > { %v5333_v42 = vrot.slane %v14515_v37, %v12657_v33 }
 0xb9f   : > { %4973 = vrot.lane.b32.xlu1 %v4936_v2, %s12505_s7  ;;  %v5212_v2 = vcombine.high %v14386_v28, %v14386_v28 }
 0xba1   : > { %4975 = vrot.lane.b32.xlu0 %v4940_v22, %s12505_s7  ;;  %v14533_v22 = vcombine.high %v14481_v56, %v14481_v56  ;;  %v5226_v28 = vrot.slane %v5212_v2, %v16956_v8  ;;  %v14594_v2 = vcombine.high %v14538_v58, %v14538_v58 }
 0xba3   : > { %4953 = vrot.lane.b32.xlu1 %v4896_v61, %s12505_s7  ;;  %v5369_v61 = vrot.slane %v14523_v29, %v12657_v33  ;;  %v5373_v25 = vrot.slane %v14533_v22, %v12657_v33 }
 0xba5   : > { %4955 = vrot.lane.b32.xlu0 %v4900_v9, %s12505_s7  ;;  %v14543_v9 = vrot.slane %v5277_v57, %v16956_v8 }
 0xba7   : > { %4957 = vrot.lane.b32.xlu1 %v4904_v23, %s12505_s7  ;;  %v14552_v23 = vcombine.high %v14509_v30, %v14509_v30  ;;  %v5381_v46 = vrot.slane %v14543_v9, %v12657_v33 }
 0xba9   : > { %4959 = vrot.lane.b32.xlu0 %v4908_v48, %s12505_s7  ;;  %v5377_v48 = vrot.slane %v14538_v58, %v12657_v33 }
 0xbab   : > { %4977 = vrot.lane.b32.xlu1 %v4944_v13, %s12505_s7  ;;  %v5228_v13 = vcombine.high %v5226_v28, %v5226_v28 }
 0xbad   : > { %4979 = vrot.lane.b32.xlu0 %v4948_v3, %s12505_s7  ;;  %v14560_v3 = vcombine.high %v14515_v37, %v14515_v37  ;;  %v14570_v1 = vrot.slane %v5228_v13, %v16956_v8 }
 0xbaf   : > { %5406 = vrot.lane.b32.xlu1 %v5361_v6, %s12505_s7  ;;  %v14565_v6 = vrot.slane %v5226_v28, %v16956_v8  ;;  %v5341_v49 = vrot.slane %v14560_v3, %v12657_v33  ;;  %v5385_v28 = vrot.slane %v14594_v2, %v12657_v33 }
 0xbb1   : > { %5408 = vrot.lane.b32.xlu0 %v5365_v51, %s12505_s7  ;;  %v5337_v51 = vrot.slane %v14552_v23, %v12657_v33  ;;  %v14580_v31 = vcombine.high %v14565_v6, %v14565_v6 }
 0xbb3   : > { %4961 = vrot.lane.b32.xlu1 %v4912_v54, %s12505_s7  ;;  %v5345_v54 = vrot.slane %v14565_v6, %v12657_v33  ;;  %v5353_v57 = vrot.slane %v14580_v31, %v12657_v33 }
 0xbb5   : > { %4963 = vrot.lane.b32.xlu0 %v4916_v14, %s12505_s7  ;;  %v5349_v14 = vrot.slane %v14570_v1, %v12657_v33 }
 0xbb7   : > { %5390 = vrot.lane.b32.xlu1 %v5329_v19, %s12505_s7  ;;  %v14586_v19 = vcombine.high %v14570_v1, %v14570_v1 }
 0xbb9   : > { %5392 = vrot.lane.b32.xlu0 %v5333_v42, %s12505_s7  ;;  %v5357_v42 = vrot.slane %v14586_v19, %v12657_v33 }
 0xbbb   : > { %5410 = vrot.lane.b32.xlu1 %v5369_v61, %s12505_s7  ;;  %v14600_v61 = vcombine.high %v14543_v9, %v14543_v9 }
 0xbbd   : > { %5412 = vrot.lane.b32.xlu0 %v5373_v25, %s12505_s7  ;;  %v5389_v25 = vrot.slane %v14600_v61, %v12657_v33 }
 0xbbf   : > { %5414 = vrot.lane.b32.xlu1 %v5377_v48, %s12505_s7 }
 0xbc1   : > { %5416 = vrot.lane.b32.xlu0 %v5381_v46, %s12505_s7 }
 0xbc3   : > { %5394 = vrot.lane.b32.xlu1 %v5337_v51, %s12505_s7 }
 0xbc5   : > { %5396 = vrot.lane.b32.xlu0 %v5341_v49, %s12505_s7 }
 0xbc7   : > { %5398 = vrot.lane.b32.xlu1 %v5345_v54, %s12505_s7 }
 0xbc9   : > { %5400 = vrot.lane.b32.xlu0 %v5349_v14, %s12505_s7 }
 0xbcb   : > { %5402 = vrot.lane.b32.xlu1 %v5353_v57, %s12505_s7 }
 0xbcd   : > { %5404 = vrot.lane.b32.xlu0 %v5357_v42, %s12505_s7 }
 0xbcf   : > { %5418 = vrot.lane.b32.xlu1 %v5385_v28, %s12505_s7 }
 0xbd1   : > { %5420 = vrot.lane.b32.xlu0 %v5389_v25, %s12505_s7 }
 0xbd3   : > { %4753 = vrot.lane.b32.xlu1 %v14402_v45, %s12506_s18 }
 0xbd5   : > { %4757 = vrot.lane.b32.xlu0 %v14416_v4, %s12506_s18 }
 0xbd7   : > { %4755 = vrot.lane.b32.xlu1 %v14397_v15, %s12506_s18 }
 0xbd9   : > { %4759 = vrot.lane.b32.xlu0 %v14411_v52, %s12506_s18 }
 0xc05   : > { %v4966_v48 = vpop.permute.xlu1 %4965 }
 0xc07   : > { %v4968_v13 = vpop.permute.xlu0 %4967 }
 0xc09   : > { %v4950_v46 = vpop.permute.xlu1 %4949 }
 0xc0a   : > { %v4997_v4 = vsel %vm998_vm9, %v14389_v39, %v4950_v46 }
 0xc0b   : > { %v4952_v51 = vpop.permute.xlu0 %4951 }
 0xc0c   : > { %v4998_v45 = vsel %vm998_vm9, %v14395_v60, %v4952_v51 }
 0xc0d   : > { %v4970_v49 = vpop.permute.xlu1 %4969  ;;  %v5029_v28 = vcombine.low %v4997_v4, %v4998_v45 }
 0xc0f   : > { %v4972_v54 = vpop.permute.xlu0 %4971  ;;  %v5037_v53 = vrot.slane %v5029_v28, %v12603_v17 }
 0xc11   : > { %v4974_v14 = vpop.permute.xlu1 %4973 }
 0xc13   : > { %v4976_v57 = vpop.permute.xlu0 %4975 }
 0xc15   : > { %v4954_v42 = vpop.permute.xlu1 %4953 }
 0xc16   : > { %v4999_v52 = vsel %vm998_vm9, %v14438_v59, %v4954_v42  ;;  %v5008_v59 = vsel %vm998_vm9, %v14420_v5, %v4972_v54 }
 0xc17   : > { %v4956_v15 = vpop.permute.xlu0 %4955 }
 0xc18   : > { %v5000_v25 = vsel %vm998_vm9, %v14446_v27, %v4956_v15  ;;  %v5006_v27 = vsel %vm998_vm9, %v14384_v10, %v4968_v13 }
 0xc19   : > { %v5030_v47 = vcombine.low %v4999_v52, %v5000_v25  ;;  %v4958_v40 = vpop.permute.xlu1 %4957 }
 0xc1a   : > { %v5001_v42 = vsel %vm998_vm9, %v14453_v38, %v4958_v40 }
 0xc1b   : > { %v5044_v8 = vrot.slane %v5030_v47, %v12603_v17  ;;  %v4960_v62 = vpop.permute.xlu0 %4959  ;;  %v5007_v47 = vsel %vm998_vm9, %v14407_v12, %v4970_v49 }
 0xc1c   : > { %v5002_v4 = vsel %vm998_vm9, %v14458_v26, %v4960_v62  ;;  %v5010_v62 = vsel %vm998_vm9, %v14429_v21, %v4976_v57 }
 0xc1d   : > { %v5045_v60 = vcombine.low %v5037_v53, %v5044_v8  ;;  %v4978_v51 = vpop.permute.xlu1 %4977  ;;  %v5005_v53 = vsel %vm998_vm9, %v14379_v11, %v4966_v48  ;;  %v5064_v8 = vcombine.low %v5007_v47, %v5008_v59  ;;  %v5046_v15 = vcombine.low %v5001_v42, %v5002_v4  ;;  %v14669_v4 = vld [vmem:[%s16894_s2] sm:$0xff] }
 0xc1e   : > { %v5063_v28 = vcombine.low %v5005_v53, %v5006_v27  ;;  %v5011_v12 = vsel %vm998_vm9, %v14468_v20, %v4978_v51  ;;  %v5009_v48 = vsel %vm998_vm9, %v14424_v34, %v4974_v14 }
 0xc1f   : > { %11924 = vmatprep.mubr.msk.f32.mxu0 %vm573_vm8, %v5045_v60  ;;  %v4980_v39 = vpop.permute.xlu0 %4979  ;;  %v5080_v49 = vcombine.low %v5009_v48, %v5010_v62  ;;  %v5054_v21 = vrot.slane %v5046_v15, %v12603_v17 }
 0xc20   : > { %v5012_v5 = vsel %vm998_vm9, %v14474_v41, %v4980_v39  ;;  %v5078_v41 = vrot.slane %v5064_v8, %v12603_v17  ;;  %v5071_v52 = vrot.slane %v5063_v28, %v12603_v17 }
 0xc21   : > { %v14629_v46 = vpop.permute.xlu1 %5406  ;;  %v5081_v40 = vcombine.low %v5011_v12, %v5012_v5  ;;  %v5088_v51 = vrot.slane %v5080_v49, %v12603_v17 }
 0xc23   : > { %v5409_v45 = vpop.permute.xlu0 %5408 }
 0xc25   : > { %v4962_v54 = vpop.permute.xlu1 %4961 }
 0xc26   : > { %v5003_v11 = vsel %vm998_vm9, %v14498_v7, %v4962_v54  ;;  %v5095_v7 = vrot.slane %v5081_v40, %v12603_v17 }
 0xc27   : > { %v4964_v10 = vpop.permute.xlu0 %4963 }
 0xc28   : > { %v5004_v26 = vsel %vm998_vm9, %v14504_v63, %v4964_v10  ;;  %v5079_v63 = vcombine.low %v5071_v52, %v5078_v41  ;;  %v5096_v34 = vcombine.low %v5088_v51, %v5095_v7  ;;  %v16957_v51 = vld [vmem:[#allocation5_spill] sm:$0xff] }
 0xc29   : > { %v5047_v38 = vcombine.low %v5003_v11, %v5004_v26  ;;  %v5391_v13 = vpop.permute.xlu1 %5390  ;;  %v5447_v11 = vsel %vm998_vm9, %v14481_v56, %v5409_v45 }
 0xc2a   : > { %v5438_v47 = vsel %vm998_vm9, %v14509_v30, %v5391_v13 }
 0xc2b   : > { %v5061_v57 = vrot.slane %v5047_v38, %v12603_v17  ;;  %v5393_v20 = vpop.permute.xlu0 %5392 }
 0xc2c   : > { %v5439_v27 = vsel %vm998_vm9, %v14515_v37, %v5393_v20 }
 0xc2d   : > { %v5062_v25 = vcombine.low %v5054_v21, %v5061_v57  ;;  %v5411_v60 = vpop.permute.xlu1 %5410  ;;  %v5470_v8 = vcombine.low %v5438_v47, %v5439_v27 }
 0xc2f   : > { %11925 = vmatmul.mubr.msk.f32.vlgmr.msra.gmra.mrb[28].mxu0 %vm573_vm8, %v5062_v25  ;;  %v5413_v39 = vpop.permute.xlu0 %5412  ;;  %v5478_v15 = vrot.slane %v5470_v8, %v12603_v17 }
 0xc30   : > { %11927 = vmatprep.mubr.msk.f32.mxu0 %vm573_vm8, %v5079_v63  ;;  %v5449_v10 = vsel %vm998_vm9, %v14533_v22, %v5413_v39  ;;  %v5446_v22 = vsel %vm998_vm9, %v14477_v16, %v14629_v46 }
 0xc31   : > { %v5415_v14 = vpop.permute.xlu1 %5414  ;;  %v5504_v48 = vcombine.low %v5446_v22, %v5447_v11 }
 0xc32   : > { %v5450_v16 = vsel %vm998_vm9, %v14538_v58, %v5415_v14 }
 0xc33   : > { %11928 = vmatmul.mubr.msk.f32.gmra.mrb[30].mxu0 %vm573_vm8, %v5096_v34  ;;  %v5417_v59 = vpop.permute.xlu0 %5416 }
 0xc34   : > { %11944 = vmatprep.mubr.msk.f32.mxu0 %vm573_vm8, %v14669_v4  ;;  %v5451_v56 = vsel %vm998_vm9, %v14543_v9, %v5417_v59  ;;  %v5512_v9 = vrot.slane %v5504_v48, %v12603_v17 }
 0xc35   : > { %v5395_v53 = vpop.permute.xlu1 %5394  ;;  %v5521_v49 = vcombine.low %v5450_v16, %v5451_v56 }
 0xc36   : > { %v5440_v5 = vsel %vm998_vm9, %v14552_v23, %v5395_v53  ;;  %v5448_v23 = vsel %vm998_vm9, %v14523_v29, %v5411_v60 }
 0xc37   : > { %v5397_v42 = vpop.permute.xlu0 %5396  ;;  %v5505_v26 = vcombine.low %v5448_v23, %v5449_v10  ;;  %v5529_v58 = vrot.slane %v5521_v49, %v12603_v17 }
 0xc38   : > { %v5441_v37 = vsel %vm998_vm9, %v14560_v3, %v5397_v42 }
 0xc39   : > { %v5471_v54 = vcombine.low %v5440_v5, %v5441_v37  ;;  %v5399_v28 = vpop.permute.xlu1 %5398  ;;  %v5519_v13 = vrot.slane %v5505_v26, %v12603_v17 }
 0xc3a   : > { %v5442_v40 = vsel %vm998_vm9, %v14565_v6, %v5399_v28 }
 0xc3b   : > { %v5485_v62 = vrot.slane %v5471_v54, %v12603_v17  ;;  %v5401_v12 = vpop.permute.xlu0 %5400  ;;  %v5520_v25 = vcombine.low %v5512_v9, %v5519_v13  ;;  %v16958_v13 = vld [vmem:[#allocation4_spill] sm:$0xff] }
 0xc3c   : > { %v5443_v30 = vsel %vm998_vm9, %v14570_v1, %v5401_v12  ;;  %v5655_v16 = vmul.f32 %v14221_v44, %v16958_v13 }
 0xc3d   : > { %v5486_v3 = vcombine.low %v5478_v15, %v5485_v62  ;;  %v5403_v38 = vpop.permute.xlu1 %5402  ;;  %v5487_v41 = vcombine.low %v5442_v40, %v5443_v30 }
 0xc3e   : > { %v5444_v29 = vsel %vm998_vm9, %v14580_v31, %v5403_v38 }
 0xc3f   : > { %11934 = vmatprep.mubr.msk.f32.mxu1 %vm573_vm8, %v5486_v3  ;;  %v5405_v1 = vpop.permute.xlu0 %5404  ;;  %v5495_v21 = vrot.slane %v5487_v41, %v12603_v17 }
 0xc40   : > { %v5445_v45 = vsel %vm998_vm9, %v14586_v19, %v5405_v1 }
 0xc41   : > { %v5488_v6 = vcombine.low %v5444_v29, %v5445_v45  ;;  %v5419_v46 = vpop.permute.xlu1 %5418 }
 0xc42   : > { %v5452_v31 = vsel %vm998_vm9, %v14594_v2, %v5419_v46 }
 0xc43   : > { %v5502_v57 = vrot.slane %v5488_v6, %v12603_v17  ;;  %v5421_v20 = vpop.permute.xlu0 %5420 }
 0xc44   : > { %v5453_v19 = vsel %vm998_vm9, %v14600_v61, %v5421_v20  ;;  %v5661_v20 = vsub.f32 1.0, %v14239_v36 }
 0xc45   : > { %v5503_v52 = vcombine.low %v5495_v21, %v5502_v57  ;;  %v5522_v7 = vcombine.low %v5452_v31, %v5453_v19  ;;  %v4754_v53 = vpop.permute.xlu1 %4753  ;;  %v5660_v21 = vsub.f32 1.0, %v14219_v32 }
 0xc46   : > { %v4765_v15 = vadd.f32 %v14207_v0, %v4754_v53 }
 0xc47   : > { %v5536_v63 = vrot.slane %v5522_v7, %v12603_v17  ;;  %11935 = vmatmul.mubr.msk.f32.vlgmr.msra.gmra.mrb[12].mxu1 %vm573_vm8, %v5503_v52  ;;  %v4758_v8 = vpop.permute.xlu0 %4757  ;;  %v16960_v7 = vld [vmem:[#allocation10_spill] sm:$0xff] }
 0xc48   : > { %11937 = vmatprep.mubr.msk.f32.mxu1 %vm573_vm8, %v5520_v25  ;;  %12171 = vmatpush3.bf16.msra.mxu1 %v16945_v55  ;;  %v4767_v30 = vadd.f32 %v14215_v43, %v4758_v8  ;;  %v16961_v25 = vld [vmem:[#allocation11_spill] sm:$0xff] }
 0xc49   : > { %v5537_v60 = vcombine.low %v5529_v58, %v5536_v63  ;;  %12173 = vmatprep.subr.bf16.mxu1 %v16957_v51  ;;  %v4756_v42 = vpop.permute.xlu1 %4755  ;;  %v5657_v58 = vmul.f32 %v14239_v36, %v16961_v25 }
 0xc4a   : > { %v4766_v11 = vadd.f32 %v14204_v24, %v4756_v42 }
 0xc4b   : > { %11938 = vmatmul.mubr.msk.f32.gmra.mrb[14].mxu1 %vm573_vm8, %v5537_v60  ;;  %v4760_v5 = vpop.permute.xlu0 %4759 }
 0xc4c   : > { %v4768_v22 = vadd.f32 %v14212_v50, %v4760_v5  ;;  %v5659_v50 = vsub.f32 1.0, %v14221_v44  ;;  %v5656_v44 = vmul.f32 %v14219_v32, %v16960_v7 }
 0xd02   : > { %v11926_v2 = vpop.f32.mrb[28].mxu0 }
 0xd03   : > { %5196 = vrot.lane.b32.xlu1 %v11926_v2, %s12506_s18  ;;  %v5171_v61 = vpop.f32.mrb[29].mxu0 }
 0xd06   : > { %v11929_v39 = vpop.f32.mrb[30].mxu0 }
 0xd07   : > { %5194 = vrot.lane.b32.xlu1 %v5171_v61, %s12506_s18  ;;  %5200 = vrot.lane.b32.xlu0 %v11929_v39, %s12506_s18  ;;  %v5181_v34 = vpop.f32.mrb[31].mxu0 }
 0xd0b   : > { %5198 = vrot.lane.b32.xlu0 %v5181_v34, %s12506_s18  ;;  %v16964_v34 = vld [vmem:[#allocation12_spill] sm:$0xff] }
 0xd1a   : > { %v11936_v14 = vpop.f32.mrb[12].mxu1 }
 0xd1b   : > { %v5612_v59 = vpop.f32.mrb[13].mxu1 }
 0xd1c   : > { %5635 = vrot.lane.b32.xlu1 %v5612_v59, %s12506_s18 }
 0xd1e   : > { %v11939_v27 = vpop.f32.mrb[14].mxu1 }
 0xd1f   : > { %v5622_v47 = vpop.f32.mrb[15].mxu1 }
 0xd20   : > { %5637 = vrot.lane.b32.xlu1 %v11936_v14, %s12506_s18  ;;  %5639 = vrot.lane.b32.xlu0 %v5622_v47, %s12506_s18  ;;  %v5658_v14 = vmul.f32 %v14233_v35, %v16964_v34 }
 0xd24   : > { %5641 = vrot.lane.b32.xlu0 %v11939_v27, %s12506_s18  ;;  %v5662_v27 = vsub.f32 1.0, %v14233_v35 }
 0xd75   : > { %v5197_v37 = vpop.permute.xlu1 %5196 }
 0xd76   : > { %v5207_v3 = vadd.f32 %v5197_v37, %v4766_v11 }
 0xd79   : > { %v5201_v54 = vpop.permute.xlu0 %5200  ;;  %v5195_v28 = vpop.permute.xlu1 %5194 }
 0xd7a   : > { %v5206_v10 = vadd.f32 %v5195_v28, %v4765_v15  ;;  %v5209_v48 = vadd.f32 %v5201_v54, %v4768_v22 }
 0xd7d   : > { %v5199_v62 = vpop.permute.xlu0 %5198 }
 0xd7e   : > { %v5208_v26 = vadd.f32 %v5199_v62, %v4767_v30 }
 0xd8e   : > { %v5636_v12 = vpop.permute.xlu1 %5635 }
 0xd8f   : > { %v5647_v23 = vadd.f32 %v5636_v12, %v5206_v10 }
 0xd91   : > { %12390 = vtanh.f32 %v5647_v23 }
 0xd92   : > { %v5638_v40 = vpop.permute.xlu1 %5637  ;;  %v5640_v38 = vpop.permute.xlu0 %5639 }
 0xd93   : > { %v5648_v41 = vadd.f32 %v5638_v40, %v5207_v3  ;;  %v5649_v1 = vadd.f32 %v5640_v38, %v5208_v26 }
 0xd95   : > { %12392 = vtanh.f32 %v5648_v41 }
 0xd96   : > { %12394 = vtanh.f32 %v5649_v1  ;;  %v5642_v0 = vpop.permute.xlu0 %5641 }
 0xd97   : > { %v5650_v56 = vadd.f32 %v5642_v0, %v5209_v48 }
 0xd99   : > { %12396 = vtanh.f32 %v5650_v56 }
 0xd9b   : > { %v12391_v29 = vpop.eup %12390 }
 0xd9c   : > { %5667 = vrot.lane.b32.xlu1 %v12391_v29, %s12505_s7 }
 0xd9f   : > { %v12393_v24 = vpop.eup %12392 }
 0xda0   : > { %v12395_v43 = vpop.eup %12394  ;;  %5669 = vrot.lane.b32.xlu1 %v12393_v24, %s12505_s7 }
 0xda1   : > { %5671 = vrot.lane.b32.xlu0 %v12395_v43, %s12505_s7 }
 0xda3   : > { %v12397_v45 = vpop.eup %12396 }
 0xda5   : > { %5673 = vrot.lane.b32.xlu0 %v12397_v45, %s12505_s7 }
 0xe0e   : > { %v5668_v6 = vpop.permute.xlu1 %5667 }
 0xe0f   : > { %v5679_v46 = vmul.f32 %v5668_v6, %v5659_v50 }
 0xe11   : > { %v14737_v49 = vadd.f32 %v5679_v46, %v5655_v16 }
 0xe12   : > { %v5670_v57 = vpop.permute.xlu1 %5669 }
 0xe13   : > { %16959 = vst [vmem:[#allocation4_spill] sm:$0xff] %v14737_v49  ;;  %v5691_v9 = vcombine.high %v14737_v49, %v14737_v49  ;;  %v14745_v31 = vrot.slane %v14737_v49, %v12603_v17  ;;  %v5680_v19 = vmul.f32 %v5670_v57, %v5660_v21  ;;  %v5672_v52 = vpop.permute.xlu0 %5671 }
 0xe14   : > { %v5681_v63 = vmul.f32 %v5672_v52, %v5661_v20 }
 0xe15   : > { %v14752_v60 = vrot.slane %v5691_v9, %v12603_v17  ;;  %v14756_v2 = vcombine.high %v14745_v31, %v14745_v31  ;;  %v14758_v61 = vadd.f32 %v5680_v19, %v5656_v44  ;;  %v5762_v36 = vrot.slane %v14745_v31, %v12657_v33 }
 0xe16   : > { %v14760_v39 = vadd.f32 %v5681_v63, %v5657_v58  ;;  %v5846_v53 = vrot.slane %v14745_v31, %v12606_v18 }
 0xe17   : > { %16962 = vst [vmem:[#allocation10_spill] sm:$0xff] %v14758_v61  ;;  %v14766_v32 = vcombine.high %v14752_v60, %v14752_v60  ;;  %v5766_v59 = vrot.slane %v14756_v2, %v12657_v33  ;;  %v5674_v47 = vpop.permute.xlu0 %5673  ;;  %v5708_v8 = vcombine.high %v14758_v61, %v14758_v61  ;;  %v5715_v42 = vrot.slane %v14758_v61, %v12603_v17 }
 0xe18   : > { %16963 = vst [vmem:[#allocation11_spill] sm:$0xff] %v14760_v39  ;;  %v5725_v5 = vcombine.high %v14760_v39, %v14760_v39  ;;  %v5770_v37 = vrot.slane %v14752_v60, %v12657_v33  ;;  %v5850_v54 = vrot.slane %v14756_v2, %v12606_v18  ;;  %v5732_v35 = vrot.slane %v14760_v39, %v12603_v17 }
 0xe19   : > { %v5682_v28 = vmul.f32 %v5674_v47, %v5662_v27  ;;  %v5854_v15 = vrot.slane %v14752_v60, %v12606_v18  ;;  %v14790_v10 = vrot.slane %v5708_v8, %v12603_v17  ;;  %v5723_v12 = vcombine.high %v5715_v42, %v5715_v42 }
 0xe1a   : > { %v5739_v62 = vrot.slane %v5725_v5, %v12603_v17  ;;  %v5740_v30 = vcombine.high %v5732_v35, %v5732_v35  ;;  %v5774_v23 = vrot.slane %v14766_v32, %v12657_v33  ;;  %v5823_v3 = vsel %vm466_vm1, %v5766_v59, %v5762_v36 }
 0xe1b   : > { %v14793_v11 = vadd.f32 %v5682_v28, %v5658_v14  ;;  %v5794_v40 = vrot.slane %v5732_v35, %v12657_v33  ;;  %v5724_v38 = vcombine.high %v14790_v10, %v14790_v10  ;;  %v5778_v22 = vrot.slane %v5715_v42, %v12657_v33 }
 0xe1c   : > { %v5741_v26 = vcombine.high %v5739_v62, %v5739_v62  ;;  %v5798_v41 = vrot.slane %v5740_v30, %v12657_v33  ;;  %v5802_v1 = vrot.slane %v5739_v62, %v12657_v33  ;;  %v5782_v56 = vrot.slane %v5723_v12, %v12657_v33 }
 0xe1d   : > { %16965 = vst [vmem:[#allocation12_spill] sm:$0xff] %v14793_v11  ;;  %v5742_v48 = vcombine.high %v14793_v11, %v14793_v11  ;;  %v5749_v0 = vrot.slane %v14793_v11, %v12603_v17  ;;  %v5786_v29 = vrot.slane %v14790_v10, %v12657_v33  ;;  %v5790_v24 = vrot.slane %v5724_v38, %v12657_v33 }
 0xe1e   : > { %v5824_v43 = vsel %vm468_vm2, %v5770_v37, %v5823_v3  ;;  %v5806_v13 = vrot.slane %v5741_v26, %v12657_v33  ;;  %v5878_v16 = vrot.slane %v5732_v35, %v12606_v18  ;;  %v5830_v57 = vsel %vm466_vm1, %v5798_v41, %v5794_v40 }
 0xe1f   : > { %v5756_v45 = vrot.slane %v5742_v48, %v12603_v17  ;;  %v5825_v50 = vsel %vm470_vm3, %v5774_v23, %v5824_v43  ;;  %v5757_v6 = vcombine.high %v5749_v0, %v5749_v0  ;;  %v5810_v21 = vrot.slane %v5749_v0, %v12657_v33 }
 0xe20   : > { %v5826_v46 = vsel %vm472_vm4, %v5778_v22, %v5825_v50  ;;  %v5882_v20 = vrot.slane %v5740_v30, %v12606_v18  ;;  %v5831_v44 = vsel %vm468_vm2, %v5802_v1, %v5830_v57  ;;  %v5858_v25 = vrot.slane %v14766_v32, %v12606_v18  ;;  %v16966_v50 = vld [vmem:[#allocation6_spill] sm:$0xff]  ;;  %v16967_v57 = vld [vmem:[#allocation3_spill] sm:$0xff] }
 0xe21   : > { %v5827_v9 = vsel %vm474_vm5, %v5782_v56, %v5826_v46  ;;  %v5758_v31 = vcombine.high %v5756_v45, %v5756_v45  ;;  %v5814_v19 = vrot.slane %v5757_v6, %v12657_v33  ;;  %v5818_v7 = vrot.slane %v5756_v45, %v12657_v33  ;;  %v14911_v46 = vld [vmem:[%s16894_s2 + $0x18] sm:$0xff] }
 0xe22   : > { %v5828_v52 = vsel %vm476_vm6, %v5786_v29, %v5827_v9  ;;  %v5832_v60 = vsel %vm470_vm3, %v5806_v13, %v5831_v44  ;;  %v5862_v2 = vrot.slane %v5715_v42, %v12606_v18  ;;  %v5886_v34 = vrot.slane %v5739_v62, %v12606_v18 }
 0xe23   : > { %v5829_v58 = vsel %vm478_vm7, %v5790_v24, %v5828_v52  ;;  %v5822_v63 = vrot.slane %v5758_v31, %v12657_v33  ;;  %v5833_v14 = vsel %vm472_vm4, %v5810_v21, %v5832_v60  ;;  %v5866_v36 = vrot.slane %v5723_v12, %v12606_v18 }
 0xe24   : > { %5837 = vrot.lane.b32.xlu1 %v5829_v58, %s12505_s7  ;;  %v5907_v59 = vsel %vm466_vm1, %v5850_v54, %v5846_v53  ;;  %v5834_v32 = vsel %vm474_vm5, %v5814_v19, %v5833_v14  ;;  %v5870_v27 = vrot.slane %v14790_v10, %v12606_v18  ;;  %v5890_v8 = vrot.slane %v5741_v26, %v12606_v18 }
 0xe25   : > { %v5908_v47 = vsel %vm468_vm2, %v5854_v15, %v5907_v59  ;;  %v5835_v42 = vsel %vm476_vm6, %v5818_v7, %v5834_v32  ;;  %v5874_v5 = vrot.slane %v5724_v38, %v12606_v18  ;;  %v5894_v35 = vrot.slane %v5749_v0, %v12606_v18 }
 0xe26   : > { %v5909_v37 = vsel %vm470_vm3, %v5858_v25, %v5908_v47  ;;  %v5836_v28 = vsel %vm478_vm7, %v5822_v63, %v5835_v42  ;;  %v5898_v54 = vrot.slane %v5757_v6, %v12606_v18  ;;  %v5914_v10 = vsel %vm466_vm1, %v5882_v20, %v5878_v16  ;;  %v14893_v6 = vld [vmem:[%s16894_s2 + $0x8] sm:$0xff]  ;;  %v14904_v16 = vld [vmem:[%s16894_s2 + $0x10] sm:$0xff] }
 0xe27   : > { %v5910_v53 = vsel %vm472_vm4, %v5862_v2, %v5909_v37  ;;  %5839 = vrot.lane.b32.xlu0 %v5836_v28, %s12505_s7  ;;  %v5902_v62 = vrot.slane %v5756_v45, %v12606_v18  ;;  %v5915_v12 = vsel %vm468_vm2, %v5886_v34, %v5914_v10  ;;  %v5906_v23 = vrot.slane %v5758_v31, %v12606_v18 }
 0xe28   : > { %6018 = vrot.lane.b32.xlu1 %v14737_v49, %s12505_s7  ;;  %v5911_v15 = vsel %vm474_vm5, %v5866_v36, %v5910_v53  ;;  %v5916_v3 = vsel %vm470_vm3, %v5890_v8, %v5915_v12 }
 0xe29   : > { %v5912_v30 = vsel %vm476_vm6, %v5870_v27, %v5911_v15  ;;  %v5917_v40 = vsel %vm472_vm4, %v5894_v35, %v5916_v3 }
 0xe2a   : > { %v5913_v26 = vsel %vm478_vm7, %v5874_v5, %v5912_v30  ;;  %v5918_v38 = vsel %vm474_vm5, %v5898_v54, %v5917_v40 }
 0xe2b   : > { %6020 = vrot.lane.b32.xlu0 %v14758_v61, %s12505_s7  ;;  %v5919_v22 = vsel %vm476_vm6, %v5902_v62, %v5918_v38 }
 0xe2c   : > { %6022 = vrot.lane.b32.xlu1 %v14760_v39, %s12505_s7  ;;  %v5920_v41 = vsel %vm478_vm7, %v5906_v23, %v5919_v22 }
 0xe2f   : > { %6024 = vrot.lane.b32.xlu0 %v14793_v11, %s12505_s7 }
 0xe96   : > { %v5838_v1 = vpop.permute.xlu1 %5837 }
 0xe97   : > { %v5923_v48 = vsel %vm573_vm8, %v5838_v1, %v5913_v26 }
 0xe98   : > { %11499 = vst.msk [vmem:[%s12581_s17 + $0x10] sm:$0xff] %vm3253_vm10, %v5923_v48 }
 0xe99   : > { %v5840_v56 = vpop.permute.xlu0 %5839 }
 0xe9a   : > { %v14873_v0 = vpop.permute.xlu1 %6018  ;;  %v5924_v29 = vsel %vm573_vm8, %v5840_v56, %v5920_v41 }
 0xe9b   : > { %11954 = vmatprep.mubr.msk.f32.mxu1 %vm573_vm8, %v14873_v0  ;;  %11500 = vst.msk [vmem:[%s12581_s17 + $0x18] sm:$0xff] %vm3253_vm10, %v5924_v29  ;;  %v12164_v24 = vpack.c.bf16 %v5924_v29, %v5923_v48 }
 0xe9d   : > { %12165 = vmatprep.subr.bf16.mxu0 %v12164_v24  ;;  %v14882_v45 = vpop.permute.xlu0 %6020 }
 0xe9e   : > { %v14880_v43 = vpop.permute.xlu1 %6022  ;;  %12167 = vmatpush3.bf16.msra.mxu0 %v12164_v24  ;;  %11955 = vmatmul.mubr.msk.f32.vlgmr.msra.gmra.mrb[16].mxu1 %vm573_vm8, %v14882_v45 }
 0xe9f   : > { %11957 = vmatprep.mubr.msk.f32.mxu1 %vm573_vm8, %v14880_v43  ;;  %12175 = vmatpush3.bf16.msra.mxu1 %v16957_v51 }
 0xea0   : > { %12177 = vmatprep.subr.bf16.mxu1 %v16966_v50 }
 0xea1   : > { %11945 = vmatmul.mubr.msk.f32.vlgmr.msra.gmra.mrb[32].mxu0 %vm573_vm8, %v14893_v6  ;;  %v14897_v13 = vpop.permute.xlu0 %6024 }
 0xea2   : > { %11958 = vmatmul.mubr.msk.f32.gmra.mrb[18].mxu1 %vm573_vm8, %v14897_v13  ;;  %11947 = vmatprep.mubr.msk.f32.mxu0 %vm573_vm8, %v14904_v16 }
 0xea5   : > { %11948 = vmatmul.mubr.msk.f32.gmra.mrb[34].mxu0 %vm573_vm8, %v14911_v46 }
 0xea6   : > { %11984 = vmatprep.mubr.msk.f32.mxu0 %vm573_vm8, %v14669_v4 }
 0xf74   : > { %v11946_v21 = vpop.f32.mrb[32].mxu0 }
 0xf75   : > { %v6181_v20 = vrot.slane %v11946_v21, %v16967_v57  ;;  %v5999_v9 = vpop.f32.mrb[33].mxu0  ;;  %v6174_v31 = vcombine.high %v11946_v21, %v11946_v21 }
 0xf76   : > { %v6132_v19 = vrot.slane %v5999_v9, %v16967_v57  ;;  %v6125_v59 = vcombine.high %v5999_v9, %v5999_v9 }
 0xf77   : > { %v6189_v52 = vcombine.high %v6181_v20, %v6181_v20  ;;  %v14920_v7 = vrot.slane %v6181_v20, %v16967_v57  ;;  %v6188_v4 = vrot.slane %v6174_v31, %v16967_v57 }
 0xf78   : > { %v6140_v44 = vcombine.high %v6132_v19, %v6132_v19  ;;  %v11949_v25 = vpop.f32.mrb[34].mxu0  ;;  %v14929_v60 = vrot.slane %v6132_v19, %v16967_v57  ;;  %v6139_v42 = vrot.slane %v6125_v59, %v16967_v57 }
 0xf79   : > { %v14923_v58 = vrot.slane %v6189_v52, %v16967_v57  ;;  %v14925_v63 = vpop.f32.mrb[35].mxu0  ;;  %v6274_v34 = vrot.slane %v14920_v7, %v12657_v33  ;;  %v6190_v36 = vcombine.high %v6188_v4, %v6188_v4  ;;  %v14942_v32 = vcombine.high %v14920_v7, %v14920_v7 }
 0xf7a   : > { %v14932_v2 = vrot.slane %v6140_v44, %v16967_v57  ;;  %v6242_v27 = vrot.slane %v14929_v60, %v12657_v33  ;;  %v14956_v5 = vrot.slane %v6188_v4, %v16967_v57  ;;  %v6141_v53 = vcombine.high %v6139_v42, %v6139_v42 }
 0xf7b   : > { %v6278_v14 = vrot.slane %v14923_v58, %v12657_v33  ;;  %6319 = vrot.lane.b32.xlu1 %v6274_v34, %s12505_s7  ;;  %v14950_v8 = vcombine.high %v14923_v58, %v14923_v58  ;;  %v14959_v37 = vrot.slane %v6190_v36, %v16967_v57  ;;  %v6282_v35 = vrot.slane %v14942_v32, %v12657_v33 }
 0xf7c   : > { %v6246_v47 = vrot.slane %v14932_v2, %v12657_v33  ;;  %v14969_v54 = vcombine.high %v14929_v60, %v14929_v60  ;;  %v6290_v10 = vrot.slane %v14956_v5, %v12657_v33  ;;  %v14977_v62 = vcombine.high %v14932_v2, %v14932_v2 }
 0xf7d   : > { %6321 = vrot.lane.b32.xlu0 %v6278_v14, %s12505_s7  ;;  %v6286_v28 = vrot.slane %v14950_v8, %v12657_v33  ;;  %v6294_v15 = vrot.slane %v14959_v37, %v12657_v33  ;;  %v6606_v12 = vrot.slane %v11949_v25, %v16967_v57  ;;  %v14983_v30 = vrot.slane %v6139_v42, %v16967_v57 }
 0xf7e   : > { %v14986_v23 = vrot.slane %v6141_v53, %v16967_v57  ;;  %v6250_v3 = vrot.slane %v14969_v54, %v12657_v33  ;;  %v6254_v26 = vrot.slane %v14977_v62, %v12657_v33  ;;  %v15000_v41 = vcombine.high %v14956_v5, %v14956_v5 }
 0xf7f   : > { %6303 = vrot.lane.b32.xlu1 %v6242_v27, %s12505_s7  ;;  %v6614_v40 = vcombine.high %v6606_v12, %v6606_v12  ;;  %v6258_v38 = vrot.slane %v14983_v30, %v12657_v33  ;;  %v15004_v1 = vcombine.high %v14959_v37, %v14959_v37  ;;  %v15008_v48 = vrot.slane %v6606_v12, %v16967_v57 }
 0xf80   : > { %v6262_v22 = vrot.slane %v14986_v23, %v12657_v33  ;;  %v6557_v29 = vrot.slane %v14925_v63, %v16967_v57  ;;  %v6298_v24 = vrot.slane %v15000_v41, %v12657_v33  ;;  %v6599_v31 = vcombine.high %v11949_v25, %v11949_v25 }
 0xf81   : > { %6305 = vrot.lane.b32.xlu0 %v6246_v47, %s12505_s7  ;;  %v15011_v56 = vrot.slane %v6614_v40, %v16967_v57  ;;  %v6302_v21 = vrot.slane %v15004_v1, %v12657_v33  ;;  %v6699_v20 = vrot.slane %v15008_v48, %v12657_v33  ;;  %v15028_v52 = vcombine.high %v14983_v30, %v14983_v30 }
 0xf82   : > { %v6565_v19 = vcombine.high %v6557_v29, %v6557_v29  ;;  %v15032_v44 = vcombine.high %v14986_v23, %v14986_v23  ;;  %v6613_v4 = vrot.slane %v6599_v31, %v16967_v57  ;;  %v15038_v34 = vrot.slane %v6557_v29, %v16967_v57 }
 0xf83   : > { %6323 = vrot.lane.b32.xlu1 %v6282_v35, %s12505_s7  ;;  %v6703_v9 = vrot.slane %v15011_v56, %v12657_v33  ;;  %v6266_v14 = vrot.slane %v15028_v52, %v12657_v33  ;;  %v6550_v27 = vcombine.high %v14925_v63, %v14925_v63  ;;  %v15053_v47 = vcombine.high %v15008_v48, %v15008_v48 }
 0xf84   : > { %v15041_v25 = vrot.slane %v6565_v19, %v16967_v57  ;;  %v6270_v36 = vrot.slane %v15032_v44, %v12657_v33  ;;  %v6615_v59 = vcombine.high %v6613_v4, %v6613_v4  ;;  %v6667_v42 = vrot.slane %v15038_v34, %v12657_v33 }
 0xf85   : > { %6325 = vrot.lane.b32.xlu0 %v6286_v28, %s12505_s7  ;;  %v15061_v28 = vcombine.high %v15011_v56, %v15011_v56  ;;  %v6564_v63 = vrot.slane %v6550_v27, %v16967_v57  ;;  %v15067_v53 = vrot.slane %v6613_v4, %v16967_v57 }
 0xf86   : > { %v6671_v35 = vrot.slane %v15041_v25, %v12657_v33 }
 0xf87   : > { %6327 = vrot.lane.b32.xlu1 %v6290_v10, %s12505_s7  ;;  %v15070_v10 = vrot.slane %v6615_v59, %v16967_v57  ;;  %v6711_v12 = vrot.slane %v15061_v28, %v12657_v33  ;;  %v6715_v40 = vrot.slane %v15067_v53, %v12657_v33  ;;  %v15093_v29 = vrot.slane %v6564_v63, %v16967_v57 }
 0xf88   : > { %v15124_v59 = vcombine.high %v15067_v53, %v15067_v53 }
 0xf89   : > { %6329 = vrot.lane.b32.xlu0 %v6294_v15, %s12505_s7  ;;  %v6707_v15 = vrot.slane %v15053_v47, %v12657_v33  ;;  %v15110_v19 = vcombine.high %v15093_v29, %v15093_v29  ;;  %v15128_v27 = vcombine.high %v15070_v10, %v15070_v10 }
 0xf8b   : > { %6307 = vrot.lane.b32.xlu1 %v6250_v3, %s12505_s7  ;;  %v6566_v3 = vcombine.high %v6564_v63, %v6564_v63 }
 0xf8d   : > { %6309 = vrot.lane.b32.xlu0 %v6254_v26, %s12505_s7  ;;  %v15080_v26 = vcombine.high %v15038_v34, %v15038_v34 }
 0xf8f   : > { %6311 = vrot.lane.b32.xlu1 %v6258_v38, %s12505_s7  ;;  %v6719_v38 = vrot.slane %v15070_v10, %v12657_v33 }
 0xf91   : > { %6313 = vrot.lane.b32.xlu0 %v6262_v22, %s12505_s7  ;;  %v15088_v22 = vcombine.high %v15041_v25, %v15041_v25 }
 0xf93   : > { %6331 = vrot.lane.b32.xlu1 %v6298_v24, %s12505_s7  ;;  %v15096_v24 = vrot.slane %v6566_v3, %v16967_v57 }
 0xf95   : > { %6333 = vrot.lane.b32.xlu0 %v6302_v21, %s12505_s7  ;;  %v6675_v21 = vrot.slane %v15080_v26, %v12657_v33  ;;  %v6687_v31 = vrot.slane %v15096_v24, %v12657_v33  ;;  %v15114_v4 = vcombine.high %v15096_v24, %v15096_v24 }
 0xf97   : > { %6744 = vrot.lane.b32.xlu1 %v6699_v20, %s12505_s7  ;;  %v6679_v20 = vrot.slane %v15088_v22, %v12657_v33 }
 0xf99   : > { %6746 = vrot.lane.b32.xlu0 %v6703_v9, %s12505_s7  ;;  %v6683_v9 = vrot.slane %v15093_v29, %v12657_v33 }
 0xf9b   : > { %6315 = vrot.lane.b32.xlu1 %v6266_v14, %s12505_s7  ;;  %v6691_v14 = vrot.slane %v15110_v19, %v12657_v33 }
 0xf9d   : > { %6317 = vrot.lane.b32.xlu0 %v6270_v36, %s12505_s7  ;;  %v6695_v36 = vrot.slane %v15114_v4, %v12657_v33 }
 0xf9f   : > { %6728 = vrot.lane.b32.xlu1 %v6667_v42, %s12505_s7  ;;  %v6723_v42 = vrot.slane %v15124_v59, %v12657_v33 }
 0xfa1   : > { %6730 = vrot.lane.b32.xlu0 %v6671_v35, %s12505_s7  ;;  %v6727_v35 = vrot.slane %v15128_v27, %v12657_v33 }
 0xfa3   : > { %6748 = vrot.lane.b32.xlu1 %v6707_v15, %s12505_s7 }
 0xfa5   : > { %6750 = vrot.lane.b32.xlu0 %v6711_v12, %s12505_s7 }
 0xfa7   : > { %6752 = vrot.lane.b32.xlu1 %v6715_v40, %s12505_s7 }
 0xfa9   : > { %6754 = vrot.lane.b32.xlu0 %v6719_v38, %s12505_s7 }
 0xfab   : > { %6732 = vrot.lane.b32.xlu1 %v6675_v21, %s12505_s7 }
 0xfad   : > { %6734 = vrot.lane.b32.xlu0 %v6679_v20, %s12505_s7 }
 0xfaf   : > { %6736 = vrot.lane.b32.xlu1 %v6683_v9, %s12505_s7 }
 0xfb1   : > { %6738 = vrot.lane.b32.xlu0 %v6687_v31, %s12505_s7 }
 0xfb3   : > { %6740 = vrot.lane.b32.xlu1 %v6691_v14, %s12505_s7 }
 0xfb5   : > { %6742 = vrot.lane.b32.xlu0 %v6695_v36, %s12505_s7 }
 0xfb7   : > { %6756 = vrot.lane.b32.xlu1 %v6723_v42, %s12505_s7 }
 0xfb9   : > { %6758 = vrot.lane.b32.xlu0 %v6727_v35, %s12505_s7 }
 0xfed   : > { %v6320_v63 = vpop.permute.xlu1 %6319 }
 0xfef   : > { %v6322_v15 = vpop.permute.xlu0 %6321 }
 0xff1   : > { %v6304_v12 = vpop.permute.xlu1 %6303 }
 0xff2   : > { %v6351_v31 = vsel %vm998_vm9, %v14929_v60, %v6304_v12 }
 0xff3   : > { %v6306_v3 = vpop.permute.xlu0 %6305 }
 0xff4   : > { %v6352_v9 = vsel %vm998_vm9, %v14932_v2, %v6306_v3 }
 0xff5   : > { %v6324_v40 = vpop.permute.xlu1 %6323  ;;  %v6383_v14 = vcombine.low %v6351_v31, %v6352_v9 }
 0xff7   : > { %v6326_v38 = vpop.permute.xlu0 %6325  ;;  %v6391_v61 = vrot.slane %v6383_v14, %v12603_v17 }
 0xff8   : > { %v6362_v12 = vsel %vm998_vm9, %v14950_v8, %v6326_v38 }
 0xff9   : > { %v6328_v21 = vpop.permute.xlu1 %6327 }
 0xffb   : > { %v6330_v20 = vpop.permute.xlu0 %6329 }
 0xffd   : > { %v6308_v36 = vpop.permute.xlu1 %6307 }
 0xffe   : > { %v6353_v42 = vsel %vm998_vm9, %v14969_v54, %v6308_v36 }
 0xfff   : > { %v6310_v11 = vpop.permute.xlu0 %6309 }
0x1000   : > { %v6354_v35 = vsel %vm998_vm9, %v14977_v62, %v6310_v11  ;;  %v6360_v11 = vsel %vm998_vm9, %v14923_v58, %v6322_v15 }
0x1001   : > { %v6384_v39 = vcombine.low %v6353_v42, %v6354_v35  ;;  %v6312_v51 = vpop.permute.xlu1 %6311 }
0x1002   : > { %v6355_v31 = vsel %vm998_vm9, %v14983_v30, %v6312_v51 }
0x1003   : > { %v6398_v49 = vrot.slane %v6384_v39, %v12603_v17  ;;  %v6314_v57 = vpop.permute.xlu0 %6313  ;;  %v6361_v39 = vsel %vm998_vm9, %v14942_v32, %v6324_v40 }
0x1004   : > { %v6356_v62 = vsel %vm998_vm9, %v14986_v23, %v6314_v57  ;;  %v6364_v57 = vsel %vm998_vm9, %v14959_v37, %v6330_v20 }
0x1005   : > { %v6399_v2 = vcombine.low %v6391_v61, %v6398_v49  ;;  %v6332_v3 = vpop.permute.xlu1 %6331  ;;  %v6359_v49 = vsel %vm998_vm9, %v14920_v7, %v6320_v63  ;;  %v6418_v61 = vcombine.low %v6361_v39, %v6362_v12  ;;  %v6400_v14 = vcombine.low %v6355_v31, %v6356_v62 }
0x1006   : > { %v6417_v38 = vcombine.low %v6359_v49, %v6360_v11  ;;  %v6365_v32 = vsel %vm998_vm9, %v15000_v41, %v6332_v3  ;;  %v6363_v63 = vsel %vm998_vm9, %v14956_v5, %v6328_v21  ;;  %v16968_v21 = vld [vmem:[#allocation9_spill] sm:$0xff] }
0x1007   : > { %11964 = vmatprep.mubr.msk.f32.mxu1 %vm573_vm8, %v6399_v2  ;;  %v6334_v60 = vpop.permute.xlu0 %6333  ;;  %v6434_v15 = vcombine.low %v6363_v63, %v6364_v57  ;;  %v6408_v40 = vrot.slane %v6400_v14, %v12603_v17 }
0x1008   : > { %v6366_v8 = vsel %vm998_vm9, %v15004_v1, %v6334_v60  ;;  %v6432_v1 = vrot.slane %v6418_v61, %v12603_v17  ;;  %v6425_v42 = vrot.slane %v6417_v38, %v12603_v17 }
0x1009   : > { %v6745_v9 = vpop.permute.xlu1 %6744  ;;  %v6435_v51 = vcombine.low %v6365_v32, %v6366_v8  ;;  %v6442_v2 = vrot.slane %v6434_v15, %v12603_v17 }
0x100b   : > { %v6747_v54 = vpop.permute.xlu0 %6746 }
0x100d   : > { %v6316_v36 = vpop.permute.xlu1 %6315 }
0x100e   : > { %v6357_v7 = vsel %vm998_vm9, %v15028_v52, %v6316_v36  ;;  %v6449_v52 = vrot.slane %v6435_v51, %v12603_v17 }
0x100f   : > { %v6318_v58 = vpop.permute.xlu0 %6317 }
0x1010   : > { %v6358_v23 = vsel %vm998_vm9, %v15032_v44, %v6318_v58  ;;  %v6433_v44 = vcombine.low %v6425_v42, %v6432_v1  ;;  %v6450_v5 = vcombine.low %v6442_v2, %v6449_v52 }
0x1011   : > { %v6401_v30 = vcombine.low %v6357_v7, %v6358_v23  ;;  %v6729_v20 = vpop.permute.xlu1 %6728  ;;  %v6785_v7 = vsel %vm998_vm9, %v15011_v56, %v6747_v54 }
0x1012   : > { %v6776_v39 = vsel %vm998_vm9, %v15038_v34, %v6729_v20 }
0x1013   : > { %v6415_v37 = vrot.slane %v6401_v30, %v12603_v17  ;;  %v6731_v41 = vpop.permute.xlu0 %6730 }
0x1014   : > { %v6777_v62 = vsel %vm998_vm9, %v15041_v25, %v6731_v41 }
0x1015   : > { %v6416_v35 = vcombine.low %v6408_v40, %v6415_v37  ;;  %v6749_v3 = vpop.permute.xlu1 %6748  ;;  %v6808_v49 = vcombine.low %v6776_v39, %v6777_v62  ;;  %v15242_v39 = vld [vmem:[%s12576_s13 + $0x50] sm:$0xff] }
0x1017   : > { %11965 = vmatmul.mubr.msk.f32.vlgmr.msra.gmra.mrb[16].mxu1 %vm573_vm8, %v6416_v35  ;;  %v6751_v60 = vpop.permute.xlu0 %6750  ;;  %v6816_v36 = vrot.slane %v6808_v49, %v12603_v17 }
0x1018   : > { %11967 = vmatprep.mubr.msk.f32.mxu1 %vm573_vm8, %v6433_v44  ;;  %12179 = vmatpush3.bf16.msra.mxu1 %v16966_v50  ;;  %v6787_v58 = vsel %vm998_vm9, %v15061_v28, %v6751_v60  ;;  %v6784_v28 = vsel %vm998_vm9, %v15008_v48, %v6745_v9 }
0x1019   : > { %12193 = vmatprep.subr.bf16.mxu1 %v16968_v21  ;;  %v6753_v12 = vpop.permute.xlu1 %6752 }
0x101a   : > { %v6788_v48 = vsel %vm998_vm9, %v15067_v53, %v6753_v12 }
0x101b   : > { %11968 = vmatmul.mubr.msk.f32.gmra.mrb[18].mxu1 %vm573_vm8, %v6450_v5  ;;  %v6755_v11 = vpop.permute.xlu0 %6754 }
0x101c   : > { %v6789_v56 = vsel %vm998_vm9, %v15070_v10, %v6755_v11  ;;  %v15239_v11 = vld [vmem:[%s12576_s13 + $0x58] sm:$0xff] }
0x101d   : > { %v6733_v61 = vpop.permute.xlu1 %6732  ;;  %v6859_v9 = vcombine.low %v6788_v48, %v6789_v56 }
0x101e   : > { %v6778_v8 = vsel %vm998_vm9, %v15080_v26, %v6733_v61  ;;  %v6786_v26 = vsel %vm998_vm9, %v15053_v47, %v6749_v3 }
0x101f   : > { %v6735_v31 = vpop.permute.xlu0 %6734  ;;  %v6843_v23 = vcombine.low %v6786_v26, %v6787_v58  ;;  %v6867_v35 = vrot.slane %v6859_v9, %v12603_v17 }
0x1020   : > { %v6779_v38 = vsel %vm998_vm9, %v15088_v22, %v6735_v31 }
0x1021   : > { %v6809_v14 = vcombine.low %v6778_v8, %v6779_v38  ;;  %v6737_v57 = vpop.permute.xlu1 %6736 }
0x1022   : > { %v6780_v51 = vsel %vm998_vm9, %v15093_v29, %v6737_v57  ;;  %v6857_v29 = vrot.slane %v6843_v23, %v12603_v17 }
0x1023   : > { %v6823_v25 = vrot.slane %v6809_v14, %v12603_v17  ;;  %v6739_v32 = vpop.permute.xlu0 %6738 }
0x1024   : > { %v6781_v34 = vsel %vm998_vm9, %v15096_v24, %v6739_v32  ;;  %v6842_v24 = vcombine.low %v6784_v28, %v6785_v7 }
0x1025   : > { %v6824_v22 = vcombine.low %v6816_v36, %v6823_v25  ;;  %v6825_v30 = vcombine.low %v6780_v51, %v6781_v34  ;;  %v6741_v1 = vpop.permute.xlu1 %6740 }
0x1026   : > { %v6782_v47 = vsel %vm998_vm9, %v15110_v19, %v6741_v1  ;;  %v6850_v19 = vrot.slane %v6842_v24, %v12603_v17 }
0x1027   : > { %11974 = vmatprep.mubr.msk.f32.mxu1 %vm573_vm8, %v6824_v22  ;;  %v6743_v63 = vpop.permute.xlu0 %6742  ;;  %v6833_v40 = vrot.slane %v6825_v30, %v12603_v17 }
0x1028   : > { %v6783_v54 = vsel %vm998_vm9, %v15114_v4, %v6743_v63  ;;  %v6858_v53 = vcombine.low %v6850_v19, %v6857_v29 }
0x1029   : > { %v6826_v15 = vcombine.low %v6782_v47, %v6783_v54  ;;  %v6757_v20 = vpop.permute.xlu1 %6756 }
0x102a   : > { %v6790_v4 = vsel %vm998_vm9, %v15124_v59, %v6757_v20  ;;  %v15231_v59 = vld [vmem:[%s12576_s13 + $0x48] sm:$0xff] }
0x102b   : > { %v6840_v37 = vrot.slane %v6826_v15, %v12603_v17  ;;  %v6759_v10 = vpop.permute.xlu0 %6758 }
0x102c   : > { %v6791_v41 = vsel %vm998_vm9, %v15128_v27, %v6759_v10  ;;  %v15234_v27 = vld [vmem:[%s12576_s13 + $0x40] sm:$0xff] }
0x102d   : > { %v6841_v42 = vcombine.low %v6833_v40, %v6840_v37  ;;  %v6860_v52 = vcombine.low %v6790_v4, %v6791_v41 }
0x102f   : > { %v6874_v44 = vrot.slane %v6860_v52, %v12603_v17  ;;  %11975 = vmatmul.mubr.msk.f32.vlgmr.msra.gmra.mrb[16].mxu1 %vm573_vm8, %v6841_v42 }
0x1030   : > { %11977 = vmatprep.mubr.msk.f32.mxu1 %vm573_vm8, %v6858_v53  ;;  %12195 = vmatpush3.bf16.msra.mxu1 %v16968_v21 }
0x1031   : > { %v6875_v2 = vcombine.low %v6867_v35, %v6874_v44  ;;  %12201 = vmatprep.subr.bf16.mxu1 %v16945_v55 }
0x1033   : > { %11978 = vmatmul.mubr.msk.f32.gmra.mrb[18].mxu1 %vm573_vm8, %v6875_v2 }
0x1102   : > { %v11976_v3 = vpop.f32.mrb[16].mxu1 }
0x1103   : > { %v12236_v60 = vadd.f32 %v11976_v3, %v15231_v59  ;;  %v6950_v5 = vpop.f32.mrb[17].mxu1 }
0x1104   : > { %v12237_v12 = vadd.f32 %v15234_v27, %v6950_v5 }
0x1105   : > { %v11522_v62 = vmul.f32 -1.442695, %v12236_v60 }
0x1106   : > { %v11521_v49 = vmul.f32 -1.442695, %v12237_v12  ;;  %v11979_v61 = vpop.f32.mrb[18].mxu1 }
0x1107   : > { %12398 = vpow2.f32 %v11522_v62  ;;  %v12238_v31 = vadd.f32 %v11979_v61, %v15239_v11  ;;  %v6960_v8 = vpop.f32.mrb[19].mxu1 }
0x1108   : > { %12400 = vpow2.f32 %v11521_v49  ;;  %v12239_v38 = vadd.f32 %v15242_v39, %v6960_v8 }
0x1109   : > { %v11524_v14 = vmul.f32 -1.442695, %v12238_v31 }
0x110a   : > { %v11523_v36 = vmul.f32 -1.442695, %v12239_v38 }
0x110b   : > { %12402 = vpow2.f32 %v11524_v14 }
0x110c   : > { %12404 = vpow2.f32 %v11523_v36 }
0x1111   : > { %v12399_v58 = vpop.eup %12398 }
0x1112   : > { %v12401_v25 = vpop.eup %12400  ;;  %v6986_v57 = vadd.f32 1.0, %v12399_v58 }
0x1113   : > { %v6985_v32 = vadd.f32 1.0, %v12401_v25 }
0x1114   : > { %12406 = vrcp.f32 %v6986_v57 }
0x1115   : > { %v12403_v34 = vpop.eup %12402  ;;  %12408 = vrcp.f32 %v6985_v32 }
0x1116   : > { %v12405_v7 = vpop.eup %12404  ;;  %v6988_v26 = vadd.f32 1.0, %v12403_v34 }
0x1117   : > { %v6987_v22 = vadd.f32 1.0, %v12405_v7 }
0x1118   : > { %12410 = vrcp.f32 %v6988_v26 }
0x1119   : > { %12412 = vrcp.f32 %v6987_v22 }
0x111e   : > { %v15246_v23 = vpop.eup %12406 }
0x111f   : > { %v15248_v51 = vpop.eup %12408  ;;  %v15252_v28 = vmul.f32 %v15246_v23, %v14882_v45 }
0x1120   : > { %v15256_v30 = vmul.f32 %v15248_v51, %v14873_v0 }
0x1121   : > { %v7026_v1 = vcombine.high %v15252_v28, %v15252_v28  ;;  %v15274_v0 = vrot.slane %v15252_v28, %v12603_v17 }
0x1122   : > { %v15260_v63 = vpop.eup %12410  ;;  %v7009_v24 = vcombine.high %v15256_v30, %v15256_v30  ;;  %v7016_v56 = vrot.slane %v15256_v30, %v12603_v17 }
0x1123   : > { %v15266_v47 = vpop.eup %12412  ;;  %v15270_v45 = vmul.f32 %v15260_v63, %v14897_v13  ;;  %v15277_v54 = vrot.slane %v7026_v1, %v12603_v17  ;;  %v7176_v53 = vrot.slane %v15274_v0, %v12606_v18 }
0x1124   : > { %v15281_v15 = vmul.f32 %v15266_v47, %v14880_v43  ;;  %v7023_v29 = vrot.slane %v7009_v24, %v12603_v17  ;;  %v7024_v48 = vcombine.high %v7016_v56, %v7016_v56  ;;  %v15296_v43 = vcombine.high %v15274_v0, %v15274_v0 }
0x1125   : > { %v7060_v9 = vcombine.high %v15270_v45, %v15270_v45  ;;  %v15288_v13 = vrot.slane %v15270_v45, %v12603_v17  ;;  %v15300_v10 = vcombine.high %v15277_v54, %v15277_v54  ;;  %v7160_v2 = vrot.slane %v7016_v56, %v12606_v18 }
0x1126   : > { %v7025_v40 = vcombine.high %v7023_v29, %v7023_v29  ;;  %v7043_v37 = vcombine.high %v15281_v15, %v15281_v15  ;;  %v7050_v20 = vrot.slane %v15281_v15, %v12603_v17  ;;  %v7164_v4 = vrot.slane %v7024_v48, %v12606_v18 }
0x1127   : > { %v15303_v19 = vrot.slane %v7060_v9, %v12603_v17  ;;  %v7168_v52 = vrot.slane %v7023_v29, %v12606_v18  ;;  %v7075_v35 = vcombine.high %v15288_v13, %v15288_v13  ;;  %v7180_v49 = vrot.slane %v15296_v43, %v12606_v18 }
0x1128   : > { %v7057_v41 = vrot.slane %v7043_v37, %v12603_v17  ;;  %v7058_v42 = vcombine.high %v7050_v20, %v7050_v20  ;;  %v7172_v3 = vrot.slane %v7025_v40, %v12606_v18  ;;  %v7192_v5 = vrot.slane %v7050_v20, %v12606_v18 }
0x1129   : > { %v7076_v44 = vcombine.high %v15303_v19, %v15303_v19  ;;  %v7184_v61 = vrot.slane %v15277_v54, %v12606_v18  ;;  %v7188_v31 = vrot.slane %v15300_v10, %v12606_v18  ;;  %v7221_v8 = vsel %vm466_vm1, %v7164_v4, %v7160_v2 }
0x112a   : > { %v7059_v60 = vcombine.high %v7057_v41, %v7057_v41  ;;  %v7196_v12 = vrot.slane %v7058_v42, %v12606_v18  ;;  %v7200_v62 = vrot.slane %v7057_v41, %v12606_v18  ;;  %v7208_v14 = vrot.slane %v15288_v13, %v12606_v18 }
0x112b   : > { %v7222_v36 = vsel %vm468_vm2, %v7168_v52, %v7221_v8  ;;  %v7212_v25 = vrot.slane %v7075_v35, %v12606_v18  ;;  %v7216_v57 = vrot.slane %v15303_v19, %v12606_v18  ;;  %v7220_v7 = vrot.slane %v7076_v44, %v12606_v18 }
0x112c   : > { %v7204_v38 = vrot.slane %v7059_v60, %v12606_v18  ;;  %v7228_v58 = vsel %vm466_vm1, %v7196_v12, %v7192_v5  ;;  %v7223_v32 = vsel %vm470_vm3, %v7172_v3, %v7222_v36  ;;  %v7080_v1 = vrot.slane %v7016_v56, %v12657_v33 }
0x112d   : > { %v7229_v34 = vsel %vm468_vm2, %v7200_v62, %v7228_v58  ;;  %v7224_v26 = vsel %vm472_vm4, %v7176_v53, %v7223_v32  ;;  %v7084_v37 = vrot.slane %v7024_v48, %v12657_v33  ;;  %v7088_v4 = vrot.slane %v7023_v29, %v12657_v33 }
0x112e   : > { %v7230_v22 = vsel %vm470_vm3, %v7204_v38, %v7229_v34  ;;  %v7225_v24 = vsel %vm474_vm5, %v7180_v49, %v7224_v26  ;;  %v7116_v3 = vrot.slane %v7058_v42, %v12657_v33  ;;  %v7120_v53 = vrot.slane %v7057_v41, %v12657_v33 }
0x112f   : > { %v7231_v9 = vsel %vm472_vm4, %v7208_v14, %v7230_v22  ;;  %v7226_v52 = vsel %vm476_vm6, %v7184_v61, %v7225_v24  ;;  %v7092_v56 = vrot.slane %v7025_v40, %v12657_v33  ;;  %v7112_v12 = vrot.slane %v7050_v20, %v12657_v33  ;;  %v16969_v24 = vld [vmem:[#allocation7_spill] sm:$0xff] }
0x1130   : > { %v7232_v2 = vsel %vm474_vm5, %v7212_v25, %v7231_v9  ;;  %v7124_v62 = vrot.slane %v7059_v60, %v12657_v33  ;;  %v7227_v48 = vsel %vm478_vm7, %v7188_v31, %v7226_v52  ;;  %v7141_v61 = vsel %vm466_vm1, %v7084_v37, %v7080_v1  ;;  %v16970_v9 = vld [vmem:[#allocation8_spill] sm:$0xff] }
0x1131   : > { %v7233_v5 = vsel %vm476_vm6, %v7216_v57, %v7232_v2  ;;  %v7148_v8 = vsel %vm466_vm1, %v7116_v3, %v7112_v12  ;;  %v7096_v41 = vrot.slane %v15274_v0, %v12657_v33  ;;  %v7128_v42 = vrot.slane %v15288_v13, %v12657_v33 }
0x1132   : > { %v7234_v29 = vsel %vm478_vm7, %v7220_v7, %v7233_v5  ;;  %v7142_v40 = vsel %vm468_vm2, %v7088_v4, %v7141_v61  ;;  %v7149_v20 = vsel %vm468_vm2, %v7120_v53, %v7148_v8  ;;  %v7100_v60 = vrot.slane %v15296_v43, %v12657_v33 }
0x1133   : > { %v12336_v49 = vpack.i.bf16 %v7234_v29, %v7227_v48  ;;  %v7132_v31 = vrot.slane %v7075_v35, %v12657_v33  ;;  %v7143_v38 = vsel %vm470_vm3, %v7092_v56, %v7142_v40  ;;  %v7150_v14 = vsel %vm470_vm3, %v7124_v62, %v7149_v20 }
0x1134   : > { %v7104_v0 = vrot.slane %v15277_v54, %v12657_v33  ;;  %v7136_v13 = vrot.slane %v15303_v19, %v12657_v33  ;;  %v7144_v36 = vsel %vm472_vm4, %v7096_v41, %v7143_v38  ;;  %v7151_v58 = vsel %vm472_vm4, %v7128_v42, %v7150_v14 }
0x1135   : > { %12337 = vrot.lane.b32.xlu1 %v12336_v49, %s12503_s25  ;;  %v7108_v25 = vrot.slane %v15300_v10, %v12657_v33  ;;  %v7140_v43 = vrot.slane %v7076_v44, %v12657_v33  ;;  %v7145_v35 = vsel %vm474_vm5, %v7100_v60, %v7144_v36  ;;  %v7152_v57 = vsel %vm474_vm5, %v7132_v31, %v7151_v58 }
0x1136   : > { %v7146_v32 = vsel %vm476_vm6, %v7104_v0, %v7145_v35  ;;  %v7153_v54 = vsel %vm476_vm6, %v7136_v13, %v7152_v57 }
0x1137   : > { %v7147_v34 = vsel %vm478_vm7, %v7108_v25, %v7146_v32  ;;  %v7154_v19 = vsel %vm478_vm7, %v7140_v43, %v7153_v54 }
0x11a7   : > { %v12338_v7 = vpop.permute.xlu1 %12337 }
0x11a8   : > { %v12340_v26 = vunpack.i.h.bf16 %v12338_v7  ;;  %v12339_v22 = vunpack.i.l.bf16 %v12338_v7 }
0x11aa   : > { %v7241_v1 = vsel %vm573_vm8, %v7147_v34, %v12339_v22  ;;  %v7242_v10 = vsel %vm573_vm8, %v7154_v19, %v12340_v26 }
0x11ab   : > { %v12180_v44 = vpack.c.bf16 %v7242_v10, %v7241_v1 }
0x11ad   : > { %12181 = vmatprep.subr.bf16.mxu0 %v12180_v44 }
0x11ae   : > { %12183 = vmatpush3.bf16.msra.mxu0 %v12180_v44 }
0x11af   : > { %12185 = vmatprep.subr.bf16.mxu0 %v16969_v24 }
0x11b1   : > { %11985 = vmatmul.mubr.msk.f32.vlgmr.msra.gmra.mrb[36].mxu0 %vm573_vm8, %v14893_v6 }
0x11b2   : > { %11987 = vmatprep.mubr.msk.f32.mxu0 %vm573_vm8, %v14904_v16  ;;  %12187 = vmatpush3.bf16.msra.mxu0 %v16969_v24  ;;  %v16971_v16 = vld [vmem:[#allocation3_spill] sm:$0xff] }
0x11b3   : > { %12189 = vmatprep.subr.bf16.mxu0 %v16970_v9 }
0x11b5   : > { %11988 = vmatmul.mubr.msk.f32.gmra.mrb[38].mxu0 %vm573_vm8, %v14911_v46 }
0x11b6   : > { %11994 = vmatprep.mubr.msk.f32.mxu0 %vm573_vm8, %v15256_v30 }
0x11b9   : > { %11995 = vmatmul.mubr.msk.f32.vlgmr.msra.gmra.mrb[40].mxu0 %vm573_vm8, %v15252_v28 }
0x11ba   : > { %11997 = vmatprep.mubr.msk.f32.mxu0 %vm573_vm8, %v15281_v15  ;;  %12191 = vmatpush3.bf16.msra.mxu0 %v16970_v9 }
0x11bd   : > { %11998 = vmatmul.mubr.msk.f32.gmra.mrb[42].mxu0 %vm573_vm8, %v15270_v45 }
0x1284   : > { %v11986_v6 = vpop.f32.mrb[36].mxu0 }
0x1285   : > { %v7499_v37 = vrot.slane %v11986_v6, %v16971_v16  ;;  %v7309_v4 = vpop.f32.mrb[37].mxu0  ;;  %v7492_v2 = vcombine.high %v11986_v6, %v11986_v6 }
0x1286   : > { %v7450_v46 = vrot.slane %v7309_v4, %v16971_v16  ;;  %v7443_v41 = vcombine.high %v7309_v4, %v7309_v4 }
0x1287   : > { %v7507_v52 = vcombine.high %v7499_v37, %v7499_v37  ;;  %v15406_v30 = vrot.slane %v7499_v37, %v16971_v16  ;;  %v7506_v56 = vrot.slane %v7492_v2, %v16971_v16 }
0x1288   : > { %v7458_v28 = vcombine.high %v7450_v46, %v7450_v46  ;;  %v15408_v3 = vpop.f32.mrb[38].mxu0  ;;  %v15416_v45 = vrot.slane %v7450_v46, %v16971_v16  ;;  %v7457_v0 = vrot.slane %v7443_v41, %v16971_v16 }
0x1289   : > { %v15411_v15 = vrot.slane %v7507_v52, %v16971_v16  ;;  %v15413_v53 = vpop.f32.mrb[39].mxu0  ;;  %v7592_v5 = vrot.slane %v15406_v30, %v12657_v33  ;;  %v15434_v49 = vcombine.high %v15406_v30, %v15406_v30  ;;  %v7508_v8 = vcombine.high %v7506_v56, %v7506_v56 }
0x128a   : > { %v15422_v12 = vrot.slane %v7458_v28, %v16971_v16  ;;  %v7560_v61 = vrot.slane %v15416_v45, %v12657_v33  ;;  %v15451_v31 = vrot.slane %v7506_v56, %v16971_v16  ;;  %v15465_v36 = vcombine.high %v15416_v45, %v15416_v45 }
0x128b   : > { %v7596_v48 = vrot.slane %v15411_v15, %v12657_v33  ;;  %7637 = vrot.lane.b32.xlu0 %v7592_v5, %s12505_s7  ;;  %v15447_v60 = vcombine.high %v15411_v15, %v15411_v15  ;;  %v7600_v38 = vrot.slane %v15434_v49, %v12657_v33  ;;  %v15456_v14 = vrot.slane %v7508_v8, %v16971_v16 }
0x128c   : > { %v15424_v62 = vpop.f32.mrb[40].mxu0  ;;  %v7564_v40 = vrot.slane %v15422_v12, %v12657_v33  ;;  %v7608_v58 = vrot.slane %v15451_v31, %v12657_v33  ;;  %v7459_v25 = vcombine.high %v7457_v0, %v7457_v0  ;;  %v15473_v35 = vcombine.high %v15422_v12, %v15422_v12 }
0x128d   : > { %v15429_v29 = vpop.f32.mrb[41].mxu0  ;;  %7639 = vrot.lane.b32.xlu1 %v7596_v48, %s12505_s7  ;;  %v7604_v13 = vrot.slane %v15447_v60, %v12657_v33  ;;  %v7612_v43 = vrot.slane %v15456_v14, %v12657_v33  ;;  %v7940_v57 = vrot.slane %v15408_v3, %v16971_v16  ;;  %v15480_v32 = vrot.slane %v7457_v0, %v16971_v16 }
0x128e   : > { %v7568_v54 = vrot.slane %v15465_v36, %v12657_v33  ;;  %v15485_v34 = vrot.slane %v7459_v25, %v16971_v16  ;;  %v7572_v19 = vrot.slane %v15473_v35, %v12657_v33  ;;  %v15495_v22 = vcombine.high %v15451_v31, %v15451_v31 }
0x128f   : > { %7621 = vrot.lane.b32.xlu0 %v7560_v61, %s12505_s7  ;;  %v7948_v7 = vcombine.high %v7940_v57, %v7940_v57  ;;  %v7576_v26 = vrot.slane %v15480_v32, %v12657_v33  ;;  %v15501_v10 = vcombine.high %v15456_v14, %v15456_v14  ;;  %v15504_v44 = vrot.slane %v7940_v57, %v16971_v16 }
0x1290   : > { %v15438_v42 = vpop.f32.mrb[42].mxu0  ;;  %v7580_v1 = vrot.slane %v15485_v34, %v12657_v33  ;;  %v7616_v37 = vrot.slane %v15495_v22, %v12657_v33  ;;  %v7891_v4 = vrot.slane %v15413_v53, %v16971_v16  ;;  %v15525_v28 = vcombine.high %v15480_v32, %v15480_v32 }
0x1291   : > { %v15443_v20 = vpop.f32.mrb[43].mxu0  ;;  %7623 = vrot.lane.b32.xlu1 %v7564_v40, %s12505_s7  ;;  %v15508_v6 = vrot.slane %v7948_v7, %v16971_v16  ;;  %v7620_v46 = vrot.slane %v15501_v10, %v12657_v33  ;;  %v8033_v52 = vrot.slane %v15504_v44, %v12657_v33  ;;  %v7933_v5 = vcombine.high %v15408_v3, %v15408_v3 }
0x1292   : > { %v7899_v56 = vcombine.high %v7891_v4, %v7891_v4  ;;  %v15531_v48 = vcombine.high %v15485_v34, %v15485_v34  ;;  %v15536_v61 = vrot.slane %v7891_v4, %v16971_v16  ;;  %v7584_v8 = vrot.slane %v15525_v28, %v12657_v33 }
0x1293   : > { %7641 = vrot.lane.b32.xlu0 %v7600_v38, %s12505_s7  ;;  %v8037_v2 = vrot.slane %v15508_v6, %v12657_v33  ;;  %v7947_v41 = vrot.slane %v7933_v5, %v16971_v16  ;;  %v15550_v38 = vcombine.high %v15504_v44, %v15504_v44 }
0x1294   : > { %v15542_v40 = vrot.slane %v7899_v56, %v16971_v16  ;;  %v7588_v3 = vrot.slane %v15531_v48, %v12657_v33  ;;  %v8001_v0 = vrot.slane %v15536_v61, %v12657_v33 }
0x1295   : > { %7643 = vrot.lane.b32.xlu1 %v7604_v13, %s12505_s7  ;;  %v7949_v13 = vcombine.high %v7947_v41, %v7947_v41  ;;  %v15565_v57 = vrot.slane %v7947_v41, %v16971_v16 }
0x1296   : > { %v8005_v25 = vrot.slane %v15542_v40, %v12657_v33 }
0x1297   : > { %7645 = vrot.lane.b32.xlu0 %v7608_v58, %s12505_s7  ;;  %v7884_v58 = vcombine.high %v15413_v53, %v15413_v53 }
0x1299   : > { %7647 = vrot.lane.b32.xlu1 %v7612_v43, %s12505_s7  ;;  %v15560_v43 = vcombine.high %v15508_v6, %v15508_v6  ;;  %v7898_v53 = vrot.slane %v7884_v58, %v16971_v16  ;;  %v15621_v58 = vcombine.high %v15565_v57, %v15565_v57 }
0x129b   : > { %7625 = vrot.lane.b32.xlu0 %v7568_v54, %s12505_s7  ;;  %v8041_v54 = vrot.slane %v15550_v38, %v12657_v33  ;;  %v8045_v7 = vrot.slane %v15560_v43, %v12657_v33 }
0x129d   : > { %7627 = vrot.lane.b32.xlu1 %v7572_v19, %s12505_s7  ;;  %v15570_v19 = vrot.slane %v7949_v13, %v16971_v16 }
0x129f   : > { %7629 = vrot.lane.b32.xlu0 %v7576_v26, %s12505_s7  ;;  %v15579_v26 = vcombine.high %v15536_v61, %v15536_v61  ;;  %v8053_v4 = vrot.slane %v15570_v19, %v12657_v33 }
0x12a1   : > { %7631 = vrot.lane.b32.xlu1 %v7580_v1, %s12505_s7  ;;  %v8049_v1 = vrot.slane %v15565_v57, %v12657_v33 }
0x12a3   : > { %7649 = vrot.lane.b32.xlu0 %v7616_v37, %s12505_s7  ;;  %v7900_v37 = vcombine.high %v7898_v53, %v7898_v53 }
0x12a5   : > { %7651 = vrot.lane.b32.xlu1 %v7620_v46, %s12505_s7  ;;  %v15587_v46 = vcombine.high %v15542_v40, %v15542_v40  ;;  %v15597_v5 = vrot.slane %v7900_v37, %v16971_v16 }
0x12a7   : > { %8078 = vrot.lane.b32.xlu0 %v8033_v52, %s12505_s7  ;;  %v15592_v52 = vrot.slane %v7898_v53, %v16971_v16  ;;  %v8013_v56 = vrot.slane %v15587_v46, %v12657_v33  ;;  %v8057_v53 = vrot.slane %v15621_v58, %v12657_v33 }
0x12a9   : > { %8080 = vrot.lane.b32.xlu1 %v8037_v2, %s12505_s7  ;;  %v8009_v2 = vrot.slane %v15579_v26, %v12657_v33  ;;  %v15607_v41 = vcombine.high %v15592_v52, %v15592_v52 }
0x12ab   : > { %7633 = vrot.lane.b32.xlu0 %v7584_v8, %s12505_s7  ;;  %v8017_v8 = vrot.slane %v15592_v52, %v12657_v33  ;;  %v8025_v13 = vrot.slane %v15607_v41, %v12657_v33 }
0x12ad   : > { %7635 = vrot.lane.b32.xlu1 %v7588_v3, %s12505_s7  ;;  %v8021_v3 = vrot.slane %v15597_v5, %v12657_v33 }
0x12af   : > { %8062 = vrot.lane.b32.xlu0 %v8001_v0, %s12505_s7  ;;  %v15613_v0 = vcombine.high %v15597_v5, %v15597_v5 }
0x12b1   : > { %8064 = vrot.lane.b32.xlu1 %v8005_v25, %s12505_s7  ;;  %v8029_v25 = vrot.slane %v15613_v0, %v12657_v33 }
0x12b3   : > { %8082 = vrot.lane.b32.xlu0 %v8041_v54, %s12505_s7  ;;  %v15627_v54 = vcombine.high %v15570_v19, %v15570_v19 }
0x12b5   : > { %8084 = vrot.lane.b32.xlu1 %v8045_v7, %s12505_s7  ;;  %v8061_v7 = vrot.slane %v15627_v54, %v12657_v33 }
0x12b7   : > { %8086 = vrot.lane.b32.xlu0 %v8049_v1, %s12505_s7 }
0x12b9   : > { %8088 = vrot.lane.b32.xlu1 %v8053_v4, %s12505_s7 }
0x12bb   : > { %8066 = vrot.lane.b32.xlu0 %v8009_v2, %s12505_s7 }
0x12bd   : > { %8068 = vrot.lane.b32.xlu1 %v8013_v56, %s12505_s7 }
0x12bf   : > { %8070 = vrot.lane.b32.xlu0 %v8017_v8, %s12505_s7 }
0x12c1   : > { %8072 = vrot.lane.b32.xlu1 %v8021_v3, %s12505_s7 }
0x12c3   : > { %8074 = vrot.lane.b32.xlu0 %v8025_v13, %s12505_s7 }
0x12c5   : > { %8076 = vrot.lane.b32.xlu1 %v8029_v25, %s12505_s7 }
0x12c7   : > { %8090 = vrot.lane.b32.xlu0 %v8057_v53, %s12505_s7 }
0x12c9   : > { %8092 = vrot.lane.b32.xlu1 %v8061_v7, %s12505_s7 }
0x12cb   : > { %7425 = vrot.lane.b32.xlu0 %v15429_v29, %s12506_s18 }
0x12cd   : > { %7429 = vrot.lane.b32.xlu1 %v15443_v20, %s12506_s18 }
0x12cf   : > { %7427 = vrot.lane.b32.xlu0 %v15424_v62, %s12506_s18 }
0x12d1   : > { %7431 = vrot.lane.b32.xlu1 %v15438_v42, %s12506_s18 }
0x12fd   : > { %v7638_v1 = vpop.permute.xlu0 %7637 }
0x12ff   : > { %v7640_v37 = vpop.permute.xlu1 %7639 }
0x1301   : > { %v7622_v4 = vpop.permute.xlu0 %7621 }
0x1302   : > { %v7669_v20 = vsel %vm998_vm9, %v15416_v45, %v7622_v4 }
0x1303   : > { %v7624_v2 = vpop.permute.xlu1 %7623 }
0x1304   : > { %v7670_v29 = vsel %vm998_vm9, %v15422_v12, %v7624_v2 }
0x1305   : > { %v7642_v56 = vpop.permute.xlu0 %7641  ;;  %v7701_v53 = vcombine.low %v7669_v20, %v7670_v29 }
0x1307   : > { %v7644_v8 = vpop.permute.xlu1 %7643  ;;  %v7709_v21 = vrot.slane %v7701_v53, %v12603_v17 }
0x1309   : > { %v7646_v3 = vpop.permute.xlu0 %7645 }
0x130b   : > { %v7648_v13 = vpop.permute.xlu1 %7647 }
0x130d   : > { %v7626_v25 = vpop.permute.xlu0 %7625 }
0x130e   : > { %v7671_v42 = vsel %vm998_vm9, %v15465_v36, %v7626_v25  ;;  %v7680_v36 = vsel %vm998_vm9, %v15447_v60, %v7644_v8 }
0x130f   : > { %v7628_v62 = vpop.permute.xlu1 %7627 }
0x1310   : > { %v7672_v7 = vsel %vm998_vm9, %v15473_v35, %v7628_v62  ;;  %v7678_v35 = vsel %vm998_vm9, %v15411_v15, %v7640_v37 }
0x1311   : > { %v7702_v9 = vcombine.low %v7671_v42, %v7672_v7  ;;  %v7630_v24 = vpop.permute.xlu0 %7629 }
0x1312   : > { %v7673_v25 = vsel %vm998_vm9, %v15480_v32, %v7630_v24 }
0x1313   : > { %v7716_v16 = vrot.slane %v7702_v9, %v12603_v17  ;;  %v7632_v50 = vpop.permute.xlu1 %7631  ;;  %v7679_v9 = vsel %vm998_vm9, %v15434_v49, %v7642_v56 }
0x1314   : > { %v7674_v20 = vsel %vm998_vm9, %v15485_v34, %v7632_v50  ;;  %v7682_v50 = vsel %vm998_vm9, %v15456_v14, %v7648_v13 }
0x1315   : > { %v7717_v12 = vcombine.low %v7709_v21, %v7716_v16  ;;  %v7650_v2 = vpop.permute.xlu0 %7649  ;;  %v7677_v21 = vsel %vm998_vm9, %v15406_v30, %v7638_v1  ;;  %v7736_v16 = vcombine.low %v7679_v9, %v7680_v36  ;;  %v7718_v62 = vcombine.low %v7673_v25, %v7674_v20  ;;  %v15696_v20 = vld [vmem:[%s16894_s2] sm:$0xff] }
0x1316   : > { %v7735_v53 = vcombine.low %v7677_v21, %v7678_v35  ;;  %v7683_v49 = vsel %vm998_vm9, %v15495_v22, %v7650_v2  ;;  %v7681_v1 = vsel %vm998_vm9, %v15451_v31, %v7646_v3 }
0x1317   : > { %12004 = vmatprep.mubr.msk.f32.mxu0 %vm573_vm8, %v7717_v12  ;;  %v7652_v45 = vpop.permute.xlu1 %7651  ;;  %v7752_v56 = vcombine.low %v7681_v1, %v7682_v50  ;;  %v7726_v14 = vrot.slane %v7718_v62, %v12603_v17 }
0x1318   : > { %v7684_v60 = vsel %vm998_vm9, %v15501_v10, %v7652_v45  ;;  %v7750_v10 = vrot.slane %v7736_v16, %v12603_v17  ;;  %v7743_v42 = vrot.slane %v7735_v53, %v12603_v17 }
0x1319   : > { %v15656_v4 = vpop.permute.xlu0 %8078  ;;  %v7753_v24 = vcombine.low %v7683_v49, %v7684_v60  ;;  %v7760_v2 = vrot.slane %v7752_v56, %v12603_v17 }
0x131b   : > { %v8081_v29 = vpop.permute.xlu1 %8080 }
0x131d   : > { %v7634_v8 = vpop.permute.xlu0 %7633 }
0x131e   : > { %v7675_v30 = vsel %vm998_vm9, %v15525_v28, %v7634_v8  ;;  %v7767_v28 = vrot.slane %v7753_v24, %v12603_v17 }
0x131f   : > { %v7636_v15 = vpop.permute.xlu1 %7635 }
0x1320   : > { %v7676_v34 = vsel %vm998_vm9, %v15531_v48, %v7636_v15  ;;  %v7751_v48 = vcombine.low %v7743_v42, %v7750_v10  ;;  %v7768_v31 = vcombine.low %v7760_v2, %v7767_v28  ;;  %v16972_v2 = vld [vmem:[#allocation5_spill] sm:$0xff] }
0x1321   : > { %v7719_v32 = vcombine.low %v7675_v30, %v7676_v34  ;;  %v8063_v37 = vpop.permute.xlu0 %8062  ;;  %v8119_v30 = vsel %vm998_vm9, %v15508_v6, %v8081_v29 }
0x1322   : > { %v8110_v9 = vsel %vm998_vm9, %v15536_v61, %v8063_v37 }
0x1323   : > { %v7733_v13 = vrot.slane %v7719_v32, %v12603_v17  ;;  %v8065_v22 = vpop.permute.xlu1 %8064 }
0x1324   : > { %v8111_v35 = vsel %vm998_vm9, %v15542_v40, %v8065_v22 }
0x1325   : > { %v7734_v7 = vcombine.low %v7726_v14, %v7733_v13  ;;  %v8083_v12 = vpop.permute.xlu0 %8082  ;;  %v8142_v16 = vcombine.low %v8110_v9, %v8111_v35 }
0x1327   : > { %12005 = vmatmul.mubr.msk.f32.vlgmr.msra.gmra.mrb[44].mxu0 %vm573_vm8, %v7734_v7  ;;  %v8085_v45 = vpop.permute.xlu1 %8084  ;;  %v8150_v62 = vrot.slane %v8142_v16, %v12603_v17 }
0x1328   : > { %12007 = vmatprep.mubr.msk.f32.mxu0 %vm573_vm8, %v7751_v48  ;;  %v8121_v15 = vsel %vm998_vm9, %v15560_v43, %v8085_v45  ;;  %v8118_v43 = vsel %vm998_vm9, %v15504_v44, %v15656_v4 }
0x1329   : > { %v8087_v3 = vpop.permute.xlu0 %8086  ;;  %v8176_v1 = vcombine.low %v8118_v43, %v8119_v30 }
0x132a   : > { %v8122_v44 = vsel %vm998_vm9, %v15565_v57, %v8087_v3 }
0x132b   : > { %12008 = vmatmul.mubr.msk.f32.gmra.mrb[46].mxu0 %vm573_vm8, %v7768_v31  ;;  %v8089_v36 = vpop.permute.xlu1 %8088 }
0x132c   : > { %12024 = vmatprep.mubr.msk.f32.mxu0 %vm573_vm8, %v15696_v20  ;;  %v8123_v6 = vsel %vm998_vm9, %v15570_v19, %v8089_v36  ;;  %v8184_v19 = vrot.slane %v8176_v1, %v12603_v17 }
0x132d   : > { %v8067_v21 = vpop.permute.xlu0 %8066  ;;  %v8193_v56 = vcombine.low %v8122_v44, %v8123_v6 }
0x132e   : > { %v8112_v60 = vsel %vm998_vm9, %v15579_v26, %v8067_v21  ;;  %v8120_v26 = vsel %vm998_vm9, %v15550_v38, %v8083_v12 }
0x132f   : > { %v8069_v25 = vpop.permute.xlu1 %8068  ;;  %v8177_v34 = vcombine.low %v8120_v26, %v8121_v15  ;;  %v8201_v57 = vrot.slane %v8193_v56, %v12603_v17  ;;  %v8332_v56 = vsub.f32 1.0, %v15246_v23 }
0x1330   : > { %v8113_v40 = vsel %vm998_vm9, %v15587_v46, %v8069_v25 }
0x1331   : > { %v8143_v8 = vcombine.low %v8112_v60, %v8113_v40  ;;  %v8071_v53 = vpop.permute.xlu0 %8070  ;;  %v8191_v37 = vrot.slane %v8177_v34, %v12603_v17 }
0x1332   : > { %v8114_v24 = vsel %vm998_vm9, %v15592_v52, %v8071_v53 }
0x1333   : > { %v8157_v50 = vrot.slane %v8143_v8, %v12603_v17  ;;  %v8073_v49 = vpop.permute.xlu1 %8072  ;;  %v8192_v7 = vcombine.low %v8184_v19, %v8191_v37 }
0x1334   : > { %v8115_v61 = vsel %vm998_vm9, %v15597_v5, %v8073_v49 }
0x1335   : > { %v8158_v46 = vcombine.low %v8150_v62, %v8157_v50  ;;  %v8075_v32 = vpop.permute.xlu0 %8074  ;;  %v8159_v10 = vcombine.low %v8114_v24, %v8115_v61 }
0x1336   : > { %v8116_v38 = vsel %vm998_vm9, %v15607_v41, %v8075_v32 }
0x1337   : > { %12014 = vmatprep.mubr.msk.f32.mxu1 %vm573_vm8, %v8158_v46  ;;  %v8077_v5 = vpop.permute.xlu1 %8076  ;;  %v8167_v14 = vrot.slane %v8159_v10, %v12603_v17 }
0x1338   : > { %v8117_v29 = vsel %vm998_vm9, %v15613_v0, %v8077_v5 }
0x1339   : > { %v8160_v52 = vcombine.low %v8116_v38, %v8117_v29  ;;  %v8091_v4 = vpop.permute.xlu0 %8090 }
0x133a   : > { %v8124_v41 = vsel %vm998_vm9, %v15621_v58, %v8091_v4 }
0x133b   : > { %v8174_v13 = vrot.slane %v8160_v52, %v12603_v17  ;;  %v8093_v22 = vpop.permute.xlu1 %8092  ;;  %v16973_v52 = vld [vmem:[#allocation4_spill] sm:$0xff] }
0x133c   : > { %v8125_v0 = vsel %vm998_vm9, %v15627_v54, %v8093_v22  ;;  %v8327_v37 = vmul.f32 %v15248_v51, %v16973_v52 }
0x133d   : > { %v8175_v42 = vcombine.low %v8167_v14, %v8174_v13  ;;  %v8194_v28 = vcombine.low %v8124_v41, %v8125_v0  ;;  %v7426_v9 = vpop.permute.xlu0 %7425  ;;  %v8333_v13 = vsub.f32 1.0, %v15266_v47 }
0x133e   : > { %v7437_v53 = vadd.f32 %v15234_v27, %v7426_v9 }
0x133f   : > { %v8208_v48 = vrot.slane %v8194_v28, %v12603_v17  ;;  %12015 = vmatmul.mubr.msk.f32.vlgmr.msra.gmra.mrb[20].mxu1 %vm573_vm8, %v8175_v42  ;;  %v7430_v21 = vpop.permute.xlu1 %7429  ;;  %v16975_v42 = vld [vmem:[#allocation10_spill] sm:$0xff]  ;;  %v16976_v28 = vld [vmem:[#allocation11_spill] sm:$0xff] }
0x1340   : > { %12017 = vmatprep.mubr.msk.f32.mxu1 %vm573_vm8, %v8192_v7  ;;  %12203 = vmatpush3.bf16.msra.mxu1 %v16945_v55  ;;  %v7439_v49 = vadd.f32 %v15242_v39, %v7430_v21  ;;  %v8329_v7 = vmul.f32 %v15266_v47, %v16976_v28 }
0x1341   : > { %v8209_v12 = vcombine.low %v8201_v57, %v8208_v48  ;;  %12205 = vmatprep.subr.bf16.mxu1 %v16972_v2  ;;  %v7428_v16 = vpop.permute.xlu0 %7427 }
0x1342   : > { %v7438_v61 = vadd.f32 %v15231_v59, %v7428_v16 }
0x1343   : > { %12018 = vmatmul.mubr.msk.f32.gmra.mrb[22].mxu1 %vm573_vm8, %v8209_v12  ;;  %v7432_v25 = vpop.permute.xlu1 %7431 }
0x1344   : > { %v7440_v32 = vadd.f32 %v15239_v11, %v7432_v25  ;;  %v8331_v11 = vsub.f32 1.0, %v15248_v51  ;;  %v8328_v51 = vmul.f32 %v15246_v23, %v16975_v42 }
0x13fa   : > { %v12006_v58 = vpop.f32.mrb[44].mxu0 }
0x13fb   : > { %7868 = vrot.lane.b32.xlu0 %v12006_v58, %s12506_s18  ;;  %v7843_v54 = vpop.f32.mrb[45].mxu0 }
0x13fe   : > { %v12009_v45 = vpop.f32.mrb[46].mxu0 }
0x13ff   : > { %7866 = vrot.lane.b32.xlu0 %v7843_v54, %s12506_s18  ;;  %7872 = vrot.lane.b32.xlu1 %v12009_v45, %s12506_s18  ;;  %v7853_v31 = vpop.f32.mrb[47].mxu0  ;;  %v16979_v45 = vld [vmem:[#allocation12_spill] sm:$0xff] }
0x1403   : > { %7870 = vrot.lane.b32.xlu1 %v7853_v31, %s12506_s18  ;;  %v8330_v31 = vmul.f32 %v15260_v63, %v16979_v45 }
0x1412   : > { %v12016_v3 = vpop.f32.mrb[20].mxu1 }
0x1413   : > { %v8284_v36 = vpop.f32.mrb[21].mxu1 }
0x1414   : > { %8307 = vrot.lane.b32.xlu0 %v8284_v36, %s12506_s18  ;;  %v8334_v36 = vsub.f32 1.0, %v15260_v63 }
0x1416   : > { %v12019_v55 = vpop.f32.mrb[22].mxu1 }
0x1417   : > { %v8294_v35 = vpop.f32.mrb[23].mxu1 }
0x1418   : > { %8309 = vrot.lane.b32.xlu0 %v12016_v3, %s12506_s18  ;;  %8311 = vrot.lane.b32.xlu1 %v8294_v35, %s12506_s18 }
0x141c   : > { %8313 = vrot.lane.b32.xlu1 %v12019_v55, %s12506_s18 }
0x146d   : > { %v7869_v60 = vpop.permute.xlu0 %7868 }
0x146e   : > { %v7879_v26 = vadd.f32 %v7869_v60, %v7438_v61 }
0x1471   : > { %v7873_v40 = vpop.permute.xlu1 %7872  ;;  %v7867_v8 = vpop.permute.xlu0 %7866 }
0x1472   : > { %v7878_v62 = vadd.f32 %v7867_v8, %v7437_v53  ;;  %v7881_v5 = vadd.f32 %v7873_v40, %v7440_v32 }
0x1475   : > { %v7871_v15 = vpop.permute.xlu1 %7870 }
0x1476   : > { %v7880_v46 = vadd.f32 %v7871_v15, %v7439_v49 }
0x1486   : > { %v8308_v50 = vpop.permute.xlu0 %8307 }
0x1487   : > { %v8319_v30 = vadd.f32 %v8308_v50, %v7878_v62 }
0x1489   : > { %12414 = vtanh.f32 %v8319_v30 }
0x148a   : > { %v8310_v34 = vpop.permute.xlu0 %8309  ;;  %v8312_v24 = vpop.permute.xlu1 %8311 }
0x148b   : > { %v8320_v43 = vadd.f32 %v8310_v34, %v7879_v26  ;;  %v8321_v10 = vadd.f32 %v8312_v24, %v7880_v46 }
0x148d   : > { %12416 = vtanh.f32 %v8320_v43 }
0x148e   : > { %12418 = vtanh.f32 %v8321_v10  ;;  %v8314_v27 = vpop.permute.xlu1 %8313 }
0x148f   : > { %v8322_v1 = vadd.f32 %v8314_v27, %v7881_v5 }
0x1491   : > { %12420 = vtanh.f32 %v8322_v1 }
0x1493   : > { %v12415_v6 = vpop.eup %12414 }
0x1494   : > { %8339 = vrot.lane.b32.xlu0 %v12415_v6, %s12505_s7 }
0x1497   : > { %v12417_v59 = vpop.eup %12416 }
0x1498   : > { %v12419_v39 = vpop.eup %12418  ;;  %8341 = vrot.lane.b32.xlu0 %v12417_v59, %s12505_s7 }
0x1499   : > { %8343 = vrot.lane.b32.xlu1 %v12419_v39, %s12505_s7 }
0x149b   : > { %v12421_v38 = vpop.eup %12420 }
0x149d   : > { %8345 = vrot.lane.b32.xlu1 %v12421_v38, %s12505_s7 }
0x1506   : > { %v8340_v29 = vpop.permute.xlu0 %8339 }
0x1507   : > { %v8351_v44 = vmul.f32 %v8340_v29, %v8331_v11 }
0x1509   : > { %v15764_v4 = vadd.f32 %v8351_v44, %v8327_v37 }
0x150a   : > { %v8342_v14 = vpop.permute.xlu0 %8341 }
0x150b   : > { %16974 = vst [vmem:[#allocation5_spill] sm:$0xff] %v15764_v4  ;;  %v8363_v22 = vcombine.high %v15764_v4, %v15764_v4  ;;  %v15772_v19 = vrot.slane %v15764_v4, %v12603_v17  ;;  %v8352_v41 = vmul.f32 %v8342_v14, %v8332_v56  ;;  %v8344_v0 = vpop.permute.xlu1 %8343 }
0x150c   : > { %v8353_v57 = vmul.f32 %v8344_v0, %v8333_v13 }
0x150d   : > { %v15779_v48 = vrot.slane %v8363_v22, %v12603_v17  ;;  %v8378_v12 = vcombine.high %v15772_v19, %v15772_v19  ;;  %v15783_v58 = vadd.f32 %v8352_v41, %v8328_v51  ;;  %v8434_v47 = vrot.slane %v15772_v19, %v12657_v33 }
0x150e   : > { %v15785_v54 = vadd.f32 %v8353_v57, %v8329_v7  ;;  %v8518_v35 = vrot.slane %v15772_v19, %v12606_v18 }
0x150f   : > { %16977 = vst [vmem:[#allocation4_spill] sm:$0xff] %v15783_v58  ;;  %v15791_v23 = vcombine.high %v15779_v48, %v15779_v48  ;;  %v8438_v3 = vrot.slane %v8378_v12, %v12657_v33  ;;  %v8346_v55 = vpop.permute.xlu1 %8345  ;;  %v8380_v9 = vcombine.high %v15783_v58, %v15783_v58  ;;  %v8387_v21 = vrot.slane %v15783_v58, %v12603_v17 }
0x1510   : > { %16978 = vst [vmem:[#allocation10_spill] sm:$0xff] %v15785_v54  ;;  %v8397_v16 = vcombine.high %v15785_v54, %v15785_v54  ;;  %v8442_v25 = vrot.slane %v15779_v48, %v12657_v33  ;;  %v8522_v60 = vrot.slane %v8378_v12, %v12606_v18  ;;  %v8404_v63 = vrot.slane %v15785_v54, %v12603_v17 }
0x1511   : > { %v8354_v40 = vmul.f32 %v8346_v55, %v8334_v36  ;;  %v8526_v8 = vrot.slane %v15779_v48, %v12606_v18  ;;  %v15813_v53 = vrot.slane %v8380_v9, %v12603_v17  ;;  %v8395_v15 = vcombine.high %v8387_v21, %v8387_v21 }
0x1512   : > { %v8411_v62 = vrot.slane %v8397_v16, %v12603_v17  ;;  %v8412_v50 = vcombine.high %v8404_v63, %v8404_v63  ;;  %v8446_v61 = vrot.slane %v15791_v23, %v12657_v33  ;;  %v8495_v30 = vsel %vm466_vm1, %v8438_v3, %v8434_v47 }
0x1513   : > { %v15816_v49 = vadd.f32 %v8354_v40, %v8330_v31  ;;  %v8534_v26 = vrot.slane %v8387_v21, %v12606_v18  ;;  %v8466_v34 = vrot.slane %v8404_v63, %v12657_v33  ;;  %v8396_v24 = vcombine.high %v15813_v53, %v15813_v53 }
0x1514   : > { %v8413_v46 = vcombine.high %v8411_v62, %v8411_v62  ;;  %v8470_v32 = vrot.slane %v8412_v50, %v12657_v33  ;;  %v8550_v43 = vrot.slane %v8404_v63, %v12606_v18  ;;  %v8474_v27 = vrot.slane %v8411_v62, %v12657_v33 }
0x1515   : > { %16980 = vst [vmem:[#allocation11_spill] sm:$0xff] %v15816_v49  ;;  %v8414_v10 = vcombine.high %v15816_v49, %v15816_v49  ;;  %v8421_v5 = vrot.slane %v15816_v49, %v12603_v17  ;;  %v8450_v1 = vrot.slane %v8387_v21, %v12657_v33  ;;  %v8454_v6 = vrot.slane %v8395_v15, %v12657_v33 }
0x1516   : > { %v8458_v59 = vrot.slane %v15813_v53, %v12657_v33  ;;  %v8462_v38 = vrot.slane %v8396_v24, %v12657_v33  ;;  %v8496_v11 = vsel %vm468_vm2, %v8442_v25, %v8495_v30  ;;  %v8478_v37 = vrot.slane %v8413_v46, %v12657_v33 }
0x1517   : > { %v8428_v39 = vrot.slane %v8414_v10, %v12603_v17  ;;  %v8429_v29 = vcombine.high %v8421_v5, %v8421_v5  ;;  %v8497_v52 = vsel %vm470_vm3, %v8446_v61, %v8496_v11  ;;  %v8482_v44 = vrot.slane %v8421_v5, %v12657_v33 }
0x1518   : > { %v8502_v56 = vsel %vm466_vm1, %v8470_v32, %v8466_v34  ;;  %v8558_v14 = vrot.slane %v8411_v62, %v12606_v18  ;;  %v8498_v13 = vsel %vm472_vm4, %v8450_v1, %v8497_v52  ;;  %v8530_v51 = vrot.slane %v15791_v23, %v12606_v18 }
0x1519   : > { %v8430_v22 = vcombine.high %v8428_v39, %v8428_v39  ;;  %v8486_v19 = vrot.slane %v8429_v29, %v12657_v33  ;;  %v8499_v41 = vsel %vm474_vm5, %v8454_v6, %v8498_v13  ;;  %v8490_v0 = vrot.slane %v8428_v39, %v12657_v33 }
0x151a   : > { %v8503_v42 = vsel %vm468_vm2, %v8474_v27, %v8502_v56  ;;  %v8554_v28 = vrot.slane %v8412_v50, %v12606_v18  ;;  %v8500_v7 = vsel %vm476_vm6, %v8458_v59, %v8499_v41  ;;  %v8538_v31 = vrot.slane %v8395_v15, %v12606_v18 }
0x151b   : > { %v8494_v57 = vrot.slane %v8430_v22, %v12657_v33  ;;  %v8504_v48 = vsel %vm470_vm3, %v8478_v37, %v8503_v42  ;;  %v8501_v12 = vsel %vm478_vm7, %v8462_v38, %v8500_v7  ;;  %v8579_v47 = vsel %vm466_vm1, %v8522_v60, %v8518_v35  ;;  %v15916_v38 = vld [vmem:[%s16894_s2 + $0x8] sm:$0xff]  ;;  %v16982_v37 = vld [vmem:[#allocation3_spill] sm:$0xff] }
0x151c   : > { %v8505_v45 = vsel %vm472_vm4, %v8482_v44, %v8504_v48  ;;  %8509 = vrot.lane.b32.xlu0 %v8501_v12, %s12505_s7  ;;  %v8542_v3 = vrot.slane %v15813_v53, %v12606_v18  ;;  %v8580_v36 = vsel %vm468_vm2, %v8526_v8, %v8579_v47  ;;  %v8562_v55 = vrot.slane %v8413_v46, %v12606_v18 }
0x151d   : > { %v8506_v23 = vsel %vm474_vm5, %v8486_v19, %v8505_v45  ;;  %v8566_v9 = vrot.slane %v8421_v5, %v12606_v18  ;;  %v8546_v16 = vrot.slane %v8396_v24, %v12606_v18  ;;  %v8581_v25 = vsel %vm470_vm3, %v8530_v51, %v8580_v36 }
0x151e   : > { %v8507_v21 = vsel %vm476_vm6, %v8490_v0, %v8506_v23  ;;  %v8582_v60 = vsel %vm472_vm4, %v8534_v26, %v8581_v25  ;;  %v8570_v63 = vrot.slane %v8429_v29, %v12606_v18  ;;  %v8586_v40 = vsel %vm466_vm1, %v8554_v28, %v8550_v43  ;;  %v15927_v29 = vld [vmem:[%s16894_s2 + $0x10] sm:$0xff] }
0x151f   : > { %v8508_v35 = vsel %vm478_vm7, %v8494_v57, %v8507_v21  ;;  %v8583_v8 = vsel %vm474_vm5, %v8538_v31, %v8582_v60  ;;  %v8574_v53 = vrot.slane %v8428_v39, %v12606_v18  ;;  %v8587_v62 = vsel %vm468_vm2, %v8558_v14, %v8586_v40  ;;  %v16981_v39 = vld [vmem:[#allocation6_spill] sm:$0xff] }
0x1520   : > { %8511 = vrot.lane.b32.xlu1 %v8508_v35, %s12505_s7  ;;  %8690 = vrot.lane.b32.xlu0 %v15764_v4, %s12505_s7  ;;  %v8584_v15 = vsel %vm476_vm6, %v8542_v3, %v8583_v8  ;;  %v8578_v50 = vrot.slane %v8430_v22, %v12606_v18  ;;  %v8588_v61 = vsel %vm470_vm3, %v8562_v55, %v8587_v62 }
0x1521   : > { %v8585_v30 = vsel %vm478_vm7, %v8546_v16, %v8584_v15  ;;  %v8589_v26 = vsel %vm472_vm4, %v8566_v9, %v8588_v61 }
0x1522   : > { %v8590_v46 = vsel %vm474_vm5, %v8570_v63, %v8589_v26 }
0x1523   : > { %v8591_v34 = vsel %vm476_vm6, %v8574_v53, %v8590_v46 }
0x1524   : > { %8692 = vrot.lane.b32.xlu1 %v15783_v58, %s12505_s7  ;;  %8694 = vrot.lane.b32.xlu0 %v15785_v54, %s12505_s7  ;;  %v8592_v24 = vsel %vm478_vm7, %v8578_v50, %v8591_v34 }
0x1528   : > { %8696 = vrot.lane.b32.xlu1 %v15816_v49, %s12505_s7 }
0x158e   : > { %v8510_v32 = vpop.permute.xlu0 %8509 }
0x158f   : > { %v8595_v43 = vsel %vm573_vm8, %v8510_v32, %v8585_v30 }
0x1590   : > { %11541 = vst.msk [vmem:[%s12581_s17 + $0x20] sm:$0xff] %vm3253_vm10, %v8595_v43 }
0x1592   : > { %v8512_v10 = vpop.permute.xlu1 %8511  ;;  %v15896_v5 = vpop.permute.xlu0 %8690 }
0x1593   : > { %v8596_v27 = vsel %vm573_vm8, %v8512_v10, %v8592_v24  ;;  %12034 = vmatprep.mubr.msk.f32.mxu1 %vm573_vm8, %v15896_v5 }
0x1594   : > { %11542 = vst.msk [vmem:[%s12581_s17 + $0x28] sm:$0xff] %vm3253_vm10, %v8596_v27  ;;  %v12196_v1 = vpack.c.bf16 %v8596_v27, %v8595_v43 }
0x1596   : > { %12197 = vmatprep.subr.bf16.mxu0 %v12196_v1  ;;  %v15903_v6 = vpop.permute.xlu1 %8692  ;;  %v15905_v59 = vpop.permute.xlu0 %8694 }
0x1597   : > { %12199 = vmatpush3.bf16.msra.mxu0 %v12196_v1  ;;  %12035 = vmatmul.mubr.msk.f32.vlgmr.msra.gmra.mrb[24].mxu1 %vm573_vm8, %v15903_v6 }
0x1598   : > { %12037 = vmatprep.mubr.msk.f32.mxu1 %vm573_vm8, %v15905_v59  ;;  %12207 = vmatpush3.bf16.msra.mxu1 %v16972_v2  ;;  %v15934_v2 = vld [vmem:[%s16894_s2 + $0x18] sm:$0xff] }
0x1599   : > { %12209 = vmatprep.subr.bf16.mxu1 %v16981_v39 }
0x159a   : > { %12025 = vmatmul.mubr.msk.f32.vlgmr.msra.gmra.mrb[48].mxu0 %vm573_vm8, %v15916_v38  ;;  %v15920_v11 = vpop.permute.xlu1 %8696 }
0x159b   : > { %12038 = vmatmul.mubr.msk.f32.gmra.mrb[26].mxu1 %vm573_vm8, %v15920_v11  ;;  %12027 = vmatprep.mubr.msk.f32.mxu0 %vm573_vm8, %v15927_v29 }
0x159e   : > { %12028 = vmatmul.mubr.msk.f32.gmra.mrb[50].mxu0 %vm573_vm8, %v15934_v2 }
0x159f   : > { %12064 = vmatprep.mubr.msk.f32.mxu0 %vm573_vm8, %v15696_v20 }
0x166d   : > { %v12026_v52 = vpop.f32.mrb[48].mxu0 }
0x166e   : > { %v8853_v44 = vrot.slane %v12026_v52, %v16982_v37  ;;  %v8671_v56 = vpop.f32.mrb[49].mxu0  ;;  %v8846_v14 = vcombine.high %v12026_v52, %v12026_v52 }
0x166f   : > { %v8804_v13 = vrot.slane %v8671_v56, %v16982_v37  ;;  %v8797_v45 = vcombine.high %v8671_v56, %v8671_v56 }
0x1670   : > { %v8861_v22 = vcombine.high %v8853_v44, %v8853_v44  ;;  %v15943_v19 = vrot.slane %v8853_v44, %v16982_v37  ;;  %v8860_v20 = vrot.slane %v8846_v14, %v16982_v37 }
0x1671   : > { %v8812_v41 = vcombine.high %v8804_v13, %v8804_v13  ;;  %v12029_v0 = vpop.f32.mrb[50].mxu0  ;;  %v15952_v28 = vrot.slane %v8804_v13, %v16982_v37  ;;  %v8811_v36 = vrot.slane %v8797_v45, %v16982_v37 }
0x1672   : > { %v15946_v42 = vrot.slane %v8861_v22, %v16982_v37  ;;  %v15948_v51 = vpop.f32.mrb[51].mxu0  ;;  %v8946_v57 = vrot.slane %v15943_v19, %v12657_v33  ;;  %v8862_v12 = vcombine.high %v8860_v20, %v8860_v20  ;;  %v15965_v31 = vcombine.high %v15943_v19, %v15943_v19 }
0x1673   : > { %v15955_v7 = vrot.slane %v8812_v41, %v16982_v37  ;;  %v8914_v47 = vrot.slane %v15952_v28, %v12657_v33  ;;  %v15979_v55 = vrot.slane %v8860_v20, %v16982_v37  ;;  %v8813_v25 = vcombine.high %v8811_v36, %v8811_v36 }
0x1674   : > { %v8950_v48 = vrot.slane %v15946_v42, %v12657_v33  ;;  %8991 = vrot.lane.b32.xlu0 %v8946_v57, %s12505_s7  ;;  %v15973_v3 = vcombine.high %v15946_v42, %v15946_v42  ;;  %v15982_v9 = vrot.slane %v8862_v12, %v16982_v37  ;;  %v8954_v21 = vrot.slane %v15965_v31, %v12657_v33 }
0x1675   : > { %v8918_v23 = vrot.slane %v15955_v7, %v12657_v33  ;;  %v15992_v35 = vcombine.high %v15952_v28, %v15952_v28  ;;  %v8962_v60 = vrot.slane %v15979_v55, %v12657_v33  ;;  %v16000_v40 = vcombine.high %v15955_v7, %v15955_v7 }
0x1676   : > { %8993 = vrot.lane.b32.xlu1 %v8950_v48, %s12505_s7  ;;  %v8958_v16 = vrot.slane %v15973_v3, %v12657_v33  ;;  %v8966_v63 = vrot.slane %v15982_v9, %v12657_v33  ;;  %v9278_v8 = vrot.slane %v12029_v0, %v16982_v37  ;;  %v16006_v53 = vrot.slane %v8811_v36, %v16982_v37 }
0x1677   : > { %v16009_v62 = vrot.slane %v8813_v25, %v16982_v37  ;;  %v8922_v15 = vrot.slane %v15992_v35, %v12657_v33  ;;  %v8926_v50 = vrot.slane %v16000_v40, %v12657_v33  ;;  %v16023_v46 = vcombine.high %v15979_v55, %v15979_v55 }
0x1678   : > { %8975 = vrot.lane.b32.xlu0 %v8914_v47, %s12505_s7  ;;  %v9286_v61 = vcombine.high %v9278_v8, %v9278_v8  ;;  %v8930_v30 = vrot.slane %v16006_v53, %v12657_v33  ;;  %v16027_v34 = vcombine.high %v15982_v9, %v15982_v9  ;;  %v16031_v24 = vrot.slane %v9278_v8, %v16982_v37 }
0x1679   : > { %v8934_v26 = vrot.slane %v16009_v62, %v12657_v33  ;;  %v9229_v43 = vrot.slane %v15948_v51, %v16982_v37  ;;  %v8970_v10 = vrot.slane %v16023_v46, %v12657_v33  ;;  %v9271_v44 = vcombine.high %v12029_v0, %v12029_v0 }
0x167a   : > { %8977 = vrot.lane.b32.xlu1 %v8918_v23, %s12505_s7  ;;  %v16034_v32 = vrot.slane %v9286_v61, %v16982_v37  ;;  %v8974_v27 = vrot.slane %v16027_v34, %v12657_v33  ;;  %v9371_v1 = vrot.slane %v16031_v24, %v12657_v33  ;;  %v16051_v14 = vcombine.high %v16006_v53, %v16006_v53 }
0x167b   : > { %v9237_v56 = vcombine.high %v9229_v43, %v9229_v43  ;;  %v16055_v13 = vcombine.high %v16009_v62, %v16009_v62  ;;  %v9285_v22 = vrot.slane %v9271_v44, %v16982_v37  ;;  %v16061_v41 = vrot.slane %v9229_v43, %v16982_v37 }
0x167c   : > { %8995 = vrot.lane.b32.xlu0 %v8954_v21, %s12505_s7  ;;  %v9375_v52 = vrot.slane %v16034_v32, %v12657_v33  ;;  %v8938_v20 = vrot.slane %v16051_v14, %v12657_v33  ;;  %v9222_v12 = vcombine.high %v15948_v51, %v15948_v51  ;;  %v16076_v45 = vcombine.high %v16031_v24, %v16031_v24 }
0x167d   : > { %v16064_v0 = vrot.slane %v9237_v56, %v16982_v37  ;;  %v8942_v57 = vrot.slane %v16055_v13, %v12657_v33  ;;  %v9287_v48 = vcombine.high %v9285_v22, %v9285_v22  ;;  %v9339_v47 = vrot.slane %v16061_v41, %v12657_v33 }
0x167e   : > { %8997 = vrot.lane.b32.xlu1 %v8958_v16, %s12505_s7  ;;  %v16084_v36 = vcombine.high %v16034_v32, %v16034_v32  ;;  %v9236_v51 = vrot.slane %v9222_v12, %v16982_v37  ;;  %v16090_v21 = vrot.slane %v9285_v22, %v16982_v37  ;;  %v9379_v25 = vrot.slane %v16076_v45, %v12657_v33 }
0x167f   : > { %v9343_v23 = vrot.slane %v16064_v0, %v12657_v33  ;;  %v16093_v16 = vrot.slane %v9287_v48, %v16982_v37  ;;  %v16103_v8 = vcombine.high %v16061_v41, %v16061_v41  ;;  %v16111_v61 = vcombine.high %v16064_v0, %v16064_v0 }
0x1680   : > { %8999 = vrot.lane.b32.xlu0 %v8962_v60, %s12505_s7  ;;  %v9383_v60 = vrot.slane %v16084_v36, %v12657_v33 }
0x1681   : > { %v9347_v43 = vrot.slane %v16103_v8, %v12657_v33 }
0x1682   : > { %9001 = vrot.lane.b32.xlu1 %v8966_v63, %s12505_s7  ;;  %v9238_v63 = vcombine.high %v9236_v51, %v9236_v51 }
0x1684   : > { %8979 = vrot.lane.b32.xlu0 %v8922_v15, %s12505_s7  ;;  %v9387_v15 = vrot.slane %v16090_v21, %v12657_v33 }
0x1686   : > { %8981 = vrot.lane.b32.xlu1 %v8926_v50, %s12505_s7  ;;  %v9391_v50 = vrot.slane %v16093_v16, %v12657_v33 }
0x1688   : > { %8983 = vrot.lane.b32.xlu0 %v8930_v30, %s12505_s7  ;;  %v16116_v30 = vrot.slane %v9236_v51, %v16982_v37 }
0x168a   : > { %8985 = vrot.lane.b32.xlu1 %v8934_v26, %s12505_s7  ;;  %v16119_v26 = vrot.slane %v9238_v63, %v16982_v37 }
0x168c   : > { %9003 = vrot.lane.b32.xlu0 %v8970_v10, %s12505_s7  ;;  %v9351_v10 = vrot.slane %v16111_v61, %v12657_v33  ;;  %v16137_v44 = vcombine.high %v16119_v26, %v16119_v26 }
0x168e   : > { %9005 = vrot.lane.b32.xlu1 %v8974_v27, %s12505_s7  ;;  %v9355_v27 = vrot.slane %v16116_v30, %v12657_v33  ;;  %v9367_v22 = vrot.slane %v16137_v44, %v12657_v33 }
0x1690   : > { %9416 = vrot.lane.b32.xlu0 %v9371_v1, %s12505_s7  ;;  %v9359_v1 = vrot.slane %v16119_v26, %v12657_v33 }
0x1692   : > { %9418 = vrot.lane.b32.xlu1 %v9375_v52, %s12505_s7  ;;  %v16133_v52 = vcombine.high %v16116_v30, %v16116_v30 }
0x1694   : > { %8987 = vrot.lane.b32.xlu0 %v8938_v20, %s12505_s7  ;;  %v9363_v56 = vrot.slane %v16133_v52, %v12657_v33  ;;  %v16147_v20 = vcombine.high %v16090_v21, %v16090_v21 }
0x1696   : > { %8989 = vrot.lane.b32.xlu1 %v8942_v57, %s12505_s7  ;;  %v16151_v57 = vcombine.high %v16093_v16, %v16093_v16  ;;  %v9395_v48 = vrot.slane %v16147_v20, %v12657_v33 }
0x1698   : > { %9400 = vrot.lane.b32.xlu0 %v9339_v47, %s12505_s7  ;;  %v9399_v12 = vrot.slane %v16151_v57, %v12657_v33 }
0x169a   : > { %9402 = vrot.lane.b32.xlu1 %v9343_v23, %s12505_s7 }
0x169c   : > { %9420 = vrot.lane.b32.xlu0 %v9379_v25, %s12505_s7 }
0x169e   : > { %9422 = vrot.lane.b32.xlu1 %v9383_v60, %s12505_s7 }
0x16a0   : > { %9424 = vrot.lane.b32.xlu0 %v9387_v15, %s12505_s7 }
0x16a2   : > { %9426 = vrot.lane.b32.xlu1 %v9391_v50, %s12505_s7 }
0x16a4   : > { %9404 = vrot.lane.b32.xlu0 %v9347_v43, %s12505_s7 }
0x16a6   : > { %9406 = vrot.lane.b32.xlu1 %v9351_v10, %s12505_s7 }
0x16a8   : > { %9408 = vrot.lane.b32.xlu0 %v9355_v27, %s12505_s7 }
0x16aa   : > { %9410 = vrot.lane.b32.xlu1 %v9359_v1, %s12505_s7 }
0x16ac   : > { %9412 = vrot.lane.b32.xlu0 %v9363_v56, %s12505_s7 }
0x16ae   : > { %9414 = vrot.lane.b32.xlu1 %v9367_v22, %s12505_s7 }
0x16b0   : > { %9428 = vrot.lane.b32.xlu0 %v9395_v48, %s12505_s7 }
0x16b2   : > { %9430 = vrot.lane.b32.xlu1 %v9399_v12, %s12505_s7 }
0x16e6   : > { %v8992_v47 = vpop.permute.xlu0 %8991 }
0x16e8   : > { %v8994_v23 = vpop.permute.xlu1 %8993 }
0x16ea   : > { %v8976_v51 = vpop.permute.xlu0 %8975 }
0x16eb   : > { %v9023_v10 = vsel %vm998_vm9, %v15952_v28, %v8976_v51 }
0x16ec   : > { %v8978_v25 = vpop.permute.xlu1 %8977 }
0x16ed   : > { %v9024_v43 = vsel %vm998_vm9, %v15955_v7, %v8978_v25 }
0x16ee   : > { %v8996_v60 = vpop.permute.xlu0 %8995  ;;  %v9055_v27 = vcombine.low %v9023_v10, %v9024_v43 }
0x16f0   : > { %v8998_v63 = vpop.permute.xlu1 %8997  ;;  %v9063_v49 = vrot.slane %v9055_v27, %v12603_v17  ;;  %v9033_v27 = vsel %vm998_vm9, %v15965_v31, %v8996_v60 }
0x16f1   : > { %v9034_v51 = vsel %vm998_vm9, %v15973_v3, %v8998_v63 }
0x16f2   : > { %v9000_v15 = vpop.permute.xlu0 %8999 }
0x16f4   : > { %v9002_v50 = vpop.permute.xlu1 %9001 }
0x16f6   : > { %v8980_v1 = vpop.permute.xlu0 %8979 }
0x16f7   : > { %v9025_v22 = vsel %vm998_vm9, %v15992_v35, %v8980_v1 }
0x16f8   : > { %v8982_v56 = vpop.permute.xlu1 %8981 }
0x16f9   : > { %v9026_v48 = vsel %vm998_vm9, %v16000_v40, %v8982_v56  ;;  %v9032_v40 = vsel %vm998_vm9, %v15946_v42, %v8994_v23 }
0x16fa   : > { %v9056_v12 = vcombine.low %v9025_v22, %v9026_v48  ;;  %v8984_v58 = vpop.permute.xlu0 %8983 }
0x16fb   : > { %v9027_v1 = vsel %vm998_vm9, %v16006_v53, %v8984_v58 }
0x16fc   : > { %v9070_v54 = vrot.slane %v9056_v12, %v12603_v17  ;;  %v8986_v4 = vpop.permute.xlu1 %8985 }
0x16fd   : > { %v9028_v10 = vsel %vm998_vm9, %v16009_v62, %v8986_v4  ;;  %v9036_v4 = vsel %vm998_vm9, %v15982_v9, %v9002_v50 }
0x16fe   : > { %v9071_v7 = vcombine.low %v9063_v49, %v9070_v54  ;;  %v9004_v25 = vpop.permute.xlu0 %9003  ;;  %v9031_v54 = vsel %vm998_vm9, %v15943_v19, %v8992_v47  ;;  %v9090_v49 = vcombine.low %v9033_v27, %v9034_v51  ;;  %v9072_v56 = vcombine.low %v9027_v1, %v9028_v10 }
0x16ff   : > { %v9089_v63 = vcombine.low %v9031_v54, %v9032_v40  ;;  %v9037_v31 = vsel %vm998_vm9, %v16023_v46, %v9004_v25  ;;  %v9035_v47 = vsel %vm998_vm9, %v15979_v55, %v9000_v15  ;;  %v16983_v15 = vld [vmem:[#allocation9_spill] sm:$0xff] }
0x1700   : > { %12044 = vmatprep.mubr.msk.f32.mxu1 %vm573_vm8, %v9071_v7  ;;  %v9006_v28 = vpop.permute.xlu1 %9005  ;;  %v9106_v23 = vcombine.low %v9035_v47, %v9036_v4  ;;  %v9080_v60 = vrot.slane %v9072_v56, %v12603_v17 }
0x1701   : > { %v9038_v3 = vsel %vm998_vm9, %v16027_v34, %v9006_v28  ;;  %v9104_v34 = vrot.slane %v9090_v49, %v12603_v17  ;;  %v9097_v48 = vrot.slane %v9089_v63, %v12603_v17 }
0x1702   : > { %v9417_v43 = vpop.permute.xlu0 %9416  ;;  %v9107_v58 = vcombine.low %v9037_v31, %v9038_v3  ;;  %v9114_v7 = vrot.slane %v9106_v23, %v12603_v17 }
0x1704   : > { %v9419_v35 = vpop.permute.xlu1 %9418 }
0x1705   : > { %v9457_v31 = vsel %vm998_vm9, %v16034_v32, %v9419_v35 }
0x1706   : > { %v8988_v22 = vpop.permute.xlu0 %8987 }
0x1707   : > { %v9029_v19 = vsel %vm998_vm9, %v16051_v14, %v8988_v22  ;;  %v9121_v14 = vrot.slane %v9107_v58, %v12603_v17 }
0x1708   : > { %v8990_v42 = vpop.permute.xlu1 %8989 }
0x1709   : > { %v9030_v62 = vsel %vm998_vm9, %v16055_v13, %v8990_v42  ;;  %v9105_v13 = vcombine.low %v9097_v48, %v9104_v34  ;;  %v9122_v55 = vcombine.low %v9114_v7, %v9121_v14 }
0x170a   : > { %v9073_v53 = vcombine.low %v9029_v19, %v9030_v62  ;;  %v9401_v50 = vpop.permute.xlu0 %9400 }
0x170b   : > { %v9448_v27 = vsel %vm998_vm9, %v16061_v41, %v9401_v50 }
0x170c   : > { %v9087_v9 = vrot.slane %v9073_v53, %v12603_v17  ;;  %v9403_v46 = vpop.permute.xlu1 %9402 }
0x170d   : > { %v9449_v10 = vsel %vm998_vm9, %v16064_v0, %v9403_v46 }
0x170e   : > { %v9088_v12 = vcombine.low %v9080_v60, %v9087_v9  ;;  %v9421_v25 = vpop.permute.xlu0 %9420  ;;  %v9480_v54 = vcombine.low %v9448_v27, %v9449_v10  ;;  %v16264_v10 = vld [vmem:[%s12576_s13 + $0x70] sm:$0xff] }
0x1710   : > { %12045 = vmatmul.mubr.msk.f32.vlgmr.msra.gmra.mrb[24].mxu1 %vm573_vm8, %v9088_v12  ;;  %v9423_v28 = vpop.permute.xlu1 %9422  ;;  %v9488_v56 = vrot.slane %v9480_v54, %v12603_v17 }
0x1711   : > { %12047 = vmatprep.mubr.msk.f32.mxu1 %vm573_vm8, %v9105_v13  ;;  %12211 = vmatpush3.bf16.msra.mxu1 %v16981_v39  ;;  %v9459_v22 = vsel %vm998_vm9, %v16084_v36, %v9423_v28  ;;  %v9456_v36 = vsel %vm998_vm9, %v16031_v24, %v9417_v43 }
0x1712   : > { %12225 = vmatprep.subr.bf16.mxu1 %v16983_v15  ;;  %v9425_v51 = vpop.permute.xlu0 %9424 }
0x1713   : > { %v9460_v24 = vsel %vm998_vm9, %v16090_v21, %v9425_v51  ;;  %v16261_v51 = vld [vmem:[%s12576_s13 + $0x78] sm:$0xff] }
0x1714   : > { %12048 = vmatmul.mubr.msk.f32.gmra.mrb[26].mxu1 %vm573_vm8, %v9122_v55  ;;  %v9427_v40 = vpop.permute.xlu1 %9426 }
0x1715   : > { %v9461_v32 = vsel %vm998_vm9, %v16093_v16, %v9427_v40 }
0x1716   : > { %v9405_v49 = vpop.permute.xlu0 %9404  ;;  %v9531_v43 = vcombine.low %v9460_v24, %v9461_v32 }
0x1717   : > { %v9450_v3 = vsel %vm998_vm9, %v16103_v8, %v9405_v49  ;;  %v9458_v8 = vsel %vm998_vm9, %v16076_v45, %v9421_v25 }
0x1718   : > { %v9407_v1 = vpop.permute.xlu1 %9406  ;;  %v9515_v19 = vcombine.low %v9458_v8, %v9459_v22  ;;  %v9539_v14 = vrot.slane %v9531_v43, %v12603_v17 }
0x1719   : > { %v9451_v39 = vsel %vm998_vm9, %v16111_v61, %v9407_v1 }
0x171a   : > { %v9481_v63 = vcombine.low %v9450_v3, %v9451_v39  ;;  %v9409_v42 = vpop.permute.xlu0 %9408 }
0x171b   : > { %v9452_v62 = vsel %vm998_vm9, %v16116_v30, %v9409_v42  ;;  %v9529_v30 = vrot.slane %v9515_v19, %v12603_v17 }
0x171c   : > { %v9495_v0 = vrot.slane %v9481_v63, %v12603_v17  ;;  %v9411_v4 = vpop.permute.xlu1 %9410 }
0x171d   : > { %v9453_v41 = vsel %vm998_vm9, %v16119_v26, %v9411_v4  ;;  %v9514_v26 = vcombine.low %v9456_v36, %v9457_v31 }
0x171e   : > { %v9496_v61 = vcombine.low %v9488_v56, %v9495_v0  ;;  %v9497_v58 = vcombine.low %v9452_v62, %v9453_v41  ;;  %v9413_v53 = vpop.permute.xlu0 %9412 }
0x171f   : > { %v9454_v45 = vsel %vm998_vm9, %v16133_v52, %v9413_v53  ;;  %v9522_v52 = vrot.slane %v9514_v26, %v12603_v17 }
0x1720   : > { %12054 = vmatprep.mubr.msk.f32.mxu1 %vm573_vm8, %v9496_v61  ;;  %v9415_v34 = vpop.permute.xlu1 %9414  ;;  %v9505_v23 = vrot.slane %v9497_v58, %v12603_v17 }
0x1721   : > { %v9455_v35 = vsel %vm998_vm9, %v16137_v44, %v9415_v34  ;;  %v9530_v48 = vcombine.low %v9522_v52, %v9529_v30 }
0x1722   : > { %v9498_v47 = vcombine.low %v9454_v45, %v9455_v35  ;;  %v9429_v9 = vpop.permute.xlu0 %9428 }
0x1723   : > { %v9462_v44 = vsel %vm998_vm9, %v16147_v20, %v9429_v9  ;;  %v16253_v20 = vld [vmem:[%s12576_s13 + $0x68] sm:$0xff] }
0x1724   : > { %v9512_v60 = vrot.slane %v9498_v47, %v12603_v17  ;;  %v9431_v16 = vpop.permute.xlu1 %9430 }
0x1725   : > { %v9463_v50 = vsel %vm998_vm9, %v16151_v57, %v9431_v16  ;;  %v16256_v57 = vld [vmem:[%s12576_s13 + $0x60] sm:$0xff] }
0x1726   : > { %v9513_v46 = vcombine.low %v9505_v23, %v9512_v60  ;;  %v9532_v21 = vcombine.low %v9462_v44, %v9463_v50 }
0x1728   : > { %v9546_v12 = vrot.slane %v9532_v21, %v12603_v17  ;;  %12055 = vmatmul.mubr.msk.f32.vlgmr.msra.gmra.mrb[24].mxu1 %vm573_vm8, %v9513_v46 }
0x1729   : > { %12057 = vmatprep.mubr.msk.f32.mxu1 %vm573_vm8, %v9530_v48  ;;  %12227 = vmatpush3.bf16.msra.mxu1 %v16983_v15 }
0x172a   : > { %v9547_v13 = vcombine.low %v9539_v14, %v9546_v12 }
0x172c   : > { %12058 = vmatmul.mubr.msk.f32.gmra.mrb[26].mxu1 %vm573_vm8, %v9547_v13 }
0x17fb   : > { %v12056_v7 = vpop.f32.mrb[24].mxu1 }
0x17fc   : > { %v12240_v25 = vadd.f32 %v12056_v7, %v16253_v20  ;;  %v9622_v28 = vpop.f32.mrb[25].mxu1 }
0x17fd   : > { %v12241_v55 = vadd.f32 %v16256_v57, %v9622_v28 }
0x17fe   : > { %v11564_v40 = vmul.f32 -1.442695, %v12240_v25 }
0x17ff   : > { %v11563_v27 = vmul.f32 -1.442695, %v12241_v55  ;;  %v12059_v15 = vpop.f32.mrb[26].mxu1 }
0x1800   : > { %12422 = vpow2.f32 %v11564_v40  ;;  %v12242_v54 = vadd.f32 %v12059_v15, %v16261_v51  ;;  %v9632_v49 = vpop.f32.mrb[27].mxu1 }
0x1801   : > { %12424 = vpow2.f32 %v11563_v27  ;;  %v12243_v1 = vadd.f32 %v16264_v10, %v9632_v49 }
0x1802   : > { %v11566_v3 = vmul.f32 -1.442695, %v12242_v54 }
0x1803   : > { %v11565_v39 = vmul.f32 -1.442695, %v12243_v1 }
0x1804   : > { %12426 = vpow2.f32 %v11566_v3 }
0x1805   : > { %12428 = vpow2.f32 %v11565_v39 }
0x180a   : > { %v12423_v63 = vpop.eup %12422 }
0x180b   : > { %v12425_v56 = vpop.eup %12424  ;;  %v9658_v22 = vadd.f32 1.0, %v12423_v63 }
0x180c   : > { %v9657_v0 = vadd.f32 1.0, %v12425_v56 }
0x180d   : > { %12430 = vrcp.f32 %v9658_v22 }
0x180e   : > { %v12427_v42 = vpop.eup %12426  ;;  %12432 = vrcp.f32 %v9657_v0 }
0x180f   : > { %v12429_v4 = vpop.eup %12428  ;;  %v9660_v41 = vadd.f32 1.0, %v12427_v42 }
0x1810   : > { %v9659_v31 = vadd.f32 1.0, %v12429_v4 }
0x1811   : > { %12434 = vrcp.f32 %v9660_v41 }
0x1812   : > { %12436 = vrcp.f32 %v9659_v31 }
0x1817   : > { %v16268_v8 = vpop.eup %12430 }
0x1818   : > { %v16270_v61 = vpop.eup %12432  ;;  %v16274_v19 = vmul.f32 %v16268_v8, %v15903_v6 }
0x1819   : > { %v16278_v62 = vmul.f32 %v16270_v61, %v15896_v5 }
0x181a   : > { %v9698_v36 = vcombine.high %v16274_v19, %v16274_v19  ;;  %v16296_v5 = vrot.slane %v16274_v19, %v12603_v17 }
0x181b   : > { %v16282_v58 = vpop.eup %12434  ;;  %v9681_v53 = vcombine.high %v16278_v62, %v16278_v62  ;;  %v9688_v34 = vrot.slane %v16278_v62, %v12603_v17 }
0x181c   : > { %v16288_v26 = vpop.eup %12436  ;;  %v16292_v6 = vmul.f32 %v16282_v58, %v15920_v11  ;;  %v16299_v32 = vrot.slane %v9698_v36, %v12603_v17  ;;  %v9848_v46 = vrot.slane %v16296_v5, %v12606_v18 }
0x181d   : > { %v16303_v45 = vmul.f32 %v16288_v26, %v15905_v59  ;;  %v9695_v35 = vrot.slane %v9681_v53, %v12603_v17  ;;  %v9696_v47 = vcombine.high %v9688_v34, %v9688_v34  ;;  %v16318_v59 = vcombine.high %v16296_v5, %v16296_v5 }
0x181e   : > { %v9732_v30 = vcombine.high %v16292_v6, %v16292_v6  ;;  %v16310_v11 = vrot.slane %v16292_v6, %v12603_v17  ;;  %v16322_v60 = vcombine.high %v16299_v32, %v16299_v32  ;;  %v9832_v14 = vrot.slane %v9688_v34, %v12606_v18 }
0x181f   : > { %v9697_v24 = vcombine.high %v9695_v35, %v9695_v35  ;;  %v9715_v43 = vcombine.high %v16303_v45, %v16303_v45  ;;  %v9722_v23 = vrot.slane %v16303_v45, %v12603_v17  ;;  %v9836_v16 = vrot.slane %v9696_v47, %v12606_v18 }
0x1820   : > { %v16325_v9 = vrot.slane %v9732_v30, %v12603_v17  ;;  %v9840_v50 = vrot.slane %v9695_v35, %v12606_v18  ;;  %v9747_v21 = vcombine.high %v16310_v11, %v16310_v11  ;;  %v9852_v55 = vrot.slane %v16318_v59, %v12606_v18 }
0x1821   : > { %v9729_v52 = vrot.slane %v9715_v43, %v12603_v17  ;;  %v9730_v44 = vcombine.high %v9722_v23, %v9722_v23  ;;  %v9844_v12 = vrot.slane %v9697_v24, %v12606_v18  ;;  %v9864_v7 = vrot.slane %v9722_v23, %v12606_v18 }
0x1822   : > { %v9748_v48 = vcombine.high %v16325_v9, %v16325_v9  ;;  %v9856_v40 = vrot.slane %v16299_v32, %v12606_v18  ;;  %v9860_v27 = vrot.slane %v16322_v60, %v12606_v18  ;;  %v9893_v15 = vsel %vm466_vm1, %v9836_v16, %v9832_v14 }
0x1823   : > { %v9731_v13 = vcombine.high %v9729_v52, %v9729_v52  ;;  %v9868_v25 = vrot.slane %v9730_v44, %v12606_v18  ;;  %v9872_v28 = vrot.slane %v9729_v52, %v12606_v18  ;;  %v9880_v49 = vrot.slane %v16310_v11, %v12606_v18 }
0x1824   : > { %v9894_v1 = vsel %vm468_vm2, %v9840_v50, %v9893_v15  ;;  %v9884_v39 = vrot.slane %v9747_v21, %v12606_v18  ;;  %v9888_v63 = vrot.slane %v16325_v9, %v12606_v18  ;;  %v9892_v0 = vrot.slane %v9748_v48, %v12606_v18 }
0x1825   : > { %v9876_v54 = vrot.slane %v9731_v13, %v12606_v18  ;;  %v9900_v3 = vsel %vm466_vm1, %v9868_v25, %v9864_v7  ;;  %v9895_v56 = vsel %vm470_vm3, %v9844_v12, %v9894_v1  ;;  %v9752_v41 = vrot.slane %v9688_v34, %v12657_v33 }
0x1826   : > { %v9901_v22 = vsel %vm468_vm2, %v9872_v28, %v9900_v3  ;;  %v9896_v42 = vsel %vm472_vm4, %v9848_v46, %v9895_v56  ;;  %v9756_v53 = vrot.slane %v9696_v47, %v12657_v33  ;;  %v9760_v30 = vrot.slane %v9695_v35, %v12657_v33 }
0x1827   : > { %v9902_v4 = vsel %vm470_vm3, %v9876_v54, %v9901_v22  ;;  %v9897_v31 = vsel %vm474_vm5, %v9852_v55, %v9896_v42  ;;  %v9788_v50 = vrot.slane %v9730_v44, %v12657_v33  ;;  %v9792_v46 = vrot.slane %v9729_v52, %v12657_v33 }
0x1828   : > { %v9903_v36 = vsel %vm472_vm4, %v9880_v49, %v9902_v4  ;;  %v9898_v43 = vsel %vm476_vm6, %v9856_v40, %v9897_v31  ;;  %v9764_v34 = vrot.slane %v9697_v24, %v12657_v33  ;;  %v9784_v12 = vrot.slane %v9722_v23, %v12657_v33  ;;  %v16984_v4 = vld [vmem:[#allocation7_spill] sm:$0xff] }
0x1829   : > { %v9904_v16 = vsel %vm474_vm5, %v9884_v39, %v9903_v36  ;;  %v9796_v7 = vrot.slane %v9731_v13, %v12657_v33  ;;  %v9899_v47 = vsel %vm478_vm7, %v9860_v27, %v9898_v43  ;;  %v9813_v28 = vsel %vm466_vm1, %v9756_v53, %v9752_v41  ;;  %v16985_v41 = vld [vmem:[#allocation8_spill] sm:$0xff] }
0x182a   : > { %v9905_v14 = vsel %vm476_vm6, %v9888_v63, %v9904_v16  ;;  %v9820_v55 = vsel %vm466_vm1, %v9788_v50, %v9784_v12  ;;  %v9768_v52 = vrot.slane %v16296_v5, %v12657_v33  ;;  %v9800_v44 = vrot.slane %v16310_v11, %v12657_v33 }
0x182b   : > { %v9906_v35 = vsel %vm478_vm7, %v9892_v0, %v9905_v14  ;;  %v9814_v24 = vsel %vm468_vm2, %v9760_v30, %v9813_v28  ;;  %v9821_v23 = vsel %vm468_vm2, %v9792_v46, %v9820_v55  ;;  %v9772_v13 = vrot.slane %v16318_v59, %v12657_v33 }
0x182c   : > { %v12341_v25 = vpack.i.bf16 %v9906_v35, %v9899_v47  ;;  %v9804_v40 = vrot.slane %v9747_v21, %v12657_v33  ;;  %v9815_v27 = vsel %vm470_vm3, %v9764_v34, %v9814_v24  ;;  %v9822_v15 = vsel %vm470_vm3, %v9796_v7, %v9821_v23 }
0x182d   : > { %v9776_v5 = vrot.slane %v16299_v32, %v12657_v33  ;;  %v9808_v11 = vrot.slane %v16325_v9, %v12657_v33  ;;  %v9816_v54 = vsel %vm472_vm4, %v9768_v52, %v9815_v27  ;;  %v9823_v49 = vsel %vm472_vm4, %v9800_v44, %v9822_v15 }
0x182e   : > { %12342 = vrot.lane.b32.xlu0 %v12341_v25, %s12503_s25  ;;  %v9780_v1 = vrot.slane %v16322_v60, %v12657_v33  ;;  %v9812_v59 = vrot.slane %v9748_v48, %v12657_v33  ;;  %v9817_v21 = vsel %vm474_vm5, %v9772_v13, %v9816_v54  ;;  %v9824_v3 = vsel %vm474_vm5, %v9804_v40, %v9823_v49 }
0x182f   : > { %v9818_v39 = vsel %vm476_vm6, %v9776_v5, %v9817_v21  ;;  %v9825_v32 = vsel %vm476_vm6, %v9808_v11, %v9824_v3 }
0x1830   : > { %v9819_v63 = vsel %vm478_vm7, %v9780_v1, %v9818_v39  ;;  %v9826_v9 = vsel %vm478_vm7, %v9812_v59, %v9825_v32 }
0x18a0   : > { %v12343_v56 = vpop.permute.xlu0 %12342 }
0x18a1   : > { %v12345_v22 = vunpack.i.h.bf16 %v12343_v56  ;;  %v12344_v0 = vunpack.i.l.bf16 %v12343_v56 }
0x18a3   : > { %v9913_v42 = vsel %vm573_vm8, %v9819_v63, %v12344_v0  ;;  %v9914_v60 = vsel %vm573_vm8, %v9826_v9, %v12345_v22 }
0x18a4   : > { %v12212_v48 = vpack.c.bf16 %v9914_v60, %v9913_v42 }
0x18a6   : > { %12213 = vmatprep.subr.bf16.mxu0 %v12212_v48 }
0x18a7   : > { %12215 = vmatpush3.bf16.msra.mxu0 %v12212_v48 }
0x18a8   : > { %12217 = vmatprep.subr.bf16.mxu0 %v16984_v4 }
0x18aa   : > { %12065 = vmatmul.mubr.msk.f32.vlgmr.msra.gmra.mrb[52].mxu0 %vm573_vm8, %v15916_v38 }
0x18ab   : > { %12067 = vmatprep.mubr.msk.f32.mxu0 %vm573_vm8, %v15927_v29  ;;  %12219 = vmatpush3.bf16.msra.mxu0 %v16984_v4 }
0x18ac   : > { %12221 = vmatprep.subr.bf16.mxu0 %v16985_v41 }
0x18ae   : > { %12068 = vmatmul.mubr.msk.f32.gmra.mrb[54].mxu0 %vm573_vm8, %v15934_v2 }
0x18af   : > { %12074 = vmatprep.mubr.msk.f32.mxu0 %vm573_vm8, %v16278_v62 }
0x18b2   : > { %12075 = vmatmul.mubr.msk.f32.vlgmr.msra.gmra.mrb[56].mxu0 %vm573_vm8, %v16274_v19 }
0x18b3   : > { %12077 = vmatprep.mubr.msk.f32.mxu0 %vm573_vm8, %v16303_v45  ;;  %12223 = vmatpush3.bf16.msra.mxu0 %v16985_v41 }
0x18b6   : > { %12078 = vmatmul.mubr.msk.f32.gmra.mrb[58].mxu0 %vm573_vm8, %v16292_v6 }
0x197d   : > { %v12066_v38 = vpop.f32.mrb[52].mxu0 }
0x197e   : > { %v10171_v29 = vrot.slane %v12066_v38, %v16982_v37  ;;  %v9981_v31 = vpop.f32.mrb[53].mxu0  ;;  %v10164_v53 = vcombine.high %v12066_v38, %v12066_v38 }
0x197f   : > { %v10122_v2 = vrot.slane %v9981_v31, %v16982_v37  ;;  %v10115_v25 = vcombine.high %v9981_v31, %v9981_v31 }
0x1980   : > { %v10179_v36 = vcombine.high %v10171_v29, %v10171_v29  ;;  %v16428_v62 = vrot.slane %v10171_v29, %v16982_v37  ;;  %v10178_v50 = vrot.slane %v10164_v53, %v16982_v37 }
0x1981   : > { %v10130_v19 = vcombine.high %v10122_v2, %v10122_v2  ;;  %v16430_v30 = vpop.f32.mrb[54].mxu0  ;;  %v16438_v6 = vrot.slane %v10122_v2, %v16982_v37  ;;  %v10129_v40 = vrot.slane %v10115_v25, %v16982_v37 }
0x1982   : > { %v16433_v45 = vrot.slane %v10179_v36, %v16982_v37  ;;  %v16435_v43 = vpop.f32.mrb[55].mxu0  ;;  %v10264_v16 = vrot.slane %v16428_v62, %v12657_v33  ;;  %v16456_v7 = vcombine.high %v16428_v62, %v16428_v62  ;;  %v10180_v35 = vcombine.high %v10178_v50, %v10178_v50 }
0x1983   : > { %v16444_v46 = vrot.slane %v10130_v19, %v16982_v37  ;;  %v10232_v47 = vrot.slane %v16438_v6, %v12657_v33  ;;  %v16473_v24 = vrot.slane %v10178_v50, %v16982_v37  ;;  %v16487_v15 = vcombine.high %v16438_v6, %v16438_v6 }
0x1984   : > { %v10268_v34 = vrot.slane %v16433_v45, %v12657_v33  ;;  %10309 = vrot.lane.b32.xlu1 %v10264_v16, %s12505_s7  ;;  %v16469_v44 = vcombine.high %v16433_v45, %v16433_v45  ;;  %v10272_v23 = vrot.slane %v16456_v7, %v12657_v33  ;;  %v16478_v13 = vrot.slane %v10180_v35, %v16982_v37 }
0x1985   : > { %v16446_v14 = vpop.f32.mrb[56].mxu0  ;;  %v10236_v55 = vrot.slane %v16444_v46, %v12657_v33  ;;  %v10280_v5 = vrot.slane %v16473_v24, %v12657_v33  ;;  %v10131_v11 = vcombine.high %v10129_v40, %v10129_v40  ;;  %v16495_v49 = vcombine.high %v16444_v46, %v16444_v46 }
0x1986   : > { %v16451_v12 = vpop.f32.mrb[57].mxu0  ;;  %10311 = vrot.lane.b32.xlu0 %v10268_v34, %s12505_s7  ;;  %v10276_v27 = vrot.slane %v16469_v44, %v12657_v33  ;;  %v10284_v54 = vrot.slane %v16478_v13, %v12657_v33  ;;  %v10612_v1 = vrot.slane %v16430_v30, %v16982_v37  ;;  %v16502_v59 = vrot.slane %v10129_v40, %v16982_v37 }
0x1987   : > { %v10240_v21 = vrot.slane %v16487_v15, %v12657_v33  ;;  %v16507_v3 = vrot.slane %v10131_v11, %v16982_v37  ;;  %v10244_v39 = vrot.slane %v16495_v49, %v12657_v33  ;;  %v16517_v9 = vcombine.high %v16473_v24, %v16473_v24 }
0x1988   : > { %10293 = vrot.lane.b32.xlu1 %v10232_v47, %s12505_s7  ;;  %v10620_v32 = vcombine.high %v10612_v1, %v10612_v1  ;;  %v10248_v63 = vrot.slane %v16502_v59, %v12657_v33  ;;  %v16523_v22 = vcombine.high %v16478_v13, %v16478_v13  ;;  %v16526_v0 = vrot.slane %v10612_v1, %v16982_v37 }
0x1989   : > { %v16460_v28 = vpop.f32.mrb[58].mxu0  ;;  %v10252_v56 = vrot.slane %v16507_v3, %v12657_v33  ;;  %v10288_v60 = vrot.slane %v16517_v9, %v12657_v33  ;;  %v10563_v48 = vrot.slane %v16435_v43, %v16982_v37  ;;  %v16547_v29 = vcombine.high %v16502_v59, %v16502_v59 }
0x198a   : > { %v16465_v52 = vpop.f32.mrb[59].mxu0  ;;  %10295 = vrot.lane.b32.xlu0 %v10236_v55, %s12505_s7  ;;  %v16530_v42 = vrot.slane %v10620_v32, %v16982_v37  ;;  %v10292_v4 = vrot.slane %v16523_v22, %v12657_v33  ;;  %v10705_v41 = vrot.slane %v16526_v0, %v12657_v33  ;;  %v10605_v31 = vcombine.high %v16430_v30, %v16430_v30 }
0x198b   : > { %v10571_v2 = vcombine.high %v10563_v48, %v10563_v48  ;;  %v16553_v36 = vcombine.high %v16507_v3, %v16507_v3  ;;  %v16558_v53 = vrot.slane %v10563_v48, %v16982_v37  ;;  %v10256_v19 = vrot.slane %v16547_v29, %v12657_v33 }
0x198c   : > { %10313 = vrot.lane.b32.xlu1 %v10272_v23, %s12505_s7  ;;  %v10709_v38 = vrot.slane %v16530_v42, %v12657_v33  ;;  %v10619_v16 = vrot.slane %v10605_v31, %v16982_v37  ;;  %v16572_v34 = vcombine.high %v16526_v0, %v16526_v0  ;;  %v10556_v25 = vcombine.high %v16435_v43, %v16435_v43 }
0x198d   : > { %v16564_v50 = vrot.slane %v10571_v2, %v16982_v37  ;;  %v10260_v30 = vrot.slane %v16553_v36, %v12657_v33  ;;  %v10673_v47 = vrot.slane %v16558_v53, %v12657_v33  ;;  %v16582_v23 = vcombine.high %v16530_v42, %v16530_v42 }
0x198e   : > { %10315 = vrot.lane.b32.xlu0 %v10276_v27, %s12505_s7  ;;  %v10621_v35 = vcombine.high %v10619_v16, %v10619_v16  ;;  %v16587_v40 = vrot.slane %v10619_v16, %v16982_v37  ;;  %v10713_v27 = vrot.slane %v16572_v34, %v12657_v33  ;;  %v10570_v43 = vrot.slane %v10556_v25, %v16982_v37 }
0x198f   : > { %v10677_v55 = vrot.slane %v16564_v50, %v12657_v33  ;;  %v10717_v11 = vrot.slane %v16582_v23, %v12657_v33  ;;  %v16609_v32 = vcombine.high %v16564_v50, %v16564_v50 }
0x1990   : > { %10317 = vrot.lane.b32.xlu1 %v10280_v5, %s12505_s7  ;;  %v16592_v5 = vrot.slane %v10621_v35, %v16982_v37  ;;  %v10721_v1 = vrot.slane %v16587_v40, %v12657_v33  ;;  %v16643_v2 = vcombine.high %v16587_v40, %v16587_v40 }
0x1991   : > { %v10685_v48 = vrot.slane %v16609_v32, %v12657_v33 }
0x1992   : > { %10319 = vrot.lane.b32.xlu0 %v10284_v54, %s12505_s7  ;;  %v16601_v54 = vcombine.high %v16558_v53, %v16558_v53  ;;  %v16649_v16 = vcombine.high %v16592_v5, %v16592_v5 }
0x1994   : > { %10297 = vrot.lane.b32.xlu1 %v10240_v21, %s12505_s7  ;;  %v10572_v21 = vcombine.high %v10570_v43, %v10570_v43 }
0x1996   : > { %10299 = vrot.lane.b32.xlu0 %v10244_v39, %s12505_s7  ;;  %v10725_v39 = vrot.slane %v16592_v5, %v12657_v33 }
0x1998   : > { %10301 = vrot.lane.b32.xlu1 %v10248_v63, %s12505_s7  ;;  %v16614_v63 = vrot.slane %v10570_v43, %v16982_v37 }
0x199a   : > { %10303 = vrot.lane.b32.xlu0 %v10252_v56, %s12505_s7  ;;  %v10681_v56 = vrot.slane %v16601_v54, %v12657_v33 }
0x199c   : > { %10321 = vrot.lane.b32.xlu1 %v10288_v60, %s12505_s7  ;;  %v16619_v60 = vrot.slane %v10572_v21, %v16982_v37 }
0x199e   : > { %10323 = vrot.lane.b32.xlu0 %v10292_v4, %s12505_s7  ;;  %v10689_v4 = vrot.slane %v16614_v63, %v12657_v33  ;;  %v16635_v37 = vcombine.high %v16619_v60, %v16619_v60 }
0x19a0   : > { %10750 = vrot.lane.b32.xlu1 %v10705_v41, %s12505_s7  ;;  %v16629_v41 = vcombine.high %v16614_v63, %v16614_v63 }
0x19a2   : > { %10752 = vrot.lane.b32.xlu0 %v10709_v38, %s12505_s7  ;;  %v10693_v38 = vrot.slane %v16619_v60, %v12657_v33  ;;  %v10697_v31 = vrot.slane %v16629_v41, %v12657_v33 }
0x19a4   : > { %10305 = vrot.lane.b32.xlu1 %v10256_v19, %s12505_s7  ;;  %v10701_v19 = vrot.slane %v16635_v37, %v12657_v33 }
0x19a6   : > { %10307 = vrot.lane.b32.xlu0 %v10260_v30, %s12505_s7  ;;  %v10729_v30 = vrot.slane %v16643_v2, %v12657_v33 }
0x19a8   : > { %10734 = vrot.lane.b32.xlu1 %v10673_v47, %s12505_s7  ;;  %v10733_v47 = vrot.slane %v16649_v16, %v12657_v33 }
0x19aa   : > { %10736 = vrot.lane.b32.xlu0 %v10677_v55, %s12505_s7 }
0x19ac   : > { %10754 = vrot.lane.b32.xlu1 %v10713_v27, %s12505_s7 }
0x19ae   : > { %10756 = vrot.lane.b32.xlu0 %v10717_v11, %s12505_s7 }
0x19b0   : > { %10758 = vrot.lane.b32.xlu1 %v10721_v1, %s12505_s7 }
0x19b2   : > { %10760 = vrot.lane.b32.xlu0 %v10725_v39, %s12505_s7 }
0x19b4   : > { %10738 = vrot.lane.b32.xlu1 %v10681_v56, %s12505_s7 }
0x19b6   : > { %10740 = vrot.lane.b32.xlu0 %v10685_v48, %s12505_s7 }
0x19b8   : > { %10742 = vrot.lane.b32.xlu1 %v10689_v4, %s12505_s7 }
0x19ba   : > { %10744 = vrot.lane.b32.xlu0 %v10693_v38, %s12505_s7 }
0x19bc   : > { %10746 = vrot.lane.b32.xlu1 %v10697_v31, %s12505_s7 }
0x19be   : > { %10748 = vrot.lane.b32.xlu0 %v10701_v19, %s12505_s7 }
0x19c0   : > { %10762 = vrot.lane.b32.xlu1 %v10729_v30, %s12505_s7 }
0x19c2   : > { %10764 = vrot.lane.b32.xlu0 %v10733_v47, %s12505_s7 }
0x19c4   : > { %10097 = vrot.lane.b32.xlu1 %v16451_v12, %s12506_s18 }
0x19c6   : > { %10101 = vrot.lane.b32.xlu0 %v16465_v52, %s12506_s18 }
0x19c8   : > { %10099 = vrot.lane.b32.xlu1 %v16446_v14, %s12506_s18 }
0x19ca   : > { %10103 = vrot.lane.b32.xlu0 %v16460_v28, %s12506_s18 }
0x19f6   : > { %v10310_v35 = vpop.permute.xlu1 %10309 }
0x19f8   : > { %v10312_v25 = vpop.permute.xlu0 %10311 }
0x19fa   : > { %v10294_v55 = vpop.permute.xlu1 %10293 }
0x19fb   : > { %v10341_v52 = vsel %vm998_vm9, %v16438_v6, %v10294_v55 }
0x19fc   : > { %v10296_v27 = vpop.permute.xlu0 %10295 }
0x19fd   : > { %v10342_v12 = vsel %vm998_vm9, %v16444_v46, %v10296_v27 }
0x19fe   : > { %v10314_v43 = vpop.permute.xlu1 %10313  ;;  %v10373_v56 = vcombine.low %v10341_v52, %v10342_v12 }
0x19ff   : > { %v10351_v52 = vsel %vm998_vm9, %v16456_v7, %v10314_v43 }
0x1a00   : > { %v10316_v11 = vpop.permute.xlu0 %10315  ;;  %v10381_v31 = vrot.slane %v10373_v56, %v12603_v17 }
0x1a01   : > { %v10352_v27 = vsel %vm998_vm9, %v16469_v44, %v10316_v11 }
0x1a02   : > { %v10318_v1 = vpop.permute.xlu1 %10317  ;;  %v10408_v56 = vcombine.low %v10351_v52, %v10352_v27 }
0x1a03   : > { %v10353_v43 = vsel %vm998_vm9, %v16473_v24, %v10318_v1 }
0x1a04   : > { %v10320_v21 = vpop.permute.xlu0 %10319 }
0x1a06   : > { %v10298_v39 = vpop.permute.xlu1 %10297 }
0x1a07   : > { %v10343_v28 = vsel %vm998_vm9, %v16487_v15, %v10298_v39  ;;  %v10349_v39 = vsel %vm998_vm9, %v16428_v62, %v10310_v35 }
0x1a08   : > { %v10300_v14 = vpop.permute.xlu0 %10299 }
0x1a09   : > { %v10344_v48 = vsel %vm998_vm9, %v16495_v49, %v10300_v14  ;;  %v10350_v49 = vsel %vm998_vm9, %v16433_v45, %v10312_v25 }
0x1a0a   : > { %v10374_v4 = vcombine.low %v10343_v28, %v10344_v48  ;;  %v10302_v38 = vpop.permute.xlu1 %10301  ;;  %v10407_v28 = vcombine.low %v10349_v39, %v10350_v49 }
0x1a0b   : > { %v10345_v14 = vsel %vm998_vm9, %v16502_v59, %v10302_v38 }
0x1a0c   : > { %v10388_v19 = vrot.slane %v10374_v4, %v12603_v17  ;;  %v10304_v30 = vpop.permute.xlu0 %10303 }
0x1a0d   : > { %v10346_v12 = vsel %vm998_vm9, %v16507_v3, %v10304_v30  ;;  %v10354_v3 = vsel %vm998_vm9, %v16478_v13, %v10320_v21 }
0x1a0e   : > { %v10389_v46 = vcombine.low %v10381_v31, %v10388_v19  ;;  %v10322_v47 = vpop.permute.xlu1 %10321  ;;  %v10390_v48 = vcombine.low %v10345_v14, %v10346_v12  ;;  %v10424_v38 = vcombine.low %v10353_v43, %v10354_v3  ;;  %v10415_v31 = vrot.slane %v10407_v28, %v12603_v17 }
0x1a0f   : > { %v10355_v7 = vsel %vm998_vm9, %v16517_v9, %v10322_v47 }
0x1a10   : > { %12084 = vmatprep.mubr.msk.f32.mxu0 %vm573_vm8, %v10389_v46  ;;  %v10324_v6 = vpop.permute.xlu0 %10323  ;;  %v10398_v13 = vrot.slane %v10390_v48, %v12603_v17  ;;  %v10432_v46 = vrot.slane %v10424_v38, %v12603_v17 }
0x1a11   : > { %v10356_v44 = vsel %vm998_vm9, %v16523_v22, %v10324_v6  ;;  %v10422_v22 = vrot.slane %v10408_v56, %v12603_v17 }
0x1a12   : > { %v10751_v55 = vpop.permute.xlu1 %10750  ;;  %v10425_v59 = vcombine.low %v10355_v7, %v10356_v44 }
0x1a14   : > { %v10753_v15 = vpop.permute.xlu0 %10752 }
0x1a15   : > { %v10791_v3 = vsel %vm998_vm9, %v16530_v42, %v10753_v15 }
0x1a16   : > { %v10306_v11 = vpop.permute.xlu1 %10305 }
0x1a17   : > { %v10347_v62 = vsel %vm998_vm9, %v16547_v29, %v10306_v11  ;;  %v10439_v29 = vrot.slane %v10425_v59, %v12603_v17 }
0x1a18   : > { %v10308_v45 = vpop.permute.xlu0 %10307 }
0x1a19   : > { %v10348_v35 = vsel %vm998_vm9, %v16553_v36, %v10308_v45  ;;  %v10423_v36 = vcombine.low %v10415_v31, %v10422_v22  ;;  %v10440_v24 = vcombine.low %v10432_v46, %v10439_v29 }
0x1a1a   : > { %v10391_v25 = vcombine.low %v10347_v62, %v10348_v35  ;;  %v10735_v4 = vpop.permute.xlu1 %10734 }
0x1a1b   : > { %v10782_v49 = vsel %vm998_vm9, %v16558_v53, %v10735_v4 }
0x1a1c   : > { %v10405_v21 = vrot.slane %v10391_v25, %v12603_v17  ;;  %v10737_v9 = vpop.permute.xlu0 %10736 }
0x1a1d   : > { %v10783_v27 = vsel %vm998_vm9, %v16564_v50, %v10737_v9 }
0x1a1e   : > { %v10406_v19 = vcombine.low %v10398_v13, %v10405_v21  ;;  %v10755_v30 = vpop.permute.xlu1 %10754  ;;  %v10814_v52 = vcombine.low %v10782_v49, %v10783_v27 }
0x1a20   : > { %12085 = vmatmul.mubr.msk.f32.vlgmr.msra.gmra.mrb[60].mxu0 %vm573_vm8, %v10406_v19  ;;  %v10757_v47 = vpop.permute.xlu0 %10756  ;;  %v10822_v28 = vrot.slane %v10814_v52, %v12603_v17 }
0x1a21   : > { %12087 = vmatprep.mubr.msk.f32.mxu0 %vm573_vm8, %v10423_v36  ;;  %v10793_v48 = vsel %vm998_vm9, %v16582_v23, %v10757_v47  ;;  %v10790_v23 = vsel %vm998_vm9, %v16526_v0, %v10751_v55 }
0x1a22   : > { %v10759_v1 = vpop.permute.xlu1 %10758 }
0x1a23   : > { %v10794_v0 = vsel %vm998_vm9, %v16587_v40, %v10759_v1 }
0x1a24   : > { %12088 = vmatmul.mubr.msk.f32.gmra.mrb[62].mxu0 %vm573_vm8, %v10440_v24  ;;  %v10761_v6 = vpop.permute.xlu0 %10760 }
0x1a25   : > { %v10795_v42 = vsel %vm998_vm9, %v16592_v5, %v10761_v6 }
0x1a26   : > { %v10739_v12 = vpop.permute.xlu1 %10738  ;;  %v10865_v43 = vcombine.low %v10794_v0, %v10795_v42  ;;  %v11004_v0 = vsub.f32 1.0, %v16268_v8 }
0x1a27   : > { %v10784_v56 = vsel %vm998_vm9, %v16601_v54, %v10739_v12  ;;  %v10792_v54 = vsel %vm998_vm9, %v16572_v34, %v10755_v30 }
0x1a28   : > { %v10741_v39 = vpop.permute.xlu0 %10740  ;;  %v10849_v7 = vcombine.low %v10792_v54, %v10793_v48  ;;  %v10873_v40 = vrot.slane %v10865_v43, %v12603_v17  ;;  %v11005_v43 = vsub.f32 1.0, %v16288_v26 }
0x1a29   : > { %v10785_v14 = vsel %vm998_vm9, %v16609_v32, %v10741_v39 }
0x1a2a   : > { %v10815_v44 = vcombine.low %v10784_v56, %v10785_v14  ;;  %v10743_v11 = vpop.permute.xlu1 %10742 }
0x1a2b   : > { %v10786_v62 = vsel %vm998_vm9, %v16614_v63, %v10743_v11  ;;  %v10863_v63 = vrot.slane %v10849_v7, %v12603_v17 }
0x1a2c   : > { %v10829_v50 = vrot.slane %v10815_v44, %v12603_v17  ;;  %v10745_v45 = vpop.permute.xlu0 %10744 }
0x1a2d   : > { %v10787_v53 = vsel %vm998_vm9, %v16619_v60, %v10745_v45  ;;  %v10848_v60 = vcombine.low %v10790_v23, %v10791_v3 }
0x1a2e   : > { %v10830_v32 = vcombine.low %v10822_v28, %v10829_v50  ;;  %v10747_v35 = vpop.permute.xlu1 %10746  ;;  %v10831_v59 = vcombine.low %v10786_v62, %v10787_v53 }
0x1a2f   : > { %v10788_v34 = vsel %vm998_vm9, %v16629_v41, %v10747_v35  ;;  %v10856_v5 = vrot.slane %v10848_v60, %v12603_v17 }
0x1a30   : > { %12094 = vmatprep.mubr.msk.f32.mxu1 %vm573_vm8, %v10830_v32  ;;  %v10749_v25 = vpop.permute.xlu0 %10748  ;;  %v10839_v4 = vrot.slane %v10831_v59, %v12603_v17 }
0x1a31   : > { %v10789_v15 = vsel %vm998_vm9, %v16635_v37, %v10749_v25  ;;  %v10864_v31 = vcombine.low %v10856_v5, %v10863_v63 }
0x1a32   : > { %v10832_v22 = vcombine.low %v10788_v34, %v10789_v15  ;;  %v10763_v55 = vpop.permute.xlu1 %10762  ;;  %v16986_v34 = vld [vmem:[#allocation5_spill] sm:$0xff] }
0x1a33   : > { %v10796_v41 = vsel %vm998_vm9, %v16643_v2, %v10763_v55  ;;  %v10999_v15 = vmul.f32 %v16270_v61, %v16986_v34 }
0x1a34   : > { %v10846_v38 = vrot.slane %v10832_v22, %v12603_v17  ;;  %v10765_v13 = vpop.permute.xlu0 %10764 }
0x1a35   : > { %v10797_v37 = vsel %vm998_vm9, %v16649_v16, %v10765_v13 }
0x1a36   : > { %v10847_v21 = vcombine.low %v10839_v4, %v10846_v38  ;;  %v10866_v9 = vcombine.low %v10796_v41, %v10797_v37  ;;  %v10098_v6 = vpop.permute.xlu1 %10097  ;;  %v16987_v41 = vld [vmem:[#allocation4_spill] sm:$0xff] }
0x1a37   : > { %v10109_v14 = vadd.f32 %v16256_v57, %v10098_v6  ;;  %v11000_v37 = vmul.f32 %v16268_v8, %v16987_v41 }
0x1a38   : > { %v10880_v29 = vrot.slane %v10866_v9, %v12603_v17  ;;  %12095 = vmatmul.mubr.msk.f32.vlgmr.msra.gmra.mrb[28].mxu1 %vm573_vm8, %v10847_v21  ;;  %v10102_v27 = vpop.permute.xlu0 %10101  ;;  %v16988_v21 = vld [vmem:[#allocation10_spill] sm:$0xff] }
0x1a39   : > { %12097 = vmatprep.mubr.msk.f32.mxu1 %vm573_vm8, %v10864_v31  ;;  %v10111_v48 = vadd.f32 %v16264_v10, %v10102_v27 }
0x1a3a   : > { %v10881_v19 = vcombine.low %v10873_v40, %v10880_v29  ;;  %v10100_v49 = vpop.permute.xlu1 %10099 }
0x1a3b   : > { %v10110_v50 = vadd.f32 %v16253_v20, %v10100_v49 }
0x1a3c   : > { %12098 = vmatmul.mubr.msk.f32.gmra.mrb[30].mxu1 %vm573_vm8, %v10881_v19  ;;  %v10104_v12 = vpop.permute.xlu0 %10103 }
0x1a3d   : > { %v10112_v7 = vadd.f32 %v16261_v51, %v10104_v12  ;;  %v11003_v51 = vsub.f32 1.0, %v16270_v61  ;;  %v11001_v61 = vmul.f32 %v16288_v26, %v16988_v21 }
0x1af3   : > { %v12086_v36 = vpop.f32.mrb[60].mxu0 }
0x1af4   : > { %10540 = vrot.lane.b32.xlu1 %v12086_v36, %s12506_s18  ;;  %v10515_v2 = vpop.f32.mrb[61].mxu0 }
0x1af7   : > { %v12089_v30 = vpop.f32.mrb[62].mxu0 }
0x1af8   : > { %10538 = vrot.lane.b32.xlu1 %v10515_v2, %s12506_s18  ;;  %10544 = vrot.lane.b32.xlu0 %v12089_v30, %s12506_s18  ;;  %v10525_v16 = vpop.f32.mrb[63].mxu0 }
0x1afc   : > { %10542 = vrot.lane.b32.xlu0 %v10525_v16, %s12506_s18 }
0x1b0b   : > { %v12096_v46 = vpop.f32.mrb[28].mxu1 }
0x1b0c   : > { %v10956_v47 = vpop.f32.mrb[29].mxu1 }
0x1b0d   : > { %10979 = vrot.lane.b32.xlu1 %v10956_v47, %s12506_s18 }
0x1b0f   : > { %v12099_v24 = vpop.f32.mrb[30].mxu1 }
0x1b10   : > { %v10966_v1 = vpop.f32.mrb[31].mxu1 }
0x1b11   : > { %10981 = vrot.lane.b32.xlu1 %v12096_v46, %s12506_s18  ;;  %10983 = vrot.lane.b32.xlu0 %v10966_v1, %s12506_s18  ;;  %v16989_v1 = vld [vmem:[#allocation11_spill] sm:$0xff] }
0x1b12   : > { %v11002_v6 = vmul.f32 %v16282_v58, %v16989_v1 }
0x1b15   : > { %10985 = vrot.lane.b32.xlu0 %v12099_v24, %s12506_s18 }
0x1b66   : > { %v10541_v52 = vpop.permute.xlu1 %10540 }
0x1b67   : > { %v10551_v53 = vadd.f32 %v10541_v52, %v10110_v50 }
0x1b6a   : > { %v10545_v39 = vpop.permute.xlu0 %10544  ;;  %v10539_v56 = vpop.permute.xlu1 %10538 }
0x1b6b   : > { %v10550_v44 = vadd.f32 %v10539_v56, %v10109_v14  ;;  %v10553_v23 = vadd.f32 %v10545_v39, %v10112_v7  ;;  %v11006_v39 = vsub.f32 1.0, %v16282_v58 }
0x1b6e   : > { %v10543_v11 = vpop.permute.xlu0 %10542 }
0x1b6f   : > { %v10552_v3 = vadd.f32 %v10543_v11, %v10111_v48 }
0x1b7f   : > { %v10980_v28 = vpop.permute.xlu1 %10979 }
0x1b80   : > { %v10991_v45 = vadd.f32 %v10980_v28, %v10550_v44 }
0x1b82   : > { %12438 = vtanh.f32 %v10991_v45 }
0x1b83   : > { %v10982_v54 = vpop.permute.xlu1 %10981  ;;  %v10984_v32 = vpop.permute.xlu0 %10983 }
0x1b84   : > { %v10992_v62 = vadd.f32 %v10982_v54, %v10551_v53  ;;  %v10993_v35 = vadd.f32 %v10984_v32, %v10552_v3 }
0x1b86   : > { %12440 = vtanh.f32 %v10992_v62 }
0x1b87   : > { %12442 = vtanh.f32 %v10993_v35  ;;  %v10986_v57 = vpop.permute.xlu0 %10985 }
0x1b88   : > { %v10994_v59 = vadd.f32 %v10986_v57, %v10553_v23 }
0x1b8a   : > { %12444 = vtanh.f32 %v10994_v59 }
0x1b8c   : > { %v12439_v25 = vpop.eup %12438 }
0x1b8d   : > { %11011 = vrot.lane.b32.xlu1 %v12439_v25, %s12505_s7 }
0x1b90   : > { %v12441_v20 = vpop.eup %12440 }
0x1b91   : > { %v12443_v10 = vpop.eup %12442  ;;  %11013 = vrot.lane.b32.xlu1 %v12441_v20, %s12505_s7 }
0x1b92   : > { %11015 = vrot.lane.b32.xlu0 %v12443_v10, %s12505_s7 }
0x1b94   : > { %v12445_v60 = vpop.eup %12444 }
0x1b96   : > { %11017 = vrot.lane.b32.xlu0 %v12445_v60, %s12505_s7 }
0x1bff   : > { %v11012_v42 = vpop.permute.xlu1 %11011 }
0x1c00   : > { %v11023_v22 = vmul.f32 %v11012_v42, %v11003_v51 }
0x1c02   : > { %v11027_v63 = vadd.f32 %v11023_v22, %v10999_v15 }
0x1c03   : > { %v11014_v55 = vpop.permute.xlu1 %11013 }
0x1c04   : > { %v11035_v4 = vcombine.high %v11027_v63, %v11027_v63  ;;  %v11042_v38 = vrot.slane %v11027_v63, %v12603_v17  ;;  %v11024_v13 = vmul.f32 %v11014_v55, %v11004_v0  ;;  %v11016_v5 = vpop.permute.xlu0 %11015  ;;  %11272 = vrot.lane.b32.xlu1 %v11027_v63, %s12505_s7 }
0x1c05   : > { %v11025_v9 = vmul.f32 %v11016_v5, %v11005_v43 }
0x1c06   : > { %v11049_v31 = vrot.slane %v11035_v4, %v12603_v17  ;;  %v11050_v40 = vcombine.high %v11042_v38, %v11042_v38  ;;  %v11106_v29 = vrot.slane %v11042_v38, %v12657_v33  ;;  %v11190_v19 = vrot.slane %v11042_v38, %v12606_v18 }
0x1c07   : > { %v11028_v36 = vadd.f32 %v11024_v13, %v11000_v37  ;;  %v16785_v2 = vadd.f32 %v11025_v9, %v11001_v61 }
0x1c08   : > { %v16787_v30 = vcombine.high %v11049_v31, %v11049_v31  ;;  %v11110_v16 = vrot.slane %v11050_v40, %v12657_v33  ;;  %v11114_v8 = vrot.slane %v11049_v31, %v12657_v33  ;;  %v11194_v46 = vrot.slane %v11050_v40, %v12606_v18  ;;  %v11018_v27 = vpop.permute.xlu0 %11017 }
0x1c09   : > { %v11052_v26 = vcombine.high %v11028_v36, %v11028_v36  ;;  %v11059_v47 = vrot.slane %v11028_v36, %v12603_v17  ;;  %v11069_v24 = vcombine.high %v16785_v2, %v16785_v2  ;;  %11274 = vrot.lane.b32.xlu0 %v11028_v36, %s12505_s7  ;;  %v11198_v56 = vrot.slane %v11049_v31, %v12606_v18 }
0x1c0a   : > { %v11118_v49 = vrot.slane %v16787_v30, %v12657_v33  ;;  %v11167_v12 = vsel %vm466_vm1, %v11110_v16, %v11106_v29  ;;  %v11251_v52 = vsel %vm466_vm1, %v11194_v46, %v11190_v19  ;;  %v11202_v14 = vrot.slane %v16787_v30, %v12606_v18 }
0x1c0b   : > { %v11066_v44 = vrot.slane %v11052_v26, %v12603_v17  ;;  %v11067_v11 = vcombine.high %v11059_v47, %v11059_v47  ;;  %v11076_v28 = vrot.slane %v16785_v2, %v12603_v17  ;;  %v11083_v48 = vrot.slane %v11069_v24, %v12603_v17 }
0x1c0c   : > { %v11026_v50 = vmul.f32 %v11018_v27, %v11006_v39  ;;  %v11168_v45 = vsel %vm468_vm2, %v11114_v8, %v11167_v12  ;;  %v11122_v53 = vrot.slane %v11059_v47, %v12657_v33  ;;  %v11206_v58 = vrot.slane %v11059_v47, %v12606_v18 }
0x1c0d   : > { %v11068_v3 = vcombine.high %v11066_v44, %v11066_v44  ;;  %v11126_v54 = vrot.slane %v11067_v11, %v12657_v33  ;;  %v11084_v32 = vcombine.high %v11076_v28, %v11076_v28  ;;  %v11085_v7 = vcombine.high %v11083_v48, %v11083_v48 }
0x1c0e   : > { %v11130_v62 = vrot.slane %v11066_v44, %v12657_v33  ;;  %v11169_v35 = vsel %vm470_vm3, %v11118_v49, %v11168_v45  ;;  %v11138_v23 = vrot.slane %v11076_v28, %v12657_v33  ;;  %v11146_v57 = vrot.slane %v11083_v48, %v12657_v33 }
0x1c0f   : > { %v11222_v59 = vrot.slane %v11076_v28, %v12606_v18  ;;  %v11030_v25 = vadd.f32 %v11026_v50, %v11002_v6  ;;  %v11142_v20 = vrot.slane %v11084_v32, %v12657_v33  ;;  %v11226_v10 = vrot.slane %v11084_v32, %v12606_v18 }
0x1c10   : > { %v11230_v60 = vrot.slane %v11083_v48, %v12606_v18  ;;  %v11134_v51 = vrot.slane %v11068_v3, %v12657_v33  ;;  %v11150_v42 = vrot.slane %v11085_v7, %v12657_v33  ;;  %v11170_v22 = vsel %vm472_vm4, %v11122_v53, %v11169_v35 }
0x1c11   : > { %v11086_v34 = vcombine.high %v11030_v25, %v11030_v25  ;;  %v11093_v15 = vrot.slane %v11030_v25, %v12603_v17  ;;  %v11174_v63 = vsel %vm466_vm1, %v11142_v20, %v11138_v23  ;;  %v11234_v0 = vrot.slane %v11085_v7, %v12606_v18 }
0x1c12   : > { %v11258_v55 = vsel %vm466_vm1, %v11226_v10, %v11222_v59  ;;  %v11171_v43 = vsel %vm474_vm5, %v11126_v54, %v11170_v22  ;;  %v11210_v5 = vrot.slane %v11067_v11, %v12606_v18  ;;  %v11175_v37 = vsel %vm468_vm2, %v11146_v57, %v11174_v63 }
0x1c13   : > { %v11100_v4 = vrot.slane %v11086_v34, %v12603_v17  ;;  %v11101_v38 = vcombine.high %v11093_v15, %v11093_v15  ;;  %v11154_v13 = vrot.slane %v11093_v15, %v12657_v33  ;;  %v11172_v41 = vsel %vm476_vm6, %v11130_v62, %v11171_v43 }
0x1c14   : > { %v11214_v21 = vrot.slane %v11066_v44, %v12606_v18  ;;  %v11252_v61 = vsel %vm468_vm2, %v11198_v56, %v11251_v52  ;;  %v11173_v9 = vsel %vm478_vm7, %v11134_v51, %v11172_v41  ;;  %v11238_v29 = vrot.slane %v11093_v15, %v12606_v18 }
0x1c15   : > { %v11102_v31 = vcombine.high %v11100_v4, %v11100_v4  ;;  %v11158_v40 = vrot.slane %v11101_v38, %v12657_v33  ;;  %v11162_v17 = vrot.slane %v11100_v4, %v12657_v33  ;;  %11181 = vrot.lane.b32.xlu1 %v11173_v9, %s12505_s7  ;;  %v11176_v19 = vsel %vm470_vm3, %v11150_v42, %v11175_v37 }
0x1c16   : > { %v11218_v36 = vrot.slane %v11068_v3, %v12606_v18  ;;  %v11253_v30 = vsel %vm470_vm3, %v11202_v14, %v11252_v61  ;;  %v11177_v8 = vsel %vm472_vm4, %v11154_v13, %v11176_v19  ;;  %v11242_v26 = vrot.slane %v11101_v38, %v12606_v18 }
0x1c17   : > { %v11166_v16 = vrot.slane %v11102_v31, %v12657_v33  ;;  %v11254_v46 = vsel %vm472_vm4, %v11206_v58, %v11253_v30  ;;  %v11178_v47 = vsel %vm474_vm5, %v11158_v40, %v11177_v8  ;;  %v11246_v1 = vrot.slane %v11100_v4, %v12606_v18 }
0x1c18   : > { %v11255_v24 = vsel %vm474_vm5, %v11210_v5, %v11254_v46  ;;  %v11259_v6 = vsel %vm468_vm2, %v11230_v60, %v11258_v55  ;;  %v11179_v27 = vsel %vm476_vm6, %v11162_v17, %v11178_v47  ;;  %v11250_v33 = vrot.slane %v11102_v31, %v12606_v18 }
0x1c19   : > { %v11256_v49 = vsel %vm476_vm6, %v11214_v21, %v11255_v24  ;;  %v11260_v12 = vsel %vm470_vm3, %v11234_v0, %v11259_v6  ;;  %11276 = vrot.lane.b32.xlu1 %v16785_v2, %s12505_s7  ;;  %v11180_v52 = vsel %vm478_vm7, %v11166_v16, %v11179_v27 }
0x1c1a   : > { %v11257_v39 = vsel %vm478_vm7, %v11218_v36, %v11256_v49  ;;  %v11261_v56 = vsel %vm472_vm4, %v11238_v29, %v11260_v12  ;;  %11183 = vrot.lane.b32.xlu0 %v11180_v52, %s12505_s7 }
0x1c1b   : > { %v11262_v14 = vsel %vm474_vm5, %v11242_v26, %v11261_v56 }
0x1c1c   : > { %v11263_v44 = vsel %vm476_vm6, %v11246_v1, %v11262_v14 }
0x1c1d   : > { %v11264_v18 = vsel %vm478_vm7, %v11250_v33, %v11263_v44 }
0x1c1e   : > { %11278 = vrot.lane.b32.xlu0 %v11030_v25, %s12505_s7 }
0x1c76   : > { %v11273_v11 = vpop.permute.xlu1 %11272 }
0x1c77   : > { %11284 = vst.msk [vmem:[#allocation2] sm:$0xff] %vm573_vm8, %v11273_v11 }
0x1c7b   : > { %v11275_v2 = vpop.permute.xlu0 %11274 }
0x1c7c   : > { %11285 = vst.msk [vmem:[#allocation2 + $0x8] sm:$0xff] %vm573_vm8, %v11275_v2 }
0x1c87   : > { %v11182_v28 = vpop.permute.xlu1 %11181 }
0x1c88   : > { %v11267_v48 = vsel %vm573_vm8, %v11182_v28, %v11257_v39 }
0x1c89   : > { %11583 = vst.msk [vmem:[%s12581_s17 + $0x30] sm:$0xff] %vm3253_vm10, %v11267_v48 }
0x1c8b   : > { %v11277_v50 = vpop.permute.xlu1 %11276 }
0x1c8c   : > { %11286 = vst.msk [vmem:[#allocation2 + $0x10] sm:$0xff] %vm573_vm8, %v11277_v50  ;;  %v11184_v45 = vpop.permute.xlu0 %11183 }
0x1c8d   : > { %v11268_v53 = vsel %vm573_vm8, %v11184_v45, %v11264_v18 }
0x1c8e   : > { %11584 = vst.msk [vmem:[%s12581_s17 + $0x38] sm:$0xff] %vm3253_vm10, %v11268_v53 }
0x1c90   : > { %v11279_v58 = vpop.permute.xlu0 %11278 }
0x1c91   : > { %11287 = vst.msk [vmem:[#allocation2 + $0x18] sm:$0xff] %vm573_vm8, %v11279_v58 }
0x1c92 PF: > { %s15_s22 = sadd.s32 1, %s12500_s22   ;;  %s16990_s18 = smov %s12492_s20 }
0x1c93   : > { %p12_p8 = scmp.ge.s32.totalorder %s15_s22, 6   ;;  %s16991_s19 = smov %s12496_s21 }
0x1c94   : > { %s16992_s20 = smov %s16995_s23  ;;  %s16993_s21 = smov %s16999_s24 }
0x1c95   :  { %14 = sbr.rel (!%p12_p8) target bundleno = 3 (0x3), region = 87 }

</bundles_post_ra>
